<compile_context>
chip_gen: v5e
topology: v5e:2x2
jax: 0.10.0
libtpu: 0.0.40
codegen_flags: <defaults>
</compile_context>

<pallas_src>
import jax
import jax.numpy as jnp
from jax.experimental import pallas as pl
from jax.experimental.pallas import tpu as pltpu

_LANE = 128


def _ceil_to(x, m):
    return (x + m - 1) // m * m


# ---------------------------------------------------------------------------
# One-time parameter preparation (runs once, outside the per-forward jit)
# ---------------------------------------------------------------------------
def _pack_gate_weight(w_torch, in_pad, gp):
    """w_torch: (3H, in_dim) torch layout -> (in_pad, 3*gp); gate g lives in
    lane-aligned columns [g*gp, g*gp + H); padded rows/cols are zero."""
    th, in_dim = w_torch.shape
    h = th // 3
    wt = jnp.transpose(w_torch.reshape(3, h, in_dim), (0, 2, 1))     # (3, in_dim, H)
    out = jnp.zeros((in_pad, 3 * gp), w_torch.dtype)
    for g in range(3):
        out = out.at[:in_dim, g * gp:g * gp + h].set(wt[g])
    return out


def _pack_gate_bias(b_torch, gp):
    h = b_torch.shape[0] // 3
    out = jnp.zeros((1, 3 * gp), b_torch.dtype)
    for g in range(3):
        out = out.at[0, g * gp:g * gp + h].set(b_torch[g * h:(g + 1) * h])
    return out


def prepare_params(params):
    """Fold the FilteringLayer gates into layer-0's W_ih and re-lay-out every GRU / FC
    weight into lane-aligned, per-gate-128-padded form.  Call ONCE per model."""
    ff = params["feature_filter"]                     # (F,)
    lags = params["lags_filter"]                      # (L, 1)
    gru = params["gru_layers"]
    fc = params["fc"]

    L = lags.shape[0]
    H = gru[0]["w_hh"].shape[1]
    GP = _ceil_to(H, _LANE)                           # per-gate padded width

    layers = []
    for li, p in enumerate(gru):
        in_dim = p["w_ih"].shape[1]
        in_pad = in_dim if li == 0 else GP            # layer 0 consumes raw features
        wih = _pack_gate_weight(p["w_ih"], in_pad, GP)
        if li == 0:
            wih = wih * ff[:, None]                   # fold feature_filter into W_ih
        layers.append({
            "wih": wih,                               # (in_pad, 3*GP)
            "bih": _pack_gate_bias(p["b_ih"], GP),    # (1, 3*GP)
            "whh": _pack_gate_weight(p["w_hh"], GP, GP),   # (GP, 3*GP)
            "bhh": _pack_gate_bias(p["b_hh"], GP),
        })

    # Head: Linear(L*H -> FCH) -> ReLU -> Linear(FCH -> O).  Flatten order is (l, h),
    # so W1^T rows [t*H:(t+1)*H] pair with timestep t's hidden state.
    FCH = fc["w1"].shape[0]
    O = fc["w2"].shape[0]
    w1t = jnp.transpose(fc["w1"]).reshape(L, H, FCH)
    w1h = jnp.zeros((L, GP, FCH), fc["w1"].dtype).at[:, :H, :].set(w1t)

    return {
        "lags": lags.reshape(L, 1, 1).astype(jnp.float32),
        "layers": layers,
        "w1h": w1h,                                   # (L, GP, FCH)
        "b1h": fc["b1"].reshape(1, FCH),
        "w2h": jnp.transpose(fc["w2"]),               # (FCH, O)
        "b2h": fc["b2"].reshape(1, O),
    }


# ---------------------------------------------------------------------------
# Fully fused kernel: GRU stack (recurrence over L) + flatten + MLP head
# ---------------------------------------------------------------------------
def _make_fused_kernel(n_layers, seq_len, gp):
    def kernel(*refs):
        gi1_ref = refs[0]                             # (L, BT, 3*GP) precomputed gi of layer 0
        idx = 1
        whh0_ref, bhh0_ref = refs[idx], refs[idx + 1]
        idx += 2
        deeper = []                                   # layers 1..n-1: (wih, bih, whh, bhh)
        for _ in range(n_layers - 1):
            deeper.append(tuple(refs[idx:idx + 4]))
            idx += 4
        w1h_ref, b1h_ref, w2h_ref, b2h_ref = refs[idx:idx + 4]
        idx += 4
        o_ref = refs[idx]

        bt = o_ref.shape[0]
        fch = b1h_ref.shape[1]

        def gru_step(gi, h, whh, bhh):
            # one fused (BT, GP) @ (GP, 3*GP) hidden matmul; lane-aligned gate slices
            gh = jnp.dot(h, whh, preferred_element_type=jnp.float32) + bhh
            r = jax.nn.sigmoid(gi[:, 0 * gp:1 * gp] + gh[:, 0 * gp:1 * gp])
            z = jax.nn.sigmoid(gi[:, 1 * gp:2 * gp] + gh[:, 1 * gp:2 * gp])
            n = jnp.tanh(gi[:, 2 * gp:3 * gp] + r * gh[:, 2 * gp:3 * gp])
            return (1.0 - z) * n + z * h

        def body(t, carry):
            hs, acc = carry
            h = gru_step(gi1_ref[t], hs[0], whh0_ref[...], bhh0_ref[...])
            new_hs = [h]
            for li in range(n_layers - 1):
                wih_ref, bih_ref, whh_ref, bhh_ref = deeper[li]
                gi = (jnp.dot(h, wih_ref[...], preferred_element_type=jnp.float32)
                      + bih_ref[...])
                h = gru_step(gi, hs[li + 1], whh_ref[...], bhh_ref[...])
                new_hs.append(h)
            # incrementally accumulate flatten(res) @ W1^T (row block t of W1^T)
            acc = acc + jnp.dot(h, w1h_ref[t], preferred_element_type=jnp.float32)
            return tuple(new_hs), acc

        hs0 = tuple(jnp.zeros((bt, gp), jnp.float32) for _ in range(n_layers))
        acc0 = jnp.zeros((bt, fch), jnp.float32)
        _, acc = jax.lax.fori_loop(0, seq_len, body, (hs0, acc0), unroll=True)

        hidden = jnp.maximum(acc + b1h_ref[...], 0.0)
        y = jnp.dot(hidden, w2h_ref[...], preferred_element_type=jnp.float32) + b2h_ref[...]
        o_ref[...] = y.astype(o_ref.dtype)

    return kernel


def _fused_granger(gi1, pp, *, out_dtype):
    L, B, G3 = gi1.shape
    layers = pp["layers"]
    n_layers = len(layers)
    GP = layers[0]["whh"].shape[0]
    FCH = pp["b1h"].shape[1]
    O = pp["b2h"].shape[1]

    # Batch tiling: whole batch when small; 8-row (sublane-aligned) tiles otherwise
    # so v7x's two TensorCores can each take part of the batch.
    if B <= 8 or B % 8 != 0:
        BT = B
    else:
        BT = 8
    n_bt = pl.cdiv(B, BT)

    operands = [gi1, layers[0]["whh"], layers[0]["bhh"]]
    in_specs = [
        pl.BlockSpec((L, BT, G3), lambda b: (0, b, 0)),
        pl.BlockSpec((GP, G3), lambda b: (0, 0)),       # weights ignore the batch axis
        pl.BlockSpec((1, G3), lambda b: (0, 0)),        #  -> stay VMEM-resident
    ]
    for layer in layers[1:]:
        operands += [layer["wih"], layer["bih"], layer["whh"], layer["bhh"]]
        in_specs += [
            pl.BlockSpec((GP, G3), lambda b: (0, 0)),
            pl.BlockSpec((1, G3), lambda b: (0, 0)),
            pl.BlockSpec((GP, G3), lambda b: (0, 0)),
            pl.BlockSpec((1, G3), lambda b: (0, 0)),
        ]
    operands += [pp["w1h"], pp["b1h"], pp["w2h"], pp["b2h"]]
    in_specs += [
        pl.BlockSpec((L, GP, FCH), lambda b: (0, 0, 0)),
        pl.BlockSpec((1, FCH), lambda b: (0, 0)),
        pl.BlockSpec((FCH, O), lambda b: (0, 0)),
        pl.BlockSpec((1, O), lambda b: (0, 0)),
    ]

    return pl.pallas_call(
        _make_fused_kernel(n_layers, L, GP),
        out_shape=jax.ShapeDtypeStruct((B, O), out_dtype),
        grid=(n_bt,),
        in_specs=in_specs,
        out_specs=pl.BlockSpec((BT, O), lambda b: (b, 0)),
        compiler_params=pltpu.CompilerParams(
            dimension_semantics=("parallel",),
            vmem_limit_bytes=32 * 1024 * 1024,
        ),
    )(*operands)


# ---------------------------------------------------------------------------
# Full forward (reg_features=True, reg_lags=True, last_only=False)
# ---------------------------------------------------------------------------
def granger_forward(x, pp):
    """x: (B, L, F); pp: output of prepare_params (filters already folded in)."""
    l0 = pp["layers"][0]
    # Hoisted layer-0 input projection: one GEMM over all timesteps (plain XLA).
    # feature_filter is folded into l0["wih"]; lags_filter is a per-step scalar.
    x_tm = jnp.transpose(x, (1, 0, 2)) * pp["lags"]                 # (L, B, F) time-major
    gi1 = jnp.einsum("lbf,fg->lbg", x_tm, l0["wih"]) + l0["bih"]    # (L, B, 3*GP)
    return _fused_granger(gi1, pp, out_dtype=x.dtype)


# ---------------------------------------------------------------------------
# Pure-JAX reference (mirrors the PyTorch module)
# ---------------------------------------------------------------------------
def _gru_ref(x, p):
    B, L, F = x.shape
    H = p["w_hh"].shape[1]
    h = jnp.zeros((B, H), x.dtype)
    outs = []
    for t in range(L):
        gi = x[:, t, :] @ p["w_ih"].T + p["b_ih"]
        gh = h @ p["w_hh"].T + p["b_hh"]
        r = jax.nn.sigmoid(gi[:, :H] + gh[:, :H])
        z = jax.nn.sigmoid(gi[:, H:2 * H] + gh[:, H:2 * H])
        n = jnp.tanh(gi[:, 2 * H:] + r * gh[:, 2 * H:])
        h = (1.0 - z) * n + z * h
        outs.append(h)
    return jnp.stack(outs, axis=1)


def reference_forward(x, params):
    res = x * params["feature_filter"][None, None, :]
    res = res * params["lags_filter"][None, :, :]
    for p in params["gru_layers"]:
        res = _gru_ref(res, p)
    flat = res.reshape(res.shape[0], -1)
    h1 = jnp.maximum(flat @ params["fc"]["w1"].T + params["fc"]["b1"], 0.0)
    return h1 @ params["fc"]["w2"].T + params["fc"]["b2"]


if __name__ == "__main__":
    # Small shapes implied by the module: (batch, lags, input_size), hidden=32.
    B, L, F, H = 2, 8, 4, 32
    FC_HIDDEN = 16

    key = jax.random.PRNGKey(0)
    ks = jax.random.split(key, 12)

    x = jax.random.normal(ks[0], (B, L, F), dtype=jnp.float32)

    # FilteringLayer params (init is ones in the module; perturb so the check is meaningful).
    feature_filter = 1.0 + 0.1 * jax.random.normal(ks[1], (F,), dtype=jnp.float32)
    lags_filter = 1.0 + 0.1 * jax.random.normal(ks[2], (L, 1), dtype=jnp.float32)

    def gru_params(k, in_dim, hid):
        k1, k2, k3, k4 = jax.random.split(k, 4)
        s = 1.0 / jnp.sqrt(jnp.float32(hid))
        return {
            "w_ih": s * jax.random.normal(k1, (3 * hid, in_dim), dtype=jnp.float32),
            "w_hh": s * jax.random.normal(k2, (3 * hid, hid), dtype=jnp.float32),
            "b_ih": s * jax.random.normal(k3, (3 * hid,), dtype=jnp.float32),
            "b_hh": s * jax.random.normal(k4, (3 * hid,), dtype=jnp.float32),
        }

    params = {
        "feature_filter": feature_filter,
        "lags_filter": lags_filter,
        "gru_layers": [gru_params(ks[3], F, H), gru_params(ks[4], H, H)],
        "fc": {
            "w1": 0.1 * jax.random.normal(ks[5], (FC_HIDDEN, L * H), dtype=jnp.float32),
            "b1": 0.1 * jax.random.normal(ks[6], (FC_HIDDEN,), dtype=jnp.float32),
            "w2": 0.1 * jax.random.normal(ks[7], (1, FC_HIDDEN), dtype=jnp.float32),
            "b2": 0.1 * jax.random.normal(ks[8], (1,), dtype=jnp.float32),
        },
    }

    # One-time weight packing / gate folding (outside the per-forward jit).
    pp = prepare_params(params)

    fwd = jax.jit(granger_forward)
    y = jax.block_until_ready(fwd(x, pp))
    y_ref = reference_forward(x, params)

    assert y.shape == (B, 1)
    assert jnp.allclose(y, y_ref, atol=2e-2, rtol=2e-2)

    print("KERNEL_OK")
</pallas_src>

<mosaic_0001>
module attributes {stable_mosaic.version = 11 : i64} {
  func.func @kernel(%arg0: i32, %arg1: memref<8x2x384xf32, #tpu.memory_space<vmem>>, %arg2: memref<128x384xf32, #tpu.memory_space<vmem>>, %arg3: memref<1x384xf32, #tpu.memory_space<vmem>>, %arg4: memref<128x384xf32, #tpu.memory_space<vmem>>, %arg5: memref<1x384xf32, #tpu.memory_space<vmem>>, %arg6: memref<128x384xf32, #tpu.memory_space<vmem>>, %arg7: memref<1x384xf32, #tpu.memory_space<vmem>>, %arg8: memref<8x128x16xf32, #tpu.memory_space<vmem>>, %arg9: memref<1x16xf32, #tpu.memory_space<vmem>>, %arg10: memref<16x1xf32, #tpu.memory_space<vmem>>, %arg11: memref<1x1xf32, #tpu.memory_space<vmem>>, %arg12: memref<2x1xf32, #tpu.memory_space<vmem>>) attributes {dimension_semantics = [#tpu.dimension_semantics<parallel>], iteration_bounds = array<i64: 1>, scalar_prefetch = 0 : i64, scratch_operands = 0 : i64, tpu.core_type = #tpu.core_type<tc>, window_params = [{transform_indices = @transform_0, window_bounds = array<i64: 8, 2, 384>}, {pipeline_mode = #tpu.pipeline_mode<synchronous>, transform_indices = @transform_1, window_bounds = array<i64: 128, 384>}, {pipeline_mode = #tpu.pipeline_mode<synchronous>, transform_indices = @transform_2, window_bounds = array<i64: 1, 384>}, {pipeline_mode = #tpu.pipeline_mode<synchronous>, transform_indices = @transform_3, window_bounds = array<i64: 128, 384>}, {pipeline_mode = #tpu.pipeline_mode<synchronous>, transform_indices = @transform_4, window_bounds = array<i64: 1, 384>}, {pipeline_mode = #tpu.pipeline_mode<synchronous>, transform_indices = @transform_5, window_bounds = array<i64: 128, 384>}, {pipeline_mode = #tpu.pipeline_mode<synchronous>, transform_indices = @transform_6, window_bounds = array<i64: 1, 384>}, {pipeline_mode = #tpu.pipeline_mode<synchronous>, transform_indices = @transform_7, window_bounds = array<i64: 8, 128, 16>}, {pipeline_mode = #tpu.pipeline_mode<synchronous>, transform_indices = @transform_8, window_bounds = array<i64: 1, 16>}, {pipeline_mode = #tpu.pipeline_mode<synchronous>, transform_indices = @transform_9, window_bounds = array<i64: 16, 1>}, {pipeline_mode = #tpu.pipeline_mode<synchronous>, transform_indices = @transform_10, window_bounds = array<i64: 1, 1>}, {transform_indices = @transform_11, window_bounds = array<i64: 2, 1>}]} {
    %cst = arith.constant 0.000000e+00 : f32
    %0 = vector.broadcast %cst : f32 to vector<2x128xf32>
    %cst_0 = arith.constant 0.000000e+00 : f32
    %1 = vector.broadcast %cst_0 : f32 to vector<2x128xf32>
    %cst_1 = arith.constant 0.000000e+00 : f32
    %2 = vector.broadcast %cst_1 : f32 to vector<2x16xf32>
    %c0_i32 = arith.constant 0 : i32
    %3 = arith.index_cast %c0_i32 : i32 to index
    %c0 = arith.constant 0 : index
    %c0_2 = arith.constant 0 : index
    %4 = vector.load %arg1[%3, %c0, %c0_2] : memref<8x2x384xf32, #tpu.memory_space<vmem>>, vector<1x2x384xf32>
    %5 = vector.shape_cast %4 : vector<1x2x384xf32> to vector<2x384xf32>
    %c0_3 = arith.constant 0 : index
    %c0_4 = arith.constant 0 : index
    %6 = vector.load %arg2[%c0_3, %c0_4] : memref<128x384xf32, #tpu.memory_space<vmem>>, vector<128x384xf32>
    %c0_5 = arith.constant 0 : index
    %c0_6 = arith.constant 0 : index
    %7 = vector.load %arg3[%c0_5, %c0_6] : memref<1x384xf32, #tpu.memory_space<vmem>>, vector<1x384xf32>
    %cst_7 = arith.constant dense<0.000000e+00> : vector<2x384xf32>
    %8 = tpu.matmul %0, %6, %cst_7 {dimension_numbers = #tpu.dot_dimension_numbers<[1], [0], [0], [1], [0, 0, 1, 1], [], []>} : vector<2x128xf32>, vector<128x384xf32>, vector<2x384xf32> -> vector<2x384xf32>
    %9 = vector.broadcast %7 : vector<1x384xf32> to vector<2x384xf32>
    %10 = arith.addf %8, %9 : vector<2x384xf32>
    %11 = vector.extract_strided_slice %5 {offsets = [0, 0], sizes = [2, 128], strides = [1, 1]} : vector<2x384xf32> to vector<2x128xf32>
    %12 = vector.extract_strided_slice %10 {offsets = [0, 0], sizes = [2, 128], strides = [1, 1]} : vector<2x384xf32> to vector<2x128xf32>
    %13 = arith.addf %11, %12 : vector<2x128xf32>
    %14 = arith.negf %13 : vector<2x128xf32>
    %15 = math.exp %14 : vector<2x128xf32>
    %cst_8 = arith.constant 1.000000e+00 : f32
    %16 = vector.broadcast %cst_8 : f32 to vector<2x128xf32>
    %17 = arith.addf %16, %15 : vector<2x128xf32>
    %18 = arith.divf %16, %17 : vector<2x128xf32>
    %19 = vector.extract_strided_slice %5 {offsets = [0, 128], sizes = [2, 128], strides = [1, 1]} : vector<2x384xf32> to vector<2x128xf32>
    %20 = vector.extract_strided_slice %10 {offsets = [0, 128], sizes = [2, 128], strides = [1, 1]} : vector<2x384xf32> to vector<2x128xf32>
    %21 = arith.addf %19, %20 : vector<2x128xf32>
    %22 = arith.negf %21 : vector<2x128xf32>
    %23 = math.exp %22 : vector<2x128xf32>
    %cst_9 = arith.constant 1.000000e+00 : f32
    %24 = vector.broadcast %cst_9 : f32 to vector<2x128xf32>
    %25 = arith.addf %24, %23 : vector<2x128xf32>
    %26 = arith.divf %24, %25 : vector<2x128xf32>
    %27 = vector.extract_strided_slice %5 {offsets = [0, 256], sizes = [2, 128], strides = [1, 1]} : vector<2x384xf32> to vector<2x128xf32>
    %28 = vector.extract_strided_slice %10 {offsets = [0, 256], sizes = [2, 128], strides = [1, 1]} : vector<2x384xf32> to vector<2x128xf32>
    %29 = arith.mulf %18, %28 : vector<2x128xf32>
    %30 = arith.addf %27, %29 : vector<2x128xf32>
    %31 = math.tanh %30 : vector<2x128xf32>
    %cst_10 = arith.constant 1.000000e+00 : f32
    %32 = vector.broadcast %cst_10 : f32 to vector<2x128xf32>
    %33 = arith.subf %32, %26 : vector<2x128xf32>
    %34 = arith.mulf %33, %31 : vector<2x128xf32>
    %35 = arith.mulf %26, %0 : vector<2x128xf32>
    %36 = arith.addf %34, %35 : vector<2x128xf32>
    %c0_11 = arith.constant 0 : index
    %c0_12 = arith.constant 0 : index
    %37 = vector.load %arg4[%c0_11, %c0_12] : memref<128x384xf32, #tpu.memory_space<vmem>>, vector<128x384xf32>
    %cst_13 = arith.constant dense<0.000000e+00> : vector<2x384xf32>
    %38 = tpu.matmul %36, %37, %cst_13 {dimension_numbers = #tpu.dot_dimension_numbers<[1], [0], [0], [1], [0, 0, 1, 1], [], []>} : vector<2x128xf32>, vector<128x384xf32>, vector<2x384xf32> -> vector<2x384xf32>
    %c0_14 = arith.constant 0 : index
    %c0_15 = arith.constant 0 : index
    %39 = vector.load %arg5[%c0_14, %c0_15] : memref<1x384xf32, #tpu.memory_space<vmem>>, vector<1x384xf32>
    %40 = vector.broadcast %39 : vector<1x384xf32> to vector<2x384xf32>
    %41 = arith.addf %38, %40 : vector<2x384xf32>
    %c0_16 = arith.constant 0 : index
    %c0_17 = arith.constant 0 : index
    %42 = vector.load %arg6[%c0_16, %c0_17] : memref<128x384xf32, #tpu.memory_space<vmem>>, vector<128x384xf32>
    %c0_18 = arith.constant 0 : index
    %c0_19 = arith.constant 0 : index
    %43 = vector.load %arg7[%c0_18, %c0_19] : memref<1x384xf32, #tpu.memory_space<vmem>>, vector<1x384xf32>
    %cst_20 = arith.constant dense<0.000000e+00> : vector<2x384xf32>
    %44 = tpu.matmul %1, %42, %cst_20 {dimension_numbers = #tpu.dot_dimension_numbers<[1], [0], [0], [1], [0, 0, 1, 1], [], []>} : vector<2x128xf32>, vector<128x384xf32>, vector<2x384xf32> -> vector<2x384xf32>
    %45 = vector.broadcast %43 : vector<1x384xf32> to vector<2x384xf32>
    %46 = arith.addf %44, %45 : vector<2x384xf32>
    %47 = vector.extract_strided_slice %41 {offsets = [0, 0], sizes = [2, 128], strides = [1, 1]} : vector<2x384xf32> to vector<2x128xf32>
    %48 = vector.extract_strided_slice %46 {offsets = [0, 0], sizes = [2, 128], strides = [1, 1]} : vector<2x384xf32> to vector<2x128xf32>
    %49 = arith.addf %47, %48 : vector<2x128xf32>
    %50 = arith.negf %49 : vector<2x128xf32>
    %51 = math.exp %50 : vector<2x128xf32>
    %cst_21 = arith.constant 1.000000e+00 : f32
    %52 = vector.broadcast %cst_21 : f32 to vector<2x128xf32>
    %53 = arith.addf %52, %51 : vector<2x128xf32>
    %54 = arith.divf %52, %53 : vector<2x128xf32>
    %55 = vector.extract_strided_slice %41 {offsets = [0, 128], sizes = [2, 128], strides = [1, 1]} : vector<2x384xf32> to vector<2x128xf32>
    %56 = vector.extract_strided_slice %46 {offsets = [0, 128], sizes = [2, 128], strides = [1, 1]} : vector<2x384xf32> to vector<2x128xf32>
    %57 = arith.addf %55, %56 : vector<2x128xf32>
    %58 = arith.negf %57 : vector<2x128xf32>
    %59 = math.exp %58 : vector<2x128xf32>
    %cst_22 = arith.constant 1.000000e+00 : f32
    %60 = vector.broadcast %cst_22 : f32 to vector<2x128xf32>
    %61 = arith.addf %60, %59 : vector<2x128xf32>
    %62 = arith.divf %60, %61 : vector<2x128xf32>
    %63 = vector.extract_strided_slice %41 {offsets = [0, 256], sizes = [2, 128], strides = [1, 1]} : vector<2x384xf32> to vector<2x128xf32>
    %64 = vector.extract_strided_slice %46 {offsets = [0, 256], sizes = [2, 128], strides = [1, 1]} : vector<2x384xf32> to vector<2x128xf32>
    %65 = arith.mulf %54, %64 : vector<2x128xf32>
    %66 = arith.addf %63, %65 : vector<2x128xf32>
    %67 = math.tanh %66 : vector<2x128xf32>
    %cst_23 = arith.constant 1.000000e+00 : f32
    %68 = vector.broadcast %cst_23 : f32 to vector<2x128xf32>
    %69 = arith.subf %68, %62 : vector<2x128xf32>
    %70 = arith.mulf %69, %67 : vector<2x128xf32>
    %71 = arith.mulf %62, %1 : vector<2x128xf32>
    %72 = arith.addf %70, %71 : vector<2x128xf32>
    %73 = arith.index_cast %c0_i32 : i32 to index
    %c0_24 = arith.constant 0 : index
    %c0_25 = arith.constant 0 : index
    %74 = vector.load %arg8[%73, %c0_24, %c0_25] : memref<8x128x16xf32, #tpu.memory_space<vmem>>, vector<1x128x16xf32>
    %75 = vector.shape_cast %74 : vector<1x128x16xf32> to vector<128x16xf32>
    %cst_26 = arith.constant dense<0.000000e+00> : vector<2x16xf32>
    %76 = tpu.matmul %72, %75, %cst_26 {dimension_numbers = #tpu.dot_dimension_numbers<[1], [0], [0], [1], [0, 0, 1, 1], [], []>} : vector<2x128xf32>, vector<128x16xf32>, vector<2x16xf32> -> vector<2x16xf32>
    %77 = arith.addf %2, %76 : vector<2x16xf32>
    %c1_i32 = arith.constant 1 : i32
    %78 = arith.index_cast %c1_i32 : i32 to index
    %c0_27 = arith.constant 0 : index
    %c0_28 = arith.constant 0 : index
    %79 = vector.load %arg1[%78, %c0_27, %c0_28] : memref<8x2x384xf32, #tpu.memory_space<vmem>>, vector<1x2x384xf32>
    %80 = vector.shape_cast %79 : vector<1x2x384xf32> to vector<2x384xf32>
    %c0_29 = arith.constant 0 : index
    %c0_30 = arith.constant 0 : index
    %81 = vector.load %arg2[%c0_29, %c0_30] : memref<128x384xf32, #tpu.memory_space<vmem>>, vector<128x384xf32>
    %c0_31 = arith.constant 0 : index
    %c0_32 = arith.constant 0 : index
    %82 = vector.load %arg3[%c0_31, %c0_32] : memref<1x384xf32, #tpu.memory_space<vmem>>, vector<1x384xf32>
    %cst_33 = arith.constant dense<0.000000e+00> : vector<2x384xf32>
    %83 = tpu.matmul %36, %81, %cst_33 {dimension_numbers = #tpu.dot_dimension_numbers<[1], [0], [0], [1], [0, 0, 1, 1], [], []>} : vector<2x128xf32>, vector<128x384xf32>, vector<2x384xf32> -> vector<2x384xf32>
    %84 = vector.broadcast %82 : vector<1x384xf32> to vector<2x384xf32>
    %85 = arith.addf %83, %84 : vector<2x384xf32>
    %86 = vector.extract_strided_slice %80 {offsets = [0, 0], sizes = [2, 128], strides = [1, 1]} : vector<2x384xf32> to vector<2x128xf32>
    %87 = vector.extract_strided_slice %85 {offsets = [0, 0], sizes = [2, 128], strides = [1, 1]} : vector<2x384xf32> to vector<2x128xf32>
    %88 = arith.addf %86, %87 : vector<2x128xf32>
    %89 = arith.negf %88 : vector<2x128xf32>
    %90 = math.exp %89 : vector<2x128xf32>
    %cst_34 = arith.constant 1.000000e+00 : f32
    %91 = vector.broadcast %cst_34 : f32 to vector<2x128xf32>
    %92 = arith.addf %91, %90 : vector<2x128xf32>
    %93 = arith.divf %91, %92 : vector<2x128xf32>
    %94 = vector.extract_strided_slice %80 {offsets = [0, 128], sizes = [2, 128], strides = [1, 1]} : vector<2x384xf32> to vector<2x128xf32>
    %95 = vector.extract_strided_slice %85 {offsets = [0, 128], sizes = [2, 128], strides = [1, 1]} : vector<2x384xf32> to vector<2x128xf32>
    %96 = arith.addf %94, %95 : vector<2x128xf32>
    %97 = arith.negf %96 : vector<2x128xf32>
    %98 = math.exp %97 : vector<2x128xf32>
    %cst_35 = arith.constant 1.000000e+00 : f32
    %99 = vector.broadcast %cst_35 : f32 to vector<2x128xf32>
    %100 = arith.addf %99, %98 : vector<2x128xf32>
    %101 = arith.divf %99, %100 : vector<2x128xf32>
    %102 = vector.extract_strided_slice %80 {offsets = [0, 256], sizes = [2, 128], strides = [1, 1]} : vector<2x384xf32> to vector<2x128xf32>
    %103 = vector.extract_strided_slice %85 {offsets = [0, 256], sizes = [2, 128], strides = [1, 1]} : vector<2x384xf32> to vector<2x128xf32>
    %104 = arith.mulf %93, %103 : vector<2x128xf32>
    %105 = arith.addf %102, %104 : vector<2x128xf32>
    %106 = math.tanh %105 : vector<2x128xf32>
    %cst_36 = arith.constant 1.000000e+00 : f32
    %107 = vector.broadcast %cst_36 : f32 to vector<2x128xf32>
    %108 = arith.subf %107, %101 : vector<2x128xf32>
    %109 = arith.mulf %108, %106 : vector<2x128xf32>
    %110 = arith.mulf %101, %36 : vector<2x128xf32>
    %111 = arith.addf %109, %110 : vector<2x128xf32>
    %c0_37 = arith.constant 0 : index
    %c0_38 = arith.constant 0 : index
    %112 = vector.load %arg4[%c0_37, %c0_38] : memref<128x384xf32, #tpu.memory_space<vmem>>, vector<128x384xf32>
    %cst_39 = arith.constant dense<0.000000e+00> : vector<2x384xf32>
    %113 = tpu.matmul %111, %112, %cst_39 {dimension_numbers = #tpu.dot_dimension_numbers<[1], [0], [0], [1], [0, 0, 1, 1], [], []>} : vector<2x128xf32>, vector<128x384xf32>, vector<2x384xf32> -> vector<2x384xf32>
    %c0_40 = arith.constant 0 : index
    %c0_41 = arith.constant 0 : index
    %114 = vector.load %arg5[%c0_40, %c0_41] : memref<1x384xf32, #tpu.memory_space<vmem>>, vector<1x384xf32>
    %115 = vector.broadcast %114 : vector<1x384xf32> to vector<2x384xf32>
    %116 = arith.addf %113, %115 : vector<2x384xf32>
    %c0_42 = arith.constant 0 : index
    %c0_43 = arith.constant 0 : index
    %117 = vector.load %arg6[%c0_42, %c0_43] : memref<128x384xf32, #tpu.memory_space<vmem>>, vector<128x384xf32>
    %c0_44 = arith.constant 0 : index
    %c0_45 = arith.constant 0 : index
    %118 = vector.load %arg7[%c0_44, %c0_45] : memref<1x384xf32, #tpu.memory_space<vmem>>, vector<1x384xf32>
    %cst_46 = arith.constant dense<0.000000e+00> : vector<2x384xf32>
    %119 = tpu.matmul %72, %117, %cst_46 {dimension_numbers = #tpu.dot_dimension_numbers<[1], [0], [0], [1], [0, 0, 1, 1], [], []>} : vector<2x128xf32>, vector<128x384xf32>, vector<2x384xf32> -> vector<2x384xf32>
    %120 = vector.broadcast %118 : vector<1x384xf32> to vector<2x384xf32>
    %121 = arith.addf %119, %120 : vector<2x384xf32>
    %122 = vector.extract_strided_slice %116 {offsets = [0, 0], sizes = [2, 128], strides = [1, 1]} : vector<2x384xf32> to vector<2x128xf32>
    %123 = vector.extract_strided_slice %121 {offsets = [0, 0], sizes = [2, 128], strides = [1, 1]} : vector<2x384xf32> to vector<2x128xf32>
    %124 = arith.addf %122, %123 : vector<2x128xf32>
    %125 = arith.negf %124 : vector<2x128xf32>
    %126 = math.exp %125 : vector<2x128xf32>
    %cst_47 = arith.constant 1.000000e+00 : f32
    %127 = vector.broadcast %cst_47 : f32 to vector<2x128xf32>
    %128 = arith.addf %127, %126 : vector<2x128xf32>
    %129 = arith.divf %127, %128 : vector<2x128xf32>
    %130 = vector.extract_strided_slice %116 {offsets = [0, 128], sizes = [2, 128], strides = [1, 1]} : vector<2x384xf32> to vector<2x128xf32>
    %131 = vector.extract_strided_slice %121 {offsets = [0, 128], sizes = [2, 128], strides = [1, 1]} : vector<2x384xf32> to vector<2x128xf32>
    %132 = arith.addf %130, %131 : vector<2x128xf32>
    %133 = arith.negf %132 : vector<2x128xf32>
    %134 = math.exp %133 : vector<2x128xf32>
    %cst_48 = arith.constant 1.000000e+00 : f32
    %135 = vector.broadcast %cst_48 : f32 to vector<2x128xf32>
    %136 = arith.addf %135, %134 : vector<2x128xf32>
    %137 = arith.divf %135, %136 : vector<2x128xf32>
    %138 = vector.extract_strided_slice %116 {offsets = [0, 256], sizes = [2, 128], strides = [1, 1]} : vector<2x384xf32> to vector<2x128xf32>
    %139 = vector.extract_strided_slice %121 {offsets = [0, 256], sizes = [2, 128], strides = [1, 1]} : vector<2x384xf32> to vector<2x128xf32>
    %140 = arith.mulf %129, %139 : vector<2x128xf32>
    %141 = arith.addf %138, %140 : vector<2x128xf32>
    %142 = math.tanh %141 : vector<2x128xf32>
    %cst_49 = arith.constant 1.000000e+00 : f32
    %143 = vector.broadcast %cst_49 : f32 to vector<2x128xf32>
    %144 = arith.subf %143, %137 : vector<2x128xf32>
    %145 = arith.mulf %144, %142 : vector<2x128xf32>
    %146 = arith.mulf %137, %72 : vector<2x128xf32>
    %147 = arith.addf %145, %146 : vector<2x128xf32>
    %148 = arith.index_cast %c1_i32 : i32 to index
    %c0_50 = arith.constant 0 : index
    %c0_51 = arith.constant 0 : index
    %149 = vector.load %arg8[%148, %c0_50, %c0_51] : memref<8x128x16xf32, #tpu.memory_space<vmem>>, vector<1x128x16xf32>
    %150 = vector.shape_cast %149 : vector<1x128x16xf32> to vector<128x16xf32>
    %cst_52 = arith.constant dense<0.000000e+00> : vector<2x16xf32>
    %151 = tpu.matmul %147, %150, %cst_52 {dimension_numbers = #tpu.dot_dimension_numbers<[1], [0], [0], [1], [0, 0, 1, 1], [], []>} : vector<2x128xf32>, vector<128x16xf32>, vector<2x16xf32> -> vector<2x16xf32>
    %152 = arith.addf %77, %151 : vector<2x16xf32>
    %c2_i32 = arith.constant 2 : i32
    %153 = arith.index_cast %c2_i32 : i32 to index
    %c0_53 = arith.constant 0 : index
    %c0_54 = arith.constant 0 : index
    %154 = vector.load %arg1[%153, %c0_53, %c0_54] : memref<8x2x384xf32, #tpu.memory_space<vmem>>, vector<1x2x384xf32>
    %155 = vector.shape_cast %154 : vector<1x2x384xf32> to vector<2x384xf32>
    %c0_55 = arith.constant 0 : index
    %c0_56 = arith.constant 0 : index
    %156 = vector.load %arg2[%c0_55, %c0_56] : memref<128x384xf32, #tpu.memory_space<vmem>>, vector<128x384xf32>
    %c0_57 = arith.constant 0 : index
    %c0_58 = arith.constant 0 : index
    %157 = vector.load %arg3[%c0_57, %c0_58] : memref<1x384xf32, #tpu.memory_space<vmem>>, vector<1x384xf32>
    %cst_59 = arith.constant dense<0.000000e+00> : vector<2x384xf32>
    %158 = tpu.matmul %111, %156, %cst_59 {dimension_numbers = #tpu.dot_dimension_numbers<[1], [0], [0], [1], [0, 0, 1, 1], [], []>} : vector<2x128xf32>, vector<128x384xf32>, vector<2x384xf32> -> vector<2x384xf32>
    %159 = vector.broadcast %157 : vector<1x384xf32> to vector<2x384xf32>
    %160 = arith.addf %158, %159 : vector<2x384xf32>
    %161 = vector.extract_strided_slice %155 {offsets = [0, 0], sizes = [2, 128], strides = [1, 1]} : vector<2x384xf32> to vector<2x128xf32>
    %162 = vector.extract_strided_slice %160 {offsets = [0, 0], sizes = [2, 128], strides = [1, 1]} : vector<2x384xf32> to vector<2x128xf32>
    %163 = arith.addf %161, %162 : vector<2x128xf32>
    %164 = arith.negf %163 : vector<2x128xf32>
    %165 = math.exp %164 : vector<2x128xf32>
    %cst_60 = arith.constant 1.000000e+00 : f32
    %166 = vector.broadcast %cst_60 : f32 to vector<2x128xf32>
    %167 = arith.addf %166, %165 : vector<2x128xf32>
    %168 = arith.divf %166, %167 : vector<2x128xf32>
    %169 = vector.extract_strided_slice %155 {offsets = [0, 128], sizes = [2, 128], strides = [1, 1]} : vector<2x384xf32> to vector<2x128xf32>
    %170 = vector.extract_strided_slice %160 {offsets = [0, 128], sizes = [2, 128], strides = [1, 1]} : vector<2x384xf32> to vector<2x128xf32>
    %171 = arith.addf %169, %170 : vector<2x128xf32>
    %172 = arith.negf %171 : vector<2x128xf32>
    %173 = math.exp %172 : vector<2x128xf32>
    %cst_61 = arith.constant 1.000000e+00 : f32
    %174 = vector.broadcast %cst_61 : f32 to vector<2x128xf32>
    %175 = arith.addf %174, %173 : vector<2x128xf32>
    %176 = arith.divf %174, %175 : vector<2x128xf32>
    %177 = vector.extract_strided_slice %155 {offsets = [0, 256], sizes = [2, 128], strides = [1, 1]} : vector<2x384xf32> to vector<2x128xf32>
    %178 = vector.extract_strided_slice %160 {offsets = [0, 256], sizes = [2, 128], strides = [1, 1]} : vector<2x384xf32> to vector<2x128xf32>
    %179 = arith.mulf %168, %178 : vector<2x128xf32>
    %180 = arith.addf %177, %179 : vector<2x128xf32>
    %181 = math.tanh %180 : vector<2x128xf32>
    %cst_62 = arith.constant 1.000000e+00 : f32
    %182 = vector.broadcast %cst_62 : f32 to vector<2x128xf32>
    %183 = arith.subf %182, %176 : vector<2x128xf32>
    %184 = arith.mulf %183, %181 : vector<2x128xf32>
    %185 = arith.mulf %176, %111 : vector<2x128xf32>
    %186 = arith.addf %184, %185 : vector<2x128xf32>
    %c0_63 = arith.constant 0 : index
    %c0_64 = arith.constant 0 : index
    %187 = vector.load %arg4[%c0_63, %c0_64] : memref<128x384xf32, #tpu.memory_space<vmem>>, vector<128x384xf32>
    %cst_65 = arith.constant dense<0.000000e+00> : vector<2x384xf32>
    %188 = tpu.matmul %186, %187, %cst_65 {dimension_numbers = #tpu.dot_dimension_numbers<[1], [0], [0], [1], [0, 0, 1, 1], [], []>} : vector<2x128xf32>, vector<128x384xf32>, vector<2x384xf32> -> vector<2x384xf32>
    %c0_66 = arith.constant 0 : index
    %c0_67 = arith.constant 0 : index
    %189 = vector.load %arg5[%c0_66, %c0_67] : memref<1x384xf32, #tpu.memory_space<vmem>>, vector<1x384xf32>
    %190 = vector.broadcast %189 : vector<1x384xf32> to vector<2x384xf32>
    %191 = arith.addf %188, %190 : vector<2x384xf32>
    %c0_68 = arith.constant 0 : index
    %c0_69 = arith.constant 0 : index
    %192 = vector.load %arg6[%c0_68, %c0_69] : memref<128x384xf32, #tpu.memory_space<vmem>>, vector<128x384xf32>
    %c0_70 = arith.constant 0 : index
    %c0_71 = arith.constant 0 : index
    %193 = vector.load %arg7[%c0_70, %c0_71] : memref<1x384xf32, #tpu.memory_space<vmem>>, vector<1x384xf32>
    %cst_72 = arith.constant dense<0.000000e+00> : vector<2x384xf32>
    %194 = tpu.matmul %147, %192, %cst_72 {dimension_numbers = #tpu.dot_dimension_numbers<[1], [0], [0], [1], [0, 0, 1, 1], [], []>} : vector<2x128xf32>, vector<128x384xf32>, vector<2x384xf32> -> vector<2x384xf32>
    %195 = vector.broadcast %193 : vector<1x384xf32> to vector<2x384xf32>
    %196 = arith.addf %194, %195 : vector<2x384xf32>
    %197 = vector.extract_strided_slice %191 {offsets = [0, 0], sizes = [2, 128], strides = [1, 1]} : vector<2x384xf32> to vector<2x128xf32>
    %198 = vector.extract_strided_slice %196 {offsets = [0, 0], sizes = [2, 128], strides = [1, 1]} : vector<2x384xf32> to vector<2x128xf32>
    %199 = arith.addf %197, %198 : vector<2x128xf32>
    %200 = arith.negf %199 : vector<2x128xf32>
    %201 = math.exp %200 : vector<2x128xf32>
    %cst_73 = arith.constant 1.000000e+00 : f32
    %202 = vector.broadcast %cst_73 : f32 to vector<2x128xf32>
    %203 = arith.addf %202, %201 : vector<2x128xf32>
    %204 = arith.divf %202, %203 : vector<2x128xf32>
    %205 = vector.extract_strided_slice %191 {offsets = [0, 128], sizes = [2, 128], strides = [1, 1]} : vector<2x384xf32> to vector<2x128xf32>
    %206 = vector.extract_strided_slice %196 {offsets = [0, 128], sizes = [2, 128], strides = [1, 1]} : vector<2x384xf32> to vector<2x128xf32>
    %207 = arith.addf %205, %206 : vector<2x128xf32>
    %208 = arith.negf %207 : vector<2x128xf32>
    %209 = math.exp %208 : vector<2x128xf32>
    %cst_74 = arith.constant 1.000000e+00 : f32
    %210 = vector.broadcast %cst_74 : f32 to vector<2x128xf32>
    %211 = arith.addf %210, %209 : vector<2x128xf32>
    %212 = arith.divf %210, %211 : vector<2x128xf32>
    %213 = vector.extract_strided_slice %191 {offsets = [0, 256], sizes = [2, 128], strides = [1, 1]} : vector<2x384xf32> to vector<2x128xf32>
    %214 = vector.extract_strided_slice %196 {offsets = [0, 256], sizes = [2, 128], strides = [1, 1]} : vector<2x384xf32> to vector<2x128xf32>
    %215 = arith.mulf %204, %214 : vector<2x128xf32>
    %216 = arith.addf %213, %215 : vector<2x128xf32>
    %217 = math.tanh %216 : vector<2x128xf32>
    %cst_75 = arith.constant 1.000000e+00 : f32
    %218 = vector.broadcast %cst_75 : f32 to vector<2x128xf32>
    %219 = arith.subf %218, %212 : vector<2x128xf32>
    %220 = arith.mulf %219, %217 : vector<2x128xf32>
    %221 = arith.mulf %212, %147 : vector<2x128xf32>
    %222 = arith.addf %220, %221 : vector<2x128xf32>
    %223 = arith.index_cast %c2_i32 : i32 to index
    %c0_76 = arith.constant 0 : index
    %c0_77 = arith.constant 0 : index
    %224 = vector.load %arg8[%223, %c0_76, %c0_77] : memref<8x128x16xf32, #tpu.memory_space<vmem>>, vector<1x128x16xf32>
    %225 = vector.shape_cast %224 : vector<1x128x16xf32> to vector<128x16xf32>
    %cst_78 = arith.constant dense<0.000000e+00> : vector<2x16xf32>
    %226 = tpu.matmul %222, %225, %cst_78 {dimension_numbers = #tpu.dot_dimension_numbers<[1], [0], [0], [1], [0, 0, 1, 1], [], []>} : vector<2x128xf32>, vector<128x16xf32>, vector<2x16xf32> -> vector<2x16xf32>
    %227 = arith.addf %152, %226 : vector<2x16xf32>
    %c3_i32 = arith.constant 3 : i32
    %228 = arith.index_cast %c3_i32 : i32 to index
    %c0_79 = arith.constant 0 : index
    %c0_80 = arith.constant 0 : index
    %229 = vector.load %arg1[%228, %c0_79, %c0_80] : memref<8x2x384xf32, #tpu.memory_space<vmem>>, vector<1x2x384xf32>
    %230 = vector.shape_cast %229 : vector<1x2x384xf32> to vector<2x384xf32>
    %c0_81 = arith.constant 0 : index
    %c0_82 = arith.constant 0 : index
    %231 = vector.load %arg2[%c0_81, %c0_82] : memref<128x384xf32, #tpu.memory_space<vmem>>, vector<128x384xf32>
    %c0_83 = arith.constant 0 : index
    %c0_84 = arith.constant 0 : index
    %232 = vector.load %arg3[%c0_83, %c0_84] : memref<1x384xf32, #tpu.memory_space<vmem>>, vector<1x384xf32>
    %cst_85 = arith.constant dense<0.000000e+00> : vector<2x384xf32>
    %233 = tpu.matmul %186, %231, %cst_85 {dimension_numbers = #tpu.dot_dimension_numbers<[1], [0], [0], [1], [0, 0, 1, 1], [], []>} : vector<2x128xf32>, vector<128x384xf32>, vector<2x384xf32> -> vector<2x384xf32>
    %234 = vector.broadcast %232 : vector<1x384xf32> to vector<2x384xf32>
    %235 = arith.addf %233, %234 : vector<2x384xf32>
    %236 = vector.extract_strided_slice %230 {offsets = [0, 0], sizes = [2, 128], strides = [1, 1]} : vector<2x384xf32> to vector<2x128xf32>
    %237 = vector.extract_strided_slice %235 {offsets = [0, 0], sizes = [2, 128], strides = [1, 1]} : vector<2x384xf32> to vector<2x128xf32>
    %238 = arith.addf %236, %237 : vector<2x128xf32>
    %239 = arith.negf %238 : vector<2x128xf32>
    %240 = math.exp %239 : vector<2x128xf32>
    %cst_86 = arith.constant 1.000000e+00 : f32
    %241 = vector.broadcast %cst_86 : f32 to vector<2x128xf32>
    %242 = arith.addf %241, %240 : vector<2x128xf32>
    %243 = arith.divf %241, %242 : vector<2x128xf32>
    %244 = vector.extract_strided_slice %230 {offsets = [0, 128], sizes = [2, 128], strides = [1, 1]} : vector<2x384xf32> to vector<2x128xf32>
    %245 = vector.extract_strided_slice %235 {offsets = [0, 128], sizes = [2, 128], strides = [1, 1]} : vector<2x384xf32> to vector<2x128xf32>
    %246 = arith.addf %244, %245 : vector<2x128xf32>
    %247 = arith.negf %246 : vector<2x128xf32>
    %248 = math.exp %247 : vector<2x128xf32>
    %cst_87 = arith.constant 1.000000e+00 : f32
    %249 = vector.broadcast %cst_87 : f32 to vector<2x128xf32>
    %250 = arith.addf %249, %248 : vector<2x128xf32>
    %251 = arith.divf %249, %250 : vector<2x128xf32>
    %252 = vector.extract_strided_slice %230 {offsets = [0, 256], sizes = [2, 128], strides = [1, 1]} : vector<2x384xf32> to vector<2x128xf32>
    %253 = vector.extract_strided_slice %235 {offsets = [0, 256], sizes = [2, 128], strides = [1, 1]} : vector<2x384xf32> to vector<2x128xf32>
    %254 = arith.mulf %243, %253 : vector<2x128xf32>
    %255 = arith.addf %252, %254 : vector<2x128xf32>
    %256 = math.tanh %255 : vector<2x128xf32>
    %cst_88 = arith.constant 1.000000e+00 : f32
    %257 = vector.broadcast %cst_88 : f32 to vector<2x128xf32>
    %258 = arith.subf %257, %251 : vector<2x128xf32>
    %259 = arith.mulf %258, %256 : vector<2x128xf32>
    %260 = arith.mulf %251, %186 : vector<2x128xf32>
    %261 = arith.addf %259, %260 : vector<2x128xf32>
    %c0_89 = arith.constant 0 : index
    %c0_90 = arith.constant 0 : index
    %262 = vector.load %arg4[%c0_89, %c0_90] : memref<128x384xf32, #tpu.memory_space<vmem>>, vector<128x384xf32>
    %cst_91 = arith.constant dense<0.000000e+00> : vector<2x384xf32>
    %263 = tpu.matmul %261, %262, %cst_91 {dimension_numbers = #tpu.dot_dimension_numbers<[1], [0], [0], [1], [0, 0, 1, 1], [], []>} : vector<2x128xf32>, vector<128x384xf32>, vector<2x384xf32> -> vector<2x384xf32>
    %c0_92 = arith.constant 0 : index
    %c0_93 = arith.constant 0 : index
    %264 = vector.load %arg5[%c0_92, %c0_93] : memref<1x384xf32, #tpu.memory_space<vmem>>, vector<1x384xf32>
    %265 = vector.broadcast %264 : vector<1x384xf32> to vector<2x384xf32>
    %266 = arith.addf %263, %265 : vector<2x384xf32>
    %c0_94 = arith.constant 0 : index
    %c0_95 = arith.constant 0 : index
    %267 = vector.load %arg6[%c0_94, %c0_95] : memref<128x384xf32, #tpu.memory_space<vmem>>, vector<128x384xf32>
    %c0_96 = arith.constant 0 : index
    %c0_97 = arith.constant 0 : index
    %268 = vector.load %arg7[%c0_96, %c0_97] : memref<1x384xf32, #tpu.memory_space<vmem>>, vector<1x384xf32>
    %cst_98 = arith.constant dense<0.000000e+00> : vector<2x384xf32>
    %269 = tpu.matmul %222, %267, %cst_98 {dimension_numbers = #tpu.dot_dimension_numbers<[1], [0], [0], [1], [0, 0, 1, 1], [], []>} : vector<2x128xf32>, vector<128x384xf32>, vector<2x384xf32> -> vector<2x384xf32>
    %270 = vector.broadcast %268 : vector<1x384xf32> to vector<2x384xf32>
    %271 = arith.addf %269, %270 : vector<2x384xf32>
    %272 = vector.extract_strided_slice %266 {offsets = [0, 0], sizes = [2, 128], strides = [1, 1]} : vector<2x384xf32> to vector<2x128xf32>
    %273 = vector.extract_strided_slice %271 {offsets = [0, 0], sizes = [2, 128], strides = [1, 1]} : vector<2x384xf32> to vector<2x128xf32>
    %274 = arith.addf %272, %273 : vector<2x128xf32>
    %275 = arith.negf %274 : vector<2x128xf32>
    %276 = math.exp %275 : vector<2x128xf32>
    %cst_99 = arith.constant 1.000000e+00 : f32
    %277 = vector.broadcast %cst_99 : f32 to vector<2x128xf32>
    %278 = arith.addf %277, %276 : vector<2x128xf32>
    %279 = arith.divf %277, %278 : vector<2x128xf32>
    %280 = vector.extract_strided_slice %266 {offsets = [0, 128], sizes = [2, 128], strides = [1, 1]} : vector<2x384xf32> to vector<2x128xf32>
    %281 = vector.extract_strided_slice %271 {offsets = [0, 128], sizes = [2, 128], strides = [1, 1]} : vector<2x384xf32> to vector<2x128xf32>
    %282 = arith.addf %280, %281 : vector<2x128xf32>
    %283 = arith.negf %282 : vector<2x128xf32>
    %284 = math.exp %283 : vector<2x128xf32>
    %cst_100 = arith.constant 1.000000e+00 : f32
    %285 = vector.broadcast %cst_100 : f32 to vector<2x128xf32>
    %286 = arith.addf %285, %284 : vector<2x128xf32>
    %287 = arith.divf %285, %286 : vector<2x128xf32>
    %288 = vector.extract_strided_slice %266 {offsets = [0, 256], sizes = [2, 128], strides = [1, 1]} : vector<2x384xf32> to vector<2x128xf32>
    %289 = vector.extract_strided_slice %271 {offsets = [0, 256], sizes = [2, 128], strides = [1, 1]} : vector<2x384xf32> to vector<2x128xf32>
    %290 = arith.mulf %279, %289 : vector<2x128xf32>
    %291 = arith.addf %288, %290 : vector<2x128xf32>
    %292 = math.tanh %291 : vector<2x128xf32>
    %cst_101 = arith.constant 1.000000e+00 : f32
    %293 = vector.broadcast %cst_101 : f32 to vector<2x128xf32>
    %294 = arith.subf %293, %287 : vector<2x128xf32>
    %295 = arith.mulf %294, %292 : vector<2x128xf32>
    %296 = arith.mulf %287, %222 : vector<2x128xf32>
    %297 = arith.addf %295, %296 : vector<2x128xf32>
    %298 = arith.index_cast %c3_i32 : i32 to index
    %c0_102 = arith.constant 0 : index
    %c0_103 = arith.constant 0 : index
    %299 = vector.load %arg8[%298, %c0_102, %c0_103] : memref<8x128x16xf32, #tpu.memory_space<vmem>>, vector<1x128x16xf32>
    %300 = vector.shape_cast %299 : vector<1x128x16xf32> to vector<128x16xf32>
    %cst_104 = arith.constant dense<0.000000e+00> : vector<2x16xf32>
    %301 = tpu.matmul %297, %300, %cst_104 {dimension_numbers = #tpu.dot_dimension_numbers<[1], [0], [0], [1], [0, 0, 1, 1], [], []>} : vector<2x128xf32>, vector<128x16xf32>, vector<2x16xf32> -> vector<2x16xf32>
    %302 = arith.addf %227, %301 : vector<2x16xf32>
    %c4_i32 = arith.constant 4 : i32
    %303 = arith.index_cast %c4_i32 : i32 to index
    %c0_105 = arith.constant 0 : index
    %c0_106 = arith.constant 0 : index
    %304 = vector.load %arg1[%303, %c0_105, %c0_106] : memref<8x2x384xf32, #tpu.memory_space<vmem>>, vector<1x2x384xf32>
    %305 = vector.shape_cast %304 : vector<1x2x384xf32> to vector<2x384xf32>
    %c0_107 = arith.constant 0 : index
    %c0_108 = arith.constant 0 : index
    %306 = vector.load %arg2[%c0_107, %c0_108] : memref<128x384xf32, #tpu.memory_space<vmem>>, vector<128x384xf32>
    %c0_109 = arith.constant 0 : index
    %c0_110 = arith.constant 0 : index
    %307 = vector.load %arg3[%c0_109, %c0_110] : memref<1x384xf32, #tpu.memory_space<vmem>>, vector<1x384xf32>
    %cst_111 = arith.constant dense<0.000000e+00> : vector<2x384xf32>
    %308 = tpu.matmul %261, %306, %cst_111 {dimension_numbers = #tpu.dot_dimension_numbers<[1], [0], [0], [1], [0, 0, 1, 1], [], []>} : vector<2x128xf32>, vector<128x384xf32>, vector<2x384xf32> -> vector<2x384xf32>
    %309 = vector.broadcast %307 : vector<1x384xf32> to vector<2x384xf32>
    %310 = arith.addf %308, %309 : vector<2x384xf32>
    %311 = vector.extract_strided_slice %305 {offsets = [0, 0], sizes = [2, 128], strides = [1, 1]} : vector<2x384xf32> to vector<2x128xf32>
    %312 = vector.extract_strided_slice %310 {offsets = [0, 0], sizes = [2, 128], strides = [1, 1]} : vector<2x384xf32> to vector<2x128xf32>
    %313 = arith.addf %311, %312 : vector<2x128xf32>
    %314 = arith.negf %313 : vector<2x128xf32>
    %315 = math.exp %314 : vector<2x128xf32>
    %cst_112 = arith.constant 1.000000e+00 : f32
    %316 = vector.broadcast %cst_112 : f32 to vector<2x128xf32>
    %317 = arith.addf %316, %315 : vector<2x128xf32>
    %318 = arith.divf %316, %317 : vector<2x128xf32>
    %319 = vector.extract_strided_slice %305 {offsets = [0, 128], sizes = [2, 128], strides = [1, 1]} : vector<2x384xf32> to vector<2x128xf32>
    %320 = vector.extract_strided_slice %310 {offsets = [0, 128], sizes = [2, 128], strides = [1, 1]} : vector<2x384xf32> to vector<2x128xf32>
    %321 = arith.addf %319, %320 : vector<2x128xf32>
    %322 = arith.negf %321 : vector<2x128xf32>
    %323 = math.exp %322 : vector<2x128xf32>
    %cst_113 = arith.constant 1.000000e+00 : f32
    %324 = vector.broadcast %cst_113 : f32 to vector<2x128xf32>
    %325 = arith.addf %324, %323 : vector<2x128xf32>
    %326 = arith.divf %324, %325 : vector<2x128xf32>
    %327 = vector.extract_strided_slice %305 {offsets = [0, 256], sizes = [2, 128], strides = [1, 1]} : vector<2x384xf32> to vector<2x128xf32>
    %328 = vector.extract_strided_slice %310 {offsets = [0, 256], sizes = [2, 128], strides = [1, 1]} : vector<2x384xf32> to vector<2x128xf32>
    %329 = arith.mulf %318, %328 : vector<2x128xf32>
    %330 = arith.addf %327, %329 : vector<2x128xf32>
    %331 = math.tanh %330 : vector<2x128xf32>
    %cst_114 = arith.constant 1.000000e+00 : f32
    %332 = vector.broadcast %cst_114 : f32 to vector<2x128xf32>
    %333 = arith.subf %332, %326 : vector<2x128xf32>
    %334 = arith.mulf %333, %331 : vector<2x128xf32>
    %335 = arith.mulf %326, %261 : vector<2x128xf32>
    %336 = arith.addf %334, %335 : vector<2x128xf32>
    %c0_115 = arith.constant 0 : index
    %c0_116 = arith.constant 0 : index
    %337 = vector.load %arg4[%c0_115, %c0_116] : memref<128x384xf32, #tpu.memory_space<vmem>>, vector<128x384xf32>
    %cst_117 = arith.constant dense<0.000000e+00> : vector<2x384xf32>
    %338 = tpu.matmul %336, %337, %cst_117 {dimension_numbers = #tpu.dot_dimension_numbers<[1], [0], [0], [1], [0, 0, 1, 1], [], []>} : vector<2x128xf32>, vector<128x384xf32>, vector<2x384xf32> -> vector<2x384xf32>
    %c0_118 = arith.constant 0 : index
    %c0_119 = arith.constant 0 : index
    %339 = vector.load %arg5[%c0_118, %c0_119] : memref<1x384xf32, #tpu.memory_space<vmem>>, vector<1x384xf32>
    %340 = vector.broadcast %339 : vector<1x384xf32> to vector<2x384xf32>
    %341 = arith.addf %338, %340 : vector<2x384xf32>
    %c0_120 = arith.constant 0 : index
    %c0_121 = arith.constant 0 : index
    %342 = vector.load %arg6[%c0_120, %c0_121] : memref<128x384xf32, #tpu.memory_space<vmem>>, vector<128x384xf32>
    %c0_122 = arith.constant 0 : index
    %c0_123 = arith.constant 0 : index
    %343 = vector.load %arg7[%c0_122, %c0_123] : memref<1x384xf32, #tpu.memory_space<vmem>>, vector<1x384xf32>
    %cst_124 = arith.constant dense<0.000000e+00> : vector<2x384xf32>
    %344 = tpu.matmul %297, %342, %cst_124 {dimension_numbers = #tpu.dot_dimension_numbers<[1], [0], [0], [1], [0, 0, 1, 1], [], []>} : vector<2x128xf32>, vector<128x384xf32>, vector<2x384xf32> -> vector<2x384xf32>
    %345 = vector.broadcast %343 : vector<1x384xf32> to vector<2x384xf32>
    %346 = arith.addf %344, %345 : vector<2x384xf32>
    %347 = vector.extract_strided_slice %341 {offsets = [0, 0], sizes = [2, 128], strides = [1, 1]} : vector<2x384xf32> to vector<2x128xf32>
    %348 = vector.extract_strided_slice %346 {offsets = [0, 0], sizes = [2, 128], strides = [1, 1]} : vector<2x384xf32> to vector<2x128xf32>
    %349 = arith.addf %347, %348 : vector<2x128xf32>
    %350 = arith.negf %349 : vector<2x128xf32>
    %351 = math.exp %350 : vector<2x128xf32>
    %cst_125 = arith.constant 1.000000e+00 : f32
    %352 = vector.broadcast %cst_125 : f32 to vector<2x128xf32>
    %353 = arith.addf %352, %351 : vector<2x128xf32>
    %354 = arith.divf %352, %353 : vector<2x128xf32>
    %355 = vector.extract_strided_slice %341 {offsets = [0, 128], sizes = [2, 128], strides = [1, 1]} : vector<2x384xf32> to vector<2x128xf32>
    %356 = vector.extract_strided_slice %346 {offsets = [0, 128], sizes = [2, 128], strides = [1, 1]} : vector<2x384xf32> to vector<2x128xf32>
    %357 = arith.addf %355, %356 : vector<2x128xf32>
    %358 = arith.negf %357 : vector<2x128xf32>
    %359 = math.exp %358 : vector<2x128xf32>
    %cst_126 = arith.constant 1.000000e+00 : f32
    %360 = vector.broadcast %cst_126 : f32 to vector<2x128xf32>
    %361 = arith.addf %360, %359 : vector<2x128xf32>
    %362 = arith.divf %360, %361 : vector<2x128xf32>
    %363 = vector.extract_strided_slice %341 {offsets = [0, 256], sizes = [2, 128], strides = [1, 1]} : vector<2x384xf32> to vector<2x128xf32>
    %364 = vector.extract_strided_slice %346 {offsets = [0, 256], sizes = [2, 128], strides = [1, 1]} : vector<2x384xf32> to vector<2x128xf32>
    %365 = arith.mulf %354, %364 : vector<2x128xf32>
    %366 = arith.addf %363, %365 : vector<2x128xf32>
    %367 = math.tanh %366 : vector<2x128xf32>
    %cst_127 = arith.constant 1.000000e+00 : f32
    %368 = vector.broadcast %cst_127 : f32 to vector<2x128xf32>
    %369 = arith.subf %368, %362 : vector<2x128xf32>
    %370 = arith.mulf %369, %367 : vector<2x128xf32>
    %371 = arith.mulf %362, %297 : vector<2x128xf32>
    %372 = arith.addf %370, %371 : vector<2x128xf32>
    %373 = arith.index_cast %c4_i32 : i32 to index
    %c0_128 = arith.constant 0 : index
    %c0_129 = arith.constant 0 : index
    %374 = vector.load %arg8[%373, %c0_128, %c0_129] : memref<8x128x16xf32, #tpu.memory_space<vmem>>, vector<1x128x16xf32>
    %375 = vector.shape_cast %374 : vector<1x128x16xf32> to vector<128x16xf32>
    %cst_130 = arith.constant dense<0.000000e+00> : vector<2x16xf32>
    %376 = tpu.matmul %372, %375, %cst_130 {dimension_numbers = #tpu.dot_dimension_numbers<[1], [0], [0], [1], [0, 0, 1, 1], [], []>} : vector<2x128xf32>, vector<128x16xf32>, vector<2x16xf32> -> vector<2x16xf32>
    %377 = arith.addf %302, %376 : vector<2x16xf32>
    %c5_i32 = arith.constant 5 : i32
    %378 = arith.index_cast %c5_i32 : i32 to index
    %c0_131 = arith.constant 0 : index
    %c0_132 = arith.constant 0 : index
    %379 = vector.load %arg1[%378, %c0_131, %c0_132] : memref<8x2x384xf32, #tpu.memory_space<vmem>>, vector<1x2x384xf32>
    %380 = vector.shape_cast %379 : vector<1x2x384xf32> to vector<2x384xf32>
    %c0_133 = arith.constant 0 : index
    %c0_134 = arith.constant 0 : index
    %381 = vector.load %arg2[%c0_133, %c0_134] : memref<128x384xf32, #tpu.memory_space<vmem>>, vector<128x384xf32>
    %c0_135 = arith.constant 0 : index
    %c0_136 = arith.constant 0 : index
    %382 = vector.load %arg3[%c0_135, %c0_136] : memref<1x384xf32, #tpu.memory_space<vmem>>, vector<1x384xf32>
    %cst_137 = arith.constant dense<0.000000e+00> : vector<2x384xf32>
    %383 = tpu.matmul %336, %381, %cst_137 {dimension_numbers = #tpu.dot_dimension_numbers<[1], [0], [0], [1], [0, 0, 1, 1], [], []>} : vector<2x128xf32>, vector<128x384xf32>, vector<2x384xf32> -> vector<2x384xf32>
    %384 = vector.broadcast %382 : vector<1x384xf32> to vector<2x384xf32>
    %385 = arith.addf %383, %384 : vector<2x384xf32>
    %386 = vector.extract_strided_slice %380 {offsets = [0, 0], sizes = [2, 128], strides = [1, 1]} : vector<2x384xf32> to vector<2x128xf32>
    %387 = vector.extract_strided_slice %385 {offsets = [0, 0], sizes = [2, 128], strides = [1, 1]} : vector<2x384xf32> to vector<2x128xf32>
    %388 = arith.addf %386, %387 : vector<2x128xf32>
    %389 = arith.negf %388 : vector<2x128xf32>
    %390 = math.exp %389 : vector<2x128xf32>
    %cst_138 = arith.constant 1.000000e+00 : f32
    %391 = vector.broadcast %cst_138 : f32 to vector<2x128xf32>
    %392 = arith.addf %391, %390 : vector<2x128xf32>
    %393 = arith.divf %391, %392 : vector<2x128xf32>
    %394 = vector.extract_strided_slice %380 {offsets = [0, 128], sizes = [2, 128], strides = [1, 1]} : vector<2x384xf32> to vector<2x128xf32>
    %395 = vector.extract_strided_slice %385 {offsets = [0, 128], sizes = [2, 128], strides = [1, 1]} : vector<2x384xf32> to vector<2x128xf32>
    %396 = arith.addf %394, %395 : vector<2x128xf32>
    %397 = arith.negf %396 : vector<2x128xf32>
    %398 = math.exp %397 : vector<2x128xf32>
    %cst_139 = arith.constant 1.000000e+00 : f32
    %399 = vector.broadcast %cst_139 : f32 to vector<2x128xf32>
    %400 = arith.addf %399, %398 : vector<2x128xf32>
    %401 = arith.divf %399, %400 : vector<2x128xf32>
    %402 = vector.extract_strided_slice %380 {offsets = [0, 256], sizes = [2, 128], strides = [1, 1]} : vector<2x384xf32> to vector<2x128xf32>
    %403 = vector.extract_strided_slice %385 {offsets = [0, 256], sizes = [2, 128], strides = [1, 1]} : vector<2x384xf32> to vector<2x128xf32>
    %404 = arith.mulf %393, %403 : vector<2x128xf32>
    %405 = arith.addf %402, %404 : vector<2x128xf32>
    %406 = math.tanh %405 : vector<2x128xf32>
    %cst_140 = arith.constant 1.000000e+00 : f32
    %407 = vector.broadcast %cst_140 : f32 to vector<2x128xf32>
    %408 = arith.subf %407, %401 : vector<2x128xf32>
    %409 = arith.mulf %408, %406 : vector<2x128xf32>
    %410 = arith.mulf %401, %336 : vector<2x128xf32>
    %411 = arith.addf %409, %410 : vector<2x128xf32>
    %c0_141 = arith.constant 0 : index
    %c0_142 = arith.constant 0 : index
    %412 = vector.load %arg4[%c0_141, %c0_142] : memref<128x384xf32, #tpu.memory_space<vmem>>, vector<128x384xf32>
    %cst_143 = arith.constant dense<0.000000e+00> : vector<2x384xf32>
    %413 = tpu.matmul %411, %412, %cst_143 {dimension_numbers = #tpu.dot_dimension_numbers<[1], [0], [0], [1], [0, 0, 1, 1], [], []>} : vector<2x128xf32>, vector<128x384xf32>, vector<2x384xf32> -> vector<2x384xf32>
    %c0_144 = arith.constant 0 : index
    %c0_145 = arith.constant 0 : index
    %414 = vector.load %arg5[%c0_144, %c0_145] : memref<1x384xf32, #tpu.memory_space<vmem>>, vector<1x384xf32>
    %415 = vector.broadcast %414 : vector<1x384xf32> to vector<2x384xf32>
    %416 = arith.addf %413, %415 : vector<2x384xf32>
    %c0_146 = arith.constant 0 : index
    %c0_147 = arith.constant 0 : index
    %417 = vector.load %arg6[%c0_146, %c0_147] : memref<128x384xf32, #tpu.memory_space<vmem>>, vector<128x384xf32>
    %c0_148 = arith.constant 0 : index
    %c0_149 = arith.constant 0 : index
    %418 = vector.load %arg7[%c0_148, %c0_149] : memref<1x384xf32, #tpu.memory_space<vmem>>, vector<1x384xf32>
    %cst_150 = arith.constant dense<0.000000e+00> : vector<2x384xf32>
    %419 = tpu.matmul %372, %417, %cst_150 {dimension_numbers = #tpu.dot_dimension_numbers<[1], [0], [0], [1], [0, 0, 1, 1], [], []>} : vector<2x128xf32>, vector<128x384xf32>, vector<2x384xf32> -> vector<2x384xf32>
    %420 = vector.broadcast %418 : vector<1x384xf32> to vector<2x384xf32>
    %421 = arith.addf %419, %420 : vector<2x384xf32>
    %422 = vector.extract_strided_slice %416 {offsets = [0, 0], sizes = [2, 128], strides = [1, 1]} : vector<2x384xf32> to vector<2x128xf32>
    %423 = vector.extract_strided_slice %421 {offsets = [0, 0], sizes = [2, 128], strides = [1, 1]} : vector<2x384xf32> to vector<2x128xf32>
    %424 = arith.addf %422, %423 : vector<2x128xf32>
    %425 = arith.negf %424 : vector<2x128xf32>
    %426 = math.exp %425 : vector<2x128xf32>
    %cst_151 = arith.constant 1.000000e+00 : f32
    %427 = vector.broadcast %cst_151 : f32 to vector<2x128xf32>
    %428 = arith.addf %427, %426 : vector<2x128xf32>
    %429 = arith.divf %427, %428 : vector<2x128xf32>
    %430 = vector.extract_strided_slice %416 {offsets = [0, 128], sizes = [2, 128], strides = [1, 1]} : vector<2x384xf32> to vector<2x128xf32>
    %431 = vector.extract_strided_slice %421 {offsets = [0, 128], sizes = [2, 128], strides = [1, 1]} : vector<2x384xf32> to vector<2x128xf32>
    %432 = arith.addf %430, %431 : vector<2x128xf32>
    %433 = arith.negf %432 : vector<2x128xf32>
    %434 = math.exp %433 : vector<2x128xf32>
    %cst_152 = arith.constant 1.000000e+00 : f32
    %435 = vector.broadcast %cst_152 : f32 to vector<2x128xf32>
    %436 = arith.addf %435, %434 : vector<2x128xf32>
    %437 = arith.divf %435, %436 : vector<2x128xf32>
    %438 = vector.extract_strided_slice %416 {offsets = [0, 256], sizes = [2, 128], strides = [1, 1]} : vector<2x384xf32> to vector<2x128xf32>
    %439 = vector.extract_strided_slice %421 {offsets = [0, 256], sizes = [2, 128], strides = [1, 1]} : vector<2x384xf32> to vector<2x128xf32>
    %440 = arith.mulf %429, %439 : vector<2x128xf32>
    %441 = arith.addf %438, %440 : vector<2x128xf32>
    %442 = math.tanh %441 : vector<2x128xf32>
    %cst_153 = arith.constant 1.000000e+00 : f32
    %443 = vector.broadcast %cst_153 : f32 to vector<2x128xf32>
    %444 = arith.subf %443, %437 : vector<2x128xf32>
    %445 = arith.mulf %444, %442 : vector<2x128xf32>
    %446 = arith.mulf %437, %372 : vector<2x128xf32>
    %447 = arith.addf %445, %446 : vector<2x128xf32>
    %448 = arith.index_cast %c5_i32 : i32 to index
    %c0_154 = arith.constant 0 : index
    %c0_155 = arith.constant 0 : index
    %449 = vector.load %arg8[%448, %c0_154, %c0_155] : memref<8x128x16xf32, #tpu.memory_space<vmem>>, vector<1x128x16xf32>
    %450 = vector.shape_cast %449 : vector<1x128x16xf32> to vector<128x16xf32>
    %cst_156 = arith.constant dense<0.000000e+00> : vector<2x16xf32>
    %451 = tpu.matmul %447, %450, %cst_156 {dimension_numbers = #tpu.dot_dimension_numbers<[1], [0], [0], [1], [0, 0, 1, 1], [], []>} : vector<2x128xf32>, vector<128x16xf32>, vector<2x16xf32> -> vector<2x16xf32>
    %452 = arith.addf %377, %451 : vector<2x16xf32>
    %c6_i32 = arith.constant 6 : i32
    %453 = arith.index_cast %c6_i32 : i32 to index
    %c0_157 = arith.constant 0 : index
    %c0_158 = arith.constant 0 : index
    %454 = vector.load %arg1[%453, %c0_157, %c0_158] : memref<8x2x384xf32, #tpu.memory_space<vmem>>, vector<1x2x384xf32>
    %455 = vector.shape_cast %454 : vector<1x2x384xf32> to vector<2x384xf32>
    %c0_159 = arith.constant 0 : index
    %c0_160 = arith.constant 0 : index
    %456 = vector.load %arg2[%c0_159, %c0_160] : memref<128x384xf32, #tpu.memory_space<vmem>>, vector<128x384xf32>
    %c0_161 = arith.constant 0 : index
    %c0_162 = arith.constant 0 : index
    %457 = vector.load %arg3[%c0_161, %c0_162] : memref<1x384xf32, #tpu.memory_space<vmem>>, vector<1x384xf32>
    %cst_163 = arith.constant dense<0.000000e+00> : vector<2x384xf32>
    %458 = tpu.matmul %411, %456, %cst_163 {dimension_numbers = #tpu.dot_dimension_numbers<[1], [0], [0], [1], [0, 0, 1, 1], [], []>} : vector<2x128xf32>, vector<128x384xf32>, vector<2x384xf32> -> vector<2x384xf32>
    %459 = vector.broadcast %457 : vector<1x384xf32> to vector<2x384xf32>
    %460 = arith.addf %458, %459 : vector<2x384xf32>
    %461 = vector.extract_strided_slice %455 {offsets = [0, 0], sizes = [2, 128], strides = [1, 1]} : vector<2x384xf32> to vector<2x128xf32>
    %462 = vector.extract_strided_slice %460 {offsets = [0, 0], sizes = [2, 128], strides = [1, 1]} : vector<2x384xf32> to vector<2x128xf32>
    %463 = arith.addf %461, %462 : vector<2x128xf32>
    %464 = arith.negf %463 : vector<2x128xf32>
    %465 = math.exp %464 : vector<2x128xf32>
    %cst_164 = arith.constant 1.000000e+00 : f32
    %466 = vector.broadcast %cst_164 : f32 to vector<2x128xf32>
    %467 = arith.addf %466, %465 : vector<2x128xf32>
    %468 = arith.divf %466, %467 : vector<2x128xf32>
    %469 = vector.extract_strided_slice %455 {offsets = [0, 128], sizes = [2, 128], strides = [1, 1]} : vector<2x384xf32> to vector<2x128xf32>
    %470 = vector.extract_strided_slice %460 {offsets = [0, 128], sizes = [2, 128], strides = [1, 1]} : vector<2x384xf32> to vector<2x128xf32>
    %471 = arith.addf %469, %470 : vector<2x128xf32>
    %472 = arith.negf %471 : vector<2x128xf32>
    %473 = math.exp %472 : vector<2x128xf32>
    %cst_165 = arith.constant 1.000000e+00 : f32
    %474 = vector.broadcast %cst_165 : f32 to vector<2x128xf32>
    %475 = arith.addf %474, %473 : vector<2x128xf32>
    %476 = arith.divf %474, %475 : vector<2x128xf32>
    %477 = vector.extract_strided_slice %455 {offsets = [0, 256], sizes = [2, 128], strides = [1, 1]} : vector<2x384xf32> to vector<2x128xf32>
    %478 = vector.extract_strided_slice %460 {offsets = [0, 256], sizes = [2, 128], strides = [1, 1]} : vector<2x384xf32> to vector<2x128xf32>
    %479 = arith.mulf %468, %478 : vector<2x128xf32>
    %480 = arith.addf %477, %479 : vector<2x128xf32>
    %481 = math.tanh %480 : vector<2x128xf32>
    %cst_166 = arith.constant 1.000000e+00 : f32
    %482 = vector.broadcast %cst_166 : f32 to vector<2x128xf32>
    %483 = arith.subf %482, %476 : vector<2x128xf32>
    %484 = arith.mulf %483, %481 : vector<2x128xf32>
    %485 = arith.mulf %476, %411 : vector<2x128xf32>
    %486 = arith.addf %484, %485 : vector<2x128xf32>
    %c0_167 = arith.constant 0 : index
    %c0_168 = arith.constant 0 : index
    %487 = vector.load %arg4[%c0_167, %c0_168] : memref<128x384xf32, #tpu.memory_space<vmem>>, vector<128x384xf32>
    %cst_169 = arith.constant dense<0.000000e+00> : vector<2x384xf32>
    %488 = tpu.matmul %486, %487, %cst_169 {dimension_numbers = #tpu.dot_dimension_numbers<[1], [0], [0], [1], [0, 0, 1, 1], [], []>} : vector<2x128xf32>, vector<128x384xf32>, vector<2x384xf32> -> vector<2x384xf32>
    %c0_170 = arith.constant 0 : index
    %c0_171 = arith.constant 0 : index
    %489 = vector.load %arg5[%c0_170, %c0_171] : memref<1x384xf32, #tpu.memory_space<vmem>>, vector<1x384xf32>
    %490 = vector.broadcast %489 : vector<1x384xf32> to vector<2x384xf32>
    %491 = arith.addf %488, %490 : vector<2x384xf32>
    %c0_172 = arith.constant 0 : index
    %c0_173 = arith.constant 0 : index
    %492 = vector.load %arg6[%c0_172, %c0_173] : memref<128x384xf32, #tpu.memory_space<vmem>>, vector<128x384xf32>
    %c0_174 = arith.constant 0 : index
    %c0_175 = arith.constant 0 : index
    %493 = vector.load %arg7[%c0_174, %c0_175] : memref<1x384xf32, #tpu.memory_space<vmem>>, vector<1x384xf32>
    %cst_176 = arith.constant dense<0.000000e+00> : vector<2x384xf32>
    %494 = tpu.matmul %447, %492, %cst_176 {dimension_numbers = #tpu.dot_dimension_numbers<[1], [0], [0], [1], [0, 0, 1, 1], [], []>} : vector<2x128xf32>, vector<128x384xf32>, vector<2x384xf32> -> vector<2x384xf32>
    %495 = vector.broadcast %493 : vector<1x384xf32> to vector<2x384xf32>
    %496 = arith.addf %494, %495 : vector<2x384xf32>
    %497 = vector.extract_strided_slice %491 {offsets = [0, 0], sizes = [2, 128], strides = [1, 1]} : vector<2x384xf32> to vector<2x128xf32>
    %498 = vector.extract_strided_slice %496 {offsets = [0, 0], sizes = [2, 128], strides = [1, 1]} : vector<2x384xf32> to vector<2x128xf32>
    %499 = arith.addf %497, %498 : vector<2x128xf32>
    %500 = arith.negf %499 : vector<2x128xf32>
    %501 = math.exp %500 : vector<2x128xf32>
    %cst_177 = arith.constant 1.000000e+00 : f32
    %502 = vector.broadcast %cst_177 : f32 to vector<2x128xf32>
    %503 = arith.addf %502, %501 : vector<2x128xf32>
    %504 = arith.divf %502, %503 : vector<2x128xf32>
    %505 = vector.extract_strided_slice %491 {offsets = [0, 128], sizes = [2, 128], strides = [1, 1]} : vector<2x384xf32> to vector<2x128xf32>
    %506 = vector.extract_strided_slice %496 {offsets = [0, 128], sizes = [2, 128], strides = [1, 1]} : vector<2x384xf32> to vector<2x128xf32>
    %507 = arith.addf %505, %506 : vector<2x128xf32>
    %508 = arith.negf %507 : vector<2x128xf32>
    %509 = math.exp %508 : vector<2x128xf32>
    %cst_178 = arith.constant 1.000000e+00 : f32
    %510 = vector.broadcast %cst_178 : f32 to vector<2x128xf32>
    %511 = arith.addf %510, %509 : vector<2x128xf32>
    %512 = arith.divf %510, %511 : vector<2x128xf32>
    %513 = vector.extract_strided_slice %491 {offsets = [0, 256], sizes = [2, 128], strides = [1, 1]} : vector<2x384xf32> to vector<2x128xf32>
    %514 = vector.extract_strided_slice %496 {offsets = [0, 256], sizes = [2, 128], strides = [1, 1]} : vector<2x384xf32> to vector<2x128xf32>
    %515 = arith.mulf %504, %514 : vector<2x128xf32>
    %516 = arith.addf %513, %515 : vector<2x128xf32>
    %517 = math.tanh %516 : vector<2x128xf32>
    %cst_179 = arith.constant 1.000000e+00 : f32
    %518 = vector.broadcast %cst_179 : f32 to vector<2x128xf32>
    %519 = arith.subf %518, %512 : vector<2x128xf32>
    %520 = arith.mulf %519, %517 : vector<2x128xf32>
    %521 = arith.mulf %512, %447 : vector<2x128xf32>
    %522 = arith.addf %520, %521 : vector<2x128xf32>
    %523 = arith.index_cast %c6_i32 : i32 to index
    %c0_180 = arith.constant 0 : index
    %c0_181 = arith.constant 0 : index
    %524 = vector.load %arg8[%523, %c0_180, %c0_181] : memref<8x128x16xf32, #tpu.memory_space<vmem>>, vector<1x128x16xf32>
    %525 = vector.shape_cast %524 : vector<1x128x16xf32> to vector<128x16xf32>
    %cst_182 = arith.constant dense<0.000000e+00> : vector<2x16xf32>
    %526 = tpu.matmul %522, %525, %cst_182 {dimension_numbers = #tpu.dot_dimension_numbers<[1], [0], [0], [1], [0, 0, 1, 1], [], []>} : vector<2x128xf32>, vector<128x16xf32>, vector<2x16xf32> -> vector<2x16xf32>
    %527 = arith.addf %452, %526 : vector<2x16xf32>
    %c7_i32 = arith.constant 7 : i32
    %528 = arith.index_cast %c7_i32 : i32 to index
    %c0_183 = arith.constant 0 : index
    %c0_184 = arith.constant 0 : index
    %529 = vector.load %arg1[%528, %c0_183, %c0_184] : memref<8x2x384xf32, #tpu.memory_space<vmem>>, vector<1x2x384xf32>
    %530 = vector.shape_cast %529 : vector<1x2x384xf32> to vector<2x384xf32>
    %c0_185 = arith.constant 0 : index
    %c0_186 = arith.constant 0 : index
    %531 = vector.load %arg2[%c0_185, %c0_186] : memref<128x384xf32, #tpu.memory_space<vmem>>, vector<128x384xf32>
    %c0_187 = arith.constant 0 : index
    %c0_188 = arith.constant 0 : index
    %532 = vector.load %arg3[%c0_187, %c0_188] : memref<1x384xf32, #tpu.memory_space<vmem>>, vector<1x384xf32>
    %cst_189 = arith.constant dense<0.000000e+00> : vector<2x384xf32>
    %533 = tpu.matmul %486, %531, %cst_189 {dimension_numbers = #tpu.dot_dimension_numbers<[1], [0], [0], [1], [0, 0, 1, 1], [], []>} : vector<2x128xf32>, vector<128x384xf32>, vector<2x384xf32> -> vector<2x384xf32>
    %534 = vector.broadcast %532 : vector<1x384xf32> to vector<2x384xf32>
    %535 = arith.addf %533, %534 : vector<2x384xf32>
    %536 = vector.extract_strided_slice %530 {offsets = [0, 0], sizes = [2, 128], strides = [1, 1]} : vector<2x384xf32> to vector<2x128xf32>
    %537 = vector.extract_strided_slice %535 {offsets = [0, 0], sizes = [2, 128], strides = [1, 1]} : vector<2x384xf32> to vector<2x128xf32>
    %538 = arith.addf %536, %537 : vector<2x128xf32>
    %539 = arith.negf %538 : vector<2x128xf32>
    %540 = math.exp %539 : vector<2x128xf32>
    %cst_190 = arith.constant 1.000000e+00 : f32
    %541 = vector.broadcast %cst_190 : f32 to vector<2x128xf32>
    %542 = arith.addf %541, %540 : vector<2x128xf32>
    %543 = arith.divf %541, %542 : vector<2x128xf32>
    %544 = vector.extract_strided_slice %530 {offsets = [0, 128], sizes = [2, 128], strides = [1, 1]} : vector<2x384xf32> to vector<2x128xf32>
    %545 = vector.extract_strided_slice %535 {offsets = [0, 128], sizes = [2, 128], strides = [1, 1]} : vector<2x384xf32> to vector<2x128xf32>
    %546 = arith.addf %544, %545 : vector<2x128xf32>
    %547 = arith.negf %546 : vector<2x128xf32>
    %548 = math.exp %547 : vector<2x128xf32>
    %cst_191 = arith.constant 1.000000e+00 : f32
    %549 = vector.broadcast %cst_191 : f32 to vector<2x128xf32>
    %550 = arith.addf %549, %548 : vector<2x128xf32>
    %551 = arith.divf %549, %550 : vector<2x128xf32>
    %552 = vector.extract_strided_slice %530 {offsets = [0, 256], sizes = [2, 128], strides = [1, 1]} : vector<2x384xf32> to vector<2x128xf32>
    %553 = vector.extract_strided_slice %535 {offsets = [0, 256], sizes = [2, 128], strides = [1, 1]} : vector<2x384xf32> to vector<2x128xf32>
    %554 = arith.mulf %543, %553 : vector<2x128xf32>
    %555 = arith.addf %552, %554 : vector<2x128xf32>
    %556 = math.tanh %555 : vector<2x128xf32>
    %cst_192 = arith.constant 1.000000e+00 : f32
    %557 = vector.broadcast %cst_192 : f32 to vector<2x128xf32>
    %558 = arith.subf %557, %551 : vector<2x128xf32>
    %559 = arith.mulf %558, %556 : vector<2x128xf32>
    %560 = arith.mulf %551, %486 : vector<2x128xf32>
    %561 = arith.addf %559, %560 : vector<2x128xf32>
    %c0_193 = arith.constant 0 : index
    %c0_194 = arith.constant 0 : index
    %562 = vector.load %arg4[%c0_193, %c0_194] : memref<128x384xf32, #tpu.memory_space<vmem>>, vector<128x384xf32>
    %cst_195 = arith.constant dense<0.000000e+00> : vector<2x384xf32>
    %563 = tpu.matmul %561, %562, %cst_195 {dimension_numbers = #tpu.dot_dimension_numbers<[1], [0], [0], [1], [0, 0, 1, 1], [], []>} : vector<2x128xf32>, vector<128x384xf32>, vector<2x384xf32> -> vector<2x384xf32>
    %c0_196 = arith.constant 0 : index
    %c0_197 = arith.constant 0 : index
    %564 = vector.load %arg5[%c0_196, %c0_197] : memref<1x384xf32, #tpu.memory_space<vmem>>, vector<1x384xf32>
    %565 = vector.broadcast %564 : vector<1x384xf32> to vector<2x384xf32>
    %566 = arith.addf %563, %565 : vector<2x384xf32>
    %c0_198 = arith.constant 0 : index
    %c0_199 = arith.constant 0 : index
    %567 = vector.load %arg6[%c0_198, %c0_199] : memref<128x384xf32, #tpu.memory_space<vmem>>, vector<128x384xf32>
    %c0_200 = arith.constant 0 : index
    %c0_201 = arith.constant 0 : index
    %568 = vector.load %arg7[%c0_200, %c0_201] : memref<1x384xf32, #tpu.memory_space<vmem>>, vector<1x384xf32>
    %cst_202 = arith.constant dense<0.000000e+00> : vector<2x384xf32>
    %569 = tpu.matmul %522, %567, %cst_202 {dimension_numbers = #tpu.dot_dimension_numbers<[1], [0], [0], [1], [0, 0, 1, 1], [], []>} : vector<2x128xf32>, vector<128x384xf32>, vector<2x384xf32> -> vector<2x384xf32>
    %570 = vector.broadcast %568 : vector<1x384xf32> to vector<2x384xf32>
    %571 = arith.addf %569, %570 : vector<2x384xf32>
    %572 = vector.extract_strided_slice %566 {offsets = [0, 0], sizes = [2, 128], strides = [1, 1]} : vector<2x384xf32> to vector<2x128xf32>
    %573 = vector.extract_strided_slice %571 {offsets = [0, 0], sizes = [2, 128], strides = [1, 1]} : vector<2x384xf32> to vector<2x128xf32>
    %574 = arith.addf %572, %573 : vector<2x128xf32>
    %575 = arith.negf %574 : vector<2x128xf32>
    %576 = math.exp %575 : vector<2x128xf32>
    %cst_203 = arith.constant 1.000000e+00 : f32
    %577 = vector.broadcast %cst_203 : f32 to vector<2x128xf32>
    %578 = arith.addf %577, %576 : vector<2x128xf32>
    %579 = arith.divf %577, %578 : vector<2x128xf32>
    %580 = vector.extract_strided_slice %566 {offsets = [0, 128], sizes = [2, 128], strides = [1, 1]} : vector<2x384xf32> to vector<2x128xf32>
    %581 = vector.extract_strided_slice %571 {offsets = [0, 128], sizes = [2, 128], strides = [1, 1]} : vector<2x384xf32> to vector<2x128xf32>
    %582 = arith.addf %580, %581 : vector<2x128xf32>
    %583 = arith.negf %582 : vector<2x128xf32>
    %584 = math.exp %583 : vector<2x128xf32>
    %cst_204 = arith.constant 1.000000e+00 : f32
    %585 = vector.broadcast %cst_204 : f32 to vector<2x128xf32>
    %586 = arith.addf %585, %584 : vector<2x128xf32>
    %587 = arith.divf %585, %586 : vector<2x128xf32>
    %588 = vector.extract_strided_slice %566 {offsets = [0, 256], sizes = [2, 128], strides = [1, 1]} : vector<2x384xf32> to vector<2x128xf32>
    %589 = vector.extract_strided_slice %571 {offsets = [0, 256], sizes = [2, 128], strides = [1, 1]} : vector<2x384xf32> to vector<2x128xf32>
    %590 = arith.mulf %579, %589 : vector<2x128xf32>
    %591 = arith.addf %588, %590 : vector<2x128xf32>
    %592 = math.tanh %591 : vector<2x128xf32>
    %cst_205 = arith.constant 1.000000e+00 : f32
    %593 = vector.broadcast %cst_205 : f32 to vector<2x128xf32>
    %594 = arith.subf %593, %587 : vector<2x128xf32>
    %595 = arith.mulf %594, %592 : vector<2x128xf32>
    %596 = arith.mulf %587, %522 : vector<2x128xf32>
    %597 = arith.addf %595, %596 : vector<2x128xf32>
    %598 = arith.index_cast %c7_i32 : i32 to index
    %c0_206 = arith.constant 0 : index
    %c0_207 = arith.constant 0 : index
    %599 = vector.load %arg8[%598, %c0_206, %c0_207] : memref<8x128x16xf32, #tpu.memory_space<vmem>>, vector<1x128x16xf32>
    %600 = vector.shape_cast %599 : vector<1x128x16xf32> to vector<128x16xf32>
    %cst_208 = arith.constant dense<0.000000e+00> : vector<2x16xf32>
    %601 = tpu.matmul %597, %600, %cst_208 {dimension_numbers = #tpu.dot_dimension_numbers<[1], [0], [0], [1], [0, 0, 1, 1], [], []>} : vector<2x128xf32>, vector<128x16xf32>, vector<2x16xf32> -> vector<2x16xf32>
    %602 = arith.addf %527, %601 : vector<2x16xf32>
    %c8_i32 = arith.constant 8 : i32
    %c0_209 = arith.constant 0 : index
    %c0_210 = arith.constant 0 : index
    %603 = vector.load %arg9[%c0_209, %c0_210] : memref<1x16xf32, #tpu.memory_space<vmem>>, vector<1x16xf32>
    %604 = vector.broadcast %603 : vector<1x16xf32> to vector<2x16xf32>
    %605 = arith.addf %602, %604 : vector<2x16xf32>
    %cst_211 = arith.constant 0.000000e+00 : f32
    %606 = vector.broadcast %cst_211 : f32 to vector<2x16xf32>
    %607 = arith.maximumf %605, %606 : vector<2x16xf32>
    %c0_212 = arith.constant 0 : index
    %c0_213 = arith.constant 0 : index
    %608 = vector.load %arg10[%c0_212, %c0_213] : memref<16x1xf32, #tpu.memory_space<vmem>>, vector<16x1xf32>
    %cst_214 = arith.constant dense<0.000000e+00> : vector<2x1xf32>
    %609 = tpu.matmul %607, %608, %cst_214 {dimension_numbers = #tpu.dot_dimension_numbers<[1], [0], [0], [1], [0, 0, 1, 1], [], []>} : vector<2x16xf32>, vector<16x1xf32>, vector<2x1xf32> -> vector<2x1xf32>
    %c0_215 = arith.constant 0 : index
    %c0_216 = arith.constant 0 : index
    %610 = vector.load %arg11[%c0_215, %c0_216] : memref<1x1xf32, #tpu.memory_space<vmem>>, vector<1x1xf32>
    %611 = vector.broadcast %610 : vector<1x1xf32> to vector<2x1xf32>
    %612 = arith.addf %609, %611 : vector<2x1xf32>
    %c0_217 = arith.constant 0 : index
    %c0_218 = arith.constant 0 : index
    %613 = vector.load %arg12[%c0_217, %c0_218] : memref<2x1xf32, #tpu.memory_space<vmem>>, vector<2x1xf32>
    tpu.vector_store %arg12[%c0_217, %c0_218], %612 {strides = array<i32>} : memref<2x1xf32, #tpu.memory_space<vmem>>, vector<2x1xf32>,
    return
  }
  func.func @transform_0(%arg0: i32) -> (i32, i32, i32) {
    %c0_i32 = arith.constant 0 : i32
    %c0_i32_0 = arith.constant 0 : i32
    %c0_i32_1 = arith.constant 0 : i32
    return %c0_i32, %arg0, %c0_i32_0 : i32, i32, i32
  }
  func.func @transform_1(%arg0: i32) -> (i32, i32) {
    %c0_i32 = arith.constant 0 : i32
    %c0_i32_0 = arith.constant 0 : i32
    %c0_i32_1 = arith.constant 0 : i32
    return %c0_i32, %c0_i32_0 : i32, i32
  }
  func.func @transform_2(%arg0: i32) -> (i32, i32) {
    %c0_i32 = arith.constant 0 : i32
    %c0_i32_0 = arith.constant 0 : i32
    %c0_i32_1 = arith.constant 0 : i32
    return %c0_i32, %c0_i32_0 : i32, i32
  }
  func.func @transform_3(%arg0: i32) -> (i32, i32) {
    %c0_i32 = arith.constant 0 : i32
    %c0_i32_0 = arith.constant 0 : i32
    %c0_i32_1 = arith.constant 0 : i32
    return %c0_i32, %c0_i32_0 : i32, i32
  }
  func.func @transform_4(%arg0: i32) -> (i32, i32) {
    %c0_i32 = arith.constant 0 : i32
    %c0_i32_0 = arith.constant 0 : i32
    %c0_i32_1 = arith.constant 0 : i32
    return %c0_i32, %c0_i32_0 : i32, i32
  }
  func.func @transform_5(%arg0: i32) -> (i32, i32) {
    %c0_i32 = arith.constant 0 : i32
    %c0_i32_0 = arith.constant 0 : i32
    %c0_i32_1 = arith.constant 0 : i32
    return %c0_i32, %c0_i32_0 : i32, i32
  }
  func.func @transform_6(%arg0: i32) -> (i32, i32) {
    %c0_i32 = arith.constant 0 : i32
    %c0_i32_0 = arith.constant 0 : i32
    %c0_i32_1 = arith.constant 0 : i32
    return %c0_i32, %c0_i32_0 : i32, i32
  }
  func.func @transform_7(%arg0: i32) -> (i32, i32, i32) {
    %c0_i32 = arith.constant 0 : i32
    %c0_i32_0 = arith.constant 0 : i32
    %c0_i32_1 = arith.constant 0 : i32
    %c0_i32_2 = arith.constant 0 : i32
    return %c0_i32, %c0_i32_0, %c0_i32_1 : i32, i32, i32
  }
  func.func @transform_8(%arg0: i32) -> (i32, i32) {
    %c0_i32 = arith.constant 0 : i32
    %c0_i32_0 = arith.constant 0 : i32
    %c0_i32_1 = arith.constant 0 : i32
    return %c0_i32, %c0_i32_0 : i32, i32
  }
  func.func @transform_9(%arg0: i32) -> (i32, i32) {
    %c0_i32 = arith.constant 0 : i32
    %c0_i32_0 = arith.constant 0 : i32
    %c0_i32_1 = arith.constant 0 : i32
    return %c0_i32, %c0_i32_0 : i32, i32
  }
  func.func @transform_10(%arg0: i32) -> (i32, i32) {
    %c0_i32 = arith.constant 0 : i32
    %c0_i32_0 = arith.constant 0 : i32
    %c0_i32_1 = arith.constant 0 : i32
    return %c0_i32, %c0_i32_0 : i32, i32
  }
  func.func @transform_11(%arg0: i32) -> (i32, i32) {
    %c0_i32 = arith.constant 0 : i32
    %c0_i32_0 = arith.constant 0 : i32
    return %arg0, %c0_i32 : i32, i32
  }
}

</mosaic_0001>

<bundles_post_ra>
// kernel: granger_forward.1
= control target key start
LH: loop header
LB: loop body
LE: loop exit
PB: predicated region body
PF: predicated region fallthrough
CT: control target
= control target key end

     0   :  { %v8196_v52 = vmov 0.0   ;;  %s8184_s1 = inlined_call_operand.vmem [shape: f32[128,384], index: 1, kind: input, shape index: {}]   ;;  %s8185_s3 = inlined_call_operand.vmem [shape: f32[128,384], index: 3, kind: input, shape index: {}]   ;;  %s8186_s5 = inlined_call_operand.vmem [shape: f32[128,384], index: 5, kind: input, shape index: {}]   ;;  %s8187_s2 = inlined_call_operand.vmem [shape: f32[1,384], index: 2, kind: input, shape index: {}]   ;;  %s8188_s0 = inlined_call_operand.vmem [shape: f32[8,2,384], index: 0, kind: input, shape index: {}]   ;;  %s8189_s6 = inlined_call_operand.vmem [shape: f32[1,384], index: 6, kind: input, shape index: {}]   ;;  %s8190_s7 = inlined_call_operand.vmem [shape: f32[8,128,16], index: 7, kind: input, shape index: {}]   ;;  %s8191_s4 = inlined_call_operand.vmem [shape: f32[1,384], index: 4, kind: input, shape index: {}]   ;;  %s8192_s8 = inlined_call_operand.vmem [shape: f32[1,16], index: 8, kind: input, shape index: {}]   ;;  %s8193_s9 = inlined_call_operand.vmem [shape: f32[16,1], index: 9, kind: input, shape index: {}]   ;;  %s8194_s10 = inlined_call_operand.<no memory space> [shape: f32[1,1], index: 10, kind: input, shape index: {}]   ;;  %s8195_s11 = inlined_call_operand.vmem [shape: f32[2,1], index: 11, kind: output, shape index: {}]  }
   0x1   :  { %v3618_v0 = vld [vmem:[%s8184_s1 + $0x168] sm:$0xff]  ;;  %v3623_v1 = vld [vmem:[%s8184_s1 + $0x170] sm:$0xff]  ;;  %v3635_v3 = vld [vmem:[%s8184_s1 + $0x158] sm:$0xff] }
   0x2   :  { %v3628_v2 = vld [vmem:[%s8184_s1 + $0x150] sm:$0xff]  ;;  %97 = vmatpush.msra.mxu0 %v3618_v0  ;;  %117 = vmatpush.msra.mxu1 %v3623_v1  ;;  %v3640_v4 = vld [vmem:[%s8184_s1 + $0x138] sm:$0xff]  ;;  %v3645_v5 = vld [vmem:[%s8184_s1 + $0x140] sm:$0xff] }
   0x3   :  { %v3652_v6 = vld [vmem:[%s8184_s1 + $0x120] sm:$0xff]  ;;  %v3657_v7 = vld [vmem:[%s8184_s1 + $0x128] sm:$0xff]  ;;  %v3669_v9 = vld [vmem:[%s8184_s1 + $0x110] sm:$0xff] }
   0x4   :  { %98 = vmatpush.msra.mxu0 %v3628_v2  ;;  %118 = vmatpush.msra.mxu1 %v3635_v3  ;;  %v3664_v8 = vld [vmem:[%s8184_s1 + $0x108] sm:$0xff]  ;;  %v3676_v10 = vld [vmem:[%s8184_s1 + $0xf0] sm:$0xff]  ;;  %v3681_v11 = vld [vmem:[%s8184_s1 + $0xf8] sm:$0xff] }
   0x5   :  { %v3686_v12 = vld [vmem:[%s8184_s1 + $0x178] sm:$0xff]  ;;  %v3693_v13 = vld [vmem:[%s8184_s1 + $0x160] sm:$0xff]  ;;  %v3711_v16 = vld [vmem:[%s8184_s1 + $0x148] sm:$0xff] }
   0x6   :  { %99 = vmatpush.msra.mxu0 %v3640_v4  ;;  %119 = vmatpush.msra.mxu1 %v3645_v5  ;;  %v3698_v14 = vld [vmem:[%s8184_s1 + $0xd8] sm:$0xff]  ;;  %v3703_v15 = vld [vmem:[%s8184_s1 + $0xe0] sm:$0xff]  ;;  %v3721_v18 = vld [vmem:[%s8184_s1 + $0xc8] sm:$0xff] }
   0x7   :  { %137 = vmatpush.msra.mxu2 %v3686_v12  ;;  %v3716_v17 = vld [vmem:[%s8184_s1 + $0xc0] sm:$0xff]  ;;  %v3729_v19 = vld [vmem:[%s8184_s1 + $0x130] sm:$0xff]  ;;  %v3734_v20 = vld [vmem:[%s8184_s1 + $0xa8] sm:$0xff] }
   0x8   :  { %100 = vmatpush.msra.mxu0 %v3652_v6  ;;  %120 = vmatpush.msra.mxu1 %v3657_v7  ;;  %v3739_v21 = vld [vmem:[%s8184_s1 + $0xb0] sm:$0xff]  ;;  %v3747_v22 = vld [vmem:[%s8184_s1 + $0x118] sm:$0xff]  ;;  %v3763_v25 = vld [vmem:[%s8185_s3 + $0x168] sm:$0xff] }
   0x9   :  { %138 = vmatpush.msra.mxu2 %v3693_v13  ;;  %v3752_v23 = vld [vmem:[%s8184_s1 + $0x90] sm:$0xff]  ;;  %v3757_v24 = vld [vmem:[%s8184_s1 + $0x98] sm:$0xff]  ;;  %v3770_v26 = vld [vmem:[%s8184_s1 + $0x100] sm:$0xff]  ;;  %265 = vmatpush.msra.mxu3 %v3763_v25 }
   0xa   :  { %101 = vmatpush.msra.mxu0 %v3664_v8  ;;  %121 = vmatpush.msra.mxu1 %v3669_v9  ;;  %v3775_v27 = vld [vmem:[%s8185_s3 + $0x150] sm:$0xff]  ;;  %v3780_v28 = vld [vmem:[%s8184_s1 + $0x78] sm:$0xff]  ;;  %v3785_v29 = vld [vmem:[%s8184_s1 + $0x80] sm:$0xff] }
   0xb   :  { %139 = vmatpush.msra.mxu2 %v3711_v16  ;;  %v3794_v30 = vld [vmem:[%s8184_s1 + $0xe8] sm:$0xff]  ;;  %v3799_v31 = vld [vmem:[%s8185_s3 + $0x138] sm:$0xff]  ;;  %v3804_v32 = vld [vmem:[%s8184_s1 + $0x60] sm:$0xff]  ;;  %266 = vmatpush.msra.mxu3 %v3775_v27 }
   0xc   :  { %102 = vmatpush.msra.mxu0 %v3676_v10  ;;  %122 = vmatpush.msra.mxu1 %v3681_v11  ;;  %8459 = vst [vmem:[#allocation3_spill] sm:$0xff] %v3794_v30  ;;  %v3809_v33 = vld [vmem:[%s8184_s1 + $0x68] sm:$0xff]  ;;  %v3818_v34 = vld [vmem:[%s8184_s1 + $0xd0] sm:$0xff]  ;;  %v3823_v35 = vld [vmem:[%s8185_s3 + $0x120] sm:$0xff] }
   0xd   :  { %140 = vmatpush.msra.mxu2 %v3729_v19  ;;  %8460 = vst [vmem:[#allocation4_spill] sm:$0xff] %v3799_v31  ;;  %v3828_v36 = vld [vmem:[%s8184_s1 + $0x48] sm:$0xff]  ;;  %v3833_v37 = vld [vmem:[%s8184_s1 + $0x50] sm:$0xff]  ;;  %267 = vmatpush.msra.mxu3 %v3799_v31  ;;  %v3842_v38 = vld [vmem:[%s8184_s1 + $0xb8] sm:$0xff] }
   0xe   :  { %103 = vmatpush.msra.mxu0 %v3698_v14  ;;  %123 = vmatpush.msra.mxu1 %v3703_v15  ;;  %8461 = vst [vmem:[#allocation5_spill] sm:$0xff] %v3818_v34  ;;  %v3847_v39 = vld [vmem:[%s8185_s3 + $0x108] sm:$0xff]  ;;  %v3852_v40 = vld [vmem:[%s8184_s1 + $0x30] sm:$0xff]  ;;  %v3857_v41 = vld [vmem:[%s8184_s1 + $0x38] sm:$0xff] }
   0xf   :  { %141 = vmatpush.msra.mxu2 %v3747_v22  ;;  %8462 = vst [vmem:[#allocation6_spill] sm:$0xff] %v3823_v35  ;;  %268 = vmatpush.msra.mxu3 %v3823_v35  ;;  %v3866_v42 = vld [vmem:[%s8184_s1 + $0xa0] sm:$0xff]  ;;  %v3871_v43 = vld [vmem:[%s8185_s3 + $0xf0] sm:$0xff]  ;;  %v3876_v44 = vld [vmem:[%s8184_s1 + $0x18] sm:$0xff] }
  0x10   :  { %104 = vmatpush.msra.mxu0 %v3716_v17  ;;  %124 = vmatpush.msra.mxu1 %v3721_v18  ;;  %8463 = vst [vmem:[#allocation7_spill] sm:$0xff] %v3842_v38  ;;  %v3881_v45 = vld [vmem:[%s8184_s1 + $0x20] sm:$0xff]  ;;  %v3890_v46 = vld [vmem:[%s8184_s1 + $0x88] sm:$0xff]  ;;  %v3895_v47 = vld [vmem:[%s8185_s3 + $0xd8] sm:$0xff] }
  0x11   :  { %142 = vmatpush.msra.mxu2 %v3770_v26  ;;  %8464 = vst [vmem:[#allocation8_spill] sm:$0xff] %v3847_v39  ;;  %269 = vmatpush.msra.mxu3 %v3847_v39  ;;  %v3900_v48 = vld [vmem:[%s8184_s1] sm:$0xff]  ;;  %v3905_v49 = vld [vmem:[%s8184_s1 + $0x8] sm:$0xff]  ;;  %v3915_v50 = vld [vmem:[%s8184_s1 + $0x70] sm:$0xff] }
  0x12   :  { %105 = vmatpush.msra.mxu0 %v3734_v20  ;;  %125 = vmatpush.msra.mxu1 %v3739_v21  ;;  %8465 = vst [vmem:[#allocation9_spill] sm:$0xff] %v3866_v42  ;;  %v3920_v51 = vld [vmem:[%s8185_s3 + $0x178] sm:$0xff]  ;;  %v3935_v54 = vld [vmem:[%s8185_s3 + $0x160] sm:$0xff]  ;;  %v3947_v56 = vld [vmem:[%s8185_s3 + $0x148] sm:$0xff] }
  0x13   :  { %143 = vmatpush.msra.mxu2 %v3794_v30  ;;  %8466 = vst [vmem:[#allocation10_spill] sm:$0xff] %v3871_v43  ;;  %270 = vmatpush.msra.mxu3 %v3871_v43  ;;  %v3930_v53 = vld [vmem:[%s8184_s1 + $0x58] sm:$0xff]  ;;  %v3942_v55 = vld [vmem:[%s8184_s1 + $0x40] sm:$0xff]  ;;  %v3954_v57 = vld [vmem:[%s8184_s1 + $0x28] sm:$0xff] }
  0x14   :  { %106 = vmatpush.msra.mxu0 %v3752_v23  ;;  %126 = vmatpush.msra.mxu1 %v3757_v24  ;;  %8467 = vst [vmem:[#allocation11_spill] sm:$0xff] %v3890_v46  ;;  %v3961_v58 = vld [vmem:[%s8184_s1 + $0x10] sm:$0xff]  ;;  %v3967_v59 = vld [vmem:[%s8186_s5 + $0x168] sm:$0xff]  ;;  %v3980_v61 = vld [vmem:[%s8186_s5 + $0x138] sm:$0xff] }
  0x15   :  { %144 = vmatpush.msra.mxu2 %v3818_v34  ;;  %8468 = vst [vmem:[#allocation12_spill] sm:$0xff] %v3895_v47  ;;  %271 = vmatpush.msra.mxu3 %v3895_v47  ;;  %v3974_v60 = vld [vmem:[%s8186_s5 + $0x150] sm:$0xff]  ;;  %v3986_v62 = vld [vmem:[%s8186_s5 + $0x120] sm:$0xff]  ;;  %v3992_v63 = vld [vmem:[%s8186_s5 + $0x108] sm:$0xff] }
  0x16   :  { %107 = vmatpush.msra.mxu0 %v3780_v28  ;;  %127 = vmatpush.msra.mxu1 %v3785_v29  ;;  %8469 = vst [vmem:[#allocation13_spill] sm:$0xff] %v3915_v50  ;;  %v4165_v47 = vld [vmem:[%s8186_s5] sm:$0xff]  ;;  %v4253_v39 = vld [vmem:[%s8186_s5 + $0x110] sm:$0xff] }
  0x17   :  { %145 = vmatpush.msra.mxu2 %v3842_v38  ;;  %8470 = vst [vmem:[#allocation14_spill] sm:$0xff] %v3930_v53  ;;  %v4215_v43 = vld [vmem:[%s8186_s5 + $0x140] sm:$0xff]  ;;  %v4234_v38 = vld [vmem:[%s8186_s5 + $0x128] sm:$0xff]  ;;  %v4328_v31 = vld [vmem:[%s8186_s5 + $0xb0] sm:$0xff] }
  0x18   :  { %108 = vmatpush.msra.mxu0 %v3804_v32  ;;  %128 = vmatpush.msra.mxu1 %v3809_v33  ;;  %8471 = vst [vmem:[#allocation15_spill] sm:$0xff] %v3942_v55  ;;  %v4258_v34 = vld [vmem:[%s8187_s2] sm:$0x7] }
  0x19   :  { %146 = vmatpush.msra.mxu2 %v3866_v42  ;;  %8472 = vst [vmem:[#allocation16_spill] sm:$0xff] %v3954_v57  ;;  %v4191_v42 = vld [vmem:[%s8185_s3 + $0x158] sm:$0xff]  ;;  %v4277_v35 = vld [vmem:[%s8188_s0] sm:$0x3f]  ;;  %v4292_v30 = vperm.slane %v4258_v34, 0 }
  0x1a   :  { %109 = vmatpush.msra.mxu0 %v3828_v36  ;;  %129 = vmatpush.msra.mxu1 %v3833_v37  ;;  %8473 = vst [vmem:[#allocation17_spill] sm:$0xff] %v3961_v58 }
  0x1b   :  { %147 = vmatpush.msra.mxu2 %v3890_v46  ;;  %8474 = vst [vmem:[#allocation18_spill] sm:$0xff] %v3967_v59  ;;  %v4147_v46 = vld [vmem:[%s8186_s5 + $0x18] sm:$0xff] }
  0x1c   :  { %110 = vmatpush.msra.mxu0 %v3852_v40  ;;  %130 = vmatpush.msra.mxu1 %v3857_v41  ;;  %8475 = vst [vmem:[#allocation19_spill] sm:$0xff] %v3974_v60 }
  0x1d   :  { %148 = vmatpush.msra.mxu2 %v3915_v50  ;;  %8476 = vst [vmem:[#allocation20_spill] sm:$0xff] %v3980_v61  ;;  %v4111_v50 = vld [vmem:[%s8186_s5 + $0x48] sm:$0xff] }
  0x1e   :  { %111 = vmatpush.msra.mxu0 %v3876_v44  ;;  %131 = vmatpush.msra.mxu1 %v3881_v45  ;;  %8477 = vst [vmem:[#allocation21_spill] sm:$0xff] %v3986_v62 }
  0x1f   :  { %149 = vmatpush.msra.mxu2 %v3930_v53  ;;  %8478 = vst [vmem:[#allocation22_spill] sm:$0xff] %v3992_v63  ;;  %v4075_v53 = vld [vmem:[%s8186_s5 + $0x78] sm:$0xff] }
  0x20   :  { %112 = vmatpush.msra.mxu0 %v3900_v48  ;;  %132 = vmatpush.msra.mxu1 %v3905_v49  ;;  %8488 = vst [vmem:[#allocation32_spill] sm:$0xff] %v4075_v53 }
  0x21   :  { %113 = vmatmul.f32.vlgmr.msra.gmra.mxu0 %v8196_v52  ;;  %133 = vmatmul.f32.vlgmr.msra.gmra.mxu1 %v8196_v52  ;;  %8492 = vst [vmem:[#allocation36_spill] sm:$0xff] %v4111_v50 }
  0x22   :  { %305 = vmatpush.msrb.mxu1 %v3920_v51  ;;  %150 = vmatpush.msra.mxu2 %v3942_v55  ;;  %v4070_v55 = vld [vmem:[%s8185_s3 + $0xe8] sm:$0xff]  ;;  %8496 = vst [vmem:[#allocation40_spill] sm:$0xff] %v4147_v46 }
  0x23   :  { %8498 = vst [vmem:[#allocation42_spill] sm:$0xff] %v4165_v47 }
  0x24   :  { %306 = vmatpush.msrb.mxu1 %v3935_v54  ;;  %151 = vmatpush.msra.mxu2 %v3954_v57  ;;  %v4057_v57 = vld [vmem:[%s8186_s5 + $0x90] sm:$0xff]  ;;  %8501 = vst [vmem:[#allocation45_spill] sm:$0xff] %v4215_v43 }
  0x25   :  { %8486 = vst [vmem:[#allocation30_spill] sm:$0xff] %v4057_v57 }
  0x26   :  { %307 = vmatpush.msrb.mxu1 %v3947_v56  ;;  %152 = vmatpush.msra.mxu2 %v3961_v58  ;;  %v4052_v58 = vld [vmem:[%s8185_s3 + $0x100] sm:$0xff]  ;;  %8502 = vst [vmem:[#allocation46_spill] sm:$0xff] %v4234_v38 }
  0x27   :  { %153 = vmatmul.f32.vlgmr.msra.gmra.mxu2 %v8196_v52  ;;  %v3998_v52 = vld [vmem:[%s8186_s5 + $0xf0] sm:$0xff]  ;;  %8504 = vst [vmem:[#allocation48_spill] sm:$0xff] %v4253_v39 }
  0x28   :  { %381 = vmatpush.msrb.mxu2 %v3967_v59  ;;  %8479 = vst [vmem:[#allocation23_spill] sm:$0xff] %v3998_v52  ;;  %v4039_v59 = vld [vmem:[%s8186_s5 + $0xa8] sm:$0xff] }
  0x29   :  { %8484 = vst [vmem:[#allocation28_spill] sm:$0xff] %v4039_v59 }
  0x2a   :  { %382 = vmatpush.msrb.mxu2 %v3974_v60  ;;  %v4004_v60 = vld [vmem:[%s8186_s5 + $0xd8] sm:$0xff]  ;;  %8509 = vst [vmem:[#allocation53_spill] sm:$0xff] %v4292_v30 }
  0x2b   :  { %8480 = vst [vmem:[#allocation24_spill] sm:$0xff] %v4004_v60 }
  0x2c   :  { %383 = vmatpush.msrb.mxu2 %v3980_v61  ;;  %v4016_v61 = vld [vmem:[%s8185_s3 + $0x130] sm:$0xff] }
  0x2d   :  { %308 = vmatpush.msrb.mxu1 %v4016_v61 }
  0x2e   :  { %384 = vmatpush.msrb.mxu2 %v3986_v62  ;;  %v4011_v62 = vld [vmem:[%s8185_s3 + $0xc0] sm:$0xff] }
  0x2f   :  { %8481 = vst [vmem:[#allocation25_spill] sm:$0xff] %v4011_v62  ;;  %272 = vmatpush.msra.mxu3 %v4011_v62  ;;  %v4129_v62 = vld [vmem:[%s8186_s5 + $0x30] sm:$0xff] }
  0x30   :  { %385 = vmatpush.msrb.mxu2 %v3992_v63  ;;  %v4021_v63 = vld [vmem:[%s8186_s5 + $0xc0] sm:$0xff]  ;;  %8494 = vst [vmem:[#allocation38_spill] sm:$0xff] %v4129_v62 }
  0x31   :  { %8482 = vst [vmem:[#allocation26_spill] sm:$0xff] %v4021_v63 }
  0x32   :  { %386 = vmatpush.msrb.mxu2 %v3998_v52  ;;  %v4034_v52 = vld [vmem:[%s8185_s3 + $0x118] sm:$0xff] }
  0x33   :  { %309 = vmatpush.msrb.mxu1 %v4034_v52 }
  0x34   :  { %387 = vmatpush.msrb.mxu2 %v4004_v60  ;;  %v4029_v60 = vld [vmem:[%s8185_s3 + $0xa8] sm:$0xff] }
  0x35   :  { %8483 = vst [vmem:[#allocation27_spill] sm:$0xff] %v4029_v60  ;;  %273 = vmatpush.msra.mxu3 %v4029_v60  ;;  %310 = vmatpush.msrb.mxu1 %v4052_v58  ;;  %v4093_v60 = vld [vmem:[%s8186_s5 + $0x60] sm:$0xff] }
  0x36   :  { %388 = vmatpush.msrb.mxu2 %v4021_v63  ;;  %v4047_v63 = vld [vmem:[%s8185_s3 + $0x90] sm:$0xff]  ;;  %8490 = vst [vmem:[#allocation34_spill] sm:$0xff] %v4093_v60 }
  0x37   :  { %8485 = vst [vmem:[#allocation29_spill] sm:$0xff] %v4047_v63  ;;  %274 = vmatpush.msra.mxu3 %v4047_v63  ;;  %311 = vmatpush.msrb.mxu1 %v4070_v55  ;;  %v4088_v63 = vld [vmem:[%s8185_s3 + $0xd0] sm:$0xff] }
  0x38   :  { %389 = vmatpush.msrb.mxu2 %v4039_v59  ;;  %v4065_v59 = vld [vmem:[%s8185_s3 + $0x78] sm:$0xff] }
  0x39   :  { %8487 = vst [vmem:[#allocation31_spill] sm:$0xff] %v4065_v59  ;;  %275 = vmatpush.msra.mxu3 %v4065_v59  ;;  %312 = vmatpush.msrb.mxu1 %v4088_v63  ;;  %v4106_v59 = vld [vmem:[%s8185_s3 + $0xb8] sm:$0xff] }
  0x3a   :  { %390 = vmatpush.msrb.mxu2 %v4057_v57  ;;  %v4083_v57 = vld [vmem:[%s8185_s3 + $0x60] sm:$0xff] }
  0x3b   :  { %8489 = vst [vmem:[#allocation33_spill] sm:$0xff] %v4083_v57  ;;  %276 = vmatpush.msra.mxu3 %v4083_v57  ;;  %313 = vmatpush.msrb.mxu1 %v4106_v59  ;;  %v4124_v57 = vld [vmem:[%s8185_s3 + $0xa0] sm:$0xff] }
  0x3c   :  { %391 = vmatpush.msrb.mxu2 %v4075_v53  ;;  %v4101_v53 = vld [vmem:[%s8185_s3 + $0x48] sm:$0xff] }
  0x3d   :  { %8491 = vst [vmem:[#allocation35_spill] sm:$0xff] %v4101_v53  ;;  %277 = vmatpush.msra.mxu3 %v4101_v53  ;;  %314 = vmatpush.msrb.mxu1 %v4124_v57  ;;  %v4142_v53 = vld [vmem:[%s8185_s3 + $0x88] sm:$0xff] }
  0x3e   :  { %392 = vmatpush.msrb.mxu2 %v4093_v60  ;;  %v4119_v60 = vld [vmem:[%s8185_s3 + $0x30] sm:$0xff] }
  0x3f   :  { %8493 = vst [vmem:[#allocation37_spill] sm:$0xff] %v4119_v60  ;;  %278 = vmatpush.msra.mxu3 %v4119_v60  ;;  %315 = vmatpush.msrb.mxu1 %v4142_v53  ;;  %v4160_v60 = vld [vmem:[%s8185_s3 + $0x70] sm:$0xff] }
  0x40   :  { %393 = vmatpush.msrb.mxu2 %v4111_v50  ;;  %v4137_v50 = vld [vmem:[%s8185_s3 + $0x18] sm:$0xff] }
  0x41   :  { %8495 = vst [vmem:[#allocation39_spill] sm:$0xff] %v4137_v50  ;;  %279 = vmatpush.msra.mxu3 %v4137_v50  ;;  %316 = vmatpush.msrb.mxu1 %v4160_v60  ;;  %v4177_v50 = vld [vmem:[%s8186_s5 + $0x170] sm:$0xff] }
  0x42   :  { %394 = vmatpush.msrb.mxu2 %v4129_v62  ;;  %v4155_v62 = vld [vmem:[%s8185_s3] sm:$0xff]  ;;  %8499 = vst [vmem:[#allocation43_spill] sm:$0xff] %v4177_v50 }
  0x43   :  { %8497 = vst [vmem:[#allocation41_spill] sm:$0xff] %v4155_v62  ;;  %280 = vmatpush.msra.mxu3 %v4155_v62  ;;  %v4184_v62 = vld [vmem:[%s8185_s3 + $0x58] sm:$0xff] }
  0x44   :  { %395 = vmatpush.msrb.mxu2 %v4147_v46  ;;  %v4172_v46 = vld [vmem:[%s8185_s3 + $0x170] sm:$0xff]  ;;  %317 = vmatpush.msrb.mxu1 %v4184_v62 }
  0x45   :  { %285 = vmatpush.msrb.mxu0 %v4172_v46  ;;  %401 = vmatpush.msrb.mxu3 %v4177_v50  ;;  %v4203_v50 = vld [vmem:[%s8185_s3 + $0x40] sm:$0xff] }
  0x46   :  { %396 = vmatpush.msrb.mxu2 %v4165_v47  ;;  %v4196_v47 = vld [vmem:[%s8186_s5 + $0x158] sm:$0xff]  ;;  %318 = vmatpush.msrb.mxu1 %v4203_v50 }
  0x47   :  { %8500 = vst [vmem:[#allocation44_spill] sm:$0xff] %v4196_v47  ;;  %286 = vmatpush.msrb.mxu0 %v4191_v42  ;;  %402 = vmatpush.msrb.mxu3 %v4196_v47  ;;  %v4222_v47 = vld [vmem:[%s8185_s3 + $0x28] sm:$0xff] }
  0x48   :  { %526 = vmatpush.msra.mxu2 %v3623_v1  ;;  %v4210_v1 = vld [vmem:[%s8185_s3 + $0x140] sm:$0xff]  ;;  %319 = vmatpush.msrb.mxu1 %v4222_v47 }
  0x49   :  { %287 = vmatpush.msrb.mxu0 %v4210_v1  ;;  %403 = vmatpush.msrb.mxu3 %v4215_v43  ;;  %v4241_v43 = vld [vmem:[%s8185_s3 + $0x10] sm:$0xff] }
  0x4a   :  { %527 = vmatpush.msra.mxu2 %v3635_v3  ;;  %v4229_v3 = vld [vmem:[%s8185_s3 + $0x128] sm:$0xff]  ;;  %320 = vmatpush.msrb.mxu1 %v4241_v43 }
  0x4b   :  { %288 = vmatpush.msrb.mxu0 %v4229_v3  ;;  %404 = vmatpush.msrb.mxu3 %v4234_v38  ;;  %v4272_v38 = vld [vmem:[%s8186_s5 + $0xf8] sm:$0xff] }
  0x4c   :  { %528 = vmatpush.msra.mxu2 %v3645_v5  ;;  %v4248_v5 = vld [vmem:[%s8185_s3 + $0x110] sm:$0xff]  ;;  %506 = vmatpush.msra.mxu1 %v3618_v0  ;;  %8506 = vst [vmem:[#allocation50_spill] sm:$0xff] %v4272_v38  ;;  %v4284_v0 = vld [vmem:[%s8185_s3 + $0xe0] sm:$0xff] }
  0x4d   :  { %8503 = vst [vmem:[#allocation47_spill] sm:$0xff] %v4248_v5  ;;  %289 = vmatpush.msrb.mxu0 %v4248_v5  ;;  %405 = vmatpush.msrb.mxu3 %v4253_v39  ;;  %v4289_v39 = vld [vmem:[%s8186_s5 + $0xe0] sm:$0xff]  ;;  %v4295_v5 = vperm.slane %v4258_v34, 1 }
  0x4e   :  { %529 = vmatpush.msra.mxu2 %v3657_v7  ;;  %v4267_v7 = vld [vmem:[%s8185_s3 + $0xf8] sm:$0xff]  ;;  %8507 = vst [vmem:[#allocation51_spill] sm:$0xff] %v4284_v0  ;;  %507 = vmatpush.msra.mxu1 %v3628_v2 }
  0x4f   :  { %8505 = vst [vmem:[#allocation49_spill] sm:$0xff] %v4267_v7  ;;  %290 = vmatpush.msrb.mxu0 %v4267_v7  ;;  %406 = vmatpush.msrb.mxu3 %v4272_v38  ;;  %v4307_v7 = vld [vmem:[%s8185_s3 + $0xc8] sm:$0xff] }
  0x50   :  { %530 = vmatpush.msra.mxu2 %v3669_v9  ;;  %8508 = vst [vmem:[#allocation52_spill] sm:$0xff] %v4289_v39  ;;  %v178_v9 = vrot.slane %v4277_v35, 2  ;;  %508 = vmatpush.msra.mxu1 %v3640_v4  ;;  %v4312_v38 = vld [vmem:[%s8186_s5 + $0xc8] sm:$0xff] }
  0x51   :  { %8510 = vst [vmem:[#allocation54_spill] sm:$0xff] %v4295_v5  ;;  %291 = vmatpush.msrb.mxu0 %v4284_v0  ;;  %407 = vmatpush.msrb.mxu3 %v4289_v39  ;;  %v4323_v0 = vld [vmem:[%s8185_s3 + $0xb0] sm:$0xff] }
  0x52   :  { %531 = vmatpush.msra.mxu2 %v3681_v11  ;;  %509 = vmatpush.msra.mxu1 %v3652_v6  ;;  %v4338_v6 = vld [vmem:[%s8185_s3 + $0x98] sm:$0xff] }
  0x53   :  { %292 = vmatpush.msrb.mxu0 %v4307_v7  ;;  %408 = vmatpush.msrb.mxu3 %v4312_v38 }
  0x54   :  { %532 = vmatpush.msra.mxu2 %v3703_v15  ;;  %510 = vmatpush.msra.mxu1 %v3664_v8  ;;  %v4352_v8 = vld [vmem:[%s8185_s3 + $0x80] sm:$0xff] }
  0x55   :  { %293 = vmatpush.msrb.mxu0 %v4323_v0  ;;  %409 = vmatpush.msrb.mxu3 %v4328_v31 }
  0x56   :  { %533 = vmatpush.msra.mxu2 %v3721_v18  ;;  %511 = vmatpush.msra.mxu1 %v3676_v10  ;;  %v4366_v10 = vld [vmem:[%s8185_s3 + $0x68] sm:$0xff] }
  0x57   :  { %294 = vmatpush.msrb.mxu0 %v4338_v6 }
  0x58   :  { %534 = vmatpush.msra.mxu2 %v3739_v21  ;;  %512 = vmatpush.msra.mxu1 %v3698_v14  ;;  %v4371_v21 = vld [vmem:[%s8186_s5 + $0x68] sm:$0xff]  ;;  %v4380_v14 = vld [vmem:[%s8185_s3 + $0x50] sm:$0xff] }
  0x59   :  { %295 = vmatpush.msrb.mxu0 %v4352_v8 }
  0x5a   :  { %535 = vmatpush.msra.mxu2 %v3757_v24  ;;  %513 = vmatpush.msra.mxu1 %v3716_v17  ;;  %v4385_v24 = vld [vmem:[%s8186_s5 + $0x50] sm:$0xff]  ;;  %v4394_v17 = vld [vmem:[%s8185_s3 + $0x38] sm:$0xff] }
  0x5b   :  { %296 = vmatpush.msrb.mxu0 %v4366_v10 }
  0x5c   :  { %536 = vmatpush.msra.mxu2 %v3785_v29  ;;  %v8511_v29 = vmov 0.0   ;;  %514 = vmatpush.msra.mxu1 %v3734_v20  ;;  %v4420_v20 = vld [vmem:[%s8185_s3 + $0x8] sm:$0xff] }
  0x5d   :  { %297 = vmatpush.msrb.mxu0 %v4380_v14  ;;  %397 = vmatmul.f32.vlgmr.msrb.gmra.mxu2 %v8511_v29 }
  0x5e   :  { %537 = vmatpush.msra.mxu2 %v3809_v33  ;;  %515 = vmatpush.msra.mxu1 %v3752_v23 }
  0x5f   :  { %298 = vmatpush.msrb.mxu0 %v4394_v17 }
  0x60   :  { %538 = vmatpush.msra.mxu2 %v3833_v37  ;;  %v4425_v37 = vld [vmem:[%s8186_s5 + $0x8] sm:$0xff]  ;;  %516 = vmatpush.msra.mxu1 %v3780_v28  ;;  %v4445_v28 = vld [vmem:[%s8186_s5 + $0x178] sm:$0xff] }
  0x62   :  { %539 = vmatpush.msra.mxu2 %v3857_v41  ;;  %517 = vmatpush.msra.mxu1 %v3804_v32 }
  0x64   :  { %540 = vmatpush.msra.mxu2 %v3881_v45  ;;  %518 = vmatpush.msra.mxu1 %v3828_v36  ;;  %v4454_v36 = vld [vmem:[%s8186_s5 + $0x160] sm:$0xff] }
  0x66   :  { %541 = vmatpush.msra.mxu2 %v3905_v49  ;;  %519 = vmatpush.msra.mxu1 %v3852_v40  ;;  %v4457_v40 = vperm.slane %v4258_v34, 2 }
  0x68   :  { %658 = vmatpush.msrb.mxu2 %v3920_v51  ;;  %520 = vmatpush.msra.mxu1 %v3876_v44  ;;  %8512 = vst [vmem:[#allocation55_spill] sm:$0xff] %v4457_v40  ;;  %v4465_v44 = vld [vmem:[%s8186_s5 + $0x148] sm:$0xff] }
  0x6a   :  { %659 = vmatpush.msrb.mxu2 %v3935_v54  ;;  %521 = vmatpush.msra.mxu1 %v3900_v48 }
  0x6c   :  { %660 = vmatpush.msrb.mxu2 %v3947_v56 }
  0x6e   :  { %661 = vmatpush.msrb.mxu2 %v4016_v61  ;;  %v4472_v61 = vld [vmem:[%s8186_s5 + $0x130] sm:$0xff] }
  0x70   :  { %662 = vmatpush.msrb.mxu2 %v4034_v52  ;;  %v4480_v52 = vld [vmem:[%s8186_s5 + $0x118] sm:$0xff] }
  0x72   :  { %663 = vmatpush.msrb.mxu2 %v4052_v58 }
  0x74   :  { %664 = vmatpush.msrb.mxu2 %v4070_v55  ;;  %v4498_v55 = vld [vmem:[%s8186_s5 + $0xe8] sm:$0xff] }
  0x76   :  { %665 = vmatpush.msrb.mxu2 %v4088_v63 }
  0x78   :  { %666 = vmatpush.msrb.mxu2 %v4106_v59  ;;  %v4519_v59 = vld [vmem:[%s8186_s5 + $0xa0] sm:$0xff] }
  0x7a   :  { %667 = vmatpush.msrb.mxu2 %v4124_v57 }
  0x7c   :  { %668 = vmatpush.msrb.mxu2 %v4142_v53 }
  0x7e   :  { %669 = vmatpush.msrb.mxu2 %v4160_v60 }
  0x80   :  { %670 = vmatpush.msrb.mxu2 %v4184_v62  ;;  %v4551_v62 = vld [vmem:[%s8186_s5 + $0x40] sm:$0xff] }
  0x82   :  { %671 = vmatpush.msrb.mxu2 %v4203_v50  ;;  %v4558_v50 = vld [vmem:[%s8186_s5 + $0x28] sm:$0xff] }
  0x84   :  { %672 = vmatpush.msrb.mxu2 %v4222_v47  ;;  %v4565_v47 = vld [vmem:[%s8186_s5 + $0x10] sm:$0xff] }
  0x86   :  { %673 = vmatpush.msrb.mxu2 %v4241_v43  ;;  %v8519_v43 = vld [vmem:[#allocation8_spill] sm:$0xff] }
  0x9e   :  { %v114_v2 = vpop.f32.mrf.mxu0  ;;  %v134_v11 = vpop.f32.mrf.mxu1 }
  0x9f   :  { %v115_v39 = vadd.f32 %v114_v2, %v4292_v30  ;;  %v135_v4 = vadd.f32 %v134_v11, %v4295_v5  ;;  %v4343_v11 = vld [vmem:[%s8186_s5 + $0x98] sm:$0xff] }
  0xa0   :  { %410 = vmatpush.msrb.mxu3 %v4343_v11 }
  0xa1   :  { %v157_v15 = vadd.f32 %v115_v39, %v4277_v35  ;;  %v180_v2 = vadd.f32 %v178_v9, %v135_v4  ;;  %v4357_v9 = vld [vmem:[%s8186_s5 + $0x80] sm:$0xff]  ;;  %v4399_v4 = vld [vmem:[%s8186_s5 + $0x38] sm:$0xff] }
  0xa2   :  { %411 = vmatpush.msrb.mxu3 %v4357_v9 }
  0xa3   :  { %v2798_v18 = vmul.f32 -1.442695, %v157_v15  ;;  %v2799_v39 = vmul.f32 -1.442695, %v180_v2  ;;  %v4408_v15 = vld [vmem:[%s8185_s3 + $0x20] sm:$0xff] }
  0xa4   :  { %412 = vmatpush.msrb.mxu3 %v4371_v21  ;;  %v4413_v2 = vld [vmem:[%s8186_s5 + $0x20] sm:$0xff]  ;;  %299 = vmatpush.msrb.mxu0 %v4408_v15 }
  0xa5   :  { %2953 = vpow2.f32 %v2798_v18 }
  0xa6   :  { %2955 = vpow2.f32 %v2799_v39  ;;  %413 = vmatpush.msrb.mxu3 %v4385_v24  ;;  %300 = vmatpush.msrb.mxu0 %v4420_v20 }
  0xa8   :  { %414 = vmatpush.msrb.mxu3 %v4399_v4  ;;  %421 = vmatpush.msra.mxu0 %v4445_v28 }
  0xaa   :  { %415 = vmatpush.msrb.mxu3 %v4413_v2  ;;  %422 = vmatpush.msra.mxu0 %v4454_v36  ;;  %v154_v54 = vpop.f32.mrf.mxu2 }
  0xab   :  { %v2954_v33 = vpop.eup %2953  ;;  %v155_v48 = vadd.f32 %v154_v54, %v4457_v40  ;;  %v4489_v54 = vld [vmem:[%s8186_s5 + $0x100] sm:$0xff] }
  0xac   :  { %v2956_v18 = vpop.eup %2955  ;;  %v161_v39 = vadd.f32 1.0, %v2954_v33  ;;  %416 = vmatpush.msrb.mxu3 %v4425_v37  ;;  %423 = vmatpush.msra.mxu0 %v4465_v44 }
  0xad   :  { %v4427_v30 = vadd.f32 1.0, %v2956_v18 }
  0xae   :  { %2957 = vrcp.f32 %v161_v39  ;;  %v173_v56 = vand.u32 2147483648, %v161_v39  ;;  %v171_v18 = vand.u32 2147483647, %v161_v39  ;;  %vm167_vm1 = vweird.f32 %v161_v39  ;;  %424 = vmatpush.msra.mxu0 %v4472_v61 }
  0xaf   :  { %2959 = vrcp.f32 %v4427_v30  ;;  %vm190_vm4 = vweird.f32 %v4427_v30 }
  0xb0   :  { %vm172_vm3 = vcmp.eq.f32.partialorder %v171_v18, 8.507059e+37  ;;  %425 = vmatpush.msra.mxu0 %v4480_v52 }
  0xb2   :  { %426 = vmatpush.msra.mxu0 %v4489_v54 }
  0xb4   :  { %v2958_v23 = vpop.eup %2957  ;;  %427 = vmatpush.msra.mxu0 %v4498_v55 }
  0xb5   :  { %v2960_v41 = vpop.eup %2959  ;;  %v163_v45 = vmul.f32 %v2958_v23, %v161_v39  ;;  %vm168_vm0 = vweird.f32 %v2958_v23 }
  0xb6   :  { %v186_v32 = vmul.f32 %v2960_v41, %v4427_v30  ;;  %vm169_vm2 = vmor %vm167_vm1, %vm168_vm0  ;;  %vm191_vm5 = vweird.f32 %v2960_v41 }
  0xb7   :  { %v164_v49 = vsub.f32 1.0, %v163_v45  ;;  %vm192_vm6 = vmor %vm190_vm4, %vm191_vm5 }
  0xb8   :  { %v187_v51 = vsub.f32 1.0, %v186_v32  ;;  %v174_v32 = vor.u32 1.1754944e-38, %v173_v56  ;;  %v196_v56 = vand.u32 2147483648, %v4427_v30 }
  0xb9   :  { %v165_v33 = vmul.f32 %v2958_v23, %v164_v49 }
  0xba   :  { %v188_v34 = vmul.f32 %v2960_v41, %v187_v51  ;;  %v201_v51 = vrot.slane %v4277_v35, 4  ;;  %v194_v35 = vand.u32 2147483647, %v4427_v30  ;;  %v197_v63 = vor.u32 1.1754944e-38, %v196_v56  ;;  %v4512_v30 = vld [vmem:[%s8186_s5 + $0xb8] sm:$0xff] }
  0xbb   :  { %v166_v45 = vadd.f32 %v2958_v23, %v165_v33  ;;  %v8529_v56 = vld [vmem:[#allocation14_spill] sm:$0xff] }
  0xbc   :  { %v189_v58 = vadd.f32 %v2960_v41, %v188_v34  ;;  %v4505_v34 = vld [vmem:[%s8186_s5 + $0xd0] sm:$0xff]  ;;  %vm195_vm7 = vcmp.eq.f32.partialorder %v194_v35, 8.507059e+37  ;;  %v8532_v35 = vld [vmem:[#allocation31_spill] sm:$0xff] }
  0xbd   :  { %v170_v49 = vsel %vm169_vm2, %v2958_v23, %v166_v45  ;;  %428 = vmatpush.msra.mxu0 %v4505_v34 }
  0xbe   :  { %v175_v39 = vsel %vm172_vm3, %v174_v32, %v170_v49  ;;  %v193_v18 = vsel %vm192_vm6, %v2960_v41, %v189_v58  ;;  %v4526_v41 = vld [vmem:[%s8186_s5 + $0x88] sm:$0xff]  ;;  %v4533_v49 = vld [vmem:[%s8186_s5 + $0x70] sm:$0xff] }
  0xbf   :  { %v200_v23 = vmul.f32 %v175_v39, %v155_v48  ;;  %v198_v48 = vsel %vm195_vm7, %v197_v63, %v193_v18  ;;  %429 = vmatpush.msra.mxu0 %v4512_v30  ;;  %v8527_v39 = vld [vmem:[#allocation13_spill] sm:$0xff]  ;;  %v8528_v58 = vld [vmem:[#allocation27_spill] sm:$0xff] }
  0xc0   :  { %v205_v57 = vsub.f32 1.0, %v198_v48  ;;  %v207_v32 = vmul.f32 0.0, %v198_v48  ;;  %v8534_v18 = vld [vmem:[#allocation33_spill] sm:$0xff]  ;;  %v8536_v48 = vld [vmem:[#allocation35_spill] sm:$0xff] }
  0xc1   :  { %v203_v33 = vadd.f32 %v201_v51, %v200_v23  ;;  %430 = vmatpush.msra.mxu0 %v4519_v59  ;;  %v4542_v51 = vld [vmem:[%s8186_s5 + $0x58] sm:$0xff]  ;;  %v8531_v23 = vld [vmem:[#allocation15_spill] sm:$0xff] }
  0xc2   :  { %v8535_v63 = vld [vmem:[#allocation17_spill] sm:$0xff] }
  0xc3   :  { %2961 = vtanh.f32 %v203_v33  ;;  %431 = vmatpush.msra.mxu0 %v4526_v41  ;;  %v8533_v33 = vld [vmem:[#allocation16_spill] sm:$0xff] }
  0xc5   :  { %432 = vmatpush.msra.mxu0 %v4533_v49 }
  0xc7   :  { %433 = vmatpush.msra.mxu0 %v4542_v51 }
  0xc9   :  { %v2962_v45 = vpop.eup %2961  ;;  %434 = vmatpush.msra.mxu0 %v4551_v62 }
  0xca   :  { %v206_v53 = vmul.f32 %v2962_v45, %v205_v57  ;;  %v8537_v57 = vld [vmem:[#allocation18_spill] sm:$0xff]  ;;  %v8538_v45 = vld [vmem:[#allocation37_spill] sm:$0xff] }
  0xcb   :  { %435 = vmatpush.msra.mxu0 %v4558_v50 }
  0xcc   :  { %v4537_v60 = vadd.f32 %v207_v32, %v206_v53  ;;  %v8539_v53 = vld [vmem:[#allocation19_spill] sm:$0xff] }
  0xcd   :  { %436 = vmatpush.msra.mxu0 %v4565_v47  ;;  %v8540_v32 = vld [vmem:[#allocation39_spill] sm:$0xff] }
  0xce   :  { %281 = vmatmul.f32.vlgmr.msra.gmra.mxu3 %v4537_v60  ;;  %301 = vmatmul.f32.vlgmr.msrb.gmra.mxu0 %v4537_v60 }
  0xcf   :  { %321 = vmatmul.f32.vlgmr.msrb.gmra.mxu1 %v4537_v60  ;;  %542 = vmatmul.f32.vlgmr.msra.gmra.mxu2 %v4537_v60 }
  0xd0   :  { %546 = vmatpush.msra.mxu3 %v3686_v12  ;;  %638 = vmatpush.msrb.mxu1 %v4172_v46  ;;  %v8513_v12 = vld [vmem:[#allocation4_spill] sm:$0xff]  ;;  %v8522_v46 = vld [vmem:[#allocation10_spill] sm:$0xff] }
  0xd1   :  { %618 = vmatpush.msrb.mxu0 %v3763_v25  ;;  %v8517_v25 = vld [vmem:[#allocation49_spill] sm:$0xff] }
  0xd2   :  { %547 = vmatpush.msra.mxu3 %v3693_v13  ;;  %639 = vmatpush.msrb.mxu1 %v4191_v42  ;;  %v8514_v13 = vld [vmem:[#allocation47_spill] sm:$0xff]  ;;  %v8518_v42 = vld [vmem:[#allocation5_spill] sm:$0xff] }
  0xd3   :  { %619 = vmatpush.msrb.mxu0 %v3775_v27  ;;  %v8521_v27 = vld [vmem:[#allocation7_spill] sm:$0xff] }
  0xd4   :  { %548 = vmatpush.msra.mxu3 %v3711_v16  ;;  %640 = vmatpush.msrb.mxu1 %v4210_v1  ;;  %v8515_v16 = vld [vmem:[#allocation3_spill] sm:$0xff]  ;;  %v8524_v1 = vld [vmem:[#allocation12_spill] sm:$0xff] }
  0xd5   :  { %620 = vmatpush.msrb.mxu0 %v8513_v12  ;;  %v8541_v12 = vld [vmem:[#allocation20_spill] sm:$0xff] }
  0xd6   :  { %549 = vmatpush.msra.mxu3 %v3729_v19  ;;  %437 = vmatmul.f32.vlgmr.msra.gmra.mxu0 %v8511_v29  ;;  %v8516_v19 = vld [vmem:[#allocation6_spill] sm:$0xff] }
  0xd7   :  { %417 = vmatmul.f32.vlgmr.msrb.gmra.mxu3 %v8511_v29  ;;  %522 = vmatmul.f32.vlgmr.msra.gmra.mxu1 %v4537_v60  ;;  %v8526_v29 = vld [vmem:[#allocation25_spill] sm:$0xff] }
  0xd8   :  { %550 = vmatpush.msra.mxu3 %v3747_v22  ;;  %641 = vmatpush.msrb.mxu1 %v4229_v3  ;;  %v8520_v22 = vld [vmem:[#allocation51_spill] sm:$0xff] }
  0xd9   :  { %621 = vmatpush.msrb.mxu0 %v8516_v19  ;;  %v8525_v3 = vld [vmem:[#allocation11_spill] sm:$0xff]  ;;  %v8544_v19 = vld [vmem:[#allocation21_spill] sm:$0xff] }
  0xda   :  { %551 = vmatpush.msra.mxu3 %v3770_v26  ;;  %642 = vmatpush.msrb.mxu1 %v8514_v13  ;;  %v8523_v26 = vld [vmem:[#allocation9_spill] sm:$0xff] }
  0xdb   :  { %622 = vmatpush.msrb.mxu0 %v8519_v43  ;;  %v8542_v13 = vld [vmem:[#allocation41_spill] sm:$0xff] }
  0xdc   :  { %552 = vmatpush.msra.mxu3 %v8515_v16  ;;  %643 = vmatpush.msrb.mxu1 %v8517_v25  ;;  %v8543_v16 = vld [vmem:[#allocation43_spill] sm:$0xff]  ;;  %v8545_v25 = vld [vmem:[#allocation44_spill] sm:$0xff]  ;;  %v8547_v43 = vld [vmem:[#allocation45_spill] sm:$0xff] }
  0xdd   :  { %623 = vmatpush.msrb.mxu0 %v8522_v46  ;;  %v8550_v46 = vld [vmem:[#allocation24_spill] sm:$0xff] }
  0xde   :  { %553 = vmatpush.msra.mxu3 %v8518_v42  ;;  %644 = vmatpush.msrb.mxu1 %v8520_v22  ;;  %v8546_v42 = vld [vmem:[#allocation22_spill] sm:$0xff]  ;;  %v8548_v22 = vld [vmem:[#allocation23_spill] sm:$0xff] }
  0xdf   :  { %624 = vmatpush.msrb.mxu0 %v8524_v1  ;;  %v8552_v1 = vld [vmem:[#allocation26_spill] sm:$0xff] }
  0xe0   :  { %554 = vmatpush.msra.mxu3 %v8521_v27  ;;  %645 = vmatpush.msrb.mxu1 %v4307_v7  ;;  %v8530_v7 = vld [vmem:[#allocation29_spill] sm:$0xff]  ;;  %v8549_v27 = vld [vmem:[#allocation46_spill] sm:$0xff] }
  0xe1   :  { %625 = vmatpush.msrb.mxu0 %v8526_v29  ;;  %v8554_v29 = vld [vmem:[#allocation28_spill] sm:$0xff] }
  0xe2   :  { %555 = vmatpush.msra.mxu3 %v8523_v26  ;;  %646 = vmatpush.msrb.mxu1 %v4323_v0  ;;  %v8551_v26 = vld [vmem:[#allocation48_spill] sm:$0xff] }
  0xe3   :  { %626 = vmatpush.msrb.mxu0 %v8528_v58  ;;  %v8556_v58 = vld [vmem:[#allocation30_spill] sm:$0xff] }
  0xe4   :  { %556 = vmatpush.msra.mxu3 %v8525_v3  ;;  %647 = vmatpush.msrb.mxu1 %v4338_v6  ;;  %v8553_v3 = vld [vmem:[#allocation50_spill] sm:$0xff] }
  0xe5   :  { %627 = vmatpush.msrb.mxu0 %v8530_v7  ;;  %v8558_v7 = vld [vmem:[#allocation34_spill] sm:$0xff] }
  0xe6   :  { %557 = vmatpush.msra.mxu3 %v8527_v39  ;;  %648 = vmatpush.msrb.mxu1 %v4352_v8  ;;  %v8555_v39 = vld [vmem:[#allocation52_spill] sm:$0xff] }
  0xe7   :  { %628 = vmatpush.msrb.mxu0 %v8532_v35  ;;  %v8562_v35 = vld [vmem:[#allocation42_spill] sm:$0xff] }
  0xe8   :  { %558 = vmatpush.msra.mxu3 %v8529_v56  ;;  %649 = vmatpush.msrb.mxu1 %v4366_v10  ;;  %v8557_v56 = vld [vmem:[#allocation32_spill] sm:$0xff] }
  0xe9   :  { %629 = vmatpush.msrb.mxu0 %v8534_v18  ;;  %v4672_v18 = vld [vmem:[%s8189_s6] sm:$0x7] }
  0xea   :  { %559 = vmatpush.msra.mxu3 %v8531_v23  ;;  %650 = vmatpush.msrb.mxu1 %v4380_v14  ;;  %v8559_v23 = vld [vmem:[#allocation36_spill] sm:$0xff] }
  0xeb   :  { %630 = vmatpush.msrb.mxu0 %v8536_v48 }
  0xec   :  { %560 = vmatpush.msra.mxu3 %v8533_v33  ;;  %651 = vmatpush.msrb.mxu1 %v4394_v17  ;;  %v398_v33 = vpop.f32.mrf.mxu2 }
  0xed   :  { %631 = vmatpush.msrb.mxu0 %v8538_v45  ;;  %v4685_v45 = vld [vmem:[%s8191_s4] sm:$0x7] }
  0xee   :  { %561 = vmatpush.msra.mxu3 %v8535_v63  ;;  %652 = vmatpush.msrb.mxu1 %v4408_v15  ;;  %v4675_v63 = vperm.slane %v4672_v18, 0 }
  0xef   :  { %562 = vmatmul.f32.vlgmr.msra.gmra.mxu3 %v4537_v60  ;;  %632 = vmatpush.msrb.mxu0 %v8540_v32  ;;  %v4693_v32 = vld [vmem:[%s8188_s0 + $0x6] sm:$0x3f] }
  0xf0   :  { %678 = vmatpush.msrb.mxu3 %v8537_v57  ;;  %653 = vmatpush.msrb.mxu1 %v4420_v20  ;;  %8563 = vst [vmem:[#allocation4_spill] sm:$0xff] %v4675_v63  ;;  %v503_v57 = vld [vmem:[%s8190_s7 + $0x78] sm:$0xff] }
  0xf1   :  { %633 = vmatpush.msrb.mxu0 %v8542_v13  ;;  %v399_v13 = vadd.f32 %v398_v33, %v4675_v63 }
  0xf2   :  { %679 = vmatpush.msrb.mxu3 %v8539_v53  ;;  %718 = vmatpush.msra.mxu1 %v4445_v28  ;;  %v4688_v53 = vperm.slane %v4685_v45, 0 }
  0xf3   :  { %698 = vmatpush.msra.mxu0 %v8543_v16  ;;  %v501_v16 = vld [vmem:[%s8190_s7 + $0x68] sm:$0xff] }
  0xf4   :  { %680 = vmatpush.msrb.mxu3 %v8541_v12  ;;  %719 = vmatpush.msra.mxu1 %v4454_v36  ;;  %8564 = vst [vmem:[#allocation47_spill] sm:$0xff] %v4688_v53  ;;  %v502_v12 = vld [vmem:[%s8190_s7 + $0x70] sm:$0xff] }
  0xf5   :  { %699 = vmatpush.msra.mxu0 %v8545_v25  ;;  %v587_v25 = vrot.slane %v4693_v32, 2 }
  0xf6   :  { %681 = vmatpush.msrb.mxu3 %v8544_v19  ;;  %720 = vmatpush.msra.mxu1 %v4465_v44 }
  0xf7   :  { %700 = vmatpush.msra.mxu0 %v8547_v43 }
  0xf8   :  { %682 = vmatpush.msrb.mxu3 %v8546_v42  ;;  %721 = vmatpush.msra.mxu1 %v4472_v61 }
  0xf9   :  { %701 = vmatpush.msra.mxu0 %v8549_v27  ;;  %v500_v27 = vld [vmem:[%s8190_s7 + $0x60] sm:$0xff] }
  0xfa   :  { %683 = vmatpush.msrb.mxu3 %v8548_v22  ;;  %722 = vmatpush.msra.mxu1 %v4480_v52 }
  0xfb   :  { %702 = vmatpush.msra.mxu0 %v8551_v26 }
  0xfc   :  { %684 = vmatpush.msrb.mxu3 %v8550_v46  ;;  %723 = vmatpush.msra.mxu1 %v4489_v54 }
  0xfd   :  { %703 = vmatpush.msra.mxu0 %v8553_v3  ;;  %v8565_v3 = vld [vmem:[#allocation53_spill] sm:$0xff] }
  0xfe   :  { %685 = vmatpush.msrb.mxu3 %v8552_v1  ;;  %724 = vmatpush.msra.mxu1 %v4498_v55 }
  0xff   :  { %704 = vmatpush.msra.mxu0 %v8555_v39  ;;  %v499_v39 = vld [vmem:[%s8190_s7 + $0x58] sm:$0xff] }
 0x100   :  { %686 = vmatpush.msrb.mxu3 %v8554_v29  ;;  %725 = vmatpush.msra.mxu1 %v4505_v34 }
 0x101   :  { %705 = vmatpush.msra.mxu0 %v4312_v38  ;;  %v8560_v38 = vld [vmem:[#allocation38_spill] sm:$0xff] }
 0x102   :  { %687 = vmatpush.msrb.mxu3 %v8556_v58  ;;  %726 = vmatpush.msra.mxu1 %v4512_v30 }
 0x103   :  { %706 = vmatpush.msra.mxu0 %v4328_v31  ;;  %v8561_v31 = vld [vmem:[#allocation40_spill] sm:$0xff] }
 0x104   :  { %688 = vmatpush.msrb.mxu3 %v8557_v56  ;;  %727 = vmatpush.msra.mxu1 %v4519_v59  ;;  %v4713_v56 = vperm.slane %v4685_v45, 1 }
 0x105   :  { %707 = vmatpush.msra.mxu0 %v4343_v11 }
 0x106   :  { %689 = vmatpush.msrb.mxu3 %v8558_v7  ;;  %728 = vmatpush.msra.mxu1 %v4526_v41  ;;  %8566 = vst [vmem:[#allocation3_spill] sm:$0xff] %v4713_v56 }
 0x107   :  { %708 = vmatpush.msra.mxu0 %v4357_v9 }
 0x108   :  { %690 = vmatpush.msrb.mxu3 %v8559_v23  ;;  %729 = vmatpush.msra.mxu1 %v4533_v49 }
 0x109   :  { %709 = vmatpush.msra.mxu0 %v4371_v21 }
 0x10a   :  { %691 = vmatpush.msrb.mxu3 %v8560_v38  ;;  %730 = vmatpush.msra.mxu1 %v4542_v51  ;;  %v4717_v38 = vperm.slane %v4672_v18, 1 }
 0x10b   :  { %710 = vmatpush.msra.mxu0 %v4385_v24 }
 0x10c   :  { %692 = vmatpush.msrb.mxu3 %v8561_v31  ;;  %731 = vmatpush.msra.mxu1 %v4551_v62  ;;  %8567 = vst [vmem:[#allocation6_spill] sm:$0xff] %v4717_v38  ;;  %v498_v31 = vld [vmem:[%s8190_s7 + $0x50] sm:$0xff] }
 0x10d   :  { %711 = vmatpush.msra.mxu0 %v4399_v4 }
 0x10e   :  { %693 = vmatpush.msrb.mxu3 %v8562_v35  ;;  %732 = vmatpush.msra.mxu1 %v4558_v50 }
 0x10f   :  { %712 = vmatpush.msra.mxu0 %v4413_v2 }
 0x110   :  { %733 = vmatpush.msra.mxu1 %v4565_v47  ;;  %822 = vmatpush.msra.mxu3 %v503_v57  ;;  %v497_v57 = vld [vmem:[%s8190_s7 + $0x48] sm:$0xff] }
 0x111   :  { %713 = vmatpush.msra.mxu0 %v4425_v37 }
 0x112   :  { %823 = vmatpush.msra.mxu3 %v502_v12 }
 0x114   :  { %824 = vmatpush.msra.mxu3 %v501_v16 }
 0x116   :  { %825 = vmatpush.msra.mxu3 %v500_v27 }
 0x118   :  { %826 = vmatpush.msra.mxu3 %v499_v39  ;;  %v493_v39 = vld [vmem:[%s8190_s7 + $0x28] sm:$0xff] }
 0x11a   :  { %827 = vmatpush.msra.mxu3 %v498_v31  ;;  %v490_v31 = vld [vmem:[%s8190_s7 + $0x10] sm:$0xff] }
 0x11c   :  { %828 = vmatpush.msra.mxu3 %v497_v57 }
 0x14b   :  { %v302_v35 = vpop.f32.mrf.mxu0 }
 0x14c   :  { %v4677_v48 = vpop.f32.mrf.mxu1 }
 0x151   :  { %v282_v19 = vpop.f32.mrf.mxu3 }
 0x152   :  { %v283_v42 = vadd.f32 %v282_v19, %v4688_v53  ;;  %v543_v43 = vpop.f32.mrf.mxu2  ;;  %v496_v19 = vld [vmem:[%s8190_s7 + $0x40] sm:$0xff] }
 0x153   :  { %v544_v22 = vadd.f32 %v543_v43, %v4295_v5  ;;  %829 = vmatpush.msra.mxu3 %v496_v19 }
 0x154   :  { %v441_v46 = vadd.f32 %v399_v13, %v283_v42  ;;  %v523_v26 = vpop.f32.mrf.mxu1  ;;  %v303_v13 = vadd.f32 %v302_v35, %v4713_v56  ;;  %v495_v42 = vld [vmem:[%s8190_s7 + $0x38] sm:$0xff] }
 0x155   :  { %v589_v1 = vadd.f32 %v587_v25, %v544_v22  ;;  %v524_v29 = vadd.f32 %v523_v26, %v8565_v3  ;;  %830 = vmatpush.msra.mxu3 %v495_v42  ;;  %v494_v26 = vld [vmem:[%s8190_s7 + $0x30] sm:$0xff]  ;;  %v4761_v42 = vperm.slane %v4672_v18, 2 }
 0x156   :  { %v2800_v58 = vmul.f32 -1.442695, %v441_v46 }
 0x157   :  { %v2804_v7 = vmul.f32 -1.442695, %v589_v1  ;;  %v566_v23 = vadd.f32 %v4693_v32, %v524_v29  ;;  %831 = vmatpush.msra.mxu3 %v494_v26  ;;  %8568 = vst [vmem:[#allocation49_spill] sm:$0xff] %v4761_v42 }
 0x158   :  { %2963 = vpow2.f32 %v2800_v58 }
 0x159   :  { %2965 = vpow2.f32 %v2804_v7  ;;  %v2803_v33 = vmul.f32 -1.442695, %v566_v23  ;;  %832 = vmatpush.msra.mxu3 %v493_v39  ;;  %v492_v7 = vld [vmem:[%s8190_s7 + $0x20] sm:$0xff]  ;;  %v491_v23 = vld [vmem:[%s8190_s7 + $0x18] sm:$0xff] }
 0x15a   :  { %v418_v12 = vpop.f32.mrf.mxu3 }
 0x15b   :  { %2967 = vpow2.f32 %v2803_v33  ;;  %v419_v16 = vadd.f32 %v418_v12, %v4717_v38  ;;  %833 = vmatpush.msra.mxu3 %v492_v7  ;;  %v489_v12 = vld [vmem:[%s8190_s7 + $0x8] sm:$0xff] }
 0x15d   :  { %v461_v25 = vadd.f32 %v419_v16, %v303_v13  ;;  %834 = vmatpush.msra.mxu3 %v491_v23 }
 0x15e   :  { %v2964_v43 = vpop.eup %2963 }
 0x15f   :  { %v2966_v22 = vpop.eup %2965  ;;  %v445_v27 = vadd.f32 1.0, %v2964_v43  ;;  %v2801_v46 = vmul.f32 -1.442695, %v461_v25  ;;  %835 = vmatpush.msra.mxu3 %v490_v31  ;;  %v4768_v31 = vperm.slane %v4685_v45, 2 }
 0x160   :  { %v4736_v1 = vadd.f32 1.0, %v2966_v22  ;;  %v488_v22 = vld [vmem:[%s8190_s7] sm:$0xff] }
 0x161   :  { %v2968_v29 = vpop.eup %2967  ;;  %2969 = vrcp.f32 %v445_v27  ;;  %836 = vmatpush.msra.mxu3 %v489_v12  ;;  %v455_v26 = vand.u32 2147483647, %v445_v27  ;;  %8569 = vst [vmem:[#allocation5_spill] sm:$0xff] %v4768_v31  ;;  %vm451_vm9 = vweird.f32 %v445_v27 }
 0x162   :  { %2971 = vrcp.f32 %v4736_v1  ;;  %v570_v58 = vadd.f32 1.0, %v2968_v29  ;;  %v457_v29 = vand.u32 2147483648, %v445_v27  ;;  %vm599_vm1 = vweird.f32 %v4736_v1 }
 0x163   :  { %2973 = vpow2.f32 %v2801_v46  ;;  %v438_v46 = vpop.f32.mrf.mxu0  ;;  %837 = vmatpush.msra.mxu3 %v488_v22  ;;  %vm456_vm12 = vcmp.eq.f32.partialorder %v455_v26, 8.507059e+37  ;;  %v603_v26 = vand.u32 2147483647, %v4736_v1 }
 0x164   :  { %2975 = vrcp.f32 %v570_v58  ;;  %v458_v5 = vor.u32 1.1754944e-38, %v457_v29  ;;  %v580_v38 = vand.u32 2147483647, %v570_v58  ;;  %vm576_vm13 = vweird.f32 %v570_v58 }
 0x165   :  { %v610_v29 = vrot.slane %v4693_v32, 4  ;;  %vm604_vm6 = vcmp.eq.f32.partialorder %v603_v26, 8.507059e+37  ;;  %v4837_v26 = vld [vmem:[%s8184_s1 + $0x158] sm:$0xff] }
 0x166   :  { %vm581_vm15 = vcmp.eq.f32.partialorder %v580_v38, 8.507059e+37  ;;  %8574 = vst [vmem:[#allocation7_spill] sm:$0xff] %v4837_v26 }
 0x167   :  { %v2970_v35 = vpop.eup %2969 }
 0x168   :  { %v4751_v33 = vpop.eup %2971  ;;  %v447_v57 = vmul.f32 %v2970_v35, %v445_v27  ;;  %vm452_vm8 = vweird.f32 %v2970_v35 }
 0x169   :  { %v2974_v13 = vpop.eup %2973  ;;  %v595_v16 = vmul.f32 %v4751_v33, %v4736_v1  ;;  %vm453_vm10 = vmor %vm451_vm9, %vm452_vm8  ;;  %vm600_vm0 = vweird.f32 %v4751_v33 }
 0x16a   :  { %v2976_v19 = vpop.eup %2975  ;;  %v4758_v25 = vadd.f32 1.0, %v2974_v13  ;;  %v448_v43 = vsub.f32 1.0, %v447_v57  ;;  %v439_v57 = vadd.f32 %v438_v46, %v4761_v42  ;;  %v582_v13 = vand.u32 2147483648, %v570_v58  ;;  %vm4783_vm2 = vmor %vm599_vm1, %vm600_vm0 }
 0x16b   :  { %v572_v39 = vmul.f32 %v2976_v19, %v570_v58  ;;  %v596_v7 = vsub.f32 1.0, %v595_v16  ;;  %vm577_vm11 = vweird.f32 %v2976_v19 }
 0x16c   :  { %2977 = vrcp.f32 %v4758_v25  ;;  %v449_v23 = vmul.f32 %v2970_v35, %v448_v43  ;;  %vm578_vm14 = vmor %vm576_vm13, %vm577_vm11  ;;  %v583_v27 = vor.u32 1.1754944e-38, %v582_v13  ;;  %v477_v32 = vand.u32 2147483648, %v4758_v25 }
 0x16d   :  { %v573_v18 = vsub.f32 1.0, %v572_v39  ;;  %v597_v16 = vmul.f32 %v4751_v33, %v596_v7  ;;  %v323_v39 = vadd.f32 %v4677_v48, %v4768_v31  ;;  %v605_v48 = vand.u32 2147483648, %v4736_v1 }
 0x16e   :  { %v450_v12 = vadd.f32 %v2970_v35, %v449_v23  ;;  %vm471_vm4 = vweird.f32 %v4758_v25  ;;  %v478_v1 = vor.u32 1.1754944e-38, %v477_v32  ;;  %v4831_v32 = vld [vmem:[%s8185_s3 + $0x168] sm:$0xff] }
 0x16f   :  { %v574_v3 = vmul.f32 %v2976_v19, %v573_v18  ;;  %v606_v13 = vor.u32 1.1754944e-38, %v605_v48  ;;  %v4816_v48 = vld [vmem:[%s8184_s1 + $0x170] sm:$0xff]  ;;  %8573 = vst [vmem:[#allocation51_spill] sm:$0xff] %v4831_v32 }
 0x170   :  { %v454_v56 = vsel %vm453_vm10, %v2970_v35, %v450_v12  ;;  %8572 = vst [vmem:[#allocation8_spill] sm:$0xff] %v4816_v48 }
 0x171   :  { %v459_v43 = vsel %vm456_vm12, %v458_v5, %v454_v56  ;;  %v575_v22 = vadd.f32 %v2976_v19, %v574_v3  ;;  %v598_v56 = vadd.f32 %v4751_v33, %v597_v16 }
 0x172   :  { %v2978_v45 = vpop.eup %2977  ;;  %v481_v46 = vmul.f32 %v459_v43, %v439_v57  ;;  %v563_v23 = vpop.f32.mrf.mxu3  ;;  %v475_v57 = vand.u32 2147483647, %v4758_v25 }
 0x173   :  { %v467_v18 = vmul.f32 %v2978_v45, %v4758_v25  ;;  %v564_v42 = vadd.f32 %v563_v23, %v4457_v40  ;;  %v579_v7 = vsel %vm578_vm14, %v2976_v19, %v575_v22  ;;  %vm472_vm3 = vweird.f32 %v2978_v45  ;;  %v4843_v19 = vld [vmem:[%s8184_s1 + $0x138] sm:$0xff] }
 0x174   :  { %v482_v5 = vadd.f32 %v481_v46, %v323_v39  ;;  %v584_v3 = vsel %vm581_vm15, %v583_v27, %v579_v7  ;;  %vm473_vm5 = vmor %vm471_vm4, %vm472_vm3  ;;  %vm476_vm7 = vcmp.eq.f32.partialorder %v475_v57, 8.507059e+37  ;;  %v4855_v57 = vld [vmem:[%s8184_s1 + $0x140] sm:$0xff]  ;;  %v5227_v40 = vld [vmem:[%s8185_s3 + $0xb8] sm:$0xff] }
 0x175   :  { %v468_v58 = vsub.f32 1.0, %v467_v18  ;;  %v609_v35 = vmul.f32 %v584_v3, %v564_v42  ;;  %v602_v42 = vsel %vm4783_vm2, %v4751_v33, %v598_v56  ;;  %v2821_v56 = vld [vmem:[%s8190_s7 + $0xf0] sm:$0xff]  ;;  %8576 = vst [vmem:[#allocation9_spill] sm:$0xff] %v4855_v57 }
 0x176   :  { %2979 = vtanh.f32 %v482_v5  ;;  %v607_v22 = vsel %vm604_vm6, %v606_v13, %v602_v42  ;;  %v2819_v42 = vld [vmem:[%s8190_s7 + $0xe0] sm:$0xff]  ;;  %v4871_v13 = vld [vmem:[%s8184_s1 + $0x128] sm:$0xff]  ;;  %8619 = vst [vmem:[#allocation59_spill] sm:$0xff] %v5227_v40 }
 0x177   :  { %v469_v38 = vmul.f32 %v2978_v45, %v468_v58  ;;  %v612_v12 = vadd.f32 %v610_v29, %v609_v35  ;;  %v614_v27 = vsub.f32 1.0, %v607_v22  ;;  %v616_v33 = vmul.f32 %v607_v22, %v4537_v60  ;;  %v2822_v60 = vld [vmem:[%s8190_s7 + $0xf8] sm:$0xff]  ;;  %v4822_v58 = vld [vmem:[%s8184_s1 + $0x150] sm:$0xff]  ;;  %v2820_v35 = vld [vmem:[%s8190_s7 + $0xe8] sm:$0xff]  ;;  %8577 = vst [vmem:[#allocation12_spill] sm:$0xff] %v4871_v13 }
 0x178   :  { %802 = vmatpush.msra.mxu2 %v2822_v60  ;;  %v4894_v22 = vld [vmem:[%s8184_s1 + $0xf0] sm:$0xff] }
 0x179   :  { %v470_v16 = vadd.f32 %v2978_v45, %v469_v38  ;;  %2981 = vtanh.f32 %v612_v12  ;;  %v4849_v38 = vld [vmem:[%s8185_s3 + $0x150] sm:$0xff]  ;;  %v4862_v12 = vld [vmem:[%s8184_s1 + $0x120] sm:$0xff] }
 0x17a   :  { %803 = vmatpush.msra.mxu2 %v2821_v56  ;;  %8575 = vst [vmem:[#allocation10_spill] sm:$0xff] %v4849_v38  ;;  %v4954_v60 = vld [vmem:[%s8185_s3 + $0xf0] sm:$0xff] }
 0x17b   :  { %v474_v43 = vsel %vm473_vm5, %v2978_v45, %v470_v16  ;;  %v4804_v45 = vld [vmem:[%s8184_s1 + $0x168] sm:$0xff]  ;;  %8585 = vst [vmem:[#allocation31_spill] sm:$0xff] %v4954_v60  ;;  %v4960_v56 = vld [vmem:[%s8184_s1 + $0xb0] sm:$0xff] }
 0x17c   :  { %v2980_v39 = vpop.eup %2979  ;;  %v479_v46 = vsel %vm476_vm7, %v478_v1, %v474_v43  ;;  %804 = vmatpush.msra.mxu2 %v2820_v35  ;;  %v4879_v16 = vld [vmem:[%s8184_s1 + $0x108] sm:$0xff]  ;;  %v2818_v1 = vld [vmem:[%s8190_s7 + $0xd8] sm:$0xff]  ;;  %v4888_v43 = vld [vmem:[%s8184_s1 + $0x110] sm:$0xff]  ;;  %8586 = vst [vmem:[#allocation16_spill] sm:$0xff] %v4960_v56 }
 0x17d   :  { %v484_v23 = vsub.f32 1.0, %v479_v46  ;;  %v486_v7 = vmul.f32 0.0, %v479_v46  ;;  %8578 = vst [vmem:[#allocation11_spill] sm:$0xff] %v4888_v43  ;;  %v4906_v46 = vld [vmem:[%s8184_s1 + $0xf8] sm:$0xff]  ;;  %v4966_v35 = vld [vmem:[%s8184_s1 + $0x90] sm:$0xff] }
 0x17e   :  { %805 = vmatpush.msra.mxu2 %v2819_v42  ;;  %8580 = vst [vmem:[#allocation13_spill] sm:$0xff] %v4906_v46  ;;  %v4972_v42 = vld [vmem:[%s8185_s3 + $0xd8] sm:$0xff] }
 0x17f   :  { %v2982_v29 = vpop.eup %2981  ;;  %v485_v18 = vmul.f32 %v2980_v39, %v484_v23  ;;  %v4900_v39 = vld [vmem:[%s8185_s3 + $0x138] sm:$0xff]  ;;  %8587 = vst [vmem:[#allocation33_spill] sm:$0xff] %v4966_v35 }
 0x180   :  { %v615_v5 = vmul.f32 %v2982_v29, %v614_v27  ;;  %8579 = vst [vmem:[#allocation25_spill] sm:$0xff] %v4900_v39  ;;  %806 = vmatpush.msra.mxu2 %v2818_v1  ;;  %v4912_v23 = vld [vmem:[%s8184_s1 + $0xd8] sm:$0xff]  ;;  %v4918_v27 = vld [vmem:[%s8185_s3 + $0x120] sm:$0xff] }
 0x181   :  { %v4793_v3 = vadd.f32 %v486_v7, %v485_v18  ;;  %8581 = vst [vmem:[#allocation27_spill] sm:$0xff] %v4918_v27  ;;  %v4924_v29 = vld [vmem:[%s8184_s1 + $0xe0] sm:$0xff]  ;;  %v4936_v7 = vld [vmem:[%s8185_s3 + $0x108] sm:$0xff]  ;;  %v4978_v1 = vld [vmem:[%s8184_s1 + $0x98] sm:$0xff] }
 0x182   :  { %v4795_v25 = vadd.f32 %v616_v33, %v615_v5  ;;  %8582 = vst [vmem:[#allocation14_spill] sm:$0xff] %v4924_v29  ;;  %v4930_v18 = vld [vmem:[%s8184_s1 + $0xc0] sm:$0xff]  ;;  %v4942_v5 = vld [vmem:[%s8184_s1 + $0xc8] sm:$0xff] }
 0x183   :  { %694 = vmatmul.f32.vlgmr.msrb.gmra.mxu3 %v4793_v3  ;;  %8583 = vst [vmem:[#allocation29_spill] sm:$0xff] %v4936_v7  ;;  %v4948_v33 = vld [vmem:[%s8184_s1 + $0xa8] sm:$0xff] }
 0x184   :  { %634 = vmatmul.f32.vlgmr.msrb.gmra.mxu0 %v4795_v25  ;;  %654 = vmatmul.f32.vlgmr.msrb.gmra.mxu1 %v4795_v25  ;;  %8584 = vst [vmem:[#allocation15_spill] sm:$0xff] %v4942_v5 }
 0x185   :  { %674 = vmatmul.f32.vlgmr.msrb.gmra.mxu2 %v4795_v25  ;;  %844 = vmatpush.msrb.mxu0 %v4804_v45  ;;  %8588 = vst [vmem:[#allocation17_spill] sm:$0xff] %v4972_v42 }
 0x186   :  { %864 = vmatpush.msrb.mxu1 %v4816_v48  ;;  %956 = vmatpush.msrb.mxu3 %v4831_v32  ;;  %8589 = vst [vmem:[#allocation35_spill] sm:$0xff] %v4978_v1  ;;  %v5026_v32 = vld [vmem:[%s8185_s3 + $0x90] sm:$0xff] }
 0x187   :  { %845 = vmatpush.msrb.mxu0 %v4822_v58  ;;  %8597 = vst [vmem:[#allocation21_spill] sm:$0xff] %v5026_v32  ;;  %v3180_v48 = vld [vmem:[%s8186_s5 + $0x110] sm:$0xff] }
 0x188   :  { %865 = vmatpush.msrb.mxu1 %v4837_v26  ;;  %957 = vmatpush.msrb.mxu3 %v4849_v38  ;;  %v5020_v38 = vld [vmem:[%s8184_s1 + $0x48] sm:$0xff] }
 0x189   :  { %846 = vmatpush.msrb.mxu0 %v4843_v19  ;;  %8596 = vst [vmem:[#allocation43_spill] sm:$0xff] %v5020_v38  ;;  %v3177_v26 = vld [vmem:[%s8186_s5 + $0x128] sm:$0xff] }
 0x18a   :  { %866 = vmatpush.msrb.mxu1 %v4855_v57  ;;  %958 = vmatpush.msrb.mxu3 %v4900_v39  ;;  %v5008_v39 = vld [vmem:[%s8185_s3 + $0xa8] sm:$0xff]  ;;  %v3174_v57 = vld [vmem:[%s8186_s5 + $0x140] sm:$0xff] }
 0x18b   :  { %838 = vmatmul.f32.vlgmr.msra.gmra.mxu3 %v4793_v3  ;;  %847 = vmatpush.msrb.mxu0 %v4862_v12  ;;  %8594 = vst [vmem:[#allocation20_spill] sm:$0xff] %v5008_v39 }
 0x18c   :  { %867 = vmatpush.msrb.mxu1 %v4871_v13  ;;  %714 = vmatmul.f32.vlgmr.msra.gmra.mxu0 %v4793_v3  ;;  %v3171_v13 = vld [vmem:[%s8186_s5 + $0x158] sm:$0xff] }
 0x18d   :  { %734 = vmatmul.f32.vlgmr.msra.gmra.mxu1 %v4793_v3  ;;  %848 = vmatpush.msrb.mxu0 %v4879_v16 }
 0x18e   :  { %868 = vmatpush.msrb.mxu1 %v4888_v43  ;;  %959 = vmatpush.msrb.mxu3 %v4918_v27  ;;  %v5002_v27 = vld [vmem:[%s8184_s1 + $0x60] sm:$0xff]  ;;  %v3168_v43 = vld [vmem:[%s8186_s5 + $0x170] sm:$0xff] }
 0x18f   :  { %849 = vmatpush.msrb.mxu0 %v4894_v22  ;;  %8593 = vst [vmem:[#allocation39_spill] sm:$0xff] %v5002_v27 }
 0x190   :  { %869 = vmatpush.msrb.mxu1 %v4906_v46  ;;  %960 = vmatpush.msrb.mxu3 %v4936_v7  ;;  %v4990_v7 = vld [vmem:[%s8185_s3 + $0xc0] sm:$0xff] }
 0x191   :  { %850 = vmatpush.msrb.mxu0 %v4912_v23  ;;  %8591 = vst [vmem:[#allocation37_spill] sm:$0xff] %v4990_v7  ;;  %v5136_v46 = vld [vmem:[%s8185_s3] sm:$0xff] }
 0x192   :  { %870 = vmatpush.msrb.mxu1 %v4924_v29  ;;  %961 = vmatpush.msrb.mxu3 %v4954_v60  ;;  %v4984_v60 = vld [vmem:[%s8184_s1 + $0x78] sm:$0xff]  ;;  %8612 = vst [vmem:[#allocation36_spill] sm:$0xff] %v5136_v46 }
 0x193   :  { %851 = vmatpush.msrb.mxu0 %v4930_v18  ;;  %8590 = vst [vmem:[#allocation18_spill] sm:$0xff] %v4984_v60  ;;  %v5118_v29 = vld [vmem:[%s8185_s3 + $0x18] sm:$0xff] }
 0x194   :  { %871 = vmatpush.msrb.mxu1 %v4942_v5  ;;  %962 = vmatpush.msrb.mxu3 %v4972_v42  ;;  %v4996_v42 = vld [vmem:[%s8184_s1 + $0x80] sm:$0xff]  ;;  %v5112_v5 = vld [vmem:[%s8185_s3 + $0x158] sm:$0xff]  ;;  %8610 = vst [vmem:[#allocation32_spill] sm:$0xff] %v5118_v29 }
 0x195   :  { %852 = vmatpush.msrb.mxu0 %v4948_v33  ;;  %8592 = vst [vmem:[#allocation19_spill] sm:$0xff] %v4996_v42 }
 0x196   :  { %872 = vmatpush.msrb.mxu1 %v4960_v56  ;;  %963 = vmatpush.msrb.mxu3 %v4990_v7  ;;  %v5014_v7 = vld [vmem:[%s8184_s1 + $0x68] sm:$0xff] }
 0x197   :  { %853 = vmatpush.msrb.mxu0 %v4966_v35  ;;  %8595 = vst [vmem:[#allocation41_spill] sm:$0xff] %v5014_v7  ;;  %v5080_v56 = vld [vmem:[%s8185_s3 + $0x48] sm:$0xff] }
 0x198   :  { %873 = vmatpush.msrb.mxu1 %v4978_v1  ;;  %964 = vmatpush.msrb.mxu3 %v5008_v39  ;;  %v5032_v39 = vld [vmem:[%s8184_s1 + $0x50] sm:$0xff]  ;;  %v5062_v1 = vld [vmem:[%s8185_s3 + $0x60] sm:$0xff]  ;;  %8606 = vst [vmem:[#allocation50_spill] sm:$0xff] %v5080_v56 }
 0x199   :  { %854 = vmatpush.msrb.mxu0 %v4984_v60  ;;  %8598 = vst [vmem:[#allocation44_spill] sm:$0xff] %v5032_v39 }
 0x19a   :  { %874 = vmatpush.msrb.mxu1 %v4996_v42  ;;  %965 = vmatpush.msrb.mxu3 %v5026_v32  ;;  %v5044_v42 = vld [vmem:[%s8185_s3 + $0x78] sm:$0xff]  ;;  %8603 = vst [vmem:[#allocation24_spill] sm:$0xff] %v5062_v1 }
 0x19b   :  { %855 = vmatpush.msrb.mxu0 %v5002_v27  ;;  %8600 = vst [vmem:[#allocation45_spill] sm:$0xff] %v5044_v42  ;;  %v5050_v32 = vld [vmem:[%s8184_s1 + $0x38] sm:$0xff] }
 0x19c   :  { %875 = vmatpush.msrb.mxu1 %v5014_v7  ;;  %v5038_v7 = vld [vmem:[%s8184_s1 + $0x30] sm:$0xff]  ;;  %966 = vmatpush.msrb.mxu3 %v5044_v42  ;;  %8601 = vst [vmem:[#allocation23_spill] sm:$0xff] %v5050_v32  ;;  %v5068_v42 = vld [vmem:[%s8184_s1 + $0x20] sm:$0xff] }
 0x19d   :  { %856 = vmatpush.msrb.mxu0 %v5020_v38  ;;  %8599 = vst [vmem:[#allocation22_spill] sm:$0xff] %v5038_v7 }
 0x19e   :  { %876 = vmatpush.msrb.mxu1 %v5032_v39  ;;  %v5056_v39 = vld [vmem:[%s8184_s1 + $0x18] sm:$0xff]  ;;  %967 = vmatpush.msrb.mxu3 %v5062_v1  ;;  %8604 = vst [vmem:[#allocation48_spill] sm:$0xff] %v5068_v42  ;;  %v5086_v1 = vld [vmem:[%s8184_s1 + $0x8] sm:$0xff] }
 0x19f   :  { %857 = vmatpush.msrb.mxu0 %v5038_v7  ;;  %8602 = vst [vmem:[#allocation46_spill] sm:$0xff] %v5056_v39 }
 0x1a0   :  { %877 = vmatpush.msrb.mxu1 %v5050_v32  ;;  %v5074_v32 = vld [vmem:[%s8184_s1] sm:$0xff]  ;;  %968 = vmatpush.msrb.mxu3 %v5080_v56  ;;  %8607 = vst [vmem:[#allocation28_spill] sm:$0xff] %v5086_v1  ;;  %v5100_v56 = vld [vmem:[%s8185_s3 + $0x30] sm:$0xff] }
 0x1a1   :  { %858 = vmatpush.msrb.mxu0 %v5056_v39  ;;  %8605 = vst [vmem:[#allocation26_spill] sm:$0xff] %v5074_v32 }
 0x1a2   :  { %878 = vmatpush.msrb.mxu1 %v5068_v42  ;;  %v5094_v42 = vld [vmem:[%s8185_s3 + $0x170] sm:$0xff]  ;;  %8608 = vst [vmem:[#allocation52_spill] sm:$0xff] %v5100_v56  ;;  %969 = vmatpush.msrb.mxu3 %v5100_v56  ;;  %v5124_v56 = vld [vmem:[%s8185_s3 + $0x160] sm:$0xff] }
 0x1a3   :  { %859 = vmatpush.msrb.mxu0 %v5074_v32  ;;  %8611 = vst [vmem:[#allocation34_spill] sm:$0xff] %v5124_v56 }
 0x1a4   :  { %879 = vmatpush.msrb.mxu1 %v5086_v1  ;;  %860 = vmatmul.f32.vlgmr.msrb.gmra.mxu0 %v4795_v25  ;;  %v5106_v1 = vld [vmem:[%s8185_s3 + $0x178] sm:$0xff] }
 0x1a5   :  { %880 = vmatmul.f32.vlgmr.msrb.gmra.mxu1 %v4795_v25  ;;  %976 = vmatpush.msra.mxu0 %v5094_v42  ;;  %8609 = vst [vmem:[#allocation30_spill] sm:$0xff] %v5106_v1 }
 0x1a6   :  { %996 = vmatpush.msra.mxu1 %v5106_v1  ;;  %970 = vmatpush.msrb.mxu3 %v5118_v29  ;;  %v5130_v1 = vld [vmem:[%s8185_s3 + $0x140] sm:$0xff]  ;;  %v5142_v29 = vld [vmem:[%s8185_s3 + $0x148] sm:$0xff] }
 0x1a7   :  { %977 = vmatpush.msra.mxu0 %v5112_v5  ;;  %8613 = vst [vmem:[#allocation38_spill] sm:$0xff] %v5142_v29 }
 0x1a8   :  { %997 = vmatpush.msra.mxu1 %v5124_v56  ;;  %971 = vmatpush.msrb.mxu3 %v5136_v46  ;;  %v5148_v56 = vld [vmem:[%s8185_s3 + $0x128] sm:$0xff]  ;;  %v5157_v46 = vld [vmem:[%s8185_s3 + $0x130] sm:$0xff] }
 0x1a9   :  { %978 = vmatpush.msra.mxu0 %v5130_v1  ;;  %8614 = vst [vmem:[#allocation40_spill] sm:$0xff] %v5157_v46 }
 0x1aa   :  { %998 = vmatpush.msra.mxu1 %v5142_v29  ;;  %1036 = vmatpush.msra.mxu3 %v3168_v43  ;;  %v5163_v29 = vld [vmem:[%s8185_s3 + $0x110] sm:$0xff]  ;;  %v5172_v43 = vld [vmem:[%s8185_s3 + $0x118] sm:$0xff] }
 0x1ab   :  { %979 = vmatpush.msra.mxu0 %v5148_v56  ;;  %8615 = vst [vmem:[#allocation42_spill] sm:$0xff] %v5172_v43 }
 0x1ac   :  { %999 = vmatpush.msra.mxu1 %v5157_v46  ;;  %1037 = vmatpush.msra.mxu3 %v3171_v13  ;;  %v5178_v46 = vld [vmem:[%s8185_s3 + $0xf8] sm:$0xff]  ;;  %v5187_v13 = vld [vmem:[%s8185_s3 + $0x100] sm:$0xff] }
 0x1ad   :  { %980 = vmatpush.msra.mxu0 %v5163_v29  ;;  %8616 = vst [vmem:[#allocation56_spill] sm:$0xff] %v5187_v13 }
 0x1ae   :  { %1000 = vmatpush.msra.mxu1 %v5172_v43  ;;  %1038 = vmatpush.msra.mxu3 %v3174_v57  ;;  %v5193_v43 = vld [vmem:[%s8185_s3 + $0xe0] sm:$0xff]  ;;  %v5202_v57 = vld [vmem:[%s8185_s3 + $0xe8] sm:$0xff] }
 0x1af   :  { %981 = vmatpush.msra.mxu0 %v5178_v46  ;;  %8617 = vst [vmem:[#allocation57_spill] sm:$0xff] %v5202_v57 }
 0x1b0   :  { %1001 = vmatpush.msra.mxu1 %v5187_v13  ;;  %1039 = vmatpush.msra.mxu3 %v3177_v26  ;;  %v5208_v13 = vld [vmem:[%s8185_s3 + $0xc8] sm:$0xff]  ;;  %v5217_v26 = vld [vmem:[%s8185_s3 + $0xd0] sm:$0xff] }
 0x1b1   :  { %982 = vmatpush.msra.mxu0 %v5193_v43  ;;  %8618 = vst [vmem:[#allocation58_spill] sm:$0xff] %v5217_v26 }
 0x1b2   :  { %1002 = vmatpush.msra.mxu1 %v5202_v57  ;;  %1040 = vmatpush.msra.mxu3 %v3180_v48  ;;  %v3182_v57 = vld [vmem:[%s8186_s5 + $0xf8] sm:$0xff]  ;;  %v3184_v48 = vld [vmem:[%s8186_s5 + $0xe0] sm:$0xff] }
 0x1b3   :  { %983 = vmatpush.msra.mxu0 %v5208_v13 }
 0x1b4   :  { %1003 = vmatpush.msra.mxu1 %v5217_v26  ;;  %1041 = vmatpush.msra.mxu3 %v3182_v57  ;;  %v3186_v57 = vld [vmem:[%s8186_s5 + $0xc8] sm:$0xff] }
 0x1b5   :  { %984 = vmatpush.msra.mxu0 %v4323_v0  ;;  %v5237_v0 = vld [vmem:[%s8185_s3 + $0xa0] sm:$0xff] }
 0x1b6   :  { %1004 = vmatpush.msra.mxu1 %v5227_v40  ;;  %1042 = vmatpush.msra.mxu3 %v3184_v48  ;;  %8620 = vst [vmem:[#allocation60_spill] sm:$0xff] %v5237_v0  ;;  %v3188_v48 = vld [vmem:[%s8186_s5 + $0xb0] sm:$0xff] }
 0x1b7   :  { %985 = vmatpush.msra.mxu0 %v4338_v6  ;;  %v5247_v6 = vld [vmem:[%s8185_s3 + $0x88] sm:$0xff] }
 0x1b8   :  { %1005 = vmatpush.msra.mxu1 %v5237_v0  ;;  %1043 = vmatpush.msra.mxu3 %v3186_v57  ;;  %8621 = vst [vmem:[#allocation61_spill] sm:$0xff] %v5247_v6  ;;  %v5273_v57 = vld [vmem:[%s8185_s3 + $0x40] sm:$0xff] }
 0x1b9   :  { %986 = vmatpush.msra.mxu0 %v4352_v8  ;;  %v5257_v8 = vld [vmem:[%s8185_s3 + $0x70] sm:$0xff]  ;;  %8624 = vst [vmem:[#allocation64_spill] sm:$0xff] %v5273_v57 }
 0x1ba   :  { %1006 = vmatpush.msra.mxu1 %v5247_v6  ;;  %1044 = vmatpush.msra.mxu3 %v3188_v48  ;;  %8622 = vst [vmem:[#allocation62_spill] sm:$0xff] %v5257_v8 }
 0x1bb   :  { %987 = vmatpush.msra.mxu0 %v4366_v10  ;;  %v5265_v10 = vld [vmem:[%s8185_s3 + $0x58] sm:$0xff] }
 0x1bc   :  { %1007 = vmatpush.msra.mxu1 %v5257_v8  ;;  %1045 = vmatpush.msra.mxu3 %v4343_v11  ;;  %8623 = vst [vmem:[#allocation63_spill] sm:$0xff] %v5265_v10  ;;  %v5281_v11 = vld [vmem:[%s8185_s3 + $0x28] sm:$0xff]  ;;  %v8631_v8 = vld [vmem:[#allocation49_spill] sm:$0xff] }
 0x1bd   :  { %988 = vmatpush.msra.mxu0 %v4380_v14  ;;  %8625 = vst [vmem:[#allocation65_spill] sm:$0xff] %v5281_v11  ;;  %v2816_v14 = vld [vmem:[%s8190_s7 + $0xc8] sm:$0xff] }
 0x1be   :  { %1008 = vmatpush.msra.mxu1 %v5265_v10  ;;  %1046 = vmatpush.msra.mxu3 %v4357_v9  ;;  %v5290_v9 = vld [vmem:[%s8185_s3 + $0x10] sm:$0xff] }
 0x1bf   :  { %989 = vmatpush.msra.mxu0 %v4394_v17  ;;  %8626 = vst [vmem:[#allocation66_spill] sm:$0xff] %v5290_v9  ;;  %v2814_v17 = vld [vmem:[%s8190_s7 + $0xb8] sm:$0xff] }
 0x1c0   :  { %1009 = vmatpush.msra.mxu1 %v5273_v57  ;;  %1047 = vmatpush.msra.mxu3 %v4371_v21  ;;  %v2817_v21 = vld [vmem:[%s8190_s7 + $0xd0] sm:$0xff] }
 0x1c1   :  { %990 = vmatpush.msra.mxu0 %v4408_v15  ;;  %807 = vmatpush.msra.mxu2 %v2817_v21  ;;  %v2812_v15 = vld [vmem:[%s8190_s7 + $0xa8] sm:$0xff]  ;;  %v5397_v21 = vld [vmem:[%s8184_s1 + $0xb8] sm:$0xff] }
 0x1c2   :  { %1010 = vmatpush.msra.mxu1 %v5281_v11  ;;  %1048 = vmatpush.msra.mxu3 %v4385_v24  ;;  %v2815_v24 = vld [vmem:[%s8190_s7 + $0xc0] sm:$0xff] }
 0x1c3   :  { %991 = vmatpush.msra.mxu0 %v4420_v20  ;;  %808 = vmatpush.msra.mxu2 %v2816_v14  ;;  %v2810_v20 = vld [vmem:[%s8190_s7 + $0x98] sm:$0xff]  ;;  %v8627_v14 = vld [vmem:[#allocation3_spill] sm:$0xff] }
 0x1c4   :  { %1011 = vmatpush.msra.mxu1 %v5290_v9  ;;  %1049 = vmatpush.msra.mxu3 %v4399_v4  ;;  %v2813_v4 = vld [vmem:[%s8190_s7 + $0xb0] sm:$0xff] }
 0x1c5   :  { %1056 = vmatpush.msrb.mxu0 %v4445_v28  ;;  %809 = vmatpush.msra.mxu2 %v2815_v24  ;;  %v2808_v28 = vld [vmem:[%s8190_s7 + $0x88] sm:$0xff] }
 0x1c6   :  { %1050 = vmatpush.msra.mxu3 %v4413_v2  ;;  %v2811_v2 = vld [vmem:[%s8190_s7 + $0xa0] sm:$0xff] }
 0x1c7   :  { %1057 = vmatpush.msrb.mxu0 %v4454_v36  ;;  %810 = vmatpush.msra.mxu2 %v2814_v17  ;;  %v2807_v36 = vld [vmem:[%s8190_s7 + $0x80] sm:$0xff] }
 0x1c8   :  { %1051 = vmatpush.msra.mxu3 %v4425_v37  ;;  %v2809_v37 = vld [vmem:[%s8190_s7 + $0x90] sm:$0xff]  ;;  %v8628_v17 = vld [vmem:[#allocation6_spill] sm:$0xff] }
 0x1c9   :  { %1058 = vmatpush.msrb.mxu0 %v4465_v44  ;;  %811 = vmatpush.msra.mxu2 %v2813_v4  ;;  %v5347_v44 = vld [vmem:[%s8184_s1 + $0x178] sm:$0xff] }
 0x1cb   :  { %1059 = vmatpush.msrb.mxu0 %v4472_v61  ;;  %812 = vmatpush.msra.mxu2 %v2812_v15  ;;  %v5353_v61 = vld [vmem:[%s8184_s1 + $0x160] sm:$0xff] }
 0x1cd   :  { %1060 = vmatpush.msrb.mxu0 %v4480_v52  ;;  %813 = vmatpush.msra.mxu2 %v2811_v2  ;;  %v5359_v52 = vld [vmem:[%s8184_s1 + $0x148] sm:$0xff]  ;;  %v5405_v2 = vld [vmem:[%s8184_s1 + $0xa0] sm:$0xff] }
 0x1cf   :  { %1061 = vmatpush.msrb.mxu0 %v4489_v54  ;;  %814 = vmatpush.msra.mxu2 %v2810_v20  ;;  %v5365_v54 = vld [vmem:[%s8184_s1 + $0x130] sm:$0xff] }
 0x1d1   :  { %1062 = vmatpush.msrb.mxu0 %v4498_v55  ;;  %815 = vmatpush.msra.mxu2 %v2809_v37  ;;  %v5411_v37 = vld [vmem:[%s8184_s1 + $0x88] sm:$0xff] }
 0x1d3   :  { %1063 = vmatpush.msrb.mxu0 %v4505_v34  ;;  %816 = vmatpush.msra.mxu2 %v2808_v28  ;;  %v5371_v34 = vld [vmem:[%s8184_s1 + $0x118] sm:$0xff] }
 0x1d5   :  { %1064 = vmatpush.msrb.mxu0 %v4512_v30  ;;  %817 = vmatpush.msra.mxu2 %v2807_v36  ;;  %v5377_v30 = vld [vmem:[%s8184_s1 + $0x100] sm:$0xff]  ;;  %v5417_v36 = vld [vmem:[%s8184_s1 + $0x70] sm:$0xff] }
 0x1d7   :  { %1065 = vmatpush.msrb.mxu0 %v4519_v59  ;;  %884 = vmatpush.msrb.mxu2 %v5347_v44  ;;  %v5383_v59 = vld [vmem:[%s8184_s1 + $0xe8] sm:$0xff] }
 0x1d9   :  { %1066 = vmatpush.msrb.mxu0 %v4526_v41  ;;  %885 = vmatpush.msrb.mxu2 %v5353_v61 }
 0x1db   :  { %1067 = vmatpush.msrb.mxu0 %v4533_v49  ;;  %886 = vmatpush.msrb.mxu2 %v5359_v52 }
 0x1dd   :  { %1068 = vmatpush.msrb.mxu0 %v4542_v51  ;;  %887 = vmatpush.msrb.mxu2 %v5365_v54 }
 0x1df   :  { %1069 = vmatpush.msrb.mxu0 %v4551_v62  ;;  %888 = vmatpush.msrb.mxu2 %v5371_v34 }
 0x1e1   :  { %1070 = vmatpush.msrb.mxu0 %v4558_v50  ;;  %889 = vmatpush.msrb.mxu2 %v5377_v30  ;;  %v5391_v50 = vld [vmem:[%s8184_s1 + $0xd0] sm:$0xff] }
 0x1e3   :  { %1071 = vmatpush.msrb.mxu0 %v4565_v47  ;;  %890 = vmatpush.msrb.mxu2 %v5383_v59 }
 0x1e5   :  { %891 = vmatpush.msrb.mxu2 %v5391_v50 }
 0x1e7   :  { %892 = vmatpush.msrb.mxu2 %v5397_v21 }
 0x1e9   :  { %893 = vmatpush.msrb.mxu2 %v5405_v2 }
 0x1eb   :  { %894 = vmatpush.msrb.mxu2 %v5411_v37 }
 0x1ed   :  { %895 = vmatpush.msrb.mxu2 %v5417_v36 }
 0x201   :  { %v635_v55 = vpop.f32.mrf.mxu0  ;;  %v655_v51 = vpop.f32.mrf.mxu1 }
 0x202   :  { %v636_v49 = vadd.f32 %v635_v55, %v4688_v53  ;;  %v656_v24 = vadd.f32 %v655_v51, %v8627_v14  ;;  %v5423_v55 = vld [vmem:[%s8184_s1 + $0x58] sm:$0xff] }
 0x203   :  { %896 = vmatpush.msrb.mxu2 %v5423_v55 }
 0x206   :  { %v695_v41 = vpop.f32.mrf.mxu3 }
 0x207   :  { %v696_v62 = vadd.f32 %v695_v41, %v4675_v63 }
 0x208   :  { %v675_v11 = vpop.f32.mrf.mxu2 }
 0x209   :  { %v738_v47 = vadd.f32 %v696_v62, %v636_v49  ;;  %v715_v48 = vpop.f32.mrf.mxu0  ;;  %v5429_v49 = vld [vmem:[%s8184_s1 + $0x40] sm:$0xff]  ;;  %v5435_v62 = vld [vmem:[%s8184_s1 + $0x28] sm:$0xff]  ;;  %v676_v26 = vadd.f32 %v675_v11, %v4768_v31  ;;  %v5490_v11 = vld [vmem:[%s8186_s5 + $0xd8] sm:$0xff] }
 0x20a   :  { %v716_v4 = vadd.f32 %v715_v48, %v8628_v17  ;;  %897 = vmatpush.msrb.mxu2 %v5429_v49  ;;  %8629 = vst [vmem:[#allocation67_spill] sm:$0xff] %v5435_v62  ;;  %v735_v9 = vpop.f32.mrf.mxu1 }
 0x20b   :  { %v2805_v15 = vmul.f32 -1.442695, %v738_v47  ;;  %v736_v6 = vadd.f32 %v735_v9, %v8631_v8  ;;  %8634 = vst [vmem:[#allocation71_spill] sm:$0xff] %v5490_v11 }
 0x20c   :  { %v758_v20 = vadd.f32 %v716_v4, %v656_v24  ;;  %898 = vmatpush.msrb.mxu2 %v5435_v62  ;;  %v5441_v24 = vld [vmem:[%s8184_s1 + $0x10] sm:$0xff] }
 0x20d   :  { %2983 = vpow2.f32 %v2805_v15  ;;  %8630 = vst [vmem:[#allocation68_spill] sm:$0xff] %v5441_v24 }
 0x20e   :  { %v2806_v28 = vmul.f32 -1.442695, %v758_v20  ;;  %899 = vmatpush.msrb.mxu2 %v5441_v24 }
 0x210   :  { %2985 = vpow2.f32 %v2806_v28 }
 0x213   :  { %v2984_v41 = vpop.eup %2983 }
 0x214   :  { %v742_v51 = vadd.f32 1.0, %v2984_v41 }
 0x216   :  { %v2986_v47 = vpop.eup %2985  ;;  %2987 = vrcp.f32 %v742_v51  ;;  %v754_v17 = vand.u32 2147483648, %v742_v51  ;;  %v752_v53 = vand.u32 2147483647, %v742_v51  ;;  %vm748_vm9 = vweird.f32 %v742_v51 }
 0x217   :  { %v762_v48 = vadd.f32 1.0, %v2986_v47 }
 0x218   :  { %v755_v10 = vor.u32 1.1754944e-38, %v754_v17  ;;  %vm753_vm11 = vcmp.eq.f32.partialorder %v752_v53, 8.507059e+37 }
 0x219   :  { %2989 = vrcp.f32 %v762_v48  ;;  %vm768_vm13 = vweird.f32 %v762_v48 }
 0x21c   :  { %v2988_v4 = vpop.eup %2987 }
 0x21d   :  { %v744_v15 = vmul.f32 %v2988_v4, %v742_v51  ;;  %vm749_vm8 = vweird.f32 %v2988_v4 }
 0x21e   :  { %vm750_vm10 = vmor %vm748_vm9, %vm749_vm8 }
 0x21f   :  { %v2990_v20 = vpop.eup %2989  ;;  %v745_v28 = vsub.f32 1.0, %v744_v15 }
 0x220   :  { %v764_v41 = vmul.f32 %v2990_v20, %v762_v48  ;;  %vm769_vm12 = vweird.f32 %v2990_v20 }
 0x221   :  { %v746_v14 = vmul.f32 %v2988_v4, %v745_v28  ;;  %v774_v28 = vand.u32 2147483648, %v762_v48  ;;  %vm770_vm14 = vmor %vm768_vm13, %vm769_vm12 }
 0x222   :  { %v765_v63 = vsub.f32 1.0, %v764_v41  ;;  %v772_v41 = vand.u32 2147483647, %v762_v48  ;;  %v5502_v48 = vld [vmem:[%s8186_s5 + $0xa8] sm:$0xff] }
 0x223   :  { %v747_v47 = vadd.f32 %v2988_v4, %v746_v14  ;;  %v775_v62 = vor.u32 1.1754944e-38, %v774_v28  ;;  %8636 = vst [vmem:[#allocation73_spill] sm:$0xff] %v5502_v48  ;;  %v5532_v28 = vld [vmem:[%s8186_s5 + $0x30] sm:$0xff] }
 0x224   :  { %v766_v57 = vmul.f32 %v2990_v20, %v765_v63  ;;  %vm773_vm15 = vcmp.eq.f32.partialorder %v772_v41, 8.507059e+37  ;;  %8641 = vst [vmem:[#allocation78_spill] sm:$0xff] %v5532_v28  ;;  %v5538_v41 = vld [vmem:[%s8186_s5 + $0x18] sm:$0xff] }
 0x225   :  { %v751_v0 = vsel %vm750_vm10, %v2988_v4, %v747_v47  ;;  %v5520_v47 = vld [vmem:[%s8186_s5 + $0x60] sm:$0xff]  ;;  %8642 = vst [vmem:[#allocation79_spill] sm:$0xff] %v5538_v41 }
 0x226   :  { %v756_v40 = vsel %vm753_vm11, %v755_v10, %v751_v0  ;;  %v767_v15 = vadd.f32 %v2990_v20, %v766_v57  ;;  %v5478_v10 = vld [vmem:[%s8186_s5 + $0x108] sm:$0xff]  ;;  %v5484_v57 = vld [vmem:[%s8186_s5 + $0xf0] sm:$0xff]  ;;  %8639 = vst [vmem:[#allocation76_spill] sm:$0xff] %v5520_v47 }
 0x227   :  { %v778_v24 = vmul.f32 %v756_v40, %v736_v6  ;;  %v5453_v40 = vld [vmem:[%s8186_s5 + $0x168] sm:$0xff]  ;;  %v5471_v6 = vld [vmem:[%s8186_s5 + $0x120] sm:$0xff]  ;;  %8632 = vst [vmem:[#allocation69_spill] sm:$0xff] %v5478_v10 }
 0x228   :  { %v771_v51 = vsel %vm770_vm14, %v2990_v20, %v767_v15  ;;  %8633 = vst [vmem:[#allocation70_spill] sm:$0xff] %v5484_v57  ;;  %v5514_v20 = vld [vmem:[%s8186_s5 + $0x78] sm:$0xff]  ;;  %v5526_v15 = vld [vmem:[%s8186_s5 + $0x48] sm:$0xff] }
 0x229   :  { %v779_v14 = vadd.f32 %v778_v24, %v676_v26  ;;  %v776_v63 = vsel %vm773_vm15, %v775_v62, %v771_v51  ;;  %v5459_v26 = vld [vmem:[%s8186_s5 + $0x150] sm:$0xff]  ;;  %v5496_v62 = vld [vmem:[%s8186_s5 + $0xc0] sm:$0xff]  ;;  %8638 = vst [vmem:[#allocation75_spill] sm:$0xff] %v5514_v20 }
 0x22a   :  { %v781_v17 = vsub.f32 1.0, %v776_v63  ;;  %v783_v53 = vmul.f32 %v776_v63, %v4793_v3  ;;  %v5465_v3 = vld [vmem:[%s8186_s5 + $0x138] sm:$0xff]  ;;  %8635 = vst [vmem:[#allocation72_spill] sm:$0xff] %v5496_v62  ;;  %v5508_v24 = vld [vmem:[%s8186_s5 + $0x90] sm:$0xff] }
 0x22b   :  { %2991 = vtanh.f32 %v779_v14  ;;  %8637 = vst [vmem:[#allocation74_spill] sm:$0xff] %v5508_v24  ;;  %v5544_v14 = vld [vmem:[%s8186_s5] sm:$0xff]  ;;  %v5575_v51 = vld [vmem:[%s8185_s3 + $0xb0] sm:$0xff] }
 0x22c   :  { %8640 = vst [vmem:[#allocation77_spill] sm:$0xff] %v5526_v15  ;;  %v2823_v63 = vld [vmem:[%s8188_s0 + $0xc] sm:$0x3f] }
 0x22d   :  { %8643 = vst [vmem:[#allocation80_spill] sm:$0xff] %v5544_v14 }
 0x22e   :  { %8644 = vst [vmem:[#allocation81_spill] sm:$0xff] %v5575_v51 }
 0x231   :  { %v2992_v9 = vpop.eup %2991 }
 0x232   :  { %v782_v4 = vmul.f32 %v2992_v9, %v781_v17  ;;  %v881_v9 = vpop.f32.mrf.mxu1 }
 0x234   :  { %v5447_v0 = vadd.f32 %v783_v53, %v782_v4  ;;  %v5615_v4 = vld [vmem:[%s8185_s3 + $0x20] sm:$0xff]  ;;  %v5621_v53 = vld [vmem:[%s8185_s3 + $0x8] sm:$0xff] }
 0x235   :  { %8651 = vst [vmem:[#allocation87_spill] sm:$0xff] %v5615_v4 }
 0x236   :  { %818 = vmatmul.f32.vlgmr.msra.gmra.mxu2 %v5447_v0  ;;  %8652 = vst [vmem:[#allocation88_spill] sm:$0xff] %v5621_v53 }
 0x237   :  { %1016 = vmatpush.msra.mxu2 %v5453_v40 }
 0x239   :  { %1017 = vmatpush.msra.mxu2 %v5459_v26 }
 0x23b   :  { %1018 = vmatpush.msra.mxu2 %v5465_v3 }
 0x23d   :  { %1019 = vmatpush.msra.mxu2 %v5471_v6 }
 0x23e   :  { %900 = vmatmul.f32.vlgmr.msrb.gmra.mxu2 %v4795_v25 }
 0x23f   :  { %1020 = vmatpush.msra.mxu2 %v5478_v10 }
 0x241   :  { %1021 = vmatpush.msra.mxu2 %v5484_v57 }
 0x243   :  { %1022 = vmatpush.msra.mxu2 %v5490_v11 }
 0x245   :  { %1023 = vmatpush.msra.mxu2 %v5496_v62 }
 0x247   :  { %1024 = vmatpush.msra.mxu2 %v5502_v48 }
 0x249   :  { %1025 = vmatpush.msra.mxu2 %v5508_v24 }
 0x24b   :  { %1026 = vmatpush.msra.mxu2 %v5514_v20 }
 0x24d   :  { %1027 = vmatpush.msra.mxu2 %v5520_v47 }
 0x24f   :  { %1028 = vmatpush.msra.mxu2 %v5526_v15 }
 0x251   :  { %1029 = vmatpush.msra.mxu2 %v5532_v28 }
 0x253   :  { %1030 = vmatpush.msra.mxu2 %v5538_v41 }
 0x255   :  { %1031 = vmatpush.msra.mxu2 %v5544_v14 }
 0x256   :  { %1032 = vmatmul.f32.vlgmr.msra.gmra.mxu2 %v5447_v0 }
 0x257   :  { %1163 = vmatpush.msrb.mxu2 %v4804_v45 }
 0x259   :  { %1164 = vmatpush.msrb.mxu2 %v4822_v58 }
 0x25b   :  { %1165 = vmatpush.msrb.mxu2 %v4843_v19 }
 0x25d   :  { %1166 = vmatpush.msrb.mxu2 %v4862_v12 }
 0x25f   :  { %1167 = vmatpush.msrb.mxu2 %v4879_v16 }
 0x261   :  { %1168 = vmatpush.msrb.mxu2 %v4894_v22 }
 0x263   :  { %1169 = vmatpush.msrb.mxu2 %v4912_v23 }
 0x265   :  { %1170 = vmatpush.msrb.mxu2 %v4930_v18 }
 0x267   :  { %1171 = vmatpush.msrb.mxu2 %v4948_v33 }
 0x269   :  { %1172 = vmatpush.msrb.mxu2 %v4966_v35 }
 0x26b   :  { %1173 = vmatpush.msrb.mxu2 %v4984_v60 }
 0x26d   :  { %1174 = vmatpush.msrb.mxu2 %v5002_v27  ;;  %v948_v27 = vrot.slane %v2823_v63, 4 }
 0x26f   :  { %1175 = vmatpush.msrb.mxu2 %v5020_v38 }
 0x271   :  { %1176 = vmatpush.msrb.mxu2 %v5038_v7 }
 0x273   :  { %1177 = vmatpush.msrb.mxu2 %v5056_v39 }
 0x275   :  { %1178 = vmatpush.msrb.mxu2 %v5074_v32 }
 0x277   :  { %1295 = vmatpush.msra.mxu2 %v5094_v42  ;;  %v8648_v42 = vld [vmem:[#allocation53_spill] sm:$0xff] }
 0x279   :  { %1296 = vmatpush.msra.mxu2 %v5112_v5  ;;  %v5581_v5 = vld [vmem:[%s8185_s3 + $0x98] sm:$0xff] }
 0x27a   :  { %8645 = vst [vmem:[#allocation82_spill] sm:$0xff] %v5581_v5 }
 0x27b   :  { %1297 = vmatpush.msra.mxu2 %v5130_v1 }
 0x27d   :  { %1298 = vmatpush.msra.mxu2 %v5148_v56  ;;  %v5593_v56 = vld [vmem:[%s8185_s3 + $0x68] sm:$0xff] }
 0x27e   :  { %8647 = vst [vmem:[#allocation84_spill] sm:$0xff] %v5593_v56 }
 0x27f   :  { %1299 = vmatpush.msra.mxu2 %v5163_v29  ;;  %v861_v29 = vpop.f32.mrf.mxu0 }
 0x280   :  { %v862_v1 = vadd.f32 %v861_v29, %v8648_v42  ;;  %v8653_v29 = vld [vmem:[#allocation54_spill] sm:$0xff] }
 0x281   :  { %1300 = vmatpush.msra.mxu2 %v5178_v46  ;;  %v5587_v46 = vld [vmem:[%s8185_s3 + $0x80] sm:$0xff] }
 0x282   :  { %8646 = vst [vmem:[#allocation83_spill] sm:$0xff] %v5587_v46  ;;  %v904_v17 = vadd.f32 %v2823_v63, %v862_v1 }
 0x283   :  { %1301 = vmatpush.msra.mxu2 %v5193_v43  ;;  %v5600_v43 = vld [vmem:[%s8185_s3 + $0x50] sm:$0xff] }
 0x284   :  { %8649 = vst [vmem:[#allocation85_spill] sm:$0xff] %v5600_v43 }
 0x285   :  { %1302 = vmatpush.msra.mxu2 %v5208_v13  ;;  %v5606_v13 = vld [vmem:[%s8185_s3 + $0x38] sm:$0xff] }
 0x286   :  { %8650 = vst [vmem:[#allocation86_spill] sm:$0xff] %v5606_v13 }
 0x287   :  { %1303 = vmatpush.msra.mxu2 %v5575_v51 }
 0x289   :  { %1304 = vmatpush.msra.mxu2 %v5581_v5 }
 0x28b   :  { %1305 = vmatpush.msra.mxu2 %v5587_v46 }
 0x28d   :  { %1306 = vmatpush.msra.mxu2 %v5593_v56  ;;  %v2824_v56 = vmul.f32 -1.442695, %v904_v17 }
 0x28f   :  { %1307 = vmatpush.msra.mxu2 %v5600_v43  ;;  %v925_v43 = vrot.slane %v2823_v63, 2  ;;  %2993 = vpow2.f32 %v2824_v56 }
 0x291   :  { %1308 = vmatpush.msra.mxu2 %v5606_v13  ;;  %v882_v13 = vadd.f32 %v881_v9, %v8653_v29 }
 0x293   :  { %1309 = vmatpush.msra.mxu2 %v5615_v4  ;;  %v927_v1 = vadd.f32 %v925_v43, %v882_v13 }
 0x295   :  { %1310 = vmatpush.msra.mxu2 %v5621_v53  ;;  %v2825_v46 = vmul.f32 -1.442695, %v927_v1  ;;  %v2994_v5 = vpop.eup %2993  ;;  %v8655_v1 = vld [vmem:[#allocation55_spill] sm:$0xff] }
 0x296   :  { %v908_v51 = vadd.f32 1.0, %v2994_v5 }
 0x297   :  { %2995 = vpow2.f32 %v2825_v46 }
 0x298   :  { %2997 = vrcp.f32 %v908_v51  ;;  %v920_v56 = vand.u32 2147483648, %v908_v51  ;;  %vm914_vm1 = vweird.f32 %v908_v51  ;;  %v918_v43 = vand.u32 2147483647, %v908_v51 }
 0x29a   :  { %vm919_vm3 = vcmp.eq.f32.partialorder %v918_v43, 8.507059e+37 }
 0x29d   :  { %v2996_v31 = vpop.eup %2995 }
 0x29e   :  { %v931_v4 = vadd.f32 1.0, %v2996_v31  ;;  %v2998_v8 = vpop.eup %2997  ;;  %v921_v31 = vor.u32 1.1754944e-38, %v920_v56 }
 0x29f   :  { %v910_v42 = vmul.f32 %v2998_v8, %v908_v51  ;;  %vm915_vm0 = vweird.f32 %v2998_v8 }
 0x2a0   :  { %2999 = vrcp.f32 %v931_v4  ;;  %vm916_vm2 = vmor %vm914_vm1, %vm915_vm0  ;;  %v943_v60 = vand.u32 2147483648, %v931_v4  ;;  %vm937_vm5 = vweird.f32 %v931_v4 }
 0x2a1   :  { %v911_v39 = vsub.f32 1.0, %v910_v42 }
 0x2a2   :  { %v944_v51 = vor.u32 1.1754944e-38, %v943_v60  ;;  %v8657_v60 = vld [vmem:[#allocation7_spill] sm:$0xff] }
 0x2a3   :  { %v912_v53 = vmul.f32 %v2998_v8, %v911_v39 }
 0x2a5   :  { %v913_v17 = vadd.f32 %v2998_v8, %v912_v53 }
 0x2a6   :  { %v3000_v32 = vpop.eup %2999 }
 0x2a7   :  { %v933_v7 = vmul.f32 %v3000_v32, %v931_v4  ;;  %v917_v5 = vsel %vm916_vm2, %v2998_v8, %v913_v17  ;;  %vm938_vm4 = vweird.f32 %v3000_v32 }
 0x2a8   :  { %v922_v42 = vsel %vm919_vm3, %v921_v31, %v917_v5  ;;  %vm939_vm6 = vmor %vm937_vm5, %vm938_vm4  ;;  %v8659_v5 = vld [vmem:[#allocation12_spill] sm:$0xff]  ;;  %v8660_v31 = vld [vmem:[#allocation11_spill] sm:$0xff] }
 0x2a9   :  { %v934_v9 = vsub.f32 1.0, %v933_v7  ;;  %v941_v7 = vand.u32 2147483647, %v931_v4  ;;  %v5657_v4 = vld [vmem:[%s8186_s5 + $0x160] sm:$0xff] }
 0x2ab   :  { %v935_v46 = vmul.f32 %v3000_v32, %v934_v9  ;;  %vm942_vm7 = vcmp.eq.f32.partialorder %v941_v7, 8.507059e+37  ;;  %v5688_v7 = vld [vmem:[%s8186_s5 + $0x118] sm:$0xff] }
 0x2ad   :  { %v936_v39 = vadd.f32 %v3000_v32, %v935_v46  ;;  %v5665_v46 = vld [vmem:[%s8186_s5 + $0x148] sm:$0xff] }
 0x2af   :  { %v940_v35 = vsel %vm939_vm6, %v3000_v32, %v936_v39  ;;  %v2843_v32 = vld [vmem:[%s8190_s7 + $0x178] sm:$0xff] }
 0x2b0   :  { %v945_v8 = vsel %vm942_vm7, %v944_v51, %v940_v35  ;;  %1140 = vmatpush.msrb.mxu1 %v2843_v32  ;;  %v2841_v35 = vld [vmem:[%s8190_s7 + $0x168] sm:$0xff]  ;;  %v8661_v39 = vld [vmem:[#allocation13_spill] sm:$0xff]  ;;  %v5696_v51 = vld [vmem:[%s8186_s5 + $0x100] sm:$0xff] }
 0x2b1   :  { %v952_v9 = vsub.f32 1.0, %v945_v8  ;;  %v954_v43 = vmul.f32 %v945_v8, %v4795_v25  ;;  %v2842_v25 = vld [vmem:[%s8190_s7 + $0x170] sm:$0xff]  ;;  %v8663_v8 = vld [vmem:[#allocation15_spill] sm:$0xff]  ;;  %v5720_v32 = vld [vmem:[%s8186_s5 + $0xb8] sm:$0xff] }
 0x2b2   :  { %1141 = vmatpush.msrb.mxu1 %v2842_v25  ;;  %v5728_v25 = vld [vmem:[%s8186_s5 + $0xa0] sm:$0xff] }
 0x2b4   :  { %1142 = vmatpush.msrb.mxu1 %v2841_v35  ;;  %v5736_v35 = vld [vmem:[%s8186_s5 + $0x88] sm:$0xff] }
 0x2b9   :  { %v5625_v38 = vpop.f32.mrf.mxu2 }
 0x2ba   :  { %8654 = vst [vmem:[#allocation89_spill] sm:$0xff] %v5625_v38 }
 0x2c1   :  { %v901_v13 = vpop.f32.mrf.mxu2 }
 0x2c2   :  { %v902_v29 = vadd.f32 %v901_v13, %v8655_v1  ;;  %v2840_v13 = vld [vmem:[%s8190_s7 + $0x160] sm:$0xff] }
 0x2c3   :  { %1143 = vmatpush.msrb.mxu1 %v2840_v13  ;;  %v8669_v13 = vld [vmem:[#allocation23_spill] sm:$0xff] }
 0x2c4   :  { %v947_v38 = vmul.f32 %v922_v42, %v902_v29  ;;  %v8658_v29 = vld [vmem:[#allocation9_spill] sm:$0xff] }
 0x2c5   :  { %v5680_v42 = vld [vmem:[%s8186_s5 + $0x130] sm:$0xff] }
 0x2c6   :  { %v950_v53 = vadd.f32 %v948_v27, %v947_v38  ;;  %v8656_v38 = vld [vmem:[#allocation8_spill] sm:$0xff]  ;;  %v5646_v27 = vld [vmem:[%s8186_s5 + $0x178] sm:$0xff] }
 0x2c8   :  { %3001 = vtanh.f32 %v950_v53  ;;  %v8662_v53 = vld [vmem:[#allocation14_spill] sm:$0xff] }
 0x2ce   :  { %v3002_v17 = vpop.eup %3001 }
 0x2cf   :  { %v953_v56 = vmul.f32 %v3002_v17, %v952_v9  ;;  %v5704_v9 = vld [vmem:[%s8186_s5 + $0xe8] sm:$0xff] }
 0x2d0   :  { %v8664_v17 = vld [vmem:[#allocation16_spill] sm:$0xff] }
 0x2d1   :  { %v5629_v63 = vadd.f32 %v954_v43, %v953_v56  ;;  %v5712_v56 = vld [vmem:[%s8186_s5 + $0xd0] sm:$0xff]  ;;  %v8665_v43 = vld [vmem:[#allocation35_spill] sm:$0xff] }
 0x2d3   :  { %972 = vmatmul.f32.vlgmr.msrb.gmra.mxu3 %v5629_v63  ;;  %992 = vmatmul.f32.vlgmr.msra.gmra.mxu0 %v5629_v63 }
 0x2d4   :  { %1012 = vmatmul.f32.vlgmr.msra.gmra.mxu1 %v5629_v63  ;;  %1179 = vmatmul.f32.vlgmr.msrb.gmra.mxu2 %v5629_v63 }
 0x2d5   :  { %1183 = vmatpush.msrb.mxu3 %v8656_v38  ;;  %1203 = vmatpush.msra.mxu0 %v5347_v44  ;;  %v8666_v38 = vld [vmem:[#allocation19_spill] sm:$0xff] }
 0x2d6   :  { %1375 = vmatpush.msrb.mxu2 %v5646_v27 }
 0x2d7   :  { %1184 = vmatpush.msrb.mxu3 %v8657_v60  ;;  %1204 = vmatpush.msra.mxu0 %v5353_v61  ;;  %v8667_v60 = vld [vmem:[#allocation41_spill] sm:$0xff] }
 0x2d8   :  { %1376 = vmatpush.msrb.mxu2 %v5657_v4 }
 0x2d9   :  { %1185 = vmatpush.msrb.mxu3 %v8658_v29  ;;  %1205 = vmatpush.msra.mxu0 %v5359_v52  ;;  %v8668_v29 = vld [vmem:[#allocation44_spill] sm:$0xff] }
 0x2da   :  { %1377 = vmatpush.msrb.mxu2 %v5665_v46 }
 0x2db   :  { %1186 = vmatpush.msrb.mxu3 %v8659_v5  ;;  %1206 = vmatpush.msra.mxu0 %v5365_v54  ;;  %v5744_v5 = vld [vmem:[%s8186_s5 + $0x70] sm:$0xff] }
 0x2dc   :  { %1052 = vmatmul.f32.vlgmr.msra.gmra.mxu3 %v5447_v0  ;;  %1072 = vmatmul.f32.vlgmr.msrb.gmra.mxu0 %v5447_v0 }
 0x2dd   :  { %1187 = vmatpush.msrb.mxu3 %v8660_v31  ;;  %1207 = vmatpush.msra.mxu0 %v5371_v34  ;;  %v5752_v31 = vld [vmem:[%s8186_s5 + $0x58] sm:$0xff] }
 0x2de   :  { %1378 = vmatpush.msrb.mxu2 %v5680_v42 }
 0x2df   :  { %1188 = vmatpush.msrb.mxu3 %v8661_v39  ;;  %1208 = vmatpush.msra.mxu0 %v5377_v30  ;;  %v8670_v39 = vld [vmem:[#allocation48_spill] sm:$0xff] }
 0x2e0   :  { %1379 = vmatpush.msrb.mxu2 %v5688_v7 }
 0x2e1   :  { %1189 = vmatpush.msrb.mxu3 %v8662_v53  ;;  %1209 = vmatpush.msra.mxu0 %v5383_v59  ;;  %v8671_v53 = vld [vmem:[#allocation67_spill] sm:$0xff] }
 0x2e2   :  { %1380 = vmatpush.msrb.mxu2 %v5696_v51 }
 0x2e3   :  { %1190 = vmatpush.msrb.mxu3 %v8663_v8  ;;  %1210 = vmatpush.msra.mxu0 %v5391_v50  ;;  %v5760_v8 = vld [vmem:[%s8186_s5 + $0x40] sm:$0xff] }
 0x2e4   :  { %1381 = vmatpush.msrb.mxu2 %v5704_v9  ;;  %8672 = vst [vmem:[#allocation55_spill] sm:$0xff] %v5760_v8 }
 0x2e5   :  { %1191 = vmatpush.msrb.mxu3 %v8664_v17  ;;  %1211 = vmatpush.msra.mxu0 %v5397_v21  ;;  %v8673_v17 = vld [vmem:[#allocation28_spill] sm:$0xff] }
 0x2e6   :  { %1382 = vmatpush.msrb.mxu2 %v5712_v56 }
 0x2e7   :  { %1192 = vmatpush.msrb.mxu3 %v8665_v43  ;;  %1212 = vmatpush.msra.mxu0 %v5405_v2  ;;  %v8674_v43 = vld [vmem:[#allocation68_spill] sm:$0xff] }
 0x2e8   :  { %1383 = vmatpush.msrb.mxu2 %v5720_v32 }
 0x2e9   :  { %1193 = vmatpush.msrb.mxu3 %v8666_v38  ;;  %1213 = vmatpush.msra.mxu0 %v5411_v37  ;;  %v8675_v38 = vld [vmem:[#allocation30_spill] sm:$0xff] }
 0x2ea   :  { %1384 = vmatpush.msrb.mxu2 %v5728_v25 }
 0x2eb   :  { %1194 = vmatpush.msrb.mxu3 %v8667_v60  ;;  %1214 = vmatpush.msra.mxu0 %v5417_v36  ;;  %v5772_v60 = vld [vmem:[%s8186_s5 + $0x28] sm:$0xff] }
 0x2ec   :  { %1385 = vmatpush.msrb.mxu2 %v5736_v35  ;;  %8676 = vst [vmem:[#allocation8_spill] sm:$0xff] %v5772_v60 }
 0x2ed   :  { %1195 = vmatpush.msrb.mxu3 %v8668_v29  ;;  %1215 = vmatpush.msra.mxu0 %v5423_v55  ;;  %v8677_v29 = vld [vmem:[#allocation34_spill] sm:$0xff] }
 0x2ee   :  { %1386 = vmatpush.msrb.mxu2 %v5744_v5 }
 0x2ef   :  { %1196 = vmatpush.msrb.mxu3 %v8669_v13  ;;  %1216 = vmatpush.msra.mxu0 %v5429_v49  ;;  %v5780_v13 = vld [vmem:[%s8186_s5 + $0x10] sm:$0xff] }
 0x2f0   :  { %1387 = vmatpush.msrb.mxu2 %v5752_v31  ;;  %8678 = vst [vmem:[#allocation7_spill] sm:$0xff] %v5780_v13 }
 0x2f1   :  { %1197 = vmatpush.msrb.mxu3 %v8670_v39  ;;  %1217 = vmatpush.msra.mxu0 %v8671_v53  ;;  %v8679_v39 = vld [vmem:[#allocation38_spill] sm:$0xff] }
 0x2f2   :  { %1388 = vmatpush.msrb.mxu2 %v5760_v8 }
 0x2f3   :  { %1198 = vmatpush.msrb.mxu3 %v8673_v17  ;;  %1218 = vmatpush.msra.mxu0 %v8674_v43  ;;  %v8680_v17 = vld [vmem:[#allocation40_spill] sm:$0xff] }
 0x2f4   :  { %1199 = vmatmul.f32.vlgmr.msrb.gmra.mxu3 %v5629_v63  ;;  %1219 = vmatmul.f32.vlgmr.msra.gmra.mxu0 %v5629_v63 }
 0x2f5   :  { %1335 = vmatpush.msrb.mxu0 %v5453_v40  ;;  %1315 = vmatpush.msra.mxu3 %v8675_v38  ;;  %v8681_v38 = vld [vmem:[#allocation42_spill] sm:$0xff] }
 0x2f6   :  { %1389 = vmatpush.msrb.mxu2 %v5772_v60  ;;  %v8683_v60 = vld [vmem:[#allocation57_spill] sm:$0xff] }
 0x2f7   :  { %1336 = vmatpush.msrb.mxu0 %v5459_v26  ;;  %1316 = vmatpush.msra.mxu3 %v8677_v29  ;;  %v8682_v29 = vld [vmem:[#allocation56_spill] sm:$0xff] }
 0x2f8   :  { %1390 = vmatpush.msrb.mxu2 %v5780_v13  ;;  %v8684_v13 = vld [vmem:[#allocation58_spill] sm:$0xff] }
 0x2f9   :  { %1337 = vmatpush.msrb.mxu0 %v5465_v3  ;;  %1317 = vmatpush.msra.mxu3 %v8679_v39  ;;  %v8685_v39 = vld [vmem:[#allocation59_spill] sm:$0xff] }
 0x2fb   :  { %1338 = vmatpush.msrb.mxu0 %v5471_v6  ;;  %1318 = vmatpush.msra.mxu3 %v8680_v17  ;;  %v8686_v17 = vld [vmem:[#allocation60_spill] sm:$0xff] }
 0x2fd   :  { %1339 = vmatpush.msrb.mxu0 %v5478_v10  ;;  %1319 = vmatpush.msra.mxu3 %v8681_v38  ;;  %v8687_v38 = vld [vmem:[#allocation61_spill] sm:$0xff] }
 0x2ff   :  { %1340 = vmatpush.msrb.mxu0 %v5484_v57  ;;  %1320 = vmatpush.msra.mxu3 %v8682_v29  ;;  %v8688_v29 = vld [vmem:[#allocation62_spill] sm:$0xff] }
 0x301   :  { %1341 = vmatpush.msrb.mxu0 %v5490_v11  ;;  %1321 = vmatpush.msra.mxu3 %v8683_v60  ;;  %v8689_v60 = vld [vmem:[#allocation63_spill] sm:$0xff] }
 0x303   :  { %1342 = vmatpush.msrb.mxu0 %v5496_v62  ;;  %1322 = vmatpush.msra.mxu3 %v8684_v13  ;;  %v8690_v13 = vld [vmem:[#allocation64_spill] sm:$0xff] }
 0x305   :  { %1343 = vmatpush.msrb.mxu0 %v5502_v48  ;;  %1323 = vmatpush.msra.mxu3 %v8685_v39  ;;  %v8691_v39 = vld [vmem:[#allocation65_spill] sm:$0xff] }
 0x307   :  { %1344 = vmatpush.msrb.mxu0 %v5508_v24  ;;  %1324 = vmatpush.msra.mxu3 %v8686_v17  ;;  %v8692_v17 = vld [vmem:[#allocation66_spill] sm:$0xff] }
 0x309   :  { %1345 = vmatpush.msrb.mxu0 %v5514_v20  ;;  %1325 = vmatpush.msra.mxu3 %v8687_v38  ;;  %v8693_v38 = vld [vmem:[#allocation33_spill] sm:$0xff] }
 0x30a   :  { %v8723_v20 = vld [vmem:[#allocation5_spill] sm:$0xff] }
 0x30b   :  { %1346 = vmatpush.msrb.mxu0 %v5520_v47  ;;  %1326 = vmatpush.msra.mxu3 %v8688_v29  ;;  %v8694_v29 = vld [vmem:[#allocation18_spill] sm:$0xff] }
 0x30d   :  { %1347 = vmatpush.msrb.mxu0 %v5526_v15  ;;  %1327 = vmatpush.msra.mxu3 %v8689_v60  ;;  %v2835_v60 = vld [vmem:[%s8190_s7 + $0x138] sm:$0xff] }
 0x30f   :  { %1348 = vmatpush.msrb.mxu0 %v5532_v28  ;;  %1328 = vmatpush.msra.mxu3 %v8690_v13  ;;  %v2834_v13 = vld [vmem:[%s8190_s7 + $0x130] sm:$0xff] }
 0x311   :  { %1349 = vmatpush.msrb.mxu0 %v5538_v41  ;;  %1329 = vmatpush.msra.mxu3 %v8691_v39  ;;  %v2833_v39 = vld [vmem:[%s8190_s7 + $0x128] sm:$0xff] }
 0x312   :  { %v8715_v41 = vld [vmem:[#allocation3_spill] sm:$0xff] }
 0x313   :  { %1350 = vmatpush.msrb.mxu0 %v5544_v14  ;;  %1330 = vmatpush.msra.mxu3 %v8692_v17  ;;  %v2832_v17 = vld [vmem:[%s8190_s7 + $0x120] sm:$0xff] }
 0x315   :  { %1482 = vmatpush.msra.mxu0 %v4804_v45  ;;  %v8695_v45 = vld [vmem:[#allocation39_spill] sm:$0xff] }
 0x317   :  { %1483 = vmatpush.msra.mxu0 %v4822_v58  ;;  %v8696_v58 = vld [vmem:[#allocation43_spill] sm:$0xff] }
 0x319   :  { %1484 = vmatpush.msra.mxu0 %v4843_v19  ;;  %v8697_v19 = vld [vmem:[#allocation22_spill] sm:$0xff] }
 0x31b   :  { %1485 = vmatpush.msra.mxu0 %v4862_v12  ;;  %v8698_v12 = vld [vmem:[#allocation46_spill] sm:$0xff] }
 0x31d   :  { %1486 = vmatpush.msra.mxu0 %v4879_v16  ;;  %v2839_v16 = vld [vmem:[%s8190_s7 + $0x158] sm:$0xff] }
 0x31e   :  { %1144 = vmatpush.msrb.mxu1 %v2839_v16  ;;  %v5865_v16 = vpop.f32.mrf.mxu3 }
 0x31f   :  { %1487 = vmatpush.msra.mxu0 %v4894_v22  ;;  %v2838_v22 = vld [vmem:[%s8190_s7 + $0x150] sm:$0xff]  ;;  %8702 = vst [vmem:[#allocation9_spill] sm:$0xff] %v5865_v16 }
 0x320   :  { %1145 = vmatpush.msrb.mxu1 %v2838_v22  ;;  %v8703_v22 = vld [vmem:[#allocation25_spill] sm:$0xff]  ;;  %v8712_v16 = vld [vmem:[#allocation20_spill] sm:$0xff] }
 0x321   :  { %1488 = vmatpush.msra.mxu0 %v4912_v23  ;;  %v8699_v23 = vld [vmem:[#allocation26_spill] sm:$0xff] }
 0x323   :  { %1489 = vmatpush.msra.mxu0 %v4930_v18  ;;  %v2837_v18 = vld [vmem:[%s8190_s7 + $0x148] sm:$0xff] }
 0x324   :  { %1146 = vmatpush.msrb.mxu1 %v2837_v18  ;;  %v8704_v18 = vld [vmem:[#allocation27_spill] sm:$0xff] }
 0x325   :  { %1490 = vmatpush.msra.mxu0 %v4948_v33  ;;  %v2836_v33 = vld [vmem:[%s8190_s7 + $0x140] sm:$0xff] }
 0x326   :  { %1147 = vmatpush.msrb.mxu1 %v2836_v33  ;;  %v8705_v33 = vld [vmem:[#allocation29_spill] sm:$0xff] }
 0x327   :  { %1491 = vmatpush.msra.mxu0 %v8693_v38  ;;  %v2831_v38 = vld [vmem:[%s8190_s7 + $0x118] sm:$0xff] }
 0x328   :  { %1148 = vmatpush.msrb.mxu1 %v2835_v60  ;;  %v8706_v60 = vld [vmem:[#allocation31_spill] sm:$0xff] }
 0x329   :  { %1492 = vmatpush.msra.mxu0 %v8694_v29  ;;  %v2830_v29 = vld [vmem:[%s8190_s7 + $0x110] sm:$0xff] }
 0x32a   :  { %1149 = vmatpush.msrb.mxu1 %v2834_v13 }
 0x32b   :  { %1493 = vmatpush.msra.mxu0 %v8695_v45  ;;  %v2829_v45 = vld [vmem:[%s8190_s7 + $0x108] sm:$0xff] }
 0x32c   :  { %1150 = vmatpush.msrb.mxu1 %v2833_v39  ;;  %v8707_v39 = vld [vmem:[#allocation17_spill] sm:$0xff] }
 0x32d   :  { %1494 = vmatpush.msra.mxu0 %v8696_v58  ;;  %v2828_v58 = vld [vmem:[%s8190_s7 + $0x100] sm:$0xff] }
 0x32e   :  { %1151 = vmatpush.msrb.mxu1 %v2832_v17  ;;  %v8708_v17 = vld [vmem:[#allocation4_spill] sm:$0xff] }
 0x32f   :  { %1495 = vmatpush.msra.mxu0 %v8697_v19  ;;  %v8700_v19 = vld [vmem:[#allocation51_spill] sm:$0xff] }
 0x330   :  { %1152 = vmatpush.msrb.mxu1 %v2831_v38 }
 0x331   :  { %1496 = vmatpush.msra.mxu0 %v8698_v12  ;;  %v8701_v12 = vld [vmem:[#allocation10_spill] sm:$0xff] }
 0x332   :  { %1153 = vmatpush.msrb.mxu1 %v2830_v29  ;;  %v8709_v29 = vld [vmem:[#allocation47_spill] sm:$0xff] }
 0x333   :  { %1497 = vmatpush.msra.mxu0 %v8699_v23  ;;  %v1033_v23 = vpop.f32.mrf.mxu2 }
 0x334   :  { %1154 = vmatpush.msrb.mxu1 %v2829_v45  ;;  %v1034_v38 = vadd.f32 %v1033_v23, %v8708_v17  ;;  %v8713_v23 = vld [vmem:[#allocation21_spill] sm:$0xff] }
 0x336   :  { %1155 = vmatpush.msrb.mxu1 %v2828_v58  ;;  %v5877_v58 = vld [vmem:[%s8188_s0 + $0x12] sm:$0x3f] }
 0x338   :  { %1275 = vmatpush.msra.mxu1 %v8700_v19 }
 0x33a   :  { %1276 = vmatpush.msra.mxu1 %v8701_v12  ;;  %v8710_v12 = vld [vmem:[#allocation53_spill] sm:$0xff] }
 0x33c   :  { %1277 = vmatpush.msra.mxu1 %v8703_v22 }
 0x33e   :  { %1278 = vmatpush.msra.mxu1 %v8704_v18  ;;  %v8711_v18 = vld [vmem:[#allocation37_spill] sm:$0xff] }
 0x340   :  { %1279 = vmatpush.msra.mxu1 %v8705_v33 }
 0x342   :  { %1280 = vmatpush.msra.mxu1 %v8706_v60 }
 0x344   :  { %1281 = vmatpush.msra.mxu1 %v8707_v39 }
 0x346   :  { %1282 = vmatpush.msra.mxu1 %v8711_v18  ;;  %v8717_v18 = vld [vmem:[#allocation24_spill] sm:$0xff] }
 0x348   :  { %1283 = vmatpush.msra.mxu1 %v8712_v16 }
 0x34a   :  { %1284 = vmatpush.msra.mxu1 %v8713_v23 }
 0x356   :  { %v973_v13 = vpop.f32.mrf.mxu3 }
 0x357   :  { %v974_v45 = vadd.f32 %v973_v13, %v8709_v29  ;;  %v1180_v19 = vpop.f32.mrf.mxu2  ;;  %v993_v13 = vpop.f32.mrf.mxu0  ;;  %v8714_v29 = vld [vmem:[#allocation45_spill] sm:$0xff] }
 0x358   :  { %v1181_v22 = vadd.f32 %v1180_v19, %v8710_v12  ;;  %1285 = vmatpush.msra.mxu1 %v8714_v29  ;;  %v994_v28 = vadd.f32 %v993_v13, %v8715_v41  ;;  %v8716_v19 = vld [vmem:[#allocation6_spill] sm:$0xff]  ;;  %v8721_v29 = vld [vmem:[#allocation36_spill] sm:$0xff] }
 0x359   :  { %v1076_v33 = vadd.f32 %v1034_v38, %v974_v45  ;;  %v8718_v45 = vld [vmem:[#allocation50_spill] sm:$0xff] }
 0x35a   :  { %v1223_v60 = vadd.f32 %v5877_v58, %v1181_v22  ;;  %1286 = vmatpush.msra.mxu1 %v8717_v18 }
 0x35b   :  { %v2826_v39 = vmul.f32 -1.442695, %v1076_v33 }
 0x35c   :  { %v2845_v14 = vmul.f32 -1.442695, %v1223_v60  ;;  %1287 = vmatpush.msra.mxu1 %v8718_v45  ;;  %v8719_v60 = vld [vmem:[#allocation52_spill] sm:$0xff] }
 0x35d   :  { %3003 = vpow2.f32 %v2826_v39  ;;  %v8720_v39 = vld [vmem:[#allocation32_spill] sm:$0xff] }
 0x35e   :  { %3005 = vpow2.f32 %v2845_v14  ;;  %1288 = vmatpush.msra.mxu1 %v8719_v60 }
 0x35f   :  { %v1053_v17 = vpop.f32.mrf.mxu3 }
 0x360   :  { %v1054_v12 = vadd.f32 %v1053_v17, %v8716_v19  ;;  %1289 = vmatpush.msra.mxu1 %v8720_v39  ;;  %v1073_v19 = vpop.f32.mrf.mxu0 }
 0x362   :  { %v1096_v38 = vadd.f32 %v1054_v12, %v994_v28  ;;  %1290 = vmatpush.msra.mxu1 %v8721_v29  ;;  %v8722_v29 = vld [vmem:[#allocation49_spill] sm:$0xff] }
 0x363   :  { %v3004_v16 = vpop.eup %3003  ;;  %v1074_v41 = vadd.f32 %v1073_v19, %v8722_v29 }
 0x364   :  { %v1080_v22 = vadd.f32 1.0, %v3004_v16  ;;  %v2827_v33 = vmul.f32 -1.442695, %v1096_v38  ;;  %v3006_v23 = vpop.eup %3005 }
 0x365   :  { %v5891_v14 = vadd.f32 1.0, %v3006_v23  ;;  %v1013_v23 = vpop.f32.mrf.mxu1 }
 0x366   :  { %3007 = vrcp.f32 %v1080_v22  ;;  %v1092_v45 = vand.u32 2147483648, %v1080_v22  ;;  %v1090_v16 = vand.u32 2147483647, %v1080_v22  ;;  %vm1086_vm9 = vweird.f32 %v1080_v22 }
 0x367   :  { %3009 = vpow2.f32 %v2827_v33  ;;  %v1014_v24 = vadd.f32 %v1013_v23, %v8723_v20  ;;  %vm1233_vm1 = vweird.f32 %v5891_v14 }
 0x368   :  { %3011 = vrcp.f32 %v5891_v14  ;;  %v1093_v33 = vor.u32 1.1754944e-38, %v1092_v45  ;;  %vm1091_vm11 = vcmp.eq.f32.partialorder %v1090_v16, 8.507059e+37 }
 0x36c   :  { %v3008_v17 = vpop.eup %3007 }
 0x36d   :  { %v1082_v28 = vmul.f32 %v3008_v17, %v1080_v22  ;;  %v3010_v12 = vpop.eup %3009  ;;  %vm1087_vm8 = vweird.f32 %v3008_v17 }
 0x36e   :  { %v1100_v18 = vadd.f32 1.0, %v3010_v12  ;;  %v3012_v60 = vpop.eup %3011  ;;  %vm1088_vm10 = vmor %vm1086_vm9, %vm1087_vm8  ;;  %v1244_v12 = vrot.slane %v5877_v58, 2 }
 0x36f   :  { %v1083_v13 = vsub.f32 1.0, %v1082_v28  ;;  %v1229_v47 = vmul.f32 %v3012_v60, %v5891_v14  ;;  %vm1234_vm0 = vweird.f32 %v3012_v60 }
 0x370   :  { %3013 = vrcp.f32 %v1100_v18  ;;  %v1112_v19 = vand.u32 2147483648, %v1100_v18  ;;  %vm1106_vm13 = vweird.f32 %v1100_v18  ;;  %vm1235_vm2 = vmor %vm1233_vm1, %vm1234_vm0 }
 0x371   :  { %v1084_v38 = vmul.f32 %v3008_v17, %v1083_v13  ;;  %v1230_v10 = vsub.f32 1.0, %v1229_v47 }
 0x373   :  { %v1085_v39 = vadd.f32 %v3008_v17, %v1084_v38  ;;  %v8724_v38 = vld [vmem:[#allocation54_spill] sm:$0xff] }
 0x375   :  { %v1089_v15 = vsel %vm1088_vm10, %v3008_v17, %v1085_v39  ;;  %v1231_v39 = vmul.f32 %v3012_v60, %v1230_v10 }
 0x376   :  { %v1094_v28 = vsel %vm1091_vm11, %v1093_v33, %v1089_v15  ;;  %v3014_v13 = vpop.eup %3013  ;;  %v1110_v15 = vand.u32 2147483647, %v1100_v18 }
 0x377   :  { %v1116_v48 = vmul.f32 %v1094_v28, %v1074_v41  ;;  %v1200_v62 = vpop.f32.mrf.mxu3  ;;  %v1102_v11 = vmul.f32 %v3014_v13, %v1100_v18  ;;  %vm1107_vm12 = vweird.f32 %v3014_v13  ;;  %v1113_v41 = vor.u32 1.1754944e-38, %v1112_v19 }
 0x378   :  { %v1201_v22 = vadd.f32 %v1200_v62, %v8724_v38  ;;  %vm1108_vm14 = vmor %vm1106_vm13, %vm1107_vm12  ;;  %vm1111_vm15 = vcmp.eq.f32.partialorder %v1110_v15, 8.507059e+37  ;;  %v1232_v62 = vadd.f32 %v3012_v60, %v1231_v39  ;;  %v5925_v15 = vld [vmem:[%s8186_s5 + $0x158] sm:$0xff] }
 0x379   :  { %v1117_v57 = vadd.f32 %v1116_v48, %v1014_v24  ;;  %v1103_v45 = vsub.f32 1.0, %v1102_v11  ;;  %v1239_v11 = vand.u32 2147483648, %v5891_v14  ;;  %v1237_v24 = vand.u32 2147483647, %v5891_v14  ;;  %v5931_v39 = vld [vmem:[%s8185_s3 + $0x158] sm:$0xff] }
 0x37a   :  { %v1246_v8 = vadd.f32 %v1244_v12, %v1201_v22  ;;  %v1236_v18 = vsel %vm1235_vm2, %v3012_v60, %v1232_v62  ;;  %v5949_v62 = vld [vmem:[%s8186_s5 + $0x128] sm:$0xff] }
 0x37b   :  { %3015 = vtanh.f32 %v1117_v57  ;;  %v1104_v17 = vmul.f32 %v3014_v13, %v1103_v45  ;;  %v1240_v22 = vor.u32 1.1754944e-38, %v1239_v11  ;;  %vm1238_vm3 = vcmp.eq.f32.partialorder %v1237_v24, 8.507059e+37  ;;  %v5961_v24 = vld [vmem:[%s8186_s5 + $0x110] sm:$0xff] }
 0x37c   :  { %v2846_v16 = vmul.f32 -1.442695, %v1246_v8 }
 0x37d   :  { %v1105_v33 = vadd.f32 %v3014_v13, %v1104_v17  ;;  %v1241_v19 = vsel %vm1238_vm3, %v1240_v22, %v1236_v18  ;;  %v5912_v17 = vld [vmem:[%s8186_s5 + $0x170] sm:$0xff]  ;;  %v5973_v18 = vld [vmem:[%s8186_s5 + $0xf8] sm:$0xff] }
 0x37e   :  { %3017 = vpow2.f32 %v2846_v16  ;;  %v1267_v16 = vrot.slane %v5877_v58, 4  ;;  %v5943_v58 = vld [vmem:[%s8185_s3 + $0x140] sm:$0xff] }
 0x37f   :  { %v1109_v23 = vsel %vm1108_vm14, %v3014_v13, %v1105_v33  ;;  %v1220_v13 = vpop.f32.mrf.mxu0 }
 0x380   :  { %v1114_v48 = vsel %vm1111_vm15, %v1113_v41, %v1109_v23  ;;  %v1221_v14 = vadd.f32 %v1220_v13, %v8655_v1  ;;  %v5937_v41 = vld [vmem:[%s8186_s5 + $0x140] sm:$0xff]  ;;  %v5979_v13 = vld [vmem:[%s8185_s3 + $0xf8] sm:$0xff] }
 0x381   :  { %v3016_v28 = vpop.eup %3015  ;;  %v1119_v57 = vsub.f32 1.0, %v1114_v48  ;;  %v1121_v8 = vmul.f32 %v1114_v48, %v5447_v0  ;;  %v5918_v0 = vld [vmem:[%s8185_s3 + $0x170] sm:$0xff]  ;;  %v5955_v48 = vld [vmem:[%s8185_s3 + $0x128] sm:$0xff] }
 0x382   :  { %v1266_v60 = vmul.f32 %v1241_v19, %v1221_v14  ;;  %v5985_v14 = vld [vmem:[%s8186_s5 + $0xe0] sm:$0xff] }
 0x383   :  { %v1120_v10 = vmul.f32 %v3016_v28, %v1119_v57 }
 0x384   :  { %v3018_v47 = vpop.eup %3017  ;;  %v1269_v28 = vadd.f32 %v1267_v16, %v1266_v60  ;;  %v5991_v60 = vld [vmem:[%s8185_s3 + $0xe0] sm:$0xff] }
 0x385   :  { %v1250_v12 = vadd.f32 1.0, %v3018_v47  ;;  %v5904_v45 = vadd.f32 %v1121_v8, %v1120_v10  ;;  %v5967_v47 = vld [vmem:[%s8185_s3 + $0x110] sm:$0xff] }
 0x387   :  { %3019 = vrcp.f32 %v1250_v12  ;;  %1156 = vmatmul.f32.vlgmr.msrb.gmra.mxu1 %v5904_v45  ;;  %1351 = vmatmul.f32.vlgmr.msrb.gmra.mxu0 %v5904_v45  ;;  %v1262_v57 = vand.u32 2147483648, %v1250_v12  ;;  %v1260_v8 = vand.u32 2147483647, %v1250_v12  ;;  %vm1256_vm5 = vweird.f32 %v1250_v12 }
 0x388   :  { %1355 = vmatpush.msrb.mxu1 %v5912_v17  ;;  %1614 = vmatpush.msrb.mxu0 %v5918_v0  ;;  %3021 = vtanh.f32 %v1269_v28  ;;  %v6003_v28 = vld [vmem:[%s8185_s3 + $0xc8] sm:$0xff] }
 0x389   :  { %v1263_v19 = vor.u32 1.1754944e-38, %v1262_v57  ;;  %vm1261_vm7 = vcmp.eq.f32.partialorder %v1260_v8, 8.507059e+37  ;;  %8725 = vst [vmem:[#allocation12_spill] sm:$0xff] %v6003_v28 }
 0x38a   :  { %1356 = vmatpush.msrb.mxu1 %v5925_v15  ;;  %1615 = vmatpush.msrb.mxu0 %v5931_v39 }
 0x38c   :  { %1357 = vmatpush.msrb.mxu1 %v5937_v41  ;;  %1616 = vmatpush.msrb.mxu0 %v5943_v58 }
 0x38d   :  { %v3020_v33 = vpop.eup %3019 }
 0x38e   :  { %v1252_v23 = vmul.f32 %v3020_v33, %v1250_v12  ;;  %1358 = vmatpush.msrb.mxu1 %v5949_v62  ;;  %1617 = vmatpush.msrb.mxu0 %v5955_v48  ;;  %vm1257_vm4 = vweird.f32 %v3020_v33  ;;  %v5997_v12 = vld [vmem:[%s8186_s5 + $0xc8] sm:$0xff]  ;;  %v3022_v57 = vpop.eup %3021 }
 0x38f   :  { %vm1258_vm6 = vmor %vm1256_vm5, %vm1257_vm4 }
 0x390   :  { %v1253_v11 = vsub.f32 1.0, %v1252_v23  ;;  %1359 = vmatpush.msrb.mxu1 %v5961_v24  ;;  %1618 = vmatpush.msrb.mxu0 %v5967_v47 }
 0x392   :  { %v1254_v10 = vmul.f32 %v3020_v33, %v1253_v11  ;;  %1360 = vmatpush.msrb.mxu1 %v5973_v18  ;;  %1619 = vmatpush.msrb.mxu0 %v5979_v13 }
 0x394   :  { %v1255_v22 = vadd.f32 %v3020_v33, %v1254_v10  ;;  %1361 = vmatpush.msrb.mxu1 %v5985_v14  ;;  %1620 = vmatpush.msrb.mxu0 %v5991_v60  ;;  %v8727_v10 = vld [vmem:[#allocation81_spill] sm:$0xff] }
 0x396   :  { %v1259_v16 = vsel %vm1258_vm6, %v3020_v33, %v1255_v22  ;;  %1362 = vmatpush.msrb.mxu1 %v5997_v12  ;;  %1621 = vmatpush.msrb.mxu0 %v6003_v28  ;;  %v6009_v33 = vld [vmem:[%s8186_s5 + $0xb0] sm:$0xff] }
 0x397   :  { %v1264_v23 = vsel %vm1261_vm7, %v1263_v19, %v1259_v16  ;;  %8726 = vst [vmem:[#allocation11_spill] sm:$0xff] %v6009_v33  ;;  %v6017_v19 = vld [vmem:[%s8186_s5 + $0x98] sm:$0xff] }
 0x398   :  { %v1271_v11 = vsub.f32 1.0, %v1264_v23  ;;  %1363 = vmatpush.msrb.mxu1 %v6009_v33  ;;  %1622 = vmatpush.msrb.mxu0 %v8727_v10  ;;  %v1273_v22 = vmul.f32 %v1264_v23, %v5629_v63  ;;  %v8728_v16 = vld [vmem:[#allocation82_spill] sm:$0xff]  ;;  %v6036_v63 = vld [vmem:[%s8186_s5 + $0x68] sm:$0xff]  ;;  %v6044_v23 = vld [vmem:[%s8186_s5 + $0x50] sm:$0xff] }
 0x399   :  { %v6026_v33 = vld [vmem:[%s8186_s5 + $0x80] sm:$0xff]  ;;  %v6052_v10 = vld [vmem:[%s8186_s5 + $0x38] sm:$0xff] }
 0x39a   :  { %v1272_v8 = vmul.f32 %v3022_v57, %v1271_v11  ;;  %1364 = vmatpush.msrb.mxu1 %v6017_v19  ;;  %1623 = vmatpush.msrb.mxu0 %v8728_v16  ;;  %v8729_v11 = vld [vmem:[#allocation83_spill] sm:$0xff]  ;;  %v8730_v57 = vld [vmem:[#allocation84_spill] sm:$0xff]  ;;  %v6085_v16 = vld [vmem:[%s8184_s1 + $0x158] sm:$0xff] }
 0x39c   :  { %v6021_v28 = vadd.f32 %v1273_v22, %v1272_v8  ;;  %1365 = vmatpush.msrb.mxu1 %v6026_v33  ;;  %1624 = vmatpush.msrb.mxu0 %v8729_v11  ;;  %v8731_v8 = vld [vmem:[#allocation85_spill] sm:$0xff]  ;;  %v8732_v22 = vld [vmem:[#allocation86_spill] sm:$0xff] }
 0x39d   :  { %v6094_v11 = vld [vmem:[%s8184_s1 + $0x140] sm:$0xff] }
 0x39e   :  { %1291 = vmatmul.f32.vlgmr.msra.gmra.mxu1 %v6021_v28  ;;  %1311 = vmatmul.f32.vlgmr.msra.gmra.mxu2 %v6021_v28 }
 0x39f   :  { %1331 = vmatmul.f32.vlgmr.msra.gmra.mxu3 %v6021_v28  ;;  %1366 = vmatpush.msrb.mxu1 %v6036_v63 }
 0x3a0   :  { %1498 = vmatmul.f32.vlgmr.msra.gmra.mxu0 %v6021_v28  ;;  %1522 = vmatpush.msra.mxu2 %v5347_v44  ;;  %v6060_v44 = vld [vmem:[%s8186_s5 + $0x20] sm:$0xff] }
 0x3a1   :  { %1367 = vmatpush.msrb.mxu1 %v6044_v23  ;;  %1625 = vmatpush.msrb.mxu0 %v8730_v57  ;;  %v8752_v57 = vld [vmem:[#allocation75_spill] sm:$0xff] }
 0x3a2   :  { %1523 = vmatpush.msra.mxu2 %v5353_v61  ;;  %v6068_v61 = vld [vmem:[%s8186_s5 + $0x8] sm:$0xff] }
 0x3a3   :  { %1368 = vmatpush.msrb.mxu1 %v6052_v10  ;;  %1626 = vmatpush.msrb.mxu0 %v8731_v8  ;;  %v6251_v8 = vld [vmem:[%s8185_s3 + $0xe8] sm:$0xff] }
 0x3a4   :  { %1524 = vmatpush.msra.mxu2 %v5359_v52  ;;  %v6077_v52 = vld [vmem:[%s8184_s1 + $0x170] sm:$0xff]  ;;  %8753 = vst [vmem:[#allocation23_spill] sm:$0xff] %v6251_v8 }
 0x3a5   :  { %1369 = vmatpush.msrb.mxu1 %v6060_v44  ;;  %1627 = vmatpush.msrb.mxu0 %v8732_v22  ;;  %v8754_v22 = vld [vmem:[#allocation76_spill] sm:$0xff] }
 0x3a6   :  { %1525 = vmatpush.msra.mxu2 %v5365_v54  ;;  %v8733_v54 = vld [vmem:[#allocation87_spill] sm:$0xff] }
 0x3a7   :  { %1370 = vmatpush.msrb.mxu1 %v6068_v61  ;;  %1391 = vmatmul.f32.vlgmr.msrb.gmra.mxu2 %v5904_v45 }
 0x3a8   :  { %1526 = vmatpush.msra.mxu2 %v5371_v34  ;;  %1371 = vmatmul.f32.vlgmr.msrb.gmra.mxu1 %v5904_v45  ;;  %v8734_v34 = vld [vmem:[#allocation88_spill] sm:$0xff] }
 0x3a9   :  { %1502 = vmatpush.msra.mxu1 %v6077_v52  ;;  %1628 = vmatpush.msrb.mxu0 %v8733_v54  ;;  %v6258_v54 = vld [vmem:[%s8185_s3 + $0xd0] sm:$0xff] }
 0x3aa   :  { %1527 = vmatpush.msra.mxu2 %v5377_v30  ;;  %v6102_v30 = vld [vmem:[%s8184_s1 + $0x128] sm:$0xff]  ;;  %8755 = vst [vmem:[#allocation48_spill] sm:$0xff] %v6258_v54 }
 0x3ab   :  { %1503 = vmatpush.msra.mxu1 %v6085_v16  ;;  %1629 = vmatpush.msrb.mxu0 %v8734_v34  ;;  %v8756_v34 = vld [vmem:[#allocation77_spill] sm:$0xff] }
 0x3ac   :  { %1528 = vmatpush.msra.mxu2 %v5383_v59  ;;  %v6110_v59 = vld [vmem:[%s8184_s1 + $0x110] sm:$0xff] }
 0x3ad   :  { %1694 = vmatpush.msra.mxu0 %v5646_v27  ;;  %1504 = vmatpush.msra.mxu1 %v6094_v11  ;;  %v6175_v27 = vld [vmem:[%s8184_s1 + $0x50] sm:$0xff] }
 0x3ae   :  { %1529 = vmatpush.msra.mxu2 %v5391_v50  ;;  %v6118_v50 = vld [vmem:[%s8184_s1 + $0xf8] sm:$0xff] }
 0x3af   :  { %1695 = vmatpush.msra.mxu0 %v5657_v4  ;;  %1505 = vmatpush.msra.mxu1 %v6102_v30  ;;  %v6183_v4 = vld [vmem:[%s8184_s1 + $0x38] sm:$0xff] }
 0x3b0   :  { %1530 = vmatpush.msra.mxu2 %v5397_v21  ;;  %v6126_v21 = vld [vmem:[%s8184_s1 + $0xe0] sm:$0xff] }
 0x3b1   :  { %1696 = vmatpush.msra.mxu0 %v5665_v46  ;;  %1506 = vmatpush.msra.mxu1 %v6110_v59  ;;  %v6199_v46 = vld [vmem:[%s8184_s1 + $0x8] sm:$0xff] }
 0x3b2   :  { %1531 = vmatpush.msra.mxu2 %v5405_v2  ;;  %v6134_v2 = vld [vmem:[%s8184_s1 + $0xc8] sm:$0xff]  ;;  %8737 = vst [vmem:[#allocation14_spill] sm:$0xff] %v6199_v46 }
 0x3b3   :  { %1697 = vmatpush.msra.mxu0 %v5680_v42  ;;  %1507 = vmatpush.msra.mxu1 %v6118_v50  ;;  %v6207_v42 = vld [vmem:[%s8185_s3 + $0x178] sm:$0xff] }
 0x3b4   :  { %1532 = vmatpush.msra.mxu2 %v5411_v37  ;;  %v6142_v37 = vld [vmem:[%s8184_s1 + $0xb0] sm:$0xff]  ;;  %8739 = vst [vmem:[#allocation15_spill] sm:$0xff] %v6207_v42 }
 0x3b5   :  { %1698 = vmatpush.msra.mxu0 %v5688_v7  ;;  %1508 = vmatpush.msra.mxu1 %v6126_v21  ;;  %v8741_v7 = vld [vmem:[#allocation70_spill] sm:$0xff] }
 0x3b6   :  { %1533 = vmatpush.msra.mxu2 %v5417_v36  ;;  %v6150_v36 = vld [vmem:[%s8184_s1 + $0x98] sm:$0xff] }
 0x3b7   :  { %1699 = vmatpush.msra.mxu0 %v5696_v51  ;;  %1509 = vmatpush.msra.mxu1 %v6134_v2  ;;  %v6215_v51 = vld [vmem:[%s8185_s3 + $0x160] sm:$0xff] }
 0x3b8   :  { %1534 = vmatpush.msra.mxu2 %v5423_v55  ;;  %v6158_v55 = vld [vmem:[%s8184_s1 + $0x80] sm:$0xff]  ;;  %8742 = vst [vmem:[#allocation16_spill] sm:$0xff] %v6215_v51 }
 0x3b9   :  { %1700 = vmatpush.msra.mxu0 %v5704_v9  ;;  %1510 = vmatpush.msra.mxu1 %v6142_v37  ;;  %v8743_v9 = vld [vmem:[#allocation7_spill] sm:$0xff] }
 0x3ba   :  { %1535 = vmatpush.msra.mxu2 %v5429_v49  ;;  %v6166_v49 = vld [vmem:[%s8184_s1 + $0x68] sm:$0xff] }
 0x3bb   :  { %1701 = vmatpush.msra.mxu0 %v5712_v56  ;;  %1511 = vmatpush.msra.mxu1 %v6150_v36  ;;  %v8744_v56 = vld [vmem:[#allocation71_spill] sm:$0xff] }
 0x3bc   :  { %1536 = vmatpush.msra.mxu2 %v8671_v53  ;;  %v8750_v53 = vld [vmem:[#allocation74_spill] sm:$0xff] }
 0x3bd   :  { %1702 = vmatpush.msra.mxu0 %v5720_v32  ;;  %1512 = vmatpush.msra.mxu1 %v6158_v55  ;;  %v6223_v32 = vld [vmem:[%s8185_s3 + $0x148] sm:$0xff] }
 0x3be   :  { %1537 = vmatpush.msra.mxu2 %v8674_v43  ;;  %8745 = vst [vmem:[#allocation35_spill] sm:$0xff] %v6223_v32  ;;  %v6244_v43 = vld [vmem:[%s8185_s3 + $0x100] sm:$0xff] }
 0x3bf   :  { %1703 = vmatpush.msra.mxu0 %v5728_v25  ;;  %1513 = vmatpush.msra.mxu1 %v6166_v49  ;;  %v8746_v25 = vld [vmem:[#allocation72_spill] sm:$0xff]  ;;  %8751 = vst [vmem:[#allocation44_spill] sm:$0xff] %v6244_v43 }
 0x3c0   :  { %1538 = vmatmul.f32.vlgmr.msra.gmra.mxu2 %v6021_v28 }
 0x3c1   :  { %1654 = vmatpush.msrb.mxu2 %v5453_v40  ;;  %1704 = vmatpush.msra.mxu0 %v5736_v35  ;;  %v6191_v40 = vld [vmem:[%s8184_s1 + $0x20] sm:$0xff]  ;;  %v6230_v35 = vld [vmem:[%s8185_s3 + $0x130] sm:$0xff] }
 0x3c2   :  { %1514 = vmatpush.msra.mxu1 %v6175_v27  ;;  %8735 = vst [vmem:[#allocation13_spill] sm:$0xff] %v6191_v40 }
 0x3c3   :  { %1655 = vmatpush.msrb.mxu2 %v5459_v26  ;;  %1705 = vmatpush.msra.mxu0 %v5744_v5  ;;  %v8736_v26 = vld [vmem:[#allocation55_spill] sm:$0xff]  ;;  %8747 = vst [vmem:[#allocation19_spill] sm:$0xff] %v6230_v35  ;;  %v8748_v5 = vld [vmem:[#allocation73_spill] sm:$0xff] }
 0x3c4   :  { %1515 = vmatpush.msra.mxu1 %v6183_v4 }
 0x3c5   :  { %1656 = vmatpush.msrb.mxu2 %v5465_v3  ;;  %1706 = vmatpush.msra.mxu0 %v5752_v31  ;;  %v8738_v3 = vld [vmem:[#allocation69_spill] sm:$0xff] }
 0x3c6   :  { %1516 = vmatpush.msra.mxu1 %v6191_v40  ;;  %v6237_v31 = vld [vmem:[%s8185_s3 + $0x118] sm:$0xff] }
 0x3c7   :  { %1657 = vmatpush.msrb.mxu2 %v5471_v6  ;;  %1707 = vmatpush.msra.mxu0 %v8736_v26  ;;  %v8740_v6 = vld [vmem:[#allocation8_spill] sm:$0xff]  ;;  %8749 = vst [vmem:[#allocation41_spill] sm:$0xff] %v6237_v31  ;;  %v6265_v26 = vld [vmem:[%s8185_s3 + $0xb8] sm:$0xff] }
 0x3c8   :  { %1517 = vmatpush.msra.mxu1 %v6199_v46  ;;  %8757 = vst [vmem:[#allocation67_spill] sm:$0xff] %v6265_v26 }
 0x3c9   :  { %1518 = vmatmul.f32.vlgmr.msra.gmra.mxu1 %v6021_v28  ;;  %1658 = vmatpush.msrb.mxu2 %v8738_v3  ;;  %v8758_v3 = vld [vmem:[#allocation78_spill] sm:$0xff] }
 0x3ca   :  { %1634 = vmatpush.msrb.mxu1 %v6207_v42  ;;  %1708 = vmatpush.msra.mxu0 %v8740_v6  ;;  %v6272_v6 = vld [vmem:[%s8185_s3 + $0xa0] sm:$0xff] }
 0x3cb   :  { %1659 = vmatpush.msrb.mxu2 %v8741_v7  ;;  %8759 = vst [vmem:[#allocation28_spill] sm:$0xff] %v6272_v6  ;;  %v8760_v7 = vld [vmem:[#allocation79_spill] sm:$0xff] }
 0x3cc   :  { %1635 = vmatpush.msrb.mxu1 %v6215_v51  ;;  %1709 = vmatpush.msra.mxu0 %v8743_v9  ;;  %v6279_v9 = vld [vmem:[%s8185_s3 + $0x88] sm:$0xff] }
 0x3cd   :  { %1660 = vmatpush.msrb.mxu2 %v8744_v56  ;;  %8761 = vst [vmem:[#allocation68_spill] sm:$0xff] %v6279_v9  ;;  %v8762_v56 = vld [vmem:[#allocation80_spill] sm:$0xff] }
 0x3ce   :  { %1636 = vmatpush.msrb.mxu1 %v6223_v32 }
 0x3cf   :  { %1661 = vmatpush.msrb.mxu2 %v8746_v25  ;;  %v6286_v25 = vld [vmem:[%s8184_s1 + $0x168] sm:$0xff] }
 0x3d0   :  { %1637 = vmatpush.msrb.mxu1 %v6230_v35  ;;  %8763 = vst [vmem:[#allocation30_spill] sm:$0xff] %v6286_v25 }
 0x3d1   :  { %1662 = vmatpush.msrb.mxu2 %v8748_v5  ;;  %v6292_v5 = vld [vmem:[%s8185_s3 + $0x70] sm:$0xff] }
 0x3d2   :  { %1638 = vmatpush.msrb.mxu1 %v6237_v31  ;;  %8764 = vst [vmem:[#allocation34_spill] sm:$0xff] %v6292_v5 }
 0x3d3   :  { %1663 = vmatpush.msrb.mxu2 %v8750_v53  ;;  %v6298_v53 = vld [vmem:[%s8184_s1 + $0x150] sm:$0xff] }
 0x3d4   :  { %1639 = vmatpush.msrb.mxu1 %v6244_v43  ;;  %8765 = vst [vmem:[#allocation38_spill] sm:$0xff] %v6298_v53 }
 0x3d5   :  { %1664 = vmatpush.msrb.mxu2 %v8752_v57  ;;  %v6304_v57 = vld [vmem:[%s8185_s3 + $0x58] sm:$0xff] }
 0x3d6   :  { %1640 = vmatpush.msrb.mxu1 %v6251_v8  ;;  %8766 = vst [vmem:[#allocation40_spill] sm:$0xff] %v6304_v57 }
 0x3d7   :  { %1665 = vmatpush.msrb.mxu2 %v8754_v22  ;;  %v6310_v22 = vld [vmem:[%s8184_s1 + $0x138] sm:$0xff] }
 0x3d8   :  { %1641 = vmatpush.msrb.mxu1 %v6258_v54  ;;  %8767 = vst [vmem:[#allocation42_spill] sm:$0xff] %v6310_v22 }
 0x3d9   :  { %1666 = vmatpush.msrb.mxu2 %v8756_v34  ;;  %v6316_v34 = vld [vmem:[%s8185_s3 + $0x40] sm:$0xff] }
 0x3da   :  { %1642 = vmatpush.msrb.mxu1 %v6265_v26  ;;  %8768 = vst [vmem:[#allocation56_spill] sm:$0xff] %v6316_v34 }
 0x3db   :  { %1667 = vmatpush.msrb.mxu2 %v8758_v3  ;;  %v6322_v3 = vld [vmem:[%s8184_s1 + $0x120] sm:$0xff] }
 0x3dc   :  { %1643 = vmatpush.msrb.mxu1 %v6272_v6  ;;  %8769 = vst [vmem:[#allocation57_spill] sm:$0xff] %v6322_v3 }
 0x3dd   :  { %1668 = vmatpush.msrb.mxu2 %v8760_v7  ;;  %v6328_v7 = vld [vmem:[%s8185_s3 + $0x28] sm:$0xff] }
 0x3de   :  { %1644 = vmatpush.msrb.mxu1 %v6279_v9  ;;  %8770 = vst [vmem:[#allocation58_spill] sm:$0xff] %v6328_v7  ;;  %v6514_v9 = vld [vmem:[%s8185_s3 + $0xa8] sm:$0xff] }
 0x3df   :  { %1669 = vmatpush.msrb.mxu2 %v8762_v56  ;;  %v2864_v56 = vld [vmem:[%s8190_s7 + $0x1f8] sm:$0xff]  ;;  %8797 = vst [vmem:[#allocation37_spill] sm:$0xff] %v6514_v9 }
 0x3e0   :  { %1645 = vmatpush.msrb.mxu1 %v6292_v5  ;;  %1459 = vmatpush.msrb.mxu3 %v2864_v56  ;;  %v6355_v56 = vld [vmem:[%s8184_s1 + $0xf0] sm:$0xff]  ;;  %v6508_v5 = vld [vmem:[%s8185_s3 + $0xc0] sm:$0xff] }
 0x3e1   :  { %1801 = vmatpush.msra.mxu2 %v6286_v25  ;;  %v6349_v25 = vld [vmem:[%s8185_s3 + $0x10] sm:$0xff]  ;;  %8773 = vst [vmem:[#allocation61_spill] sm:$0xff] %v6355_v56 }
 0x3e2   :  { %1646 = vmatpush.msrb.mxu1 %v6304_v57  ;;  %8772 = vst [vmem:[#allocation60_spill] sm:$0xff] %v6349_v25 }
 0x3e3   :  { %1802 = vmatpush.msra.mxu2 %v6298_v53  ;;  %v2862_v53 = vld [vmem:[%s8190_s7 + $0x1e8] sm:$0xff]  ;;  %8796 = vst [vmem:[#allocation17_spill] sm:$0xff] %v6508_v5 }
 0x3e4   :  { %1647 = vmatpush.msrb.mxu1 %v6316_v34 }
 0x3e5   :  { %1803 = vmatpush.msra.mxu2 %v6310_v22  ;;  %v2863_v22 = vld [vmem:[%s8190_s7 + $0x1f0] sm:$0xff] }
 0x3e6   :  { %1648 = vmatpush.msrb.mxu1 %v6328_v7  ;;  %1460 = vmatpush.msrb.mxu3 %v2863_v22  ;;  %v6364_v7 = vld [vmem:[%s8184_s1 + $0xd8] sm:$0xff] }
 0x3e7   :  { %1804 = vmatpush.msra.mxu2 %v6322_v3  ;;  %v6340_v3 = vld [vmem:[%s8184_s1 + $0x108] sm:$0xff]  ;;  %8774 = vst [vmem:[#allocation62_spill] sm:$0xff] %v6364_v7  ;;  %v2860_v22 = vld [vmem:[%s8190_s7 + $0x1d8] sm:$0xff] }
 0x3e8   :  { %8771 = vst [vmem:[#allocation59_spill] sm:$0xff] %v6340_v3  ;;  %1649 = vmatpush.msrb.mxu1 %v6349_v25  ;;  %1461 = vmatpush.msrb.mxu3 %v2862_v53  ;;  %v2859_v53 = vld [vmem:[%s8190_s7 + $0x1d0] sm:$0xff] }
 0x3e9   :  { %1805 = vmatpush.msra.mxu2 %v6340_v3  ;;  %v2861_v3 = vld [vmem:[%s8190_s7 + $0x1e0] sm:$0xff]  ;;  %v8785_v25 = vld [vmem:[#allocation9_spill] sm:$0xff] }
 0x3ea   :  { %1462 = vmatpush.msrb.mxu3 %v2861_v3  ;;  %v2858_v3 = vld [vmem:[%s8190_s7 + $0x1c8] sm:$0xff] }
 0x3eb   :  { %1806 = vmatpush.msra.mxu2 %v6355_v56  ;;  %v6373_v56 = vld [vmem:[%s8184_s1 + $0xc0] sm:$0xff] }
 0x3ec   :  { %8775 = vst [vmem:[#allocation63_spill] sm:$0xff] %v6373_v56  ;;  %1463 = vmatpush.msrb.mxu3 %v2860_v22  ;;  %v6397_v22 = vld [vmem:[%s8184_s1 + $0x78] sm:$0xff] }
 0x3ed   :  { %1807 = vmatpush.msra.mxu2 %v6364_v7  ;;  %v6382_v7 = vld [vmem:[%s8184_s1 + $0xa8] sm:$0xff]  ;;  %8778 = vst [vmem:[#allocation66_spill] sm:$0xff] %v6397_v22 }
 0x3ee   :  { %8776 = vst [vmem:[#allocation64_spill] sm:$0xff] %v6382_v7  ;;  %1464 = vmatpush.msrb.mxu3 %v2859_v53  ;;  %v6409_v53 = vld [vmem:[%s8184_s1 + $0x48] sm:$0xff] }
 0x3ef   :  { %1808 = vmatpush.msra.mxu2 %v6373_v56  ;;  %v6391_v56 = vld [vmem:[%s8184_s1 + $0x90] sm:$0xff]  ;;  %8780 = vst [vmem:[#allocation18_spill] sm:$0xff] %v6409_v53 }
 0x3f0   :  { %8777 = vst [vmem:[#allocation65_spill] sm:$0xff] %v6391_v56  ;;  %1465 = vmatpush.msrb.mxu3 %v2858_v3  ;;  %v6415_v3 = vld [vmem:[%s8184_s1 + $0x30] sm:$0xff] }
 0x3f1   :  { %1809 = vmatpush.msra.mxu2 %v6382_v7  ;;  %v6403_v7 = vld [vmem:[%s8184_s1 + $0x60] sm:$0xff]  ;;  %8781 = vst [vmem:[#allocation39_spill] sm:$0xff] %v6415_v3 }
 0x3f2   :  { %8779 = vst [vmem:[#allocation33_spill] sm:$0xff] %v6403_v7 }
 0x3f3   :  { %1810 = vmatpush.msra.mxu2 %v6391_v56  ;;  %v8784_v56 = vld [vmem:[#allocation89_spill] sm:$0xff] }
 0x3f4   :  { %v840_v34 = vadd.f32 %v8785_v25, %v8784_v56  ;;  %v2850_v25 = vld [vmem:[%s8190_s7 + $0x188] sm:$0xff]  ;;  %v6470_v56 = vld [vmem:[%s8185_s3 + $0x150] sm:$0xff] }
 0x3f5   :  { %1811 = vmatpush.msra.mxu2 %v6397_v22  ;;  %v6421_v22 = vld [vmem:[%s8184_s1 + $0x18] sm:$0xff]  ;;  %8788 = vst [vmem:[#allocation51_spill] sm:$0xff] %v6470_v56 }
 0x3f6   :  { %8782 = vst [vmem:[#allocation43_spill] sm:$0xff] %v6421_v22 }
 0x3f7   :  { %1812 = vmatpush.msra.mxu2 %v6403_v7  ;;  %v2857_v7 = vld [vmem:[%s8190_s7 + $0x1c0] sm:$0xff] }
 0x3f8   :  { %1466 = vmatpush.msrb.mxu3 %v2857_v7  ;;  %v2854_v7 = vld [vmem:[%s8190_s7 + $0x1a8] sm:$0xff] }
 0x3f9   :  { %1813 = vmatpush.msra.mxu2 %v6409_v53  ;;  %v6430_v53 = vld [vmem:[%s8184_s1] sm:$0xff] }
 0x3fa   :  { %8783 = vst [vmem:[#allocation22_spill] sm:$0xff] %v6430_v53 }
 0x3fb   :  { %1814 = vmatpush.msra.mxu2 %v6415_v3  ;;  %v2856_v3 = vld [vmem:[%s8190_s7 + $0x1b8] sm:$0xff] }
 0x3fc   :  { %1467 = vmatpush.msrb.mxu3 %v2856_v3 }
 0x3fd   :  { %1815 = vmatpush.msra.mxu2 %v6421_v22  ;;  %v2855_v22 = vld [vmem:[%s8190_s7 + $0x1b0] sm:$0xff] }
 0x3fe   :  { %1468 = vmatpush.msrb.mxu3 %v2855_v22  ;;  %v2852_v22 = vld [vmem:[%s8190_s7 + $0x198] sm:$0xff] }
 0x3ff   :  { %1816 = vmatpush.msra.mxu2 %v6430_v53  ;;  %v2853_v53 = vld [vmem:[%s8190_s7 + $0x1a0] sm:$0xff] }
 0x400   :  { %1469 = vmatpush.msrb.mxu3 %v2854_v7  ;;  %v2851_v7 = vld [vmem:[%s8190_s7 + $0x190] sm:$0xff] }
 0x402   :  { %1470 = vmatpush.msrb.mxu3 %v2853_v53  ;;  %v6476_v53 = vld [vmem:[%s8185_s3 + $0x138] sm:$0xff] }
 0x403   :  { %8789 = vst [vmem:[#allocation10_spill] sm:$0xff] %v6476_v53 }
 0x404   :  { %v1157_v57 = vpop.f32.mrf.mxu1  ;;  %1471 = vmatpush.msrb.mxu3 %v2852_v22  ;;  %v6482_v22 = vld [vmem:[%s8185_s3 + $0x120] sm:$0xff] }
 0x405   :  { %v6447_v3 = vadd.f32 %v1157_v57, %v840_v34  ;;  %v2849_v57 = vld [vmem:[%s8190_s7 + $0x180] sm:$0xff]  ;;  %v6464_v34 = vld [vmem:[%s8185_s3 + $0x168] sm:$0xff]  ;;  %8790 = vst [vmem:[#allocation25_spill] sm:$0xff] %v6482_v22 }
 0x406   :  { %1472 = vmatpush.msrb.mxu3 %v2851_v7  ;;  %8787 = vst [vmem:[#allocation26_spill] sm:$0xff] %v6464_v34  ;;  %v6488_v7 = vld [vmem:[%s8185_s3 + $0x108] sm:$0xff] }
 0x407   :  { %8786 = vst [vmem:[#allocation46_spill] sm:$0xff] %v6447_v3  ;;  %v8795_v3 = vld [vmem:[#allocation47_spill] sm:$0xff] }
 0x408   :  { %1473 = vmatpush.msrb.mxu3 %v2850_v25  ;;  %8791 = vst [vmem:[#allocation27_spill] sm:$0xff] %v6488_v7  ;;  %v1352_v25 = vpop.f32.mrf.mxu0 }
 0x40a   :  { %1474 = vmatpush.msrb.mxu3 %v2849_v57  ;;  %v6494_v57 = vld [vmem:[%s8185_s3 + $0xf0] sm:$0xff] }
 0x40b   :  { %8792 = vst [vmem:[#allocation29_spill] sm:$0xff] %v6494_v57 }
 0x40c   :  { %1594 = vmatpush.msra.mxu3 %v6464_v34 }
 0x40e   :  { %1595 = vmatpush.msra.mxu3 %v6470_v56  ;;  %v8794_v56 = vld [vmem:[#allocation4_spill] sm:$0xff] }
 0x40f   :  { %v1353_v34 = vadd.f32 %v1352_v25, %v8794_v56  ;;  %v8803_v56 = vld [vmem:[#allocation6_spill] sm:$0xff] }
 0x410   :  { %1596 = vmatpush.msra.mxu3 %v6476_v53  ;;  %v6500_v53 = vld [vmem:[%s8185_s3 + $0xd8] sm:$0xff] }
 0x411   :  { %8793 = vst [vmem:[#allocation31_spill] sm:$0xff] %v6500_v53 }
 0x412   :  { %1597 = vmatpush.msra.mxu3 %v6482_v22 }
 0x414   :  { %1598 = vmatpush.msra.mxu3 %v6488_v7 }
 0x416   :  { %1599 = vmatpush.msra.mxu3 %v6494_v57 }
 0x418   :  { %1600 = vmatpush.msra.mxu3 %v6500_v53 }
 0x41a   :  { %1601 = vmatpush.msra.mxu3 %v6508_v5  ;;  %v8802_v5 = vld [vmem:[#allocation3_spill] sm:$0xff] }
 0x41b   :  { %v1292_v22 = vpop.f32.mrf.mxu1 }
 0x41c   :  { %v1293_v7 = vadd.f32 %v1292_v22, %v8795_v3  ;;  %1602 = vmatpush.msra.mxu3 %v6514_v9  ;;  %v6520_v22 = vld [vmem:[%s8185_s3 + $0x90] sm:$0xff] }
 0x41d   :  { %v1499_v6 = vpop.f32.mrf.mxu0  ;;  %8798 = vst [vmem:[#allocation20_spill] sm:$0xff] %v6520_v22 }
 0x41e   :  { %v1395_v57 = vadd.f32 %v1353_v34, %v1293_v7  ;;  %1603 = vmatpush.msra.mxu3 %v6520_v22  ;;  %v6526_v34 = vld [vmem:[%s8185_s3 + $0x78] sm:$0xff]  ;;  %v6538_v22 = vld [vmem:[%s8185_s3 + $0x60] sm:$0xff] }
 0x41f   :  { %8799 = vst [vmem:[#allocation21_spill] sm:$0xff] %v6526_v34  ;;  %v8800_v7 = vld [vmem:[#allocation53_spill] sm:$0xff] }
 0x420   :  { %v2847_v53 = vmul.f32 -1.442695, %v1395_v57  ;;  %1604 = vmatpush.msra.mxu3 %v6526_v34  ;;  %v1500_v25 = vadd.f32 %v1499_v6, %v8800_v7  ;;  %v6533_v57 = vld [vmem:[%s8188_s0 + $0x18] sm:$0x3f]  ;;  %8801 = vst [vmem:[#allocation45_spill] sm:$0xff] %v6538_v22  ;;  %v6546_v6 = vld [vmem:[%s8185_s3 + $0x48] sm:$0xff] }
 0x421   :  { %v1312_v9 = vpop.f32.mrf.mxu2  ;;  %8804 = vst [vmem:[#allocation24_spill] sm:$0xff] %v6546_v6 }
 0x422   :  { %3023 = vpow2.f32 %v2847_v53  ;;  %1605 = vmatpush.msra.mxu3 %v6538_v22  ;;  %v1313_v3 = vadd.f32 %v1312_v9, %v8802_v5  ;;  %v1542_v7 = vadd.f32 %v6533_v57, %v1500_v25  ;;  %v6553_v22 = vld [vmem:[%s8185_s3 + $0x30] sm:$0xff]  ;;  %v1332_v35 = vpop.f32.mrf.mxu3 }
 0x423   :  { %8805 = vst [vmem:[#allocation50_spill] sm:$0xff] %v6553_v22 }
 0x424   :  { %1606 = vmatpush.msra.mxu3 %v6546_v6  ;;  %v2866_v25 = vmul.f32 -1.442695, %v1542_v7 }
 0x425   :  { %v1372_v53 = vpop.f32.mrf.mxu1 }
 0x426   :  { %v1373_v34 = vadd.f32 %v1372_v53, %v8803_v56  ;;  %1607 = vmatpush.msra.mxu3 %v6553_v22  ;;  %v6559_v56 = vld [vmem:[%s8185_s3 + $0x18] sm:$0xff] }
 0x427   :  { %8806 = vst [vmem:[#allocation52_spill] sm:$0xff] %v6559_v56 }
 0x428   :  { %v3024_v26 = vpop.eup %3023  ;;  %v1415_v54 = vadd.f32 %v1373_v34, %v1313_v3  ;;  %1608 = vmatpush.msra.mxu3 %v6559_v56  ;;  %v6565_v3 = vld [vmem:[%s8185_s3] sm:$0xff] }
 0x429   :  { %v1399_v9 = vadd.f32 1.0, %v3024_v26  ;;  %8807 = vst [vmem:[#allocation32_spill] sm:$0xff] %v6565_v3 }
 0x42a   :  { %v2848_v53 = vmul.f32 -1.442695, %v1415_v54  ;;  %1609 = vmatpush.msra.mxu3 %v6565_v3 }
 0x42b   :  { %3025 = vrcp.f32 %v1399_v9  ;;  %v1411_v8 = vand.u32 2147483648, %v1399_v9  ;;  %v1409_v7 = vand.u32 2147483647, %v1399_v9  ;;  %vm1405_vm9 = vweird.f32 %v1399_v9 }
 0x42c   :  { %3027 = vpow2.f32 %v2848_v53  ;;  %v1392_v53 = vpop.f32.mrf.mxu2 }
 0x42d   :  { %3029 = vpow2.f32 %v2866_v25  ;;  %v1412_v3 = vor.u32 1.1754944e-38, %v1411_v8  ;;  %v1393_v25 = vadd.f32 %v1392_v53, %v8722_v29  ;;  %vm1410_vm11 = vcmp.eq.f32.partialorder %v1409_v7, 8.507059e+37 }
 0x431   :  { %v3026_v26 = vpop.eup %3025 }
 0x432   :  { %v3028_v54 = vpop.eup %3027  ;;  %v1401_v34 = vmul.f32 %v3026_v26, %v1399_v9  ;;  %vm1406_vm8 = vweird.f32 %v3026_v26 }
 0x433   :  { %v1419_v22 = vadd.f32 1.0, %v3028_v54  ;;  %v3030_v5 = vpop.eup %3029  ;;  %vm1407_vm10 = vmor %vm1405_vm9, %vm1406_vm8 }
 0x434   :  { %v1402_v6 = vsub.f32 1.0, %v1401_v34  ;;  %v6568_v43 = vadd.f32 1.0, %v3030_v5 }
 0x435   :  { %3031 = vrcp.f32 %v1419_v22  ;;  %v1431_v40 = vand.u32 2147483648, %v1419_v22  ;;  %v1429_v9 = vand.u32 2147483647, %v1419_v22  ;;  %vm1425_vm13 = vweird.f32 %v1419_v22 }
 0x436   :  { %v1403_v56 = vmul.f32 %v3026_v26, %v1402_v6  ;;  %3033 = vrcp.f32 %v6568_v43  ;;  %v1333_v6 = vadd.f32 %v1332_v35, %v8723_v20  ;;  %vm1552_vm1 = vweird.f32 %v6568_v43 }
 0x437   :  { %vm1430_vm15 = vcmp.eq.f32.partialorder %v1429_v9, 8.507059e+37 }
 0x438   :  { %v1404_v31 = vadd.f32 %v3026_v26, %v1403_v56 }
 0x43a   :  { %v1408_v32 = vsel %vm1407_vm10, %v3026_v26, %v1404_v31  ;;  %v1432_v31 = vor.u32 1.1754944e-38, %v1431_v40 }
 0x43b   :  { %v3032_v54 = vpop.eup %3031  ;;  %v1413_v34 = vsel %vm1410_vm11, %v1412_v3, %v1408_v32  ;;  %v1563_v32 = vrot.slane %v6533_v57, 2 }
 0x43c   :  { %v1421_v51 = vmul.f32 %v3032_v54, %v1419_v22  ;;  %v1435_v42 = vmul.f32 %v1413_v34, %v1393_v25  ;;  %vm1426_vm12 = vweird.f32 %v3032_v54  ;;  %v3034_v8 = vpop.eup %3033 }
 0x43d   :  { %vm1427_vm14 = vmor %vm1425_vm13, %vm1426_vm12  ;;  %v1548_v35 = vmul.f32 %v3034_v8, %v6568_v43  ;;  %vm1553_vm0 = vweird.f32 %v3034_v8 }
 0x43e   :  { %v1422_v46 = vsub.f32 1.0, %v1421_v51  ;;  %v1436_v5 = vadd.f32 %v1435_v42, %v1333_v6  ;;  %vm1554_vm2 = vmor %vm1552_vm1, %vm1553_vm0 }
 0x43f   :  { %v1549_v22 = vsub.f32 1.0, %v1548_v35 }
 0x440   :  { %v1423_v56 = vmul.f32 %v3032_v54, %v1422_v46  ;;  %3035 = vtanh.f32 %v1436_v5 }
 0x441   :  { %v1550_v40 = vmul.f32 %v3034_v8, %v1549_v22  ;;  %v6717_v22 = vld [vmem:[%s8184_s1 + $0x118] sm:$0xff] }
 0x442   :  { %v1424_v53 = vadd.f32 %v3032_v54, %v1423_v56 }
 0x443   :  { %v1539_v9 = vpop.f32.mrf.mxu2 }
 0x444   :  { %v1428_v26 = vsel %vm1427_vm14, %v3032_v54, %v1424_v53  ;;  %v1551_v54 = vadd.f32 %v3034_v8, %v1550_v40  ;;  %v1558_v53 = vand.u32 2147483648, %v6568_v43  ;;  %v6749_v40 = vld [vmem:[%s8186_s5 + $0x100] sm:$0xff] }
 0x445   :  { %v1433_v3 = vsel %vm1430_vm15, %v1432_v31, %v1428_v26  ;;  %v6620_v26 = vld [vmem:[%s8185_s3 + $0x80] sm:$0xff] }
 0x446   :  { %v1519_v7 = vpop.f32.mrf.mxu1  ;;  %v3036_v51 = vpop.eup %3035  ;;  %v1438_v42 = vsub.f32 1.0, %v1433_v3  ;;  %v1440_v6 = vmul.f32 %v1433_v3, %v5904_v45  ;;  %v6627_v3 = vld [vmem:[%s8185_s3 + $0x68] sm:$0xff] }
 0x447   :  { %v1520_v46 = vadd.f32 %v1519_v7, %v8724_v38  ;;  %v6634_v7 = vld [vmem:[%s8185_s3 + $0x50] sm:$0xff] }
 0x448   :  { %v1439_v25 = vmul.f32 %v3036_v51, %v1438_v42  ;;  %v6641_v42 = vld [vmem:[%s8185_s3 + $0x38] sm:$0xff] }
 0x449   :  { %v1565_v34 = vadd.f32 %v1563_v32, %v1520_v46 }
 0x44a   :  { %v6577_v56 = vadd.f32 %v1440_v6, %v1439_v25  ;;  %v6649_v25 = vld [vmem:[%s8185_s3 + $0x20] sm:$0xff]  ;;  %v6701_v6 = vld [vmem:[%s8186_s5 + $0x148] sm:$0xff] }
 0x44b   :  { %v2867_v5 = vmul.f32 -1.442695, %v1565_v34  ;;  %v6658_v34 = vld [vmem:[%s8185_s3 + $0x8] sm:$0xff] }
 0x44c   :  { %1475 = vmatmul.f32.vlgmr.msrb.gmra.mxu3 %v6577_v56  ;;  %1670 = vmatmul.f32.vlgmr.msrb.gmra.mxu2 %v6577_v56 }
 0x44d   :  { %3037 = vpow2.f32 %v2867_v5  ;;  %1674 = vmatpush.msrb.mxu3 %v5912_v17  ;;  %1933 = vmatpush.msrb.mxu2 %v5918_v0  ;;  %v1556_v17 = vand.u32 2147483647, %v6568_v43  ;;  %v1540_v0 = vadd.f32 %v1539_v9, %v8655_v1  ;;  %v6736_v5 = vld [vmem:[%s8186_s5 + $0x118] sm:$0xff] }
 0x44e   :  { %v6788_v9 = vld [vmem:[%s8186_s5 + $0xb8] sm:$0xff] }
 0x44f   :  { %1675 = vmatpush.msrb.mxu3 %v5925_v15  ;;  %1934 = vmatpush.msrb.mxu2 %v5931_v39  ;;  %v1555_v15 = vsel %vm1554_vm2, %v3034_v8, %v1551_v54  ;;  %v1559_v39 = vor.u32 1.1754944e-38, %v1558_v53  ;;  %vm1557_vm3 = vcmp.eq.f32.partialorder %v1556_v17, 8.507059e+37  ;;  %v8809_v8 = vld [vmem:[#allocation11_spill] sm:$0xff] }
 0x450   :  { %v6762_v54 = vld [vmem:[%s8186_s5 + $0xe8] sm:$0xff]  ;;  %v6801_v53 = vld [vmem:[%s8186_s5 + $0xa0] sm:$0xff] }
 0x451   :  { %1676 = vmatpush.msrb.mxu3 %v5937_v41  ;;  %1935 = vmatpush.msrb.mxu2 %v5943_v58  ;;  %v1560_v41 = vsel %vm1557_vm3, %v1559_v39, %v1555_v15  ;;  %8810 = vst [vmem:[#allocation36_spill] sm:$0xff] %v6801_v53  ;;  %v6814_v17 = vld [vmem:[%s8186_s5 + $0x88] sm:$0xff]  ;;  %v8814_v15 = vld [vmem:[#allocation13_spill] sm:$0xff]  ;;  %v6853_v39 = vld [vmem:[%s8186_s5 + $0x40] sm:$0xff] }
 0x452   :  { %v1585_v58 = vmul.f32 %v1560_v41, %v1540_v0  ;;  %8811 = vst [vmem:[#allocation49_spill] sm:$0xff] %v6814_v17  ;;  %v6840_v0 = vld [vmem:[%s8186_s5 + $0x58] sm:$0xff] }
 0x453   :  { %v3038_v45 = vpop.eup %3037  ;;  %1677 = vmatpush.msrb.mxu3 %v5949_v62  ;;  %1936 = vmatpush.msrb.mxu2 %v5955_v48  ;;  %v1586_v62 = vrot.slane %v6533_v57, 4  ;;  %8813 = vst [vmem:[#allocation54_spill] sm:$0xff] %v6840_v0  ;;  %v8816_v41 = vld [vmem:[#allocation14_spill] sm:$0xff] }
 0x454   :  { %v1569_v31 = vadd.f32 1.0, %v3038_v45  ;;  %v6775_v45 = vld [vmem:[%s8186_s5 + $0xd0] sm:$0xff]  ;;  %8815 = vst [vmem:[#allocation81_spill] sm:$0xff] %v6853_v39 }
 0x455   :  { %1678 = vmatpush.msrb.mxu3 %v5961_v24  ;;  %1937 = vmatpush.msrb.mxu2 %v5967_v47  ;;  %v8808_v24 = vld [vmem:[#allocation12_spill] sm:$0xff]  ;;  %v1588_v43 = vadd.f32 %v1586_v62, %v1585_v58 }
 0x456   :  { %3039 = vrcp.f32 %v1569_v31  ;;  %v1579_v57 = vand.u32 2147483647, %v1569_v31  ;;  %vm1575_vm5 = vweird.f32 %v1569_v31  ;;  %v6860_v58 = vld [vmem:[%s8184_s1 + $0x10] sm:$0xff]  ;;  %v6868_v62 = vld [vmem:[%s8186_s5 + $0x168] sm:$0xff] }
 0x457   :  { %1679 = vmatpush.msrb.mxu3 %v5973_v18  ;;  %1938 = vmatpush.msrb.mxu2 %v5979_v13  ;;  %v6606_v18 = vld [vmem:[%s8185_s3 + $0xb0] sm:$0xff]  ;;  %3041 = vtanh.f32 %v1588_v43  ;;  %8817 = vst [vmem:[#allocation82_spill] sm:$0xff] %v6868_v62 }
 0x458   :  { %vm1580_vm7 = vcmp.eq.f32.partialorder %v1579_v57, 8.507059e+37  ;;  %v8821_v43 = vld [vmem:[#allocation16_spill] sm:$0xff]  ;;  %v8826_v57 = vld [vmem:[#allocation19_spill] sm:$0xff] }
 0x459   :  { %1680 = vmatpush.msrb.mxu3 %v5985_v14  ;;  %1939 = vmatpush.msrb.mxu2 %v5991_v60  ;;  %v1581_v14 = vand.u32 2147483648, %v1569_v31  ;;  %v6613_v60 = vld [vmem:[%s8185_s3 + $0x98] sm:$0xff] }
 0x45b   :  { %1681 = vmatpush.msrb.mxu3 %v5997_v12  ;;  %1940 = vmatpush.msrb.mxu2 %v8808_v24  ;;  %v1582_v32 = vor.u32 1.1754944e-38, %v1581_v14  ;;  %v6875_v24 = vld [vmem:[%s8186_s5 + $0x28] sm:$0xff] }
 0x45c   :  { %v3040_v48 = vpop.eup %3039  ;;  %8819 = vst [vmem:[#allocation83_spill] sm:$0xff] %v6875_v24  ;;  %v8824_v14 = vld [vmem:[#allocation35_spill] sm:$0xff] }
 0x45d   :  { %v1571_v47 = vmul.f32 %v3040_v48, %v1569_v31  ;;  %1682 = vmatpush.msrb.mxu3 %v8809_v8  ;;  %1941 = vmatpush.msrb.mxu2 %v6606_v18  ;;  %vm1576_vm4 = vweird.f32 %v3040_v48  ;;  %v3042_v51 = vpop.eup %3041  ;;  %v6827_v31 = vld [vmem:[%s8186_s5 + $0x70] sm:$0xff] }
 0x45e   :  { %vm1577_vm6 = vmor %vm1575_vm5, %vm1576_vm4  ;;  %8812 = vst [vmem:[#allocation5_spill] sm:$0xff] %v6827_v31  ;;  %v6888_v8 = vld [vmem:[%s8186_s5 + $0x10] sm:$0xff] }
 0x45f   :  { %v1572_v13 = vsub.f32 1.0, %v1571_v47  ;;  %1683 = vmatpush.msrb.mxu3 %v6017_v19  ;;  %1942 = vmatpush.msrb.mxu2 %v6613_v60  ;;  %v6881_v47 = vld [vmem:[%s8186_s5 + $0x150] sm:$0xff]  ;;  %8822 = vst [vmem:[#allocation85_spill] sm:$0xff] %v6888_v8 }
 0x460   :  { %8820 = vst [vmem:[#allocation84_spill] sm:$0xff] %v6881_v47 }
 0x461   :  { %v1573_v12 = vmul.f32 %v3040_v48, %v1572_v13  ;;  %1684 = vmatpush.msrb.mxu3 %v6026_v33  ;;  %1943 = vmatpush.msrb.mxu2 %v6620_v26  ;;  %v6894_v13 = vld [vmem:[%s8186_s5 + $0x138] sm:$0xff] }
 0x462   :  { %8823 = vst [vmem:[#allocation86_spill] sm:$0xff] %v6894_v13 }
 0x463   :  { %v1574_v19 = vadd.f32 %v3040_v48, %v1573_v12  ;;  %1685 = vmatpush.msrb.mxu3 %v6036_v63  ;;  %1944 = vmatpush.msrb.mxu2 %v6627_v3  ;;  %v6901_v12 = vld [vmem:[%s8186_s5 + $0x120] sm:$0xff] }
 0x464   :  { %8825 = vst [vmem:[#allocation87_spill] sm:$0xff] %v6901_v12 }
 0x465   :  { %v1578_v33 = vsel %vm1577_vm6, %v3040_v48, %v1574_v19  ;;  %1686 = vmatpush.msrb.mxu3 %v6044_v23  ;;  %1945 = vmatpush.msrb.mxu2 %v6634_v7  ;;  %v8818_v48 = vld [vmem:[#allocation15_spill] sm:$0xff] }
 0x466   :  { %v1583_v35 = vsel %vm1580_vm7, %v1582_v32, %v1578_v33  ;;  %v6908_v19 = vld [vmem:[%s8186_s5 + $0x108] sm:$0xff]  ;;  %v8828_v32 = vld [vmem:[#allocation41_spill] sm:$0xff] }
 0x467   :  { %v1590_v63 = vsub.f32 1.0, %v1583_v35  ;;  %1687 = vmatpush.msrb.mxu3 %v6052_v10  ;;  %1946 = vmatpush.msrb.mxu2 %v6641_v42  ;;  %v1592_v23 = vmul.f32 %v1583_v35, %v6021_v28  ;;  %v6669_v28 = vld [vmem:[%s8184_s1 + $0x178] sm:$0xff]  ;;  %8827 = vst [vmem:[#allocation88_spill] sm:$0xff] %v6908_v19  ;;  %v6915_v33 = vld [vmem:[%s8186_s5 + $0xf0] sm:$0xff] }
 0x468   :  { %8829 = vst [vmem:[#allocation55_spill] sm:$0xff] %v6915_v33  ;;  %v8830_v35 = vld [vmem:[#allocation44_spill] sm:$0xff] }
 0x469   :  { %v1591_v46 = vmul.f32 %v3042_v51, %v1590_v63  ;;  %1688 = vmatpush.msrb.mxu3 %v6060_v44  ;;  %1947 = vmatpush.msrb.mxu2 %v6649_v25  ;;  %v6675_v44 = vld [vmem:[%s8186_s5 + $0x178] sm:$0xff]  ;;  %v8832_v51 = vld [vmem:[#allocation23_spill] sm:$0xff] }
 0x46a   :  { %v6922_v63 = vld [vmem:[%s8186_s5 + $0xd8] sm:$0xff] }
 0x46b   :  { %v6652_v10 = vadd.f32 %v1592_v23, %v1591_v46  ;;  %1689 = vmatpush.msrb.mxu3 %v6068_v61  ;;  %1948 = vmatpush.msrb.mxu2 %v6658_v34  ;;  %v6682_v61 = vld [vmem:[%s8184_s1 + $0x160] sm:$0xff]  ;;  %8831 = vst [vmem:[#allocation69_spill] sm:$0xff] %v6922_v63  ;;  %v8834_v23 = vld [vmem:[#allocation48_spill] sm:$0xff] }
 0x46c   :  { %v6929_v46 = vld [vmem:[%s8186_s5 + $0xc0] sm:$0xff] }
 0x46d   :  { %1610 = vmatmul.f32.vlgmr.msra.gmra.mxu3 %v6652_v10  ;;  %1630 = vmatmul.f32.vlgmr.msrb.gmra.mxu0 %v6652_v10  ;;  %8833 = vst [vmem:[#allocation8_spill] sm:$0xff] %v6929_v46 }
 0x46e   :  { %1650 = vmatmul.f32.vlgmr.msrb.gmra.mxu1 %v6652_v10  ;;  %1817 = vmatmul.f32.vlgmr.msra.gmra.mxu2 %v6652_v10 }
 0x46f   :  { %1821 = vmatpush.msra.mxu3 %v6077_v52  ;;  %1841 = vmatpush.msrb.mxu0 %v6669_v28  ;;  %v6688_v52 = vld [vmem:[%s8186_s5 + $0x160] sm:$0xff] }
 0x470   :  { %2013 = vmatpush.msra.mxu2 %v6675_v44 }
 0x471   :  { %1822 = vmatpush.msra.mxu3 %v6085_v16  ;;  %1842 = vmatpush.msrb.mxu0 %v6682_v61  ;;  %v6695_v16 = vld [vmem:[%s8184_s1 + $0x148] sm:$0xff] }
 0x472   :  { %2014 = vmatpush.msra.mxu2 %v6688_v52 }
 0x473   :  { %1823 = vmatpush.msra.mxu3 %v6094_v11  ;;  %1843 = vmatpush.msrb.mxu0 %v6695_v16  ;;  %v6708_v11 = vld [vmem:[%s8184_s1 + $0x130] sm:$0xff] }
 0x474   :  { %2015 = vmatpush.msra.mxu2 %v6701_v6 }
 0x475   :  { %1824 = vmatpush.msra.mxu3 %v6102_v30  ;;  %1844 = vmatpush.msrb.mxu0 %v6708_v11  ;;  %v6723_v30 = vld [vmem:[%s8186_s5 + $0x130] sm:$0xff] }
 0x476   :  { %1690 = vmatmul.f32.vlgmr.msrb.gmra.mxu3 %v6577_v56  ;;  %1710 = vmatmul.f32.vlgmr.msra.gmra.mxu0 %v6577_v56 }
 0x477   :  { %1825 = vmatpush.msra.mxu3 %v6110_v59  ;;  %1845 = vmatpush.msrb.mxu0 %v6717_v22  ;;  %v6730_v59 = vld [vmem:[%s8184_s1 + $0x100] sm:$0xff] }
 0x478   :  { %2016 = vmatpush.msra.mxu2 %v6723_v30 }
 0x479   :  { %1826 = vmatpush.msra.mxu3 %v6118_v50  ;;  %1846 = vmatpush.msrb.mxu0 %v6730_v59  ;;  %v6743_v50 = vld [vmem:[%s8184_s1 + $0xe8] sm:$0xff] }
 0x47a   :  { %2017 = vmatpush.msra.mxu2 %v6736_v5 }
 0x47b   :  { %1827 = vmatpush.msra.mxu3 %v6126_v21  ;;  %1847 = vmatpush.msrb.mxu0 %v6743_v50  ;;  %v6756_v21 = vld [vmem:[%s8184_s1 + $0xd0] sm:$0xff] }
 0x47c   :  { %2018 = vmatpush.msra.mxu2 %v6749_v40 }
 0x47d   :  { %1828 = vmatpush.msra.mxu3 %v6134_v2  ;;  %1848 = vmatpush.msrb.mxu0 %v6756_v21  ;;  %v6769_v2 = vld [vmem:[%s8184_s1 + $0xb8] sm:$0xff] }
 0x47e   :  { %2019 = vmatpush.msra.mxu2 %v6762_v54 }
 0x47f   :  { %1829 = vmatpush.msra.mxu3 %v6142_v37  ;;  %1849 = vmatpush.msrb.mxu0 %v6769_v2  ;;  %v6782_v37 = vld [vmem:[%s8184_s1 + $0xa0] sm:$0xff] }
 0x480   :  { %2020 = vmatpush.msra.mxu2 %v6775_v45 }
 0x481   :  { %1830 = vmatpush.msra.mxu3 %v6150_v36  ;;  %1850 = vmatpush.msrb.mxu0 %v6782_v37  ;;  %v6795_v36 = vld [vmem:[%s8184_s1 + $0x88] sm:$0xff] }
 0x482   :  { %2021 = vmatpush.msra.mxu2 %v6788_v9 }
 0x483   :  { %1831 = vmatpush.msra.mxu3 %v6158_v55  ;;  %1851 = vmatpush.msrb.mxu0 %v6795_v36  ;;  %v6808_v55 = vld [vmem:[%s8184_s1 + $0x70] sm:$0xff] }
 0x484   :  { %2022 = vmatpush.msra.mxu2 %v6801_v53 }
 0x485   :  { %1832 = vmatpush.msra.mxu3 %v6166_v49  ;;  %1852 = vmatpush.msrb.mxu0 %v6808_v55  ;;  %v6821_v49 = vld [vmem:[%s8184_s1 + $0x58] sm:$0xff] }
 0x486   :  { %2023 = vmatpush.msra.mxu2 %v6814_v17 }
 0x487   :  { %1833 = vmatpush.msra.mxu3 %v6175_v27  ;;  %1853 = vmatpush.msrb.mxu0 %v6821_v49  ;;  %v6834_v27 = vld [vmem:[%s8184_s1 + $0x40] sm:$0xff] }
 0x488   :  { %2024 = vmatpush.msra.mxu2 %v6827_v31 }
 0x489   :  { %1834 = vmatpush.msra.mxu3 %v6183_v4  ;;  %1854 = vmatpush.msrb.mxu0 %v6834_v27  ;;  %v6847_v4 = vld [vmem:[%s8184_s1 + $0x28] sm:$0xff] }
 0x48a   :  { %2025 = vmatpush.msra.mxu2 %v6840_v0 }
 0x48b   :  { %1835 = vmatpush.msra.mxu3 %v8814_v15  ;;  %1855 = vmatpush.msrb.mxu0 %v6847_v4  ;;  %v6936_v15 = vld [vmem:[%s8186_s5 + $0xa8] sm:$0xff] }
 0x48c   :  { %2026 = vmatpush.msra.mxu2 %v6853_v39  ;;  %8835 = vst [vmem:[#allocation70_spill] sm:$0xff] %v6936_v15  ;;  %v8883_v39 = vld [vmem:[#allocation3_spill] sm:$0xff] }
 0x48d   :  { %1836 = vmatpush.msra.mxu3 %v8816_v41  ;;  %1856 = vmatpush.msrb.mxu0 %v6860_v58  ;;  %v8836_v41 = vld [vmem:[#allocation67_spill] sm:$0xff] }
 0x48e   :  { %1837 = vmatmul.f32.vlgmr.msra.gmra.mxu3 %v6652_v10  ;;  %1857 = vmatmul.f32.vlgmr.msrb.gmra.mxu0 %v6652_v10 }
 0x48f   :  { %1973 = vmatpush.msra.mxu0 %v6868_v62  ;;  %1953 = vmatpush.msrb.mxu3 %v8818_v48  ;;  %v6943_v48 = vld [vmem:[%s8186_s5 + $0x90] sm:$0xff] }
 0x490   :  { %2027 = vmatpush.msra.mxu2 %v6875_v24  ;;  %8837 = vst [vmem:[#allocation7_spill] sm:$0xff] %v6943_v48  ;;  %v8880_v24 = vld [vmem:[#allocation37_spill] sm:$0xff] }
 0x491   :  { %1974 = vmatpush.msra.mxu0 %v6881_v47  ;;  %1954 = vmatpush.msrb.mxu3 %v8821_v43  ;;  %v8838_v43 = vld [vmem:[#allocation28_spill] sm:$0xff] }
 0x492   :  { %2028 = vmatpush.msra.mxu2 %v6888_v8  ;;  %v8877_v8 = vld [vmem:[#allocation47_spill] sm:$0xff] }
 0x493   :  { %1975 = vmatpush.msra.mxu0 %v6894_v13  ;;  %1955 = vmatpush.msrb.mxu3 %v8824_v14  ;;  %v6950_v14 = vld [vmem:[%s8186_s5 + $0x78] sm:$0xff] }
 0x494   :  { %8839 = vst [vmem:[#allocation71_spill] sm:$0xff] %v6950_v14 }
 0x495   :  { %1976 = vmatpush.msra.mxu0 %v6901_v12  ;;  %1956 = vmatpush.msrb.mxu3 %v8826_v57  ;;  %v8840_v57 = vld [vmem:[#allocation68_spill] sm:$0xff] }
 0x497   :  { %1977 = vmatpush.msra.mxu0 %v6908_v19  ;;  %1957 = vmatpush.msrb.mxu3 %v8828_v32  ;;  %v6957_v32 = vld [vmem:[%s8186_s5 + $0x60] sm:$0xff] }
 0x498   :  { %8841 = vst [vmem:[#allocation72_spill] sm:$0xff] %v6957_v32 }
 0x499   :  { %1978 = vmatpush.msra.mxu0 %v6915_v33  ;;  %1958 = vmatpush.msrb.mxu3 %v8830_v35  ;;  %v8842_v35 = vld [vmem:[#allocation34_spill] sm:$0xff] }
 0x49b   :  { %1979 = vmatpush.msra.mxu0 %v6922_v63  ;;  %1959 = vmatpush.msrb.mxu3 %v8832_v51  ;;  %v6964_v51 = vld [vmem:[%s8186_s5 + $0x48] sm:$0xff] }
 0x49c   :  { %8843 = vst [vmem:[#allocation73_spill] sm:$0xff] %v6964_v51 }
 0x49d   :  { %1980 = vmatpush.msra.mxu0 %v6929_v46  ;;  %1960 = vmatpush.msrb.mxu3 %v8834_v23  ;;  %v8844_v23 = vld [vmem:[#allocation40_spill] sm:$0xff]  ;;  %v8863_v46 = vld [vmem:[#allocation18_spill] sm:$0xff] }
 0x49f   :  { %1981 = vmatpush.msra.mxu0 %v6936_v15  ;;  %1961 = vmatpush.msrb.mxu3 %v8836_v41  ;;  %v6971_v41 = vld [vmem:[%s8186_s5 + $0x30] sm:$0xff] }
 0x4a0   :  { %8845 = vst [vmem:[#allocation74_spill] sm:$0xff] %v6971_v41  ;;  %v8860_v15 = vld [vmem:[#allocation65_spill] sm:$0xff] }
 0x4a1   :  { %1982 = vmatpush.msra.mxu0 %v6943_v48  ;;  %1962 = vmatpush.msrb.mxu3 %v8838_v43  ;;  %v8846_v43 = vld [vmem:[#allocation56_spill] sm:$0xff] }
 0x4a2   :  { %v8859_v48 = vld [vmem:[#allocation64_spill] sm:$0xff] }
 0x4a3   :  { %1983 = vmatpush.msra.mxu0 %v6950_v14  ;;  %1963 = vmatpush.msrb.mxu3 %v8840_v57  ;;  %v6978_v57 = vld [vmem:[%s8186_s5 + $0x18] sm:$0xff] }
 0x4a4   :  { %8847 = vst [vmem:[#allocation75_spill] sm:$0xff] %v6978_v57  ;;  %v8856_v14 = vld [vmem:[#allocation61_spill] sm:$0xff] }
 0x4a5   :  { %1984 = vmatpush.msra.mxu0 %v6957_v32  ;;  %1964 = vmatpush.msrb.mxu3 %v8842_v35  ;;  %v8848_v35 = vld [vmem:[#allocation58_spill] sm:$0xff] }
 0x4a6   :  { %v2885_v32 = vld [vmem:[%s8190_s7 + $0x278] sm:$0xff] }
 0x4a7   :  { %1985 = vmatpush.msra.mxu0 %v6964_v51  ;;  %1965 = vmatpush.msrb.mxu3 %v8844_v23  ;;  %v6985_v23 = vld [vmem:[%s8186_s5] sm:$0xff]  ;;  %v8850_v51 = vld [vmem:[#allocation60_spill] sm:$0xff] }
 0x4a8   :  { %8849 = vst [vmem:[#allocation76_spill] sm:$0xff] %v6985_v23  ;;  %1778 = vmatpush.msra.mxu1 %v2885_v32  ;;  %v8857_v32 = vld [vmem:[#allocation62_spill] sm:$0xff] }
 0x4a9   :  { %1986 = vmatpush.msra.mxu0 %v6971_v41  ;;  %1966 = vmatpush.msrb.mxu3 %v8846_v43  ;;  %v8851_v41 = vld [vmem:[#allocation30_spill] sm:$0xff] }
 0x4aa   :  { %v8852_v43 = vld [vmem:[#allocation38_spill] sm:$0xff] }
 0x4ab   :  { %1987 = vmatpush.msra.mxu0 %v6978_v57  ;;  %1967 = vmatpush.msrb.mxu3 %v8848_v35  ;;  %v2884_v35 = vld [vmem:[%s8190_s7 + $0x270] sm:$0xff]  ;;  %v8853_v57 = vld [vmem:[#allocation42_spill] sm:$0xff] }
 0x4ac   :  { %1779 = vmatpush.msra.mxu1 %v2884_v35  ;;  %v8861_v35 = vld [vmem:[#allocation66_spill] sm:$0xff] }
 0x4ad   :  { %1988 = vmatpush.msra.mxu0 %v6985_v23  ;;  %1968 = vmatpush.msrb.mxu3 %v8850_v51  ;;  %v2883_v23 = vld [vmem:[%s8190_s7 + $0x268] sm:$0xff]  ;;  %v8854_v51 = vld [vmem:[#allocation57_spill] sm:$0xff] }
 0x4ae   :  { %1780 = vmatpush.msra.mxu1 %v2883_v23  ;;  %v8864_v23 = vld [vmem:[#allocation39_spill] sm:$0xff] }
 0x4af   :  { %2120 = vmatpush.msrb.mxu0 %v8851_v41  ;;  %v2882_v41 = vld [vmem:[%s8190_s7 + $0x260] sm:$0xff] }
 0x4b0   :  { %1781 = vmatpush.msra.mxu1 %v2882_v41  ;;  %v2879_v41 = vld [vmem:[%s8190_s7 + $0x248] sm:$0xff] }
 0x4b1   :  { %2121 = vmatpush.msrb.mxu0 %v8852_v43  ;;  %v8855_v43 = vld [vmem:[#allocation59_spill] sm:$0xff] }
 0x4b3   :  { %2122 = vmatpush.msrb.mxu0 %v8853_v57  ;;  %v8858_v57 = vld [vmem:[#allocation63_spill] sm:$0xff] }
 0x4b5   :  { %2123 = vmatpush.msrb.mxu0 %v8854_v51  ;;  %v8862_v51 = vld [vmem:[#allocation33_spill] sm:$0xff] }
 0x4b7   :  { %2124 = vmatpush.msrb.mxu0 %v8855_v43  ;;  %v8865_v43 = vld [vmem:[#allocation43_spill] sm:$0xff] }
 0x4b9   :  { %2125 = vmatpush.msrb.mxu0 %v8856_v14  ;;  %v2881_v14 = vld [vmem:[%s8190_s7 + $0x258] sm:$0xff] }
 0x4ba   :  { %1782 = vmatpush.msra.mxu1 %v2881_v14  ;;  %v2874_v14 = vld [vmem:[%s8190_s7 + $0x220] sm:$0xff] }
 0x4bb   :  { %2126 = vmatpush.msrb.mxu0 %v8857_v32  ;;  %v8867_v32 = vld [vmem:[#allocation46_spill] sm:$0xff] }
 0x4bd   :  { %2127 = vmatpush.msrb.mxu0 %v8858_v57 }
 0x4bf   :  { %2128 = vmatpush.msrb.mxu0 %v8859_v48  ;;  %v2880_v48 = vld [vmem:[%s8190_s7 + $0x250] sm:$0xff] }
 0x4c0   :  { %1783 = vmatpush.msra.mxu1 %v2880_v48  ;;  %v2873_v48 = vld [vmem:[%s8190_s7 + $0x218] sm:$0xff] }
 0x4c1   :  { %2129 = vmatpush.msrb.mxu0 %v8860_v15  ;;  %v8866_v15 = vld [vmem:[#allocation22_spill] sm:$0xff] }
 0x4c2   :  { %1784 = vmatpush.msra.mxu1 %v2879_v41  ;;  %v2871_v41 = vld [vmem:[%s8190_s7 + $0x208] sm:$0xff] }
 0x4c3   :  { %2130 = vmatpush.msrb.mxu0 %v8861_v35  ;;  %v2878_v35 = vld [vmem:[%s8190_s7 + $0x240] sm:$0xff] }
 0x4c4   :  { %1785 = vmatpush.msra.mxu1 %v2878_v35  ;;  %v8870_v35 = vld [vmem:[#allocation51_spill] sm:$0xff] }
 0x4c5   :  { %2131 = vmatpush.msrb.mxu0 %v8862_v51  ;;  %v2877_v51 = vld [vmem:[%s8190_s7 + $0x238] sm:$0xff] }
 0x4c6   :  { %1786 = vmatpush.msra.mxu1 %v2877_v51  ;;  %v8871_v51 = vld [vmem:[#allocation10_spill] sm:$0xff] }
 0x4c7   :  { %2132 = vmatpush.msrb.mxu0 %v8863_v46 }
 0x4c9   :  { %2133 = vmatpush.msrb.mxu0 %v8864_v23  ;;  %v2876_v23 = vld [vmem:[%s8190_s7 + $0x230] sm:$0xff] }
 0x4ca   :  { %1787 = vmatpush.msra.mxu1 %v2876_v23 }
 0x4cb   :  { %2134 = vmatpush.msrb.mxu0 %v8865_v43  ;;  %v2875_v43 = vld [vmem:[%s8190_s7 + $0x228] sm:$0xff] }
 0x4cc   :  { %1788 = vmatpush.msra.mxu1 %v2875_v43  ;;  %v8872_v43 = vld [vmem:[#allocation25_spill] sm:$0xff] }
 0x4cd   :  { %2135 = vmatpush.msrb.mxu0 %v8866_v15  ;;  %v2872_v15 = vld [vmem:[%s8190_s7 + $0x210] sm:$0xff] }
 0x4ce   :  { %1789 = vmatpush.msra.mxu1 %v2874_v14  ;;  %v8873_v14 = vld [vmem:[#allocation27_spill] sm:$0xff] }
 0x4cf   :  { %v1476_v46 = vpop.f32.mrf.mxu3  ;;  %v1671_v23 = vpop.f32.mrf.mxu2 }
 0x4d0   :  { %v7027_v57 = vadd.f32 %v1476_v46, %v8867_v32  ;;  %1790 = vmatpush.msra.mxu1 %v2873_v48  ;;  %v2870_v46 = vld [vmem:[%s8190_s7 + $0x200] sm:$0xff]  ;;  %v8874_v48 = vld [vmem:[#allocation29_spill] sm:$0xff] }
 0x4d1   :  { %v8869_v32 = vld [vmem:[#allocation26_spill] sm:$0xff] }
 0x4d2   :  { %8868 = vst [vmem:[#allocation77_spill] sm:$0xff] %v7027_v57  ;;  %1791 = vmatpush.msra.mxu1 %v2872_v15  ;;  %v8876_v57 = vld [vmem:[#allocation4_spill] sm:$0xff] }
 0x4d3   :  { %v1672_v63 = vadd.f32 %v1671_v23, %v8876_v57  ;;  %v8881_v23 = vld [vmem:[#allocation20_spill] sm:$0xff] }
 0x4d4   :  { %1792 = vmatpush.msra.mxu1 %v2871_v41  ;;  %v8875_v41 = vld [vmem:[#allocation31_spill] sm:$0xff] }
 0x4d6   :  { %1793 = vmatpush.msra.mxu1 %v2870_v46 }
 0x4d8   :  { %1913 = vmatpush.msrb.mxu1 %v8869_v32  ;;  %v7068_v32 = vld [vmem:[%s8188_s0 + $0x1e] sm:$0x3f] }
 0x4da   :  { %1914 = vmatpush.msrb.mxu1 %v8870_v35 }
 0x4dc   :  { %1915 = vmatpush.msrb.mxu1 %v8871_v51  ;;  %v8878_v51 = vld [vmem:[#allocation53_spill] sm:$0xff] }
 0x4de   :  { %1916 = vmatpush.msrb.mxu1 %v8872_v43  ;;  %v8879_v43 = vld [vmem:[#allocation17_spill] sm:$0xff] }
 0x4e0   :  { %1917 = vmatpush.msrb.mxu1 %v8873_v14 }
 0x4e2   :  { %1918 = vmatpush.msrb.mxu1 %v8874_v48 }
 0x4e4   :  { %1919 = vmatpush.msrb.mxu1 %v8875_v41 }
 0x4e6   :  { %1920 = vmatpush.msrb.mxu1 %v8879_v43  ;;  %v8885_v43 = vld [vmem:[#allocation45_spill] sm:$0xff] }
 0x4e8   :  { %1921 = vmatpush.msrb.mxu1 %v8880_v24 }
 0x4ea   :  { %1922 = vmatpush.msrb.mxu1 %v8881_v23 }
 0x4f0   :  { %v1611_v15 = vpop.f32.mrf.mxu3 }
 0x4f1   :  { %v1612_v46 = vadd.f32 %v1611_v15, %v8877_v8  ;;  %v1818_v35 = vpop.f32.mrf.mxu2  ;;  %v1631_v15 = vpop.f32.mrf.mxu0  ;;  %v8882_v8 = vld [vmem:[#allocation21_spill] sm:$0xff] }
 0x4f2   :  { %v1819_v33 = vadd.f32 %v1818_v35, %v8878_v51  ;;  %1923 = vmatpush.msrb.mxu1 %v8882_v8  ;;  %v1632_v12 = vadd.f32 %v1631_v15, %v8883_v39  ;;  %v8884_v35 = vld [vmem:[#allocation6_spill] sm:$0xff] }
 0x4f3   :  { %v1714_v14 = vadd.f32 %v1672_v63, %v1612_v46 }
 0x4f4   :  { %v1861_v48 = vadd.f32 %v7068_v32, %v1819_v33  ;;  %1924 = vmatpush.msrb.mxu1 %v8885_v43  ;;  %v8886_v33 = vld [vmem:[#allocation24_spill] sm:$0xff] }
 0x4f5   :  { %v2868_v41 = vmul.f32 -1.442695, %v1714_v14 }
 0x4f6   :  { %v2887_v19 = vmul.f32 -1.442695, %v1861_v48  ;;  %1925 = vmatpush.msrb.mxu1 %v8886_v33  ;;  %v8887_v48 = vld [vmem:[#allocation50_spill] sm:$0xff] }
 0x4f7   :  { %3043 = vpow2.f32 %v2868_v41  ;;  %v8888_v41 = vld [vmem:[#allocation52_spill] sm:$0xff] }
 0x4f8   :  { %3045 = vpow2.f32 %v2887_v19  ;;  %1926 = vmatpush.msrb.mxu1 %v8887_v48  ;;  %v8889_v19 = vld [vmem:[#allocation32_spill] sm:$0xff] }
 0x4f9   :  { %v1691_v57 = vpop.f32.mrf.mxu3 }
 0x4fa   :  { %v1692_v51 = vadd.f32 %v1691_v57, %v8884_v35  ;;  %1927 = vmatpush.msrb.mxu1 %v8888_v41  ;;  %v1711_v35 = vpop.f32.mrf.mxu0 }
 0x4fc   :  { %v1734_v63 = vadd.f32 %v1692_v51, %v1632_v12  ;;  %1928 = vmatpush.msrb.mxu1 %v8889_v19  ;;  %v1712_v19 = vadd.f32 %v1711_v35, %v8722_v29 }
 0x4fd   :  { %v3044_v24 = vpop.eup %3043 }
 0x4fe   :  { %v1718_v46 = vadd.f32 1.0, %v3044_v24  ;;  %v2869_v14 = vmul.f32 -1.442695, %v1734_v63  ;;  %v3046_v23 = vpop.eup %3045 }
 0x4ff   :  { %v7082_v8 = vadd.f32 1.0, %v3046_v23  ;;  %v1651_v23 = vpop.f32.mrf.mxu1 }
 0x500   :  { %3047 = vrcp.f32 %v1718_v46  ;;  %v1730_v33 = vand.u32 2147483648, %v1718_v46  ;;  %v1728_v24 = vand.u32 2147483647, %v1718_v46  ;;  %vm1724_vm9 = vweird.f32 %v1718_v46 }
 0x501   :  { %3049 = vpow2.f32 %v2869_v14  ;;  %v1652_v13 = vadd.f32 %v1651_v23, %v8723_v20  ;;  %vm1871_vm1 = vweird.f32 %v7082_v8 }
 0x502   :  { %3051 = vrcp.f32 %v7082_v8  ;;  %v1731_v14 = vor.u32 1.1754944e-38, %v1730_v33  ;;  %vm1729_vm11 = vcmp.eq.f32.partialorder %v1728_v24, 8.507059e+37 }
 0x506   :  { %v3048_v57 = vpop.eup %3047 }
 0x507   :  { %v1720_v12 = vmul.f32 %v3048_v57, %v1718_v46  ;;  %v3050_v51 = vpop.eup %3049  ;;  %vm1725_vm8 = vweird.f32 %v3048_v57 }
 0x508   :  { %v1738_v43 = vadd.f32 1.0, %v3050_v51  ;;  %v3052_v48 = vpop.eup %3051  ;;  %vm1726_vm10 = vmor %vm1724_vm9, %vm1725_vm8  ;;  %v1882_v51 = vrot.slane %v7068_v32, 2 }
 0x509   :  { %v1721_v15 = vsub.f32 1.0, %v1720_v12  ;;  %v1867_v0 = vmul.f32 %v3052_v48, %v7082_v8  ;;  %vm1872_vm0 = vweird.f32 %v3052_v48 }
 0x50a   :  { %3053 = vrcp.f32 %v1738_v43  ;;  %v1750_v35 = vand.u32 2147483648, %v1738_v43  ;;  %vm1744_vm13 = vweird.f32 %v1738_v43  ;;  %vm1873_vm2 = vmor %vm1871_vm1, %vm1872_vm0 }
 0x50b   :  { %v1722_v63 = vmul.f32 %v3048_v57, %v1721_v15  ;;  %v1868_v62 = vsub.f32 1.0, %v1867_v0 }
 0x50c   :  { %v1751_v23 = vor.u32 1.1754944e-38, %v1750_v35 }
 0x50d   :  { %v1723_v41 = vadd.f32 %v3048_v57, %v1722_v63 }
 0x50f   :  { %v1727_v39 = vsel %vm1726_vm10, %v3048_v57, %v1723_v41  ;;  %v1869_v41 = vmul.f32 %v3052_v48, %v1868_v62 }
 0x510   :  { %v1732_v12 = vsel %vm1729_vm11, %v1731_v14, %v1727_v39  ;;  %v3054_v15 = vpop.eup %3053  ;;  %v1748_v39 = vand.u32 2147483647, %v1738_v43 }
 0x511   :  { %v1754_v31 = vmul.f32 %v1732_v12, %v1712_v19  ;;  %v1838_v47 = vpop.f32.mrf.mxu3  ;;  %v1740_v17 = vmul.f32 %v3054_v15, %v1738_v43  ;;  %vm1745_vm12 = vweird.f32 %v3054_v15 }
 0x512   :  { %v1839_v46 = vadd.f32 %v1838_v47, %v8724_v38  ;;  %vm1746_vm14 = vmor %vm1744_vm13, %vm1745_vm12  ;;  %vm1749_vm15 = vcmp.eq.f32.partialorder %v1748_v39, 8.507059e+37  ;;  %v1870_v47 = vadd.f32 %v3052_v48, %v1869_v41  ;;  %v7116_v39 = vld [vmem:[%s8186_s5 + $0x158] sm:$0xff] }
 0x513   :  { %v1755_v63 = vadd.f32 %v1754_v31, %v1652_v13  ;;  %v1741_v33 = vsub.f32 1.0, %v1740_v17  ;;  %v1877_v17 = vand.u32 2147483648, %v7082_v8  ;;  %v7122_v41 = vld [vmem:[%s8185_s3 + $0x158] sm:$0xff] }
 0x514   :  { %v1884_v53 = vadd.f32 %v1882_v51, %v1839_v46  ;;  %v1874_v51 = vsel %vm1873_vm2, %v3052_v48, %v1870_v47  ;;  %v7140_v47 = vld [vmem:[%s8186_s5 + $0x128] sm:$0xff] }
 0x515   :  { %3055 = vtanh.f32 %v1755_v63  ;;  %v1742_v57 = vmul.f32 %v3054_v15, %v1741_v33  ;;  %v1878_v63 = vor.u32 1.1754944e-38, %v1877_v17 }
 0x516   :  { %v2888_v24 = vmul.f32 -1.442695, %v1884_v53  ;;  %v1875_v53 = vand.u32 2147483647, %v7082_v8 }
 0x517   :  { %v1743_v14 = vadd.f32 %v3054_v15, %v1742_v57  ;;  %v7103_v57 = vld [vmem:[%s8186_s5 + $0x170] sm:$0xff] }
 0x518   :  { %3057 = vpow2.f32 %v2888_v24  ;;  %vm1876_vm3 = vcmp.eq.f32.partialorder %v1875_v53, 8.507059e+37  ;;  %v1905_v24 = vrot.slane %v7068_v32, 4  ;;  %v7134_v32 = vld [vmem:[%s8185_s3 + $0x140] sm:$0xff]  ;;  %v7152_v53 = vld [vmem:[%s8186_s5 + $0x110] sm:$0xff] }
 0x519   :  { %v1747_v19 = vsel %vm1746_vm14, %v3054_v15, %v1743_v14  ;;  %v1858_v15 = vpop.f32.mrf.mxu0  ;;  %v1879_v35 = vsel %vm1876_vm3, %v1878_v63, %v1874_v51  ;;  %v7164_v51 = vld [vmem:[%s8186_s5 + $0xf8] sm:$0xff] }
 0x51a   :  { %v1752_v31 = vsel %vm1749_vm15, %v1751_v23, %v1747_v19  ;;  %v1859_v8 = vadd.f32 %v1858_v15, %v8655_v1  ;;  %v7128_v23 = vld [vmem:[%s8186_s5 + $0x140] sm:$0xff]  ;;  %v7170_v15 = vld [vmem:[%s8185_s3 + $0xf8] sm:$0xff] }
 0x51b   :  { %v3056_v12 = vpop.eup %3055  ;;  %v1757_v0 = vsub.f32 1.0, %v1752_v31  ;;  %v1759_v43 = vmul.f32 %v1752_v31, %v6577_v56  ;;  %v7109_v56 = vld [vmem:[%s8185_s3 + $0x170] sm:$0xff]  ;;  %v7146_v31 = vld [vmem:[%s8185_s3 + $0x128] sm:$0xff] }
 0x51c   :  { %v1904_v48 = vmul.f32 %v1879_v35, %v1859_v8  ;;  %v7176_v8 = vld [vmem:[%s8186_s5 + $0xe0] sm:$0xff] }
 0x51d   :  { %v1758_v62 = vmul.f32 %v3056_v12, %v1757_v0 }
 0x51e   :  { %v3058_v13 = vpop.eup %3057  ;;  %v1907_v12 = vadd.f32 %v1905_v24, %v1904_v48  ;;  %v7182_v48 = vld [vmem:[%s8185_s3 + $0xe0] sm:$0xff] }
 0x51f   :  { %v1888_v46 = vadd.f32 1.0, %v3058_v13  ;;  %v7095_v33 = vadd.f32 %v1759_v43, %v1758_v62  ;;  %v7158_v13 = vld [vmem:[%s8185_s3 + $0x110] sm:$0xff] }
 0x521   :  { %3059 = vrcp.f32 %v1888_v46  ;;  %1794 = vmatmul.f32.vlgmr.msra.gmra.mxu1 %v7095_v33  ;;  %1989 = vmatmul.f32.vlgmr.msra.gmra.mxu0 %v7095_v33  ;;  %v1900_v0 = vand.u32 2147483648, %v1888_v46  ;;  %v1898_v43 = vand.u32 2147483647, %v1888_v46  ;;  %vm1894_vm5 = vweird.f32 %v1888_v46 }
 0x522   :  { %1993 = vmatpush.msra.mxu1 %v7103_v57  ;;  %2252 = vmatpush.msra.mxu0 %v7109_v56  ;;  %3061 = vtanh.f32 %v1907_v12  ;;  %v7194_v12 = vld [vmem:[%s8185_s3 + $0xc8] sm:$0xff] }
 0x523   :  { %v1901_v35 = vor.u32 1.1754944e-38, %v1900_v0  ;;  %vm1899_vm7 = vcmp.eq.f32.partialorder %v1898_v43, 8.507059e+37 }
 0x524   :  { %1994 = vmatpush.msra.mxu1 %v7116_v39  ;;  %2253 = vmatpush.msra.mxu0 %v7122_v41 }
 0x526   :  { %1995 = vmatpush.msra.mxu1 %v7128_v23  ;;  %2254 = vmatpush.msra.mxu0 %v7134_v32 }
 0x527   :  { %v3060_v14 = vpop.eup %3059 }
 0x528   :  { %v1890_v19 = vmul.f32 %v3060_v14, %v1888_v46  ;;  %1996 = vmatpush.msra.mxu1 %v7140_v47  ;;  %2255 = vmatpush.msra.mxu0 %v7146_v31  ;;  %vm1895_vm4 = vweird.f32 %v3060_v14  ;;  %v7188_v46 = vld [vmem:[%s8186_s5 + $0xc8] sm:$0xff]  ;;  %v3062_v0 = vpop.eup %3061 }
 0x529   :  { %vm1896_vm6 = vmor %vm1894_vm5, %vm1895_vm4 }
 0x52a   :  { %v1891_v17 = vsub.f32 1.0, %v1890_v19  ;;  %1997 = vmatpush.msra.mxu1 %v7152_v53  ;;  %2256 = vmatpush.msra.mxu0 %v7158_v13 }
 0x52c   :  { %v1892_v62 = vmul.f32 %v3060_v14, %v1891_v17  ;;  %1998 = vmatpush.msra.mxu1 %v7164_v51  ;;  %2257 = vmatpush.msra.mxu0 %v7170_v15 }
 0x52e   :  { %v1893_v63 = vadd.f32 %v3060_v14, %v1892_v62  ;;  %1999 = vmatpush.msra.mxu1 %v7176_v8  ;;  %2258 = vmatpush.msra.mxu0 %v7182_v48 }
 0x530   :  { %v1897_v24 = vsel %vm1896_vm6, %v3060_v14, %v1893_v63  ;;  %2000 = vmatpush.msra.mxu1 %v7188_v46  ;;  %2259 = vmatpush.msra.mxu0 %v7194_v12  ;;  %v7200_v14 = vld [vmem:[%s8186_s5 + $0xb0] sm:$0xff]  ;;  %v7208_v63 = vld [vmem:[%s8186_s5 + $0x98] sm:$0xff] }
 0x531   :  { %v1902_v19 = vsel %vm1899_vm7, %v1901_v35, %v1897_v24  ;;  %v7217_v24 = vld [vmem:[%s8186_s5 + $0x80] sm:$0xff] }
 0x532   :  { %v1909_v17 = vsub.f32 1.0, %v1902_v19  ;;  %2001 = vmatpush.msra.mxu1 %v7200_v14  ;;  %2260 = vmatpush.msra.mxu0 %v6606_v18  ;;  %v1911_v43 = vmul.f32 %v1902_v19, %v6652_v10  ;;  %v7227_v18 = vld [vmem:[%s8186_s5 + $0x68] sm:$0xff]  ;;  %v7251_v10 = vld [vmem:[%s8186_s5 + $0x20] sm:$0xff] }
 0x533   :  { %v7406_v19 = vld [vmem:[%s8185_s3 + $0x160] sm:$0xff] }
 0x534   :  { %v1910_v62 = vmul.f32 %v3062_v0, %v1909_v17  ;;  %2002 = vmatpush.msra.mxu1 %v7208_v63  ;;  %2261 = vmatpush.msra.mxu0 %v6613_v60  ;;  %v7235_v60 = vld [vmem:[%s8186_s5 + $0x50] sm:$0xff]  ;;  %8907 = vst [vmem:[#allocation12_spill] sm:$0xff] %v7406_v19 }
 0x535   :  { %v8908_v17 = vld [vmem:[#allocation85_spill] sm:$0xff] }
 0x536   :  { %v7212_v35 = vadd.f32 %v1911_v43, %v1910_v62  ;;  %2003 = vmatpush.msra.mxu1 %v7217_v24  ;;  %2262 = vmatpush.msra.mxu0 %v6620_v26  ;;  %v7243_v26 = vld [vmem:[%s8186_s5 + $0x38] sm:$0xff]  ;;  %v7414_v62 = vld [vmem:[%s8185_s3 + $0x148] sm:$0xff] }
 0x537   :  { %v8909_v0 = vld [vmem:[#allocation69_spill] sm:$0xff]  ;;  %8910 = vst [vmem:[#allocation11_spill] sm:$0xff] %v7414_v62  ;;  %v8911_v43 = vld [vmem:[#allocation8_spill] sm:$0xff] }
 0x538   :  { %1929 = vmatmul.f32.vlgmr.msrb.gmra.mxu1 %v7212_v35  ;;  %1949 = vmatmul.f32.vlgmr.msrb.gmra.mxu2 %v7212_v35 }
 0x539   :  { %1969 = vmatmul.f32.vlgmr.msrb.gmra.mxu3 %v7212_v35  ;;  %2004 = vmatpush.msra.mxu1 %v7227_v18 }
 0x53a   :  { %2136 = vmatmul.f32.vlgmr.msrb.gmra.mxu0 %v7212_v35  ;;  %2160 = vmatpush.msrb.mxu2 %v6669_v28  ;;  %v7285_v28 = vld [vmem:[%s8184_s1 + $0x140] sm:$0xff] }
 0x53b   :  { %2005 = vmatpush.msra.mxu1 %v7235_v60  ;;  %2263 = vmatpush.msra.mxu0 %v6627_v3  ;;  %v7259_v3 = vld [vmem:[%s8186_s5 + $0x8] sm:$0xff] }
 0x53c   :  { %2161 = vmatpush.msrb.mxu2 %v6682_v61  ;;  %v7317_v61 = vld [vmem:[%s8184_s1 + $0xe0] sm:$0xff] }
 0x53d   :  { %2006 = vmatpush.msra.mxu1 %v7243_v26  ;;  %2264 = vmatpush.msra.mxu0 %v6634_v7  ;;  %v7268_v7 = vld [vmem:[%s8184_s1 + $0x170] sm:$0xff] }
 0x53e   :  { %2162 = vmatpush.msrb.mxu2 %v6695_v16  ;;  %v7333_v16 = vld [vmem:[%s8184_s1 + $0xb0] sm:$0xff] }
 0x53f   :  { %2007 = vmatpush.msra.mxu1 %v7251_v10  ;;  %2265 = vmatpush.msra.mxu0 %v6641_v42  ;;  %v7276_v42 = vld [vmem:[%s8184_s1 + $0x158] sm:$0xff] }
 0x540   :  { %2163 = vmatpush.msrb.mxu2 %v6708_v11  ;;  %v7349_v11 = vld [vmem:[%s8184_s1 + $0x80] sm:$0xff] }
 0x541   :  { %2008 = vmatpush.msra.mxu1 %v7259_v3  ;;  %2029 = vmatmul.f32.vlgmr.msra.gmra.mxu2 %v7095_v33 }
 0x542   :  { %2164 = vmatpush.msrb.mxu2 %v6717_v22  ;;  %2009 = vmatmul.f32.vlgmr.msra.gmra.mxu1 %v7095_v33  ;;  %v8890_v22 = vld [vmem:[#allocation36_spill] sm:$0xff] }
 0x543   :  { %2140 = vmatpush.msrb.mxu1 %v7268_v7  ;;  %2266 = vmatpush.msra.mxu0 %v6649_v25  ;;  %v7293_v25 = vld [vmem:[%s8184_s1 + $0x128] sm:$0xff] }
 0x544   :  { %2165 = vmatpush.msrb.mxu2 %v6730_v59  ;;  %v8891_v59 = vld [vmem:[#allocation82_spill] sm:$0xff] }
 0x545   :  { %2141 = vmatpush.msrb.mxu1 %v7276_v42  ;;  %2267 = vmatpush.msra.mxu0 %v6658_v34  ;;  %v7301_v34 = vld [vmem:[%s8184_s1 + $0x110] sm:$0xff] }
 0x546   :  { %2166 = vmatpush.msrb.mxu2 %v6743_v50  ;;  %v7366_v50 = vld [vmem:[%s8184_s1 + $0x50] sm:$0xff] }
 0x547   :  { %2332 = vmatpush.msrb.mxu0 %v6675_v44  ;;  %2142 = vmatpush.msrb.mxu1 %v7285_v28  ;;  %v7309_v44 = vld [vmem:[%s8184_s1 + $0xf8] sm:$0xff]  ;;  %8893 = vst [vmem:[#allocation78_spill] sm:$0xff] %v7366_v50 }
 0x548   :  { %2167 = vmatpush.msrb.mxu2 %v6756_v21  ;;  %v8895_v21 = vld [vmem:[#allocation5_spill] sm:$0xff] }
 0x549   :  { %2333 = vmatpush.msrb.mxu0 %v6688_v52  ;;  %2143 = vmatpush.msrb.mxu1 %v7293_v25  ;;  %v7325_v52 = vld [vmem:[%s8184_s1 + $0xc8] sm:$0xff] }
 0x54a   :  { %2168 = vmatpush.msrb.mxu2 %v6769_v2  ;;  %v8897_v2 = vld [vmem:[#allocation86_spill] sm:$0xff] }
 0x54b   :  { %2334 = vmatpush.msrb.mxu0 %v6701_v6  ;;  %2144 = vmatpush.msrb.mxu1 %v7301_v34  ;;  %v7341_v6 = vld [vmem:[%s8184_s1 + $0x98] sm:$0xff] }
 0x54c   :  { %2169 = vmatpush.msrb.mxu2 %v6782_v37  ;;  %v7382_v37 = vld [vmem:[%s8184_s1 + $0x20] sm:$0xff] }
 0x54d   :  { %2335 = vmatpush.msrb.mxu0 %v6723_v30  ;;  %2145 = vmatpush.msrb.mxu1 %v7309_v44  ;;  %v7357_v30 = vld [vmem:[%s8184_s1 + $0x68] sm:$0xff]  ;;  %8899 = vst [vmem:[#allocation80_spill] sm:$0xff] %v7382_v37 }
 0x54e   :  { %2170 = vmatpush.msrb.mxu2 %v6795_v36  ;;  %v8901_v36 = vld [vmem:[#allocation81_spill] sm:$0xff] }
 0x54f   :  { %2336 = vmatpush.msrb.mxu0 %v6736_v5  ;;  %2146 = vmatpush.msrb.mxu1 %v7317_v61  ;;  %v8892_v5 = vld [vmem:[#allocation49_spill] sm:$0xff] }
 0x550   :  { %2171 = vmatpush.msrb.mxu2 %v6808_v55  ;;  %v7390_v55 = vld [vmem:[%s8184_s1 + $0x8] sm:$0xff] }
 0x551   :  { %2337 = vmatpush.msrb.mxu0 %v6749_v40  ;;  %2147 = vmatpush.msrb.mxu1 %v7325_v52  ;;  %v8894_v40 = vld [vmem:[#allocation84_spill] sm:$0xff]  ;;  %8902 = vst [vmem:[#allocation89_spill] sm:$0xff] %v7390_v55 }
 0x552   :  { %2172 = vmatpush.msrb.mxu2 %v6821_v49  ;;  %v8903_v49 = vld [vmem:[#allocation88_spill] sm:$0xff] }
 0x553   :  { %2338 = vmatpush.msrb.mxu0 %v6762_v54  ;;  %2148 = vmatpush.msrb.mxu1 %v7333_v16  ;;  %v7374_v54 = vld [vmem:[%s8184_s1 + $0x38] sm:$0xff] }
 0x554   :  { %2173 = vmatpush.msrb.mxu2 %v6834_v27  ;;  %8896 = vst [vmem:[#allocation79_spill] sm:$0xff] %v7374_v54  ;;  %v7398_v27 = vld [vmem:[%s8185_s3 + $0x178] sm:$0xff] }
 0x555   :  { %2339 = vmatpush.msrb.mxu0 %v6775_v45  ;;  %2149 = vmatpush.msrb.mxu1 %v7341_v6  ;;  %v8898_v45 = vld [vmem:[#allocation54_spill] sm:$0xff]  ;;  %8904 = vst [vmem:[#allocation9_spill] sm:$0xff] %v7398_v27 }
 0x556   :  { %2174 = vmatpush.msrb.mxu2 %v6847_v4  ;;  %v8905_v4 = vld [vmem:[#allocation83_spill] sm:$0xff] }
 0x557   :  { %2340 = vmatpush.msrb.mxu0 %v6788_v9  ;;  %2150 = vmatpush.msrb.mxu1 %v7349_v11  ;;  %v8900_v9 = vld [vmem:[#allocation87_spill] sm:$0xff] }
 0x558   :  { %2175 = vmatpush.msrb.mxu2 %v6860_v58  ;;  %v8906_v58 = vld [vmem:[#allocation55_spill] sm:$0xff] }
 0x559   :  { %2341 = vmatpush.msrb.mxu0 %v8890_v22  ;;  %2151 = vmatpush.msrb.mxu1 %v7357_v30  ;;  %v7421_v22 = vld [vmem:[%s8185_s3 + $0x130] sm:$0xff] }
 0x55a   :  { %2176 = vmatmul.f32.vlgmr.msrb.gmra.mxu2 %v7212_v35  ;;  %8912 = vst [vmem:[#allocation13_spill] sm:$0xff] %v7421_v22 }
 0x55b   :  { %2292 = vmatpush.msra.mxu2 %v8891_v59  ;;  %2342 = vmatpush.msrb.mxu0 %v8892_v5  ;;  %v8913_v59 = vld [vmem:[#allocation70_spill] sm:$0xff] }
 0x55c   :  { %2152 = vmatpush.msrb.mxu1 %v7366_v50  ;;  %v7428_v5 = vld [vmem:[%s8185_s3 + $0x118] sm:$0xff] }
 0x55d   :  { %2293 = vmatpush.msra.mxu2 %v8894_v40  ;;  %2343 = vmatpush.msrb.mxu0 %v8895_v21  ;;  %8914 = vst [vmem:[#allocation14_spill] sm:$0xff] %v7428_v5  ;;  %v8915_v40 = vld [vmem:[#allocation7_spill] sm:$0xff] }
 0x55e   :  { %2153 = vmatpush.msrb.mxu1 %v7374_v54  ;;  %v7435_v21 = vld [vmem:[%s8185_s3 + $0x100] sm:$0xff] }
 0x55f   :  { %2294 = vmatpush.msra.mxu2 %v8897_v2  ;;  %2344 = vmatpush.msrb.mxu0 %v8898_v45  ;;  %8916 = vst [vmem:[#allocation15_spill] sm:$0xff] %v7435_v21  ;;  %v8917_v2 = vld [vmem:[#allocation71_spill] sm:$0xff] }
 0x560   :  { %2154 = vmatpush.msrb.mxu1 %v7382_v37  ;;  %v7442_v45 = vld [vmem:[%s8185_s3 + $0xe8] sm:$0xff] }
 0x561   :  { %2295 = vmatpush.msra.mxu2 %v8900_v9  ;;  %2345 = vmatpush.msrb.mxu0 %v8901_v36  ;;  %8918 = vst [vmem:[#allocation16_spill] sm:$0xff] %v7442_v45  ;;  %v8919_v9 = vld [vmem:[#allocation72_spill] sm:$0xff] }
 0x562   :  { %2155 = vmatpush.msrb.mxu1 %v7390_v55  ;;  %v7449_v36 = vld [vmem:[%s8185_s3 + $0xd0] sm:$0xff] }
 0x563   :  { %2156 = vmatmul.f32.vlgmr.msrb.gmra.mxu1 %v7212_v35  ;;  %2296 = vmatpush.msra.mxu2 %v8903_v49  ;;  %8920 = vst [vmem:[#allocation35_spill] sm:$0xff] %v7449_v36  ;;  %v8921_v49 = vld [vmem:[#allocation73_spill] sm:$0xff] }
 0x564   :  { %2272 = vmatpush.msra.mxu1 %v7398_v27  ;;  %2346 = vmatpush.msrb.mxu0 %v8905_v4  ;;  %v7456_v4 = vld [vmem:[%s8185_s3 + $0xb8] sm:$0xff] }
 0x565   :  { %2297 = vmatpush.msra.mxu2 %v8906_v58  ;;  %8922 = vst [vmem:[#allocation19_spill] sm:$0xff] %v7456_v4  ;;  %v8923_v58 = vld [vmem:[#allocation74_spill] sm:$0xff] }
 0x566   :  { %2273 = vmatpush.msra.mxu1 %v7406_v19  ;;  %2347 = vmatpush.msrb.mxu0 %v8908_v17  ;;  %v7463_v17 = vld [vmem:[%s8185_s3 + $0xa0] sm:$0xff] }
 0x567   :  { %2298 = vmatpush.msra.mxu2 %v8909_v0  ;;  %8924 = vst [vmem:[#allocation41_spill] sm:$0xff] %v7463_v17  ;;  %v8925_v0 = vld [vmem:[#allocation75_spill] sm:$0xff] }
 0x568   :  { %2274 = vmatpush.msra.mxu1 %v7414_v62 }
 0x569   :  { %2299 = vmatpush.msra.mxu2 %v8911_v43  ;;  %v7470_v43 = vld [vmem:[%s8185_s3 + $0x88] sm:$0xff] }
 0x56a   :  { %2275 = vmatpush.msra.mxu1 %v7421_v22  ;;  %8926 = vst [vmem:[#allocation44_spill] sm:$0xff] %v7470_v43 }
 0x56b   :  { %2300 = vmatpush.msra.mxu2 %v8913_v59  ;;  %v8927_v59 = vld [vmem:[#allocation76_spill] sm:$0xff] }
 0x56c   :  { %2276 = vmatpush.msra.mxu1 %v7428_v5 }
 0x56d   :  { %2301 = vmatpush.msra.mxu2 %v8915_v40  ;;  %v3445_v40 = vld [vmem:[%s8184_s1 + $0x168] sm:$0xff] }
 0x56e   :  { %2277 = vmatpush.msra.mxu1 %v7435_v21 }
 0x56f   :  { %2302 = vmatpush.msra.mxu2 %v8917_v2  ;;  %v7480_v2 = vld [vmem:[%s8185_s3 + $0x70] sm:$0xff] }
 0x570   :  { %2278 = vmatpush.msra.mxu1 %v7442_v45  ;;  %8928 = vst [vmem:[#allocation23_spill] sm:$0xff] %v7480_v2 }
 0x571   :  { %2303 = vmatpush.msra.mxu2 %v8919_v9  ;;  %v3447_v9 = vld [vmem:[%s8184_s1 + $0x150] sm:$0xff] }
 0x572   :  { %2279 = vmatpush.msra.mxu1 %v7449_v36 }
 0x573   :  { %2304 = vmatpush.msra.mxu2 %v8921_v49  ;;  %v7489_v49 = vld [vmem:[%s8185_s3 + $0x58] sm:$0xff] }
 0x574   :  { %2280 = vmatpush.msra.mxu1 %v7456_v4  ;;  %8929 = vst [vmem:[#allocation48_spill] sm:$0xff] %v7489_v49  ;;  %v7656_v4 = vld [vmem:[%s8185_s3 + $0xa8] sm:$0xff] }
 0x575   :  { %2305 = vmatpush.msra.mxu2 %v8923_v58  ;;  %v3449_v58 = vld [vmem:[%s8184_s1 + $0x138] sm:$0xff]  ;;  %8945 = vst [vmem:[#allocation59_spill] sm:$0xff] %v7656_v4 }
 0x576   :  { %2281 = vmatpush.msra.mxu1 %v7463_v17  ;;  %v7650_v17 = vld [vmem:[%s8185_s3 + $0xc0] sm:$0xff] }
 0x577   :  { %2306 = vmatpush.msra.mxu2 %v8925_v0  ;;  %v7498_v0 = vld [vmem:[%s8185_s3 + $0x40] sm:$0xff]  ;;  %8944 = vst [vmem:[#allocation57_spill] sm:$0xff] %v7650_v17 }
 0x578   :  { %2282 = vmatpush.msra.mxu1 %v7470_v43  ;;  %8930 = vst [vmem:[#allocation67_spill] sm:$0xff] %v7498_v0  ;;  %v8943_v43 = vld [vmem:[#allocation47_spill] sm:$0xff] }
 0x579   :  { %2307 = vmatpush.msra.mxu2 %v8927_v59  ;;  %v3451_v59 = vld [vmem:[%s8184_s1 + $0x120] sm:$0xff] }
 0x57a   :  { %2283 = vmatpush.msra.mxu1 %v7480_v2 }
 0x57b   :  { %2439 = vmatpush.msrb.mxu2 %v3445_v40  ;;  %v7507_v40 = vld [vmem:[%s8185_s3 + $0x28] sm:$0xff] }
 0x57c   :  { %2284 = vmatpush.msra.mxu1 %v7489_v49  ;;  %8931 = vst [vmem:[#allocation28_spill] sm:$0xff] %v7507_v40  ;;  %v3456_v49 = vld [vmem:[%s8184_s1 + $0xd8] sm:$0xff] }
 0x57d   :  { %2440 = vmatpush.msrb.mxu2 %v3447_v9  ;;  %v2906_v9 = vld [vmem:[%s8190_s7 + $0x2f8] sm:$0xff] }
 0x57e   :  { %2285 = vmatpush.msra.mxu1 %v7498_v0  ;;  %2097 = vmatpush.msra.mxu3 %v2906_v9  ;;  %v2904_v0 = vld [vmem:[%s8190_s7 + $0x2e8] sm:$0xff]  ;;  %v3455_v9 = vld [vmem:[%s8184_s1 + $0xf0] sm:$0xff] }
 0x57f   :  { %2441 = vmatpush.msrb.mxu2 %v3449_v58  ;;  %v2905_v58 = vld [vmem:[%s8190_s7 + $0x2f0] sm:$0xff] }
 0x580   :  { %2286 = vmatpush.msra.mxu1 %v7507_v40  ;;  %v7525_v40 = vld [vmem:[%s8185_s3 + $0x10] sm:$0xff]  ;;  %2098 = vmatpush.msra.mxu3 %v2905_v58  ;;  %v3457_v58 = vld [vmem:[%s8184_s1 + $0xc0] sm:$0xff] }
 0x581   :  { %2442 = vmatpush.msrb.mxu2 %v3451_v59  ;;  %v3453_v59 = vld [vmem:[%s8184_s1 + $0x108] sm:$0xff]  ;;  %8932 = vst [vmem:[#allocation68_spill] sm:$0xff] %v7525_v40 }
 0x582   :  { %2287 = vmatpush.msra.mxu1 %v7525_v40  ;;  %2099 = vmatpush.msra.mxu3 %v2904_v0  ;;  %v2902_v40 = vld [vmem:[%s8190_s7 + $0x2d8] sm:$0xff]  ;;  %v3458_v0 = vld [vmem:[%s8184_s1 + $0xa8] sm:$0xff] }
 0x583   :  { %2443 = vmatpush.msrb.mxu2 %v3453_v59  ;;  %v2903_v59 = vld [vmem:[%s8190_s7 + $0x2e0] sm:$0xff] }
 0x584   :  { %2100 = vmatpush.msra.mxu3 %v2903_v59  ;;  %v3459_v59 = vld [vmem:[%s8184_s1 + $0x90] sm:$0xff] }
 0x585   :  { %2444 = vmatpush.msrb.mxu2 %v3455_v9  ;;  %v2901_v9 = vld [vmem:[%s8190_s7 + $0x2d0] sm:$0xff] }
 0x586   :  { %2101 = vmatpush.msra.mxu3 %v2902_v40  ;;  %v3460_v40 = vld [vmem:[%s8184_s1 + $0x78] sm:$0xff] }
 0x587   :  { %2445 = vmatpush.msrb.mxu2 %v3456_v49  ;;  %v2900_v49 = vld [vmem:[%s8190_s7 + $0x2c8] sm:$0xff] }
 0x588   :  { %2102 = vmatpush.msra.mxu3 %v2901_v9  ;;  %v3462_v9 = vld [vmem:[%s8184_s1 + $0x48] sm:$0xff] }
 0x589   :  { %2446 = vmatpush.msrb.mxu2 %v3457_v58  ;;  %v3461_v58 = vld [vmem:[%s8184_s1 + $0x60] sm:$0xff] }
 0x58a   :  { %2103 = vmatpush.msra.mxu3 %v2900_v49  ;;  %v3464_v49 = vld [vmem:[%s8184_s1 + $0x18] sm:$0xff] }
 0x58b   :  { %2447 = vmatpush.msrb.mxu2 %v3458_v0  ;;  %v3463_v0 = vld [vmem:[%s8184_s1 + $0x30] sm:$0xff] }
 0x58d   :  { %2448 = vmatpush.msrb.mxu2 %v3459_v59  ;;  %v2899_v59 = vld [vmem:[%s8190_s7 + $0x2c0] sm:$0xff] }
 0x58e   :  { %2104 = vmatpush.msra.mxu3 %v2899_v59 }
 0x58f   :  { %2449 = vmatpush.msrb.mxu2 %v3460_v40  ;;  %v3465_v40 = vld [vmem:[%s8184_s1] sm:$0xff] }
 0x591   :  { %2450 = vmatpush.msrb.mxu2 %v3461_v58  ;;  %v2898_v58 = vld [vmem:[%s8190_s7 + $0x2b8] sm:$0xff] }
 0x592   :  { %2105 = vmatpush.msra.mxu3 %v2898_v58  ;;  %v2894_v58 = vld [vmem:[%s8190_s7 + $0x298] sm:$0xff] }
 0x593   :  { %2451 = vmatpush.msrb.mxu2 %v3462_v9  ;;  %v2897_v9 = vld [vmem:[%s8190_s7 + $0x2b0] sm:$0xff] }
 0x594   :  { %2106 = vmatpush.msra.mxu3 %v2897_v9  ;;  %v2893_v9 = vld [vmem:[%s8190_s7 + $0x290] sm:$0xff] }
 0x595   :  { %2452 = vmatpush.msrb.mxu2 %v3463_v0  ;;  %v2896_v0 = vld [vmem:[%s8190_s7 + $0x2a8] sm:$0xff] }
 0x596   :  { %2107 = vmatpush.msra.mxu3 %v2896_v0  ;;  %v2892_v0 = vld [vmem:[%s8190_s7 + $0x288] sm:$0xff] }
 0x597   :  { %2453 = vmatpush.msrb.mxu2 %v3464_v49  ;;  %v2895_v49 = vld [vmem:[%s8190_s7 + $0x2a0] sm:$0xff] }
 0x598   :  { %2108 = vmatpush.msra.mxu3 %v2895_v49  ;;  %v2891_v49 = vld [vmem:[%s8190_s7 + $0x280] sm:$0xff] }
 0x599   :  { %2454 = vmatpush.msrb.mxu2 %v3465_v40  ;;  %v8933_v40 = vld [vmem:[#allocation77_spill] sm:$0xff] }
 0x59a   :  { %2109 = vmatpush.msra.mxu3 %v2894_v58  ;;  %v7618_v58 = vld [vmem:[%s8185_s3 + $0x138] sm:$0xff] }
 0x59b   :  { %8937 = vst [vmem:[#allocation58_spill] sm:$0xff] %v7618_v58 }
 0x59c   :  { %2110 = vmatpush.msra.mxu3 %v2893_v9  ;;  %v7624_v9 = vld [vmem:[%s8185_s3 + $0x120] sm:$0xff] }
 0x59d   :  { %8938 = vst [vmem:[#allocation60_spill] sm:$0xff] %v7624_v9 }
 0x59e   :  { %v1795_v59 = vpop.f32.mrf.mxu1  ;;  %2111 = vmatpush.msra.mxu3 %v2892_v0  ;;  %v7630_v0 = vld [vmem:[%s8185_s3 + $0x108] sm:$0xff] }
 0x59f   :  { %v7589_v2 = vadd.f32 %v1795_v59, %v8933_v40  ;;  %v7606_v59 = vld [vmem:[%s8185_s3 + $0x168] sm:$0xff]  ;;  %v7612_v40 = vld [vmem:[%s8185_s3 + $0x150] sm:$0xff]  ;;  %8939 = vst [vmem:[#allocation30_spill] sm:$0xff] %v7630_v0 }
 0x5a0   :  { %2112 = vmatpush.msra.mxu3 %v2891_v49  ;;  %8935 = vst [vmem:[#allocation40_spill] sm:$0xff] %v7606_v59  ;;  %v1990_v49 = vpop.f32.mrf.mxu0 }
 0x5a1   :  { %8934 = vst [vmem:[#allocation34_spill] sm:$0xff] %v7589_v2 }
 0x5a2   :  { %2232 = vmatpush.msrb.mxu3 %v7606_v59  ;;  %8936 = vst [vmem:[#allocation56_spill] sm:$0xff] %v7612_v40  ;;  %v8942_v59 = vld [vmem:[#allocation4_spill] sm:$0xff] }
 0x5a3   :  { %v1991_v2 = vadd.f32 %v1990_v49, %v8942_v59  ;;  %v8951_v59 = vld [vmem:[#allocation6_spill] sm:$0xff] }
 0x5a4   :  { %2233 = vmatpush.msrb.mxu3 %v7612_v40  ;;  %v7636_v40 = vld [vmem:[%s8185_s3 + $0xf0] sm:$0xff] }
 0x5a5   :  { %8940 = vst [vmem:[#allocation38_spill] sm:$0xff] %v7636_v40 }
 0x5a6   :  { %2234 = vmatpush.msrb.mxu3 %v7618_v58  ;;  %v7642_v58 = vld [vmem:[%s8185_s3 + $0xd8] sm:$0xff] }
 0x5a7   :  { %8941 = vst [vmem:[#allocation42_spill] sm:$0xff] %v7642_v58 }
 0x5a8   :  { %2235 = vmatpush.msrb.mxu3 %v7624_v9 }
 0x5aa   :  { %2236 = vmatpush.msrb.mxu3 %v7630_v0 }
 0x5ac   :  { %2237 = vmatpush.msrb.mxu3 %v7636_v40 }
 0x5ae   :  { %2238 = vmatpush.msrb.mxu3 %v7642_v58 }
 0x5b0   :  { %2239 = vmatpush.msrb.mxu3 %v7650_v17  ;;  %v8950_v17 = vld [vmem:[#allocation3_spill] sm:$0xff] }
 0x5b2   :  { %2240 = vmatpush.msrb.mxu3 %v7656_v4 }
 0x5b5   :  { %v1930_v9 = vpop.f32.mrf.mxu1 }
 0x5b6   :  { %v1931_v0 = vadd.f32 %v1930_v9, %v8943_v43  ;;  %v7662_v9 = vld [vmem:[%s8185_s3 + $0x90] sm:$0xff] }
 0x5b7   :  { %v2137_v36 = vpop.f32.mrf.mxu0  ;;  %8946 = vst [vmem:[#allocation61_spill] sm:$0xff] %v7662_v9  ;;  %2241 = vmatpush.msrb.mxu3 %v7662_v9  ;;  %v7680_v9 = vld [vmem:[%s8185_s3 + $0x60] sm:$0xff] }
 0x5b8   :  { %v2033_v40 = vadd.f32 %v1991_v2, %v1931_v0  ;;  %v7668_v2 = vld [vmem:[%s8185_s3 + $0x78] sm:$0xff]  ;;  %8949 = vst [vmem:[#allocation63_spill] sm:$0xff] %v7680_v9 }
 0x5b9   :  { %8947 = vst [vmem:[#allocation62_spill] sm:$0xff] %v7668_v2  ;;  %2242 = vmatpush.msrb.mxu3 %v7668_v2  ;;  %v8948_v0 = vld [vmem:[#allocation53_spill] sm:$0xff] }
 0x5ba   :  { %v2889_v58 = vmul.f32 -1.442695, %v2033_v40  ;;  %v2138_v49 = vadd.f32 %v2137_v36, %v8948_v0  ;;  %v7675_v40 = vld [vmem:[%s8188_s0 + $0x24] sm:$0x3f] }
 0x5bb   :  { %v1950_v4 = vpop.f32.mrf.mxu2  ;;  %2243 = vmatpush.msrb.mxu3 %v7680_v9  ;;  %v7688_v36 = vld [vmem:[%s8185_s3 + $0x48] sm:$0xff]  ;;  %v7695_v9 = vld [vmem:[%s8185_s3 + $0x30] sm:$0xff] }
 0x5bc   :  { %3063 = vpow2.f32 %v2889_v58  ;;  %v1951_v43 = vadd.f32 %v1950_v4, %v8950_v17  ;;  %8952 = vst [vmem:[#allocation64_spill] sm:$0xff] %v7688_v36  ;;  %v2180_v0 = vadd.f32 %v7675_v40, %v2138_v49  ;;  %v1970_v19 = vpop.f32.mrf.mxu3 }
 0x5bd   :  { %2244 = vmatpush.msrb.mxu3 %v7688_v36  ;;  %8953 = vst [vmem:[#allocation65_spill] sm:$0xff] %v7695_v9 }
 0x5be   :  { %v2908_v49 = vmul.f32 -1.442695, %v2180_v0 }
 0x5bf   :  { %v2010_v58 = vpop.f32.mrf.mxu1  ;;  %2245 = vmatpush.msrb.mxu3 %v7695_v9 }
 0x5c0   :  { %v2011_v2 = vadd.f32 %v2010_v58, %v8951_v59  ;;  %v7701_v59 = vld [vmem:[%s8185_s3 + $0x18] sm:$0xff] }
 0x5c1   :  { %8954 = vst [vmem:[#allocation66_spill] sm:$0xff] %v7701_v59  ;;  %2246 = vmatpush.msrb.mxu3 %v7701_v59 }
 0x5c2   :  { %v3064_v45 = vpop.eup %3063  ;;  %v2053_v21 = vadd.f32 %v2011_v2, %v1951_v43  ;;  %v7707_v43 = vld [vmem:[%s8185_s3] sm:$0xff] }
 0x5c3   :  { %v2037_v4 = vadd.f32 1.0, %v3064_v45  ;;  %8955 = vst [vmem:[#allocation33_spill] sm:$0xff] %v7707_v43  ;;  %2247 = vmatpush.msrb.mxu3 %v7707_v43 }
 0x5c4   :  { %v2890_v58 = vmul.f32 -1.442695, %v2053_v21 }
 0x5c5   :  { %3065 = vrcp.f32 %v2037_v4  ;;  %v2049_v5 = vand.u32 2147483648, %v2037_v4  ;;  %v2047_v0 = vand.u32 2147483647, %v2037_v4  ;;  %vm2043_vm9 = vweird.f32 %v2037_v4 }
 0x5c6   :  { %3067 = vpow2.f32 %v2890_v58  ;;  %v2030_v58 = vpop.f32.mrf.mxu2 }
 0x5c7   :  { %3069 = vpow2.f32 %v2908_v49  ;;  %v2050_v43 = vor.u32 1.1754944e-38, %v2049_v5  ;;  %v2031_v49 = vadd.f32 %v2030_v58, %v8722_v29  ;;  %vm2048_vm11 = vcmp.eq.f32.partialorder %v2047_v0, 8.507059e+37 }
 0x5cb   :  { %v3066_v45 = vpop.eup %3065 }
 0x5cc   :  { %v3068_v21 = vpop.eup %3067  ;;  %v2039_v2 = vmul.f32 %v3066_v45, %v2037_v4  ;;  %vm2044_vm8 = vweird.f32 %v3066_v45 }
 0x5cd   :  { %v2057_v9 = vadd.f32 1.0, %v3068_v21  ;;  %v3070_v17 = vpop.eup %3069  ;;  %vm2045_vm10 = vmor %vm2043_vm9, %vm2044_vm8 }
 0x5ce   :  { %v2040_v36 = vsub.f32 1.0, %v2039_v2  ;;  %v7710_v22 = vadd.f32 1.0, %v3070_v17 }
 0x5cf   :  { %3071 = vrcp.f32 %v2057_v9  ;;  %v2069_v50 = vand.u32 2147483648, %v2057_v9  ;;  %v2067_v4 = vand.u32 2147483647, %v2057_v9  ;;  %vm2063_vm13 = vweird.f32 %v2057_v9 }
 0x5d0   :  { %v2041_v59 = vmul.f32 %v3066_v45, %v2040_v36  ;;  %3073 = vrcp.f32 %v7710_v22  ;;  %v1971_v36 = vadd.f32 %v1970_v19, %v8723_v20  ;;  %vm2190_vm1 = vweird.f32 %v7710_v22 }
 0x5d1   :  { %vm2068_vm15 = vcmp.eq.f32.partialorder %v2067_v4, 8.507059e+37 }
 0x5d2   :  { %v2042_v62 = vadd.f32 %v3066_v45, %v2041_v59 }
 0x5d4   :  { %v2046_v27 = vsel %vm2045_vm10, %v3066_v45, %v2042_v62  ;;  %v2070_v62 = vor.u32 1.1754944e-38, %v2069_v50 }
 0x5d5   :  { %v3072_v21 = vpop.eup %3071  ;;  %v2051_v2 = vsel %vm2048_vm11, %v2050_v43, %v2046_v27  ;;  %v2201_v27 = vrot.slane %v7675_v40, 2 }
 0x5d6   :  { %v2059_v55 = vmul.f32 %v3072_v21, %v2057_v9  ;;  %v2073_v37 = vmul.f32 %v2051_v2, %v2031_v49  ;;  %vm2064_vm12 = vweird.f32 %v3072_v21  ;;  %v3074_v5 = vpop.eup %3073 }
 0x5d7   :  { %vm2065_vm14 = vmor %vm2063_vm13, %vm2064_vm12  ;;  %v2186_v19 = vmul.f32 %v3074_v5, %v7710_v22  ;;  %vm2191_vm0 = vweird.f32 %v3074_v5 }
 0x5d8   :  { %v2060_v54 = vsub.f32 1.0, %v2059_v55  ;;  %v2074_v17 = vadd.f32 %v2073_v37, %v1971_v36  ;;  %vm2192_vm2 = vmor %vm2190_vm1, %vm2191_vm0 }
 0x5d9   :  { %v2187_v9 = vsub.f32 1.0, %v2186_v19 }
 0x5da   :  { %v2061_v59 = vmul.f32 %v3072_v21, %v2060_v54  ;;  %3075 = vtanh.f32 %v2074_v17 }
 0x5db   :  { %v2188_v50 = vmul.f32 %v3074_v5, %v2187_v9  ;;  %v3505_v9 = vld [vmem:[%s8184_s1 + $0xb8] sm:$0xff] }
 0x5dc   :  { %v2062_v58 = vadd.f32 %v3072_v21, %v2061_v59 }
 0x5dd   :  { %v2177_v4 = vpop.f32.mrf.mxu2 }
 0x5de   :  { %v2066_v45 = vsel %vm2065_vm14, %v3072_v21, %v2062_v58  ;;  %v2189_v21 = vadd.f32 %v3074_v5, %v2188_v50  ;;  %v2196_v58 = vand.u32 2147483648, %v7710_v22  ;;  %v3509_v50 = vld [vmem:[%s8184_s1 + $0x88] sm:$0xff] }
 0x5df   :  { %v2071_v43 = vsel %vm2068_vm15, %v2070_v62, %v2066_v45 }
 0x5e0   :  { %v2157_v0 = vpop.f32.mrf.mxu1  ;;  %v3076_v55 = vpop.eup %3075  ;;  %v2076_v37 = vsub.f32 1.0, %v2071_v43  ;;  %v2078_v36 = vmul.f32 %v2071_v43, %v7095_v33 }
 0x5e1   :  { %v2158_v54 = vadd.f32 %v2157_v0, %v8724_v38 }
 0x5e2   :  { %v2077_v49 = vmul.f32 %v3076_v55, %v2076_v37  ;;  %v3494_v37 = vld [vmem:[%s8184_s1 + $0x148] sm:$0xff] }
 0x5e3   :  { %v2203_v2 = vadd.f32 %v2201_v27, %v2158_v54  ;;  %v3496_v54 = vld [vmem:[%s8184_s1 + $0x130] sm:$0xff] }
 0x5e4   :  { %v7719_v59 = vadd.f32 %v2078_v36, %v2077_v49  ;;  %v3499_v49 = vld [vmem:[%s8184_s1 + $0x100] sm:$0xff]  ;;  %v3503_v36 = vld [vmem:[%s8184_s1 + $0xd0] sm:$0xff] }
 0x5e5   :  { %v2909_v17 = vmul.f32 -1.442695, %v2203_v2  ;;  %v3501_v2 = vld [vmem:[%s8184_s1 + $0xe8] sm:$0xff] }
 0x5e6   :  { %2113 = vmatmul.f32.vlgmr.msra.gmra.mxu3 %v7719_v59  ;;  %2308 = vmatmul.f32.vlgmr.msra.gmra.mxu2 %v7719_v59 }
 0x5e7   :  { %3077 = vpow2.f32 %v2909_v17  ;;  %2312 = vmatpush.msra.mxu3 %v7103_v57  ;;  %2571 = vmatpush.msra.mxu2 %v7109_v56  ;;  %v2194_v57 = vand.u32 2147483647, %v7710_v22  ;;  %v2178_v56 = vadd.f32 %v2177_v4, %v8655_v1  ;;  %v3507_v17 = vld [vmem:[%s8184_s1 + $0xa0] sm:$0xff]  ;;  %v3513_v4 = vld [vmem:[%s8184_s1 + $0x58] sm:$0xff] }
 0x5e9   :  { %2313 = vmatpush.msra.mxu3 %v7116_v39  ;;  %2572 = vmatpush.msra.mxu2 %v7122_v41  ;;  %v2193_v39 = vsel %vm2192_vm2, %v3074_v5, %v2189_v21  ;;  %v2197_v41 = vor.u32 1.1754944e-38, %v2196_v58  ;;  %vm2195_vm3 = vcmp.eq.f32.partialorder %v2194_v57, 8.507059e+37  ;;  %v3511_v21 = vld [vmem:[%s8184_s1 + $0x70] sm:$0xff]  ;;  %v8957_v58 = vld [vmem:[#allocation79_spill] sm:$0xff] }
 0x5ea   :  { %v3515_v57 = vld [vmem:[%s8184_s1 + $0x40] sm:$0xff] }
 0x5eb   :  { %2314 = vmatpush.msra.mxu3 %v7128_v23  ;;  %2573 = vmatpush.msra.mxu2 %v7134_v32  ;;  %v2198_v23 = vsel %vm2195_vm3, %v2197_v41, %v2193_v39  ;;  %v3517_v39 = vld [vmem:[%s8184_s1 + $0x28] sm:$0xff]  ;;  %v3518_v41 = vld [vmem:[%s8186_s5 + $0x40] sm:$0xff] }
 0x5ec   :  { %v2223_v32 = vmul.f32 %v2198_v23, %v2178_v56  ;;  %v8958_v56 = vld [vmem:[#allocation80_spill] sm:$0xff]  ;;  %v8959_v23 = vld [vmem:[#allocation89_spill] sm:$0xff] }
 0x5ed   :  { %v3078_v33 = vpop.eup %3077  ;;  %2315 = vmatpush.msra.mxu3 %v7140_v47  ;;  %2574 = vmatpush.msra.mxu2 %v7146_v31  ;;  %v2224_v47 = vrot.slane %v7675_v40, 4  ;;  %v3485_v40 = vld [vmem:[%s8185_s3 + $0x68] sm:$0xff] }
 0x5ee   :  { %v2207_v62 = vadd.f32 1.0, %v3078_v33  ;;  %v8956_v33 = vld [vmem:[#allocation78_spill] sm:$0xff] }
 0x5ef   :  { %2316 = vmatpush.msra.mxu3 %v7152_v53  ;;  %2575 = vmatpush.msra.mxu2 %v7158_v13  ;;  %v2226_v13 = vadd.f32 %v2224_v47, %v2223_v32  ;;  %v3519_v32 = vld [vmem:[%s8184_s1 + $0x10] sm:$0xff]  ;;  %v3520_v47 = vld [vmem:[%s8186_s5 + $0x168] sm:$0xff] }
 0x5f0   :  { %3079 = vrcp.f32 %v2207_v62  ;;  %v2219_v22 = vand.u32 2147483648, %v2207_v62  ;;  %vm2213_vm5 = vweird.f32 %v2207_v62 }
 0x5f1   :  { %2317 = vmatpush.msra.mxu3 %v7164_v51  ;;  %2576 = vmatpush.msra.mxu2 %v7170_v15  ;;  %v3482_v51 = vld [vmem:[%s8185_s3 + $0xb0] sm:$0xff]  ;;  %3081 = vtanh.f32 %v2226_v13 }
 0x5f2   :  { %v3522_v13 = vld [vmem:[%s8186_s5 + $0x150] sm:$0xff] }
 0x5f3   :  { %2318 = vmatpush.msra.mxu3 %v7176_v8  ;;  %2577 = vmatpush.msra.mxu2 %v7182_v48  ;;  %v3483_v8 = vld [vmem:[%s8185_s3 + $0x98] sm:$0xff] }
 0x5f5   :  { %2319 = vmatpush.msra.mxu3 %v7188_v46  ;;  %2578 = vmatpush.msra.mxu2 %v7194_v12  ;;  %v2217_v46 = vand.u32 2147483647, %v2207_v62  ;;  %v3484_v12 = vld [vmem:[%s8185_s3 + $0x80] sm:$0xff] }
 0x5f6   :  { %v3080_v31 = vpop.eup %3079 }
 0x5f7   :  { %v2209_v53 = vmul.f32 %v3080_v31, %v2207_v62  ;;  %2320 = vmatpush.msra.mxu3 %v7200_v14  ;;  %2579 = vmatpush.msra.mxu2 %v3482_v51  ;;  %vm2214_vm4 = vweird.f32 %v3080_v31  ;;  %vm2218_vm7 = vcmp.eq.f32.partialorder %v2217_v46, 8.507059e+37  ;;  %v3082_v43 = vpop.eup %3081  ;;  %v3516_v62 = vld [vmem:[%s8186_s5 + $0x58] sm:$0xff]  ;;  %v8961_v51 = vld [vmem:[#allocation12_spill] sm:$0xff] }
 0x5f8   :  { %vm2215_vm6 = vmor %vm2213_vm5, %vm2214_vm4  ;;  %v8963_v46 = vld [vmem:[#allocation13_spill] sm:$0xff] }
 0x5f9   :  { %v2210_v15 = vsub.f32 1.0, %v2209_v53  ;;  %2321 = vmatpush.msra.mxu3 %v7208_v63  ;;  %2580 = vmatpush.msra.mxu2 %v3483_v8  ;;  %v2220_v63 = vor.u32 1.1754944e-38, %v2219_v22  ;;  %v3521_v53 = vld [vmem:[%s8186_s5 + $0x28] sm:$0xff]  ;;  %v3524_v22 = vld [vmem:[%s8186_s5 + $0x138] sm:$0xff] }
 0x5fa   :  { %v8962_v8 = vld [vmem:[#allocation11_spill] sm:$0xff] }
 0x5fb   :  { %v2211_v48 = vmul.f32 %v3080_v31, %v2210_v15  ;;  %2322 = vmatpush.msra.mxu3 %v7217_v24  ;;  %2581 = vmatpush.msra.mxu2 %v3484_v12  ;;  %v3486_v24 = vld [vmem:[%s8185_s3 + $0x50] sm:$0xff]  ;;  %v3526_v12 = vld [vmem:[%s8186_s5 + $0x108] sm:$0xff] }
 0x5fc   :  { %v3523_v15 = vld [vmem:[%s8186_s5 + $0x10] sm:$0xff] }
 0x5fd   :  { %v2212_v14 = vadd.f32 %v3080_v31, %v2211_v48  ;;  %2323 = vmatpush.msra.mxu3 %v7227_v18  ;;  %2582 = vmatpush.msra.mxu2 %v3485_v40  ;;  %v3487_v18 = vld [vmem:[%s8185_s3 + $0x38] sm:$0xff]  ;;  %v3525_v48 = vld [vmem:[%s8186_s5 + $0x120] sm:$0xff] }
 0x5fe   :  { %v8965_v40 = vld [vmem:[#allocation15_spill] sm:$0xff] }
 0x5ff   :  { %v2216_v5 = vsel %vm2215_vm6, %v3080_v31, %v2212_v14  ;;  %2324 = vmatpush.msra.mxu3 %v7235_v60  ;;  %2583 = vmatpush.msra.mxu2 %v3486_v24  ;;  %v3488_v60 = vld [vmem:[%s8185_s3 + $0x20] sm:$0xff]  ;;  %v8960_v31 = vld [vmem:[#allocation9_spill] sm:$0xff] }
 0x600   :  { %v2221_v45 = vsel %vm2218_vm7, %v2220_v63, %v2216_v5  ;;  %v8964_v14 = vld [vmem:[#allocation14_spill] sm:$0xff]  ;;  %v3527_v63 = vld [vmem:[%s8186_s5 + $0xf0] sm:$0xff] }
 0x601   :  { %v2228_v27 = vsub.f32 1.0, %v2221_v45  ;;  %2325 = vmatpush.msra.mxu3 %v7243_v26  ;;  %2584 = vmatpush.msra.mxu2 %v3487_v18  ;;  %v2230_v0 = vmul.f32 %v2221_v45, %v7212_v35  ;;  %v3489_v26 = vld [vmem:[%s8185_s3 + $0x8] sm:$0xff]  ;;  %v3490_v35 = vld [vmem:[%s8184_s1 + $0x178] sm:$0xff]  ;;  %v3529_v24 = vld [vmem:[%s8186_s5 + $0xc0] sm:$0xff] }
 0x602   :  { %v3528_v5 = vld [vmem:[%s8186_s5 + $0xd8] sm:$0xff]  ;;  %v8966_v45 = vld [vmem:[#allocation16_spill] sm:$0xff]  ;;  %v8968_v18 = vld [vmem:[#allocation19_spill] sm:$0xff] }
 0x603   :  { %v2229_v19 = vmul.f32 %v3082_v43, %v2228_v27  ;;  %2326 = vmatpush.msra.mxu3 %v7251_v10  ;;  %2585 = vmatpush.msra.mxu2 %v3488_v60  ;;  %v3491_v10 = vld [vmem:[%s8186_s5 + $0x178] sm:$0xff]  ;;  %v8967_v27 = vld [vmem:[#allocation35_spill] sm:$0xff] }
 0x604   :  { %v3530_v43 = vld [vmem:[%s8186_s5 + $0xa8] sm:$0xff]  ;;  %v3532_v60 = vld [vmem:[%s8186_s5 + $0x78] sm:$0xff] }
 0x605   :  { %v7773_v55 = vadd.f32 %v2230_v0, %v2229_v19  ;;  %2327 = vmatpush.msra.mxu3 %v7259_v3  ;;  %2586 = vmatpush.msra.mxu2 %v3489_v26  ;;  %v3492_v3 = vld [vmem:[%s8184_s1 + $0x160] sm:$0xff]  ;;  %v3531_v19 = vld [vmem:[%s8186_s5 + $0x90] sm:$0xff] }
 0x606   :  { %v8969_v0 = vld [vmem:[#allocation41_spill] sm:$0xff]  ;;  %v8970_v26 = vld [vmem:[#allocation44_spill] sm:$0xff] }
 0x607   :  { %2248 = vmatmul.f32.vlgmr.msrb.gmra.mxu3 %v7773_v55  ;;  %2268 = vmatmul.f32.vlgmr.msra.gmra.mxu0 %v7773_v55 }
 0x608   :  { %2288 = vmatmul.f32.vlgmr.msra.gmra.mxu1 %v7773_v55  ;;  %2455 = vmatmul.f32.vlgmr.msrb.gmra.mxu2 %v7773_v55 }
 0x609   :  { %2459 = vmatpush.msrb.mxu3 %v7268_v7  ;;  %2479 = vmatpush.msra.mxu0 %v3490_v35  ;;  %v3493_v7 = vld [vmem:[%s8186_s5 + $0x160] sm:$0xff] }
 0x60a   :  { %2651 = vmatpush.msrb.mxu2 %v3491_v10  ;;  %v3533_v35 = vld [vmem:[%s8186_s5 + $0x60] sm:$0xff] }
 0x60b   :  { %2460 = vmatpush.msrb.mxu3 %v7276_v42  ;;  %2480 = vmatpush.msra.mxu0 %v3492_v3  ;;  %v3495_v42 = vld [vmem:[%s8186_s5 + $0x148] sm:$0xff] }
 0x60c   :  { %2652 = vmatpush.msrb.mxu2 %v3493_v7  ;;  %v8971_v10 = vld [vmem:[#allocation23_spill] sm:$0xff]  ;;  %v8972_v7 = vld [vmem:[#allocation48_spill] sm:$0xff] }
 0x60d   :  { %2461 = vmatpush.msrb.mxu3 %v7285_v28  ;;  %2481 = vmatpush.msra.mxu0 %v3494_v37  ;;  %v3497_v28 = vld [vmem:[%s8184_s1 + $0x118] sm:$0xff]  ;;  %v3534_v3 = vld [vmem:[%s8186_s5 + $0x48] sm:$0xff]  ;;  %v3535_v37 = vld [vmem:[%s8186_s5 + $0x30] sm:$0xff] }
 0x60e   :  { %2653 = vmatpush.msrb.mxu2 %v3495_v42  ;;  %v8973_v42 = vld [vmem:[#allocation67_spill] sm:$0xff] }
 0x60f   :  { %2462 = vmatpush.msrb.mxu3 %v7293_v25  ;;  %2482 = vmatpush.msra.mxu0 %v3496_v54  ;;  %v3498_v25 = vld [vmem:[%s8186_s5 + $0x130] sm:$0xff]  ;;  %v3536_v54 = vld [vmem:[%s8186_s5 + $0x18] sm:$0xff] }
 0x610   :  { %2328 = vmatmul.f32.vlgmr.msra.gmra.mxu3 %v7719_v59  ;;  %2348 = vmatmul.f32.vlgmr.msrb.gmra.mxu0 %v7719_v59 }
 0x611   :  { %2463 = vmatpush.msrb.mxu3 %v7301_v34  ;;  %2483 = vmatpush.msra.mxu0 %v3497_v28  ;;  %v3500_v34 = vld [vmem:[%s8186_s5 + $0x118] sm:$0xff]  ;;  %v8974_v28 = vld [vmem:[#allocation28_spill] sm:$0xff] }
 0x612   :  { %2654 = vmatpush.msrb.mxu2 %v3498_v25  ;;  %v3537_v25 = vld [vmem:[%s8186_s5] sm:$0xff] }
 0x613   :  { %2464 = vmatpush.msrb.mxu3 %v7309_v44  ;;  %2484 = vmatpush.msra.mxu0 %v3499_v49  ;;  %v3502_v44 = vld [vmem:[%s8186_s5 + $0x100] sm:$0xff]  ;;  %v8975_v49 = vld [vmem:[#allocation68_spill] sm:$0xff] }
 0x614   :  { %2655 = vmatpush.msrb.mxu2 %v3500_v34  ;;  %v2927_v34 = vld [vmem:[%s8190_s7 + $0x378] sm:$0xff] }
 0x615   :  { %2465 = vmatpush.msrb.mxu3 %v7317_v61  ;;  %2485 = vmatpush.msra.mxu0 %v3501_v2  ;;  %v3504_v61 = vld [vmem:[%s8186_s5 + $0xe8] sm:$0xff]  ;;  %v2926_v2 = vld [vmem:[%s8190_s7 + $0x370] sm:$0xff] }
 0x616   :  { %2656 = vmatpush.msrb.mxu2 %v3502_v44  ;;  %2416 = vmatpush.msrb.mxu1 %v2927_v34  ;;  %v2925_v44 = vld [vmem:[%s8190_s7 + $0x368] sm:$0xff]  ;;  %v8996_v34 = vld [vmem:[#allocation66_spill] sm:$0xff] }
 0x617   :  { %2466 = vmatpush.msrb.mxu3 %v7325_v52  ;;  %2486 = vmatpush.msra.mxu0 %v3503_v36  ;;  %v3506_v52 = vld [vmem:[%s8186_s5 + $0xd0] sm:$0xff]  ;;  %v2924_v36 = vld [vmem:[%s8190_s7 + $0x360] sm:$0xff] }
 0x618   :  { %2657 = vmatpush.msrb.mxu2 %v3504_v61  ;;  %2417 = vmatpush.msrb.mxu1 %v2926_v2  ;;  %v2923_v61 = vld [vmem:[%s8190_s7 + $0x358] sm:$0xff] }
 0x619   :  { %2467 = vmatpush.msrb.mxu3 %v7333_v16  ;;  %2487 = vmatpush.msra.mxu0 %v3505_v9  ;;  %v3508_v16 = vld [vmem:[%s8186_s5 + $0xb8] sm:$0xff]  ;;  %v2922_v9 = vld [vmem:[%s8190_s7 + $0x350] sm:$0xff] }
 0x61a   :  { %2658 = vmatpush.msrb.mxu2 %v3506_v52  ;;  %2418 = vmatpush.msrb.mxu1 %v2925_v44  ;;  %v2921_v52 = vld [vmem:[%s8190_s7 + $0x348] sm:$0xff]  ;;  %v8997_v44 = vld [vmem:[#allocation33_spill] sm:$0xff] }
 0x61b   :  { %2468 = vmatpush.msrb.mxu3 %v7341_v6  ;;  %2488 = vmatpush.msra.mxu0 %v3507_v17  ;;  %v3510_v6 = vld [vmem:[%s8186_s5 + $0xa0] sm:$0xff] }
 0x61c   :  { %2659 = vmatpush.msrb.mxu2 %v3508_v16  ;;  %2419 = vmatpush.msrb.mxu1 %v2924_v36  ;;  %v8976_v16 = vld [vmem:[#allocation34_spill] sm:$0xff] }
 0x61d   :  { %2469 = vmatpush.msrb.mxu3 %v7349_v11  ;;  %2489 = vmatpush.msra.mxu0 %v3509_v50  ;;  %v3512_v11 = vld [vmem:[%s8186_s5 + $0x88] sm:$0xff] }
 0x61e   :  { %2660 = vmatpush.msrb.mxu2 %v3510_v6  ;;  %2420 = vmatpush.msrb.mxu1 %v2923_v61  ;;  %v2920_v6 = vld [vmem:[%s8190_s7 + $0x340] sm:$0xff] }
 0x61f   :  { %2470 = vmatpush.msrb.mxu3 %v7357_v30  ;;  %2490 = vmatpush.msra.mxu0 %v3511_v21  ;;  %v3514_v30 = vld [vmem:[%s8186_s5 + $0x70] sm:$0xff]  ;;  %v2919_v21 = vld [vmem:[%s8190_s7 + $0x338] sm:$0xff] }
 0x620   :  { %2661 = vmatpush.msrb.mxu2 %v3512_v11  ;;  %2421 = vmatpush.msrb.mxu1 %v2922_v9  ;;  %v2918_v11 = vld [vmem:[%s8190_s7 + $0x330] sm:$0xff] }
 0x621   :  { %2471 = vmatpush.msrb.mxu3 %v8956_v33  ;;  %2491 = vmatpush.msra.mxu0 %v3513_v4  ;;  %v2917_v33 = vld [vmem:[%s8190_s7 + $0x328] sm:$0xff]  ;;  %v2916_v4 = vld [vmem:[%s8190_s7 + $0x320] sm:$0xff] }
 0x622   :  { %2662 = vmatpush.msrb.mxu2 %v3514_v30  ;;  %2422 = vmatpush.msrb.mxu1 %v2921_v52  ;;  %v2915_v30 = vld [vmem:[%s8190_s7 + $0x318] sm:$0xff] }
 0x623   :  { %2472 = vmatpush.msrb.mxu3 %v8957_v58  ;;  %2492 = vmatpush.msra.mxu0 %v3515_v57  ;;  %v2914_v58 = vld [vmem:[%s8190_s7 + $0x310] sm:$0xff]  ;;  %v2913_v57 = vld [vmem:[%s8190_s7 + $0x308] sm:$0xff] }
 0x624   :  { %2663 = vmatpush.msrb.mxu2 %v3516_v62  ;;  %2423 = vmatpush.msrb.mxu1 %v2920_v6  ;;  %v2912_v62 = vld [vmem:[%s8190_s7 + $0x300] sm:$0xff] }
 0x625   :  { %2473 = vmatpush.msrb.mxu3 %v8958_v56  ;;  %2493 = vmatpush.msra.mxu0 %v3517_v39  ;;  %v8977_v56 = vld [vmem:[#allocation40_spill] sm:$0xff] }
 0x626   :  { %2664 = vmatpush.msrb.mxu2 %v3518_v41  ;;  %2424 = vmatpush.msrb.mxu1 %v2919_v21  ;;  %v8978_v39 = vld [vmem:[#allocation56_spill] sm:$0xff]  ;;  %v8979_v41 = vld [vmem:[#allocation58_spill] sm:$0xff] }
 0x627   :  { %2474 = vmatpush.msrb.mxu3 %v8959_v23  ;;  %2494 = vmatpush.msra.mxu0 %v3519_v32  ;;  %v8980_v32 = vld [vmem:[#allocation60_spill] sm:$0xff] }
 0x628   :  { %2475 = vmatmul.f32.vlgmr.msrb.gmra.mxu3 %v7773_v55  ;;  %2495 = vmatmul.f32.vlgmr.msra.gmra.mxu0 %v7773_v55 }
 0x629   :  { %2611 = vmatpush.msrb.mxu0 %v3520_v47  ;;  %2591 = vmatpush.msra.mxu3 %v8960_v31  ;;  %v8981_v47 = vld [vmem:[#allocation30_spill] sm:$0xff] }
 0x62a   :  { %2665 = vmatpush.msrb.mxu2 %v3521_v53  ;;  %2425 = vmatpush.msrb.mxu1 %v2918_v11  ;;  %v8982_v31 = vld [vmem:[#allocation38_spill] sm:$0xff] }
 0x62b   :  { %2612 = vmatpush.msrb.mxu0 %v3522_v13  ;;  %2592 = vmatpush.msra.mxu3 %v8961_v51  ;;  %v8983_v13 = vld [vmem:[#allocation42_spill] sm:$0xff]  ;;  %v8984_v51 = vld [vmem:[#allocation4_spill] sm:$0xff] }
 0x62c   :  { %2666 = vmatpush.msrb.mxu2 %v3523_v15  ;;  %2426 = vmatpush.msrb.mxu1 %v2917_v33 }
 0x62d   :  { %2613 = vmatpush.msrb.mxu0 %v3524_v22  ;;  %2593 = vmatpush.msra.mxu3 %v8962_v8  ;;  %v8985_v22 = vld [vmem:[#allocation47_spill] sm:$0xff] }
 0x62e   :  { %2427 = vmatpush.msrb.mxu1 %v2916_v4 }
 0x62f   :  { %2614 = vmatpush.msrb.mxu0 %v3525_v48  ;;  %2594 = vmatpush.msra.mxu3 %v8963_v46  ;;  %v8026_v48 = vld [vmem:[%s8188_s0 + $0x2a] sm:$0x3f] }
 0x630   :  { %2428 = vmatpush.msrb.mxu1 %v2915_v30 }
 0x631   :  { %2615 = vmatpush.msrb.mxu0 %v3526_v12  ;;  %2595 = vmatpush.msra.mxu3 %v8964_v14  ;;  %v8986_v12 = vld [vmem:[#allocation53_spill] sm:$0xff] }
 0x632   :  { %2429 = vmatpush.msrb.mxu1 %v2914_v58 }
 0x633   :  { %2616 = vmatpush.msrb.mxu0 %v3527_v63  ;;  %2596 = vmatpush.msra.mxu3 %v8965_v40  ;;  %v8987_v63 = vld [vmem:[#allocation57_spill] sm:$0xff] }
 0x634   :  { %2430 = vmatpush.msrb.mxu1 %v2913_v57 }
 0x635   :  { %2617 = vmatpush.msrb.mxu0 %v3528_v5  ;;  %2597 = vmatpush.msra.mxu3 %v8966_v45  ;;  %v8988_v45 = vld [vmem:[#allocation59_spill] sm:$0xff] }
 0x636   :  { %2431 = vmatpush.msrb.mxu1 %v2912_v62 }
 0x637   :  { %2618 = vmatpush.msrb.mxu0 %v3529_v24  ;;  %2598 = vmatpush.msra.mxu3 %v8967_v27 }
 0x638   :  { %2551 = vmatpush.msra.mxu1 %v8977_v56 }
 0x639   :  { %2619 = vmatpush.msrb.mxu0 %v3530_v43  ;;  %2599 = vmatpush.msra.mxu3 %v8968_v18  ;;  %v8989_v43 = vld [vmem:[#allocation61_spill] sm:$0xff] }
 0x63a   :  { %2552 = vmatpush.msra.mxu1 %v8978_v39 }
 0x63b   :  { %2620 = vmatpush.msrb.mxu0 %v3531_v19  ;;  %2600 = vmatpush.msra.mxu3 %v8969_v0  ;;  %v8990_v19 = vld [vmem:[#allocation62_spill] sm:$0xff] }
 0x63c   :  { %2553 = vmatpush.msra.mxu1 %v8979_v41  ;;  %v2520_v41 = vrot.slane %v8026_v48, 2 }
 0x63d   :  { %2621 = vmatpush.msrb.mxu0 %v3532_v60  ;;  %2601 = vmatpush.msra.mxu3 %v8970_v26  ;;  %v8991_v60 = vld [vmem:[#allocation3_spill] sm:$0xff] }
 0x63e   :  { %2554 = vmatpush.msra.mxu1 %v8980_v32 }
 0x63f   :  { %2622 = vmatpush.msrb.mxu0 %v3533_v35  ;;  %2602 = vmatpush.msra.mxu3 %v8971_v10  ;;  %v8992_v35 = vld [vmem:[#allocation6_spill] sm:$0xff] }
 0x640   :  { %2555 = vmatpush.msra.mxu1 %v8981_v47 }
 0x641   :  { %2623 = vmatpush.msrb.mxu0 %v3534_v3  ;;  %2603 = vmatpush.msra.mxu3 %v8972_v7  ;;  %v8993_v3 = vld [vmem:[#allocation63_spill] sm:$0xff] }
 0x642   :  { %2556 = vmatpush.msra.mxu1 %v8982_v31 }
 0x643   :  { %2624 = vmatpush.msrb.mxu0 %v3535_v37  ;;  %2604 = vmatpush.msra.mxu3 %v8973_v42  ;;  %v8994_v37 = vld [vmem:[#allocation64_spill] sm:$0xff] }
 0x644   :  { %2557 = vmatpush.msra.mxu1 %v8983_v13 }
 0x645   :  { %2625 = vmatpush.msrb.mxu0 %v3536_v54  ;;  %2605 = vmatpush.msra.mxu3 %v8974_v28 }
 0x646   :  { %2558 = vmatpush.msra.mxu1 %v8987_v63 }
 0x647   :  { %2626 = vmatpush.msrb.mxu0 %v3537_v25  ;;  %2606 = vmatpush.msra.mxu3 %v8975_v49  ;;  %v8995_v25 = vld [vmem:[#allocation65_spill] sm:$0xff] }
 0x648   :  { %2559 = vmatpush.msra.mxu1 %v8988_v45 }
 0x64a   :  { %2560 = vmatpush.msra.mxu1 %v8989_v43 }
 0x64c   :  { %2561 = vmatpush.msra.mxu1 %v8990_v19 }
 0x64e   :  { %2562 = vmatpush.msra.mxu1 %v8993_v3 }
 0x650   :  { %2563 = vmatpush.msra.mxu1 %v8994_v37 }
 0x652   :  { %2564 = vmatpush.msra.mxu1 %v8995_v25 }
 0x654   :  { %2565 = vmatpush.msra.mxu1 %v8996_v34 }
 0x656   :  { %2566 = vmatpush.msra.mxu1 %v8997_v44  ;;  %v3538_v44 = vld [vmem:[%s8186_s5 + $0x170] sm:$0xff] }
 0x669   :  { %v2114_v17 = vpop.f32.mrf.mxu3  ;;  %v2309_v23 = vpop.f32.mrf.mxu2 }
 0x66a   :  { %v7985_v50 = vadd.f32 %v2114_v17, %v8976_v16  ;;  %v2310_v15 = vadd.f32 %v2309_v23, %v8984_v51 }
 0x684   :  { %v2269_v18 = vpop.f32.mrf.mxu0 }
 0x685   :  { %v2270_v26 = vadd.f32 %v2269_v18, %v8991_v60  ;;  %v2289_v30 = vpop.f32.mrf.mxu1 }
 0x686   :  { %v2290_v32 = vadd.f32 %v2289_v30, %v8723_v20 }
 0x68a   :  { %v2249_v53 = vpop.f32.mrf.mxu3 }
 0x68b   :  { %v2250_v8 = vadd.f32 %v2249_v53, %v8985_v22  ;;  %v2456_v46 = vpop.f32.mrf.mxu2 }
 0x68c   :  { %v2457_v14 = vadd.f32 %v2456_v46, %v8986_v12 }
 0x68d   :  { %v2352_v40 = vadd.f32 %v2310_v15, %v2250_v8  ;;  %v2349_v33 = vpop.f32.mrf.mxu0 }
 0x68e   :  { %v2499_v5 = vadd.f32 %v8026_v48, %v2457_v14  ;;  %v2350_v57 = vadd.f32 %v2349_v33, %v8722_v29 }
 0x68f   :  { %v2910_v24 = vmul.f32 -1.442695, %v2352_v40 }
 0x690   :  { %v2929_v27 = vmul.f32 -1.442695, %v2499_v5 }
 0x691   :  { %3083 = vpow2.f32 %v2910_v24 }
 0x692   :  { %3085 = vpow2.f32 %v2929_v27 }
 0x693   :  { %v2329_v0 = vpop.f32.mrf.mxu3 }
 0x694   :  { %v2330_v10 = vadd.f32 %v2329_v0, %v8992_v35 }
 0x696   :  { %v2372_v7 = vadd.f32 %v2330_v10, %v2270_v26 }
 0x697   :  { %v3084_v42 = vpop.eup %3083 }
 0x698   :  { %v2356_v54 = vadd.f32 1.0, %v3084_v42  ;;  %v2911_v28 = vmul.f32 -1.442695, %v2372_v7  ;;  %v3086_v49 = vpop.eup %3085 }
 0x699   :  { %v8040_v2 = vadd.f32 1.0, %v3086_v49 }
 0x69a   :  { %3087 = vrcp.f32 %v2356_v54  ;;  %v2368_v16 = vand.u32 2147483648, %v2356_v54  ;;  %v2366_v21 = vand.u32 2147483647, %v2356_v54  ;;  %vm2362_vm9 = vweird.f32 %v2356_v54 }
 0x69b   :  { %3089 = vpow2.f32 %v2911_v28  ;;  %v2515_v0 = vand.u32 2147483648, %v8040_v2  ;;  %vm2509_vm1 = vweird.f32 %v8040_v2  ;;  %v2513_v10 = vand.u32 2147483647, %v8040_v2 }
 0x69c   :  { %3091 = vrcp.f32 %v8040_v2  ;;  %v2369_v58 = vor.u32 1.1754944e-38, %v2368_v16  ;;  %vm2367_vm11 = vcmp.eq.f32.partialorder %v2366_v21, 8.507059e+37  ;;  %v3541_v16 = vld [vmem:[%s8186_s5 + $0x128] sm:$0xff] }
 0x69d   :  { %v2516_v25 = vor.u32 1.1754944e-38, %v2515_v0  ;;  %vm2514_vm3 = vcmp.eq.f32.partialorder %v2513_v10, 8.507059e+37  ;;  %v2941_v0 = vld [vmem:[%s8190_s7 + $0x3c0] sm:$0xff] }
 0x6a0   :  { %v3088_v36 = vpop.eup %3087 }
 0x6a1   :  { %v2358_v61 = vmul.f32 %v3088_v36, %v2356_v54  ;;  %v3090_v9 = vpop.eup %3089  ;;  %vm2363_vm8 = vweird.f32 %v3088_v36 }
 0x6a2   :  { %v2376_v17 = vadd.f32 1.0, %v3090_v9  ;;  %v3092_v11 = vpop.eup %3091  ;;  %vm2364_vm10 = vmor %vm2362_vm9, %vm2363_vm8 }
 0x6a3   :  { %v2359_v52 = vsub.f32 1.0, %v2358_v61  ;;  %v2505_v56 = vmul.f32 %v3092_v11, %v8040_v2  ;;  %vm2510_vm0 = vweird.f32 %v3092_v11  ;;  %v3539_v61 = vld [vmem:[%s8186_s5 + $0x158] sm:$0xff] }
 0x6a4   :  { %3093 = vrcp.f32 %v2376_v17  ;;  %v2388_v14 = vand.u32 2147483648, %v2376_v17  ;;  %v2386_v5 = vand.u32 2147483647, %v2376_v17  ;;  %vm2382_vm13 = vweird.f32 %v2376_v17  ;;  %vm2511_vm2 = vmor %vm2509_vm1, %vm2510_vm0 }
 0x6a5   :  { %v2360_v6 = vmul.f32 %v3088_v36, %v2359_v52  ;;  %v2506_v8 = vsub.f32 1.0, %v2505_v56  ;;  %v2496_v28 = vpop.f32.mrf.mxu0  ;;  %v3540_v52 = vld [vmem:[%s8186_s5 + $0x140] sm:$0xff]  ;;  %v3545_v56 = vld [vmem:[%s8186_s5 + $0xc8] sm:$0xff]  ;;  %vm2768_vm0 = vcmask 130048   ;;  %vm2792_vm1 = vcmask 1024  }
 0x6a6   :  { %v2389_v27 = vor.u32 1.1754944e-38, %v2388_v14  ;;  %vm2387_vm15 = vcmp.eq.f32.partialorder %v2386_v5, 8.507059e+37  ;;  %v2497_v2 = vadd.f32 %v2496_v28, %v8655_v1  ;;  %v3553_v14 = vld [vmem:[%s8186_s5 + $0x8] sm:$0xff]  ;;  %v2948_v5 = vld [vmem:[%s8190_s7 + $0x3f8] sm:$0xff] }
 0x6a7   :  { %v2361_v4 = vadd.f32 %v3088_v36, %v2360_v6  ;;  %v2507_v45 = vmul.f32 %v3092_v11, %v2506_v8  ;;  %v3549_v8 = vld [vmem:[%s8186_s5 + $0x68] sm:$0xff]  ;;  %2735 = vmatpush.msrb.mxu3 %v2948_v5  ;;  %v2936_v28 = vld [vmem:[%s8190_s7 + $0x398] sm:$0xff] }
 0x6a9   :  { %v2365_v62 = vsel %vm2364_vm10, %v3088_v36, %v2361_v4  ;;  %v2543_v36 = vrot.slane %v8026_v48, 4  ;;  %v3542_v48 = vld [vmem:[%s8186_s5 + $0x110] sm:$0xff]  ;;  %v3543_v4 = vld [vmem:[%s8186_s5 + $0xf8] sm:$0xff] }
 0x6aa   :  { %v2370_v39 = vsel %vm2367_vm11, %v2369_v58, %v2365_v62  ;;  %v3094_v23 = vpop.eup %3093  ;;  %v3544_v58 = vld [vmem:[%s8186_s5 + $0xe0] sm:$0xff] }
 0x6ab   :  { %v2392_v47 = vmul.f32 %v2370_v39, %v2350_v57  ;;  %v2476_v31 = vpop.f32.mrf.mxu3  ;;  %v2378_v53 = vmul.f32 %v3094_v23, %v2376_v17  ;;  %vm2383_vm12 = vweird.f32 %v3094_v23 }
 0x6ac   :  { %v2477_v13 = vadd.f32 %v2476_v31, %v8724_v38  ;;  %vm2384_vm14 = vmor %vm2382_vm13, %vm2383_vm12  ;;  %v2508_v38 = vadd.f32 %v3092_v11, %v2507_v45  ;;  %v2947_v45 = vld [vmem:[%s8190_s7 + $0x3f0] sm:$0xff] }
 0x6ad   :  { %v2393_v15 = vadd.f32 %v2392_v47, %v2290_v32  ;;  %v2379_v46 = vsub.f32 1.0, %v2378_v53  ;;  %v3546_v32 = vld [vmem:[%s8186_s5 + $0xb0] sm:$0xff]  ;;  %v3547_v53 = vld [vmem:[%s8186_s5 + $0x98] sm:$0xff]  ;;  %2736 = vmatpush.msrb.mxu3 %v2947_v45 }
 0x6ae   :  { %v2522_v12 = vadd.f32 %v2520_v41, %v2477_v13  ;;  %v2512_v42 = vsel %vm2511_vm2, %v3092_v11, %v2508_v38  ;;  %v2942_v38 = vld [vmem:[%s8190_s7 + $0x3c8] sm:$0xff] }
 0x6af   :  { %3095 = vtanh.f32 %v2393_v15  ;;  %v2380_v63 = vmul.f32 %v3094_v23, %v2379_v46  ;;  %v2517_v34 = vsel %vm2514_vm3, %v2516_v25, %v2512_v42  ;;  %v3548_v15 = vld [vmem:[%s8186_s5 + $0x80] sm:$0xff]  ;;  %v3551_v46 = vld [vmem:[%s8186_s5 + $0x38] sm:$0xff] }
 0x6b0   :  { %v2930_v40 = vmul.f32 -1.442695, %v2522_v12  ;;  %v3552_v12 = vld [vmem:[%s8186_s5 + $0x20] sm:$0xff] }
 0x6b1   :  { %v2381_v24 = vadd.f32 %v3094_v23, %v2380_v63 }
 0x6b2   :  { %3097 = vpow2.f32 %v2930_v40 }
 0x6b3   :  { %v2385_v43 = vsel %vm2384_vm14, %v3094_v23, %v2381_v24  ;;  %v2946_v24 = vld [vmem:[%s8190_s7 + $0x3e8] sm:$0xff] }
 0x6b4   :  { %v2390_v19 = vsel %vm2387_vm15, %v2389_v27, %v2385_v43  ;;  %2737 = vmatpush.msrb.mxu3 %v2946_v24  ;;  %v2944_v27 = vld [vmem:[%s8190_s7 + $0x3d8] sm:$0xff]  ;;  %v2943_v43 = vld [vmem:[%s8190_s7 + $0x3d0] sm:$0xff]  ;;  %v2762_v24 = vld [vmem:[%s8193_s9] sm:$0xff] }
 0x6b5   :  { %v3096_v18 = vpop.eup %3095  ;;  %v2395_v26 = vsub.f32 1.0, %v2390_v19  ;;  %v2397_v37 = vmul.f32 %v2390_v19, %v7719_v59  ;;  %v2542_v59 = vmul.f32 %v2517_v34, %v2497_v2  ;;  %v2935_v34 = vld [vmem:[%s8190_s7 + $0x390] sm:$0xff] }
 0x6b7   :  { %v2396_v7 = vmul.f32 %v3096_v18, %v2395_v26  ;;  %v2545_v17 = vadd.f32 %v2543_v36, %v2542_v59  ;;  %v2934_v59 = vld [vmem:[%s8190_s7 + $0x388] sm:$0xff] }
 0x6b8   :  { %v3098_v3 = vpop.eup %3097 }
 0x6b9   :  { %v2526_v54 = vadd.f32 1.0, %v3098_v3  ;;  %v8053_v49 = vadd.f32 %v2397_v37, %v2396_v7  ;;  %v2940_v3 = vld [vmem:[%s8190_s7 + $0x3b8] sm:$0xff]  ;;  %v2939_v37 = vld [vmem:[%s8190_s7 + $0x3b0] sm:$0xff] }
 0x6bb   :  { %3099 = vrcp.f32 %v2526_v54  ;;  %2432 = vmatmul.f32.vlgmr.msrb.gmra.mxu1 %v8053_v49  ;;  %2627 = vmatmul.f32.vlgmr.msrb.gmra.mxu0 %v8053_v49  ;;  %v2538_v21 = vand.u32 2147483648, %v2526_v54  ;;  %v2536_v33 = vand.u32 2147483647, %v2526_v54  ;;  %vm2532_vm5 = vweird.f32 %v2526_v54 }
 0x6bc   :  { %2631 = vmatpush.msrb.mxu1 %v3538_v44  ;;  %3101 = vtanh.f32 %v2545_v17 }
 0x6bd   :  { %v2539_v57 = vor.u32 1.1754944e-38, %v2538_v21  ;;  %vm2537_vm7 = vcmp.eq.f32.partialorder %v2536_v33, 8.507059e+37 }
 0x6be   :  { %2632 = vmatpush.msrb.mxu1 %v3539_v61 }
 0x6c0   :  { %2633 = vmatpush.msrb.mxu1 %v3540_v52  ;;  %v2933_v52 = vld [vmem:[%s8190_s7 + $0x380] sm:$0xff] }
 0x6c1   :  { %v3100_v9 = vpop.eup %3099 }
 0x6c2   :  { %v2528_v1 = vmul.f32 %v3100_v9, %v2526_v54  ;;  %2634 = vmatpush.msrb.mxu1 %v3541_v16  ;;  %vm2533_vm4 = vweird.f32 %v3100_v9  ;;  %v3102_v23 = vpop.eup %3101  ;;  %v2938_v54 = vld [vmem:[%s8190_s7 + $0x3a8] sm:$0xff] }
 0x6c3   :  { %vm2534_vm6 = vmor %vm2532_vm5, %vm2533_vm4 }
 0x6c4   :  { %v2529_v6 = vsub.f32 1.0, %v2528_v1  ;;  %2635 = vmatpush.msrb.mxu1 %v3542_v48 }
 0x6c6   :  { %v2530_v11 = vmul.f32 %v3100_v9, %v2529_v6  ;;  %2636 = vmatpush.msrb.mxu1 %v3543_v4 }
 0x6c8   :  { %v2531_v30 = vadd.f32 %v3100_v9, %v2530_v11  ;;  %2637 = vmatpush.msrb.mxu1 %v3544_v58 }
 0x6ca   :  { %v2535_v62 = vsel %vm2534_vm6, %v3100_v9, %v2531_v30  ;;  %2638 = vmatpush.msrb.mxu1 %v3545_v56 }
 0x6cb   :  { %v2540_v39 = vsel %vm2537_vm7, %v2539_v57, %v2535_v62 }
 0x6cc   :  { %v2547_v41 = vsub.f32 1.0, %v2540_v39  ;;  %2639 = vmatpush.msrb.mxu1 %v3546_v32  ;;  %v2549_v31 = vmul.f32 %v2540_v39, %v7773_v55  ;;  %v3550_v55 = vld [vmem:[%s8186_s5 + $0x50] sm:$0xff] }
 0x6ce   :  { %v2548_v47 = vmul.f32 %v3102_v23, %v2547_v41  ;;  %2640 = vmatpush.msrb.mxu1 %v3547_v53 }
 0x6d0   :  { %v2550_v13 = vadd.f32 %v2549_v31, %v2548_v47  ;;  %2641 = vmatpush.msrb.mxu1 %v3548_v15 }
 0x6d2   :  { %2567 = vmatmul.f32.vlgmr.msra.gmra.mxu1 %v2550_v13  ;;  %2587 = vmatmul.f32.vlgmr.msra.gmra.mxu2 %v2550_v13 }
 0x6d3   :  { %2607 = vmatmul.f32.vlgmr.msra.gmra.mxu3 %v2550_v13  ;;  %2642 = vmatpush.msrb.mxu1 %v3549_v8 }
 0x6d5   :  { %2643 = vmatpush.msrb.mxu1 %v3550_v55 }
 0x6d7   :  { %2644 = vmatpush.msrb.mxu1 %v3551_v46 }
 0x6d9   :  { %2645 = vmatpush.msrb.mxu1 %v3552_v12 }
 0x6da   :  { %2667 = vmatmul.f32.vlgmr.msrb.gmra.mxu2 %v8053_v49 }
 0x6db   :  { %2646 = vmatpush.msrb.mxu1 %v3553_v14 }
 0x6dc   :  { %2647 = vmatmul.f32.vlgmr.msrb.gmra.mxu1 %v8053_v49 }
 0x738   :  { %v2433_v63 = vpop.f32.mrf.mxu1  ;;  %v2628_v18 = vpop.f32.mrf.mxu0 }
 0x739   :  { %v8111_v40 = vadd.f32 %v2433_v63, %v7985_v50  ;;  %v2945_v50 = vld [vmem:[%s8190_s7 + $0x3e0] sm:$0xff]  ;;  %v2629_v26 = vadd.f32 %v2628_v18, %v8984_v51 }
 0x73a   :  { %2738 = vmatpush.msrb.mxu3 %v2945_v50  ;;  %v2937_v51 = vld [vmem:[%s8190_s7 + $0x3a0] sm:$0xff]  ;;  %v16_v50 = vstv %s8194_s10 }
 0x73b   :  { %17 = vst [vmem:[#allocation2] sm:$0x1] %v16_v50 }
 0x73c   :  { %2739 = vmatpush.msrb.mxu3 %v2944_v27  ;;  %v2951_v27 = vld [vmem:[%s8192_s8] ss:$0 sm:$0xff] }
 0x73e   :  { %2740 = vmatpush.msrb.mxu3 %v2943_v43 }
 0x740   :  { %2741 = vmatpush.msrb.mxu3 %v2942_v38 }
 0x742   :  { %2742 = vmatpush.msrb.mxu3 %v2941_v0 }
 0x744   :  { %2743 = vmatpush.msrb.mxu3 %v2940_v3 }
 0x746   :  { %2744 = vmatpush.msrb.mxu3 %v2939_v37 }
 0x748   :  { %2745 = vmatpush.msrb.mxu3 %v2938_v54 }
 0x74a   :  { %2746 = vmatpush.msrb.mxu3 %v2937_v51 }
 0x74c   :  { %2747 = vmatpush.msrb.mxu3 %v2936_v28 }
 0x74e   :  { %2748 = vmatpush.msrb.mxu3 %v2935_v34 }
 0x74f   :  { %v2568_v19 = vpop.f32.mrf.mxu1 }
 0x750   :  { %v2569_v10 = vadd.f32 %v2568_v19, %v8985_v22  ;;  %2749 = vmatpush.msrb.mxu3 %v2934_v59  ;;  %v2952_v19 = vld [vmem:[#allocation2] ss:$0 sm:$0xff] }
 0x752   :  { %v2671_v7 = vadd.f32 %v2629_v26, %v2569_v10  ;;  %2750 = vmatpush.msrb.mxu3 %v2933_v52 }
 0x754   :  { %v2931_v42 = vmul.f32 -1.442695, %v2671_v7 }
 0x755   :  { %v2588_v22 = vpop.f32.mrf.mxu2 }
 0x756   :  { %3103 = vpow2.f32 %v2931_v42  ;;  %v2589_v2 = vadd.f32 %v2588_v22, %v8991_v60  ;;  %v2763_v60 = vld [vmem:[%s8193_s9 + $0x8] sm:$0xff]  ;;  %v2608_v58 = vpop.f32.mrf.mxu3 }
 0x757   :  { %2786 = vmatpush.msra.mxu0 %v2763_v60  ;;  %v2609_v23 = vadd.f32 %v2608_v58, %v8723_v20 }
 0x759   :  { %v2648_v25 = vpop.f32.mrf.mxu1  ;;  %2787 = vmatpush.msra.mxu0 %v2762_v24 }
 0x75a   :  { %v2649_v44 = vadd.f32 %v2648_v25, %v8992_v35 }
 0x75c   :  { %v3104_v36 = vpop.eup %3103  ;;  %v2691_v61 = vadd.f32 %v2649_v44, %v2589_v2 }
 0x75d   :  { %v2675_v9 = vadd.f32 1.0, %v3104_v36  ;;  %v2668_v4 = vpop.f32.mrf.mxu2 }
 0x75e   :  { %v2932_v1 = vmul.f32 -1.442695, %v2691_v61  ;;  %v2669_v62 = vadd.f32 %v2668_v4, %v8722_v29 }
 0x75f   :  { %3105 = vrcp.f32 %v2675_v9  ;;  %v2687_v21 = vand.u32 2147483648, %v2675_v9  ;;  %v2685_v33 = vand.u32 2147483647, %v2675_v9  ;;  %vm2681_vm9 = vweird.f32 %v2675_v9 }
 0x760   :  { %3107 = vpow2.f32 %v2932_v1 }
 0x761   :  { %v2688_v57 = vor.u32 1.1754944e-38, %v2687_v21  ;;  %vm2686_vm11 = vcmp.eq.f32.partialorder %v2685_v33, 8.507059e+37 }
 0x765   :  { %v3106_v35 = vpop.eup %3105 }
 0x766   :  { %v3108_v17 = vpop.eup %3107  ;;  %v2677_v16 = vmul.f32 %v3106_v35, %v2675_v9  ;;  %vm2682_vm8 = vweird.f32 %v3106_v35 }
 0x767   :  { %v2695_v6 = vadd.f32 1.0, %v3108_v17  ;;  %vm2683_vm10 = vmor %vm2681_vm9, %vm2682_vm8 }
 0x768   :  { %v2678_v48 = vsub.f32 1.0, %v2677_v16 }
 0x769   :  { %3109 = vrcp.f32 %v2695_v6  ;;  %v2707_v13 = vand.u32 2147483648, %v2695_v6  ;;  %v2705_v8 = vand.u32 2147483647, %v2695_v6  ;;  %vm2701_vm13 = vweird.f32 %v2695_v6 }
 0x76a   :  { %v2679_v11 = vmul.f32 %v3106_v35, %v2678_v48 }
 0x76b   :  { %v2708_v46 = vor.u32 1.1754944e-38, %v2707_v13  ;;  %vm2706_vm15 = vcmp.eq.f32.partialorder %v2705_v8, 8.507059e+37 }
 0x76c   :  { %v2680_v30 = vadd.f32 %v3106_v35, %v2679_v11 }
 0x76e   :  { %v2684_v56 = vsel %vm2683_vm10, %v3106_v35, %v2680_v30 }
 0x76f   :  { %v3110_v39 = vpop.eup %3109  ;;  %v2689_v41 = vsel %vm2686_vm11, %v2688_v57, %v2684_v56 }
 0x770   :  { %v2697_v32 = vmul.f32 %v3110_v39, %v2695_v6  ;;  %v2711_v47 = vmul.f32 %v2689_v41, %v2669_v62  ;;  %vm2702_vm12 = vweird.f32 %v3110_v39 }
 0x771   :  { %vm2703_vm14 = vmor %vm2701_vm13, %vm2702_vm12 }
 0x772   :  { %v2698_v31 = vsub.f32 1.0, %v2697_v32  ;;  %v2712_v53 = vadd.f32 %v2711_v47, %v2609_v23 }
 0x774   :  { %3111 = vtanh.f32 %v2712_v53  ;;  %v2699_v15 = vmul.f32 %v3110_v39, %v2698_v31 }
 0x776   :  { %v2700_v55 = vadd.f32 %v3110_v39, %v2699_v15 }
 0x778   :  { %v2704_v29 = vsel %vm2703_vm14, %v3110_v39, %v2700_v55 }
 0x779   :  { %v2709_v12 = vsel %vm2706_vm15, %v2708_v46, %v2704_v29 }
 0x77a   :  { %v3112_v14 = vpop.eup %3111  ;;  %v2714_v63 = vsub.f32 1.0, %v2709_v12  ;;  %v2716_v20 = vmul.f32 %v2709_v12, %v8053_v49 }
 0x77c   :  { %v2715_v5 = vmul.f32 %v3112_v14, %v2714_v63 }
 0x77e   :  { %v2717_v45 = vadd.f32 %v2716_v20, %v2715_v5 }
 0x780   :  { %2751 = vmatmul.f32.vlgmr.msrb.gmra.mxu3 %v2717_v45 }
 0x803   :  { %v2752_v43 = vpop.f32.mrf.mxu3 }
 0x804   :  { %v2755_v18 = vadd.f32 %v2752_v43, %v8111_v40 }
 0x806   :  { %v2760_v49 = vadd.f32 %v2951_v27, %v2755_v18 }
 0x808   :  { %v2761_v38 = vmax.f32 %v2760_v49, 0.0 }
 0x80a   :  { %2949 = vmatmul.msk.f32.vlgmr.msra.gmra.mxu0 %vm2768_vm0, %v2761_v38 }
 0x887   :  { %v2789_v0 = vpop.f32.mrf.mxu0 }
 0x888   :  { %v2790_v26 = vadd.f32 %v2952_v19, %v2789_v0 }
 0x88a   :  { %2793 = vst.msk [vmem:[%s8195_s11] sm:$0x3] %vm2792_vm1, %v2790_v26 }

</bundles_post_ra>
